<compile_context>
chip_gen: v5e
topology: v5e:2x2
jax: 0.10.0
libtpu: 0.0.40
codegen_flags: <defaults>
</compile_context>

<pallas_src>
import functools

import jax
import jax.numpy as jnp
from jax.experimental import pallas as pl
from jax.experimental.pallas import tpu as pltpu

CP = 128          # lane-padded channel width used for every activation/weight
BN_EPS = 1e-5


# ----------------------------- Pallas kernels ------------------------------

def _fused_net_kernel(x_ref, w1s_ref, w3s_ref, bs_ref, o_ref, ps_ref, pad_ref,
                      *, h, w):
    """layer4 (3 Bottlenecks) + 3x3 classifier conv + mean(H,W), one sample.

    x_ref rows are parity-major: phase p = 2*(h%2) + (w%2) occupies rows
    [p*m1, (p+1)*m1), row-major over its (ho, wo) sub-grid.  Stacked weights:
      w1s_ref: [b0.conv1, b0.conv3, b0.downsample, b1.conv1, b1.conv3,
                b2.conv1, b2.conv3]                                (7, C, C)
      w3s_ref: 9 taps each for b0.conv2, b1.conv2, b2.conv2, classifier
                                                                   (36, C, C)
      bs_ref : [b0.b1,b0.b2,b0.b3,b0.bd, b1.b1,b1.b2,b1.b3,
                b2.b1,b2.b2,b2.b3, cls.b]                          (11, C)
    """
    f32, bf16 = jnp.float32, jnp.bfloat16
    ho, wo = h // 2, w // 2          # spatial size after the stride-2 block
    m1 = ho * wo
    hv, wv = ho - 2, wo - 2          # classifier (valid 3x3) output size

    def dot32(a, b):
        return jnp.dot(a, b, preferred_element_type=f32)

    def bias(k):
        return bs_ref[k:k + 1, :]    # (1, C) f32, broadcasts over M

    # ---------------- Block 0 (stride 2, downsample branch) ----------------
    # conv1 (1x1) + bn1 + ReLU over all input pixels: ONE (h*w, C)x(C, C) dot.
    x_flat = x_ref[0]                                              # (h*w, C)
    h1 = jnp.maximum(dot32(x_flat, w1s_ref[0]) + bias(0), 0.0).astype(bf16)

    # Scatter conv1 output into a zero-padded, parity-split scratch so every
    # stride-2 3x3 tap below is one contiguous static (ho, wo, C) slice:
    #   ps_ref[2*PR+PC, j, i, :] == h1_spatially_padded[2j+PR, 2i+PC, :]
    ps_ref[...] = jnp.zeros_like(ps_ref)
    for pr in range(2):
        for pc in range(2):
            src = (1 - pr) * 2 + (1 - pc)              # conv1 input phase
            blk = h1[src * m1:(src + 1) * m1, :].reshape(ho, wo, CP)
            ps_ref[pr * 2 + pc,
                   1 - pr:1 - pr + ho,
                   1 - pc:1 - pc + wo, :] = blk

    # conv2 (3x3, stride 2) + bn2 + ReLU: one dot per tap, M = ho*wo.
    acc = jnp.zeros((m1, CP), f32)
    for kh in range(3):
        for kw in range(3):
            plane = (kh % 2) * 2 + (kw % 2)
            patch = ps_ref[plane,
                           kh // 2:kh // 2 + ho,
                           kw // 2:kw // 2 + wo, :]
            acc = acc + dot32(patch.reshape(m1, CP), w3s_ref[kh * 3 + kw])
    t = jnp.maximum(acc + bias(1), 0.0).astype(bf16)

    # conv3 (1x1) + bn3, 1x1 stride-2 downsample branch, residual, ReLU.
    out3 = dot32(t, w1s_ref[1]) + bias(2)
    xds = x_ref[0, 0:m1, :]                    # parity (0,0) == x[::2, ::2]
    ident = dot32(xds, w1s_ref[2]) + bias(3)
    act = jnp.maximum(out3 + ident, 0.0).astype(bf16)              # (m1, C)

    # ---------------- Blocks 1..2 (stride 1, identity residual) -------------
    pad_ref[...] = jnp.zeros_like(pad_ref)     # halo stays zero for both blocks
    for b in range(2):
        w1, w3 = w1s_ref[3 + 2 * b], w1s_ref[4 + 2 * b]
        b1, b2, b3 = bias(4 + 3 * b), bias(5 + 3 * b), bias(6 + 3 * b)
        tap0 = 9 * (1 + b)

        h1b = jnp.maximum(dot32(act, w1) + b1, 0.0).astype(bf16)
        pad_ref[1:1 + ho, 1:1 + wo, :] = h1b.reshape(ho, wo, CP)

        accb = jnp.zeros((m1, CP), f32)
        for kh in range(3):
            for kw in range(3):
                patch = pad_ref[kh:kh + ho, kw:kw + wo, :]
                accb = accb + dot32(patch.reshape(m1, CP),
                                    w3s_ref[tap0 + kh * 3 + kw])
        tb = jnp.maximum(accb + b2, 0.0).astype(bf16)

        outb = dot32(tb, w3) + b3 + act.astype(f32)
        act = jnp.maximum(outb, 0.0).astype(bf16)

    # ---------------- classifier 3x3 (padding 0) + mean(H, W) ---------------
    # Rows are computed wo-wide (last 2 columns are junk and discarded) so the
    # per-tap reshape stays 8-sublane aligned.
    pad_ref[0:ho, 0:wo, :] = act.reshape(ho, wo, CP)
    accc = jnp.zeros((hv * wo, CP), f32)
    for kh in range(3):
        for kw in range(3):
            patch = pad_ref[kh:kh + hv, kw:kw + wo, :]
            accc = accc + dot32(patch.reshape(hv * wo, CP),
                                w3s_ref[27 + kh * 3 + kw])
    valid = accc.reshape(hv, wo, CP)[:, 0:wv, :]
    feat = (jnp.sum(valid, axis=(0, 1)).reshape(1, CP) * (1.0 / (hv * wv))
            + bias(10))                       # bias commutes with the mean
    o_ref[...] = feat.reshape(1, 1, CP).astype(o_ref.dtype)


def _tail_kernel(f_ref, w_ref, b_ref, o_ref, *, n, ncls, target, weight):
    """Linear(C,2) -> log_softmax -> NLL(const target) * weight, lane-masked."""
    feat = f_ref[...]                                               # (n, CP)
    logits = jnp.dot(feat, w_ref[...],
                     preferred_element_type=jnp.float32) + b_ref[...]
    lane = jax.lax.broadcasted_iota(jnp.int32, logits.shape, 1)
    masked = jnp.where(lane < ncls, logits, -1e30)
    m = jnp.max(masked, axis=1, keepdims=True)
    e = jnp.exp(masked - m)
    lse = m + jnp.log(jnp.sum(e, axis=1, keepdims=True))
    logp_t = logits[:, target:target + 1] - lse                     # (n, 1)
    loss = -(jnp.sum(logp_t) * (1.0 / n)) * weight
    o_ref[...] = jnp.zeros((1, CP), jnp.float32) + loss


# ------------------------ one-time parameter prep ---------------------------

def _pad_axis(x, size, axis):
    pad = size - x.shape[axis]
    if pad <= 0:
        return x
    widths = [(0, 0)] * x.ndim
    widths[axis] = (0, pad)
    return jnp.pad(x, widths)


def _fold_bn(w_hwio, bn):
    """Fold FrozenBatchNorm2d into the conv weight (scale) and a bias."""
    scale = bn['gamma'] * jax.lax.rsqrt(bn['var'] + BN_EPS)
    bias = bn['beta'] - bn['mean'] * scale
    return w_hwio * scale, bias              # scale broadcasts over cout (HWIO)


def _prep_1x1(w_hwio, bn):
    w, b = _fold_bn(w_hwio, bn)
    w = w.reshape(w.shape[2], w.shape[3])                        # (cin, cout)
    w = _pad_axis(_pad_axis(w, CP, 0), CP, 1).astype(jnp.bfloat16)
    b = _pad_axis(b, CP, 0).astype(jnp.float32)
    return w, b


def _prep_3x3(w_hwio, bn=None, bias=None):
    if bn is not None:
        w, b = _fold_bn(w_hwio, bn)
    else:
        w, b = w_hwio, bias
    w = _pad_axis(_pad_axis(w, CP, 2), CP, 3)                    # (3,3,CP,CP)
    w = w.reshape(-1, CP, CP).astype(jnp.bfloat16)               # (9, CP, CP)
    b = _pad_axis(b, CP, 0).astype(jnp.float32)
    return w, b


def prepare_params(params):
    """BN folding, 128-lane padding, bf16 cast, weight stacking.  Run ONCE."""
    blocks = params['layer4']
    assert len(blocks) == 3, "layer4 of a Bottleneck ResNet has 3 blocks"

    b0 = blocks[0]
    w1_0, bi1_0 = _prep_1x1(b0['conv1_w'], b0['bn1'])
    w2_0, bi2_0 = _prep_3x3(b0['conv2_w'], bn=b0['bn2'])
    w3_0, bi3_0 = _prep_1x1(b0['conv3_w'], b0['bn3'])
    wd_0, bid_0 = _prep_1x1(b0['ds_w'], b0['ds_bn'])

    w1s = [w1_0, w3_0, wd_0]
    w3s = [w2_0]
    bs = [bi1_0, bi2_0, bi3_0, bid_0]
    for blk in blocks[1:]:
        w1, bi1 = _prep_1x1(blk['conv1_w'], blk['bn1'])
        w2, bi2 = _prep_3x3(blk['conv2_w'], bn=blk['bn2'])
        w3, bi3 = _prep_1x1(blk['conv3_w'], blk['bn3'])
        w1s += [w1, w3]
        w3s += [w2]
        bs += [bi1, bi2, bi3]

    wcls, bcls = _prep_3x3(params['cls_w'], bias=params['cls_b'])
    w3s += [wcls]
    bs += [bcls]

    fc_w = _pad_axis(_pad_axis(params['fc_w'], CP, 0), CP, 1).astype(jnp.float32)
    fc_b = _pad_axis(params['fc_b'], CP, 0).reshape(1, CP).astype(jnp.float32)

    return dict(w1s=jnp.stack(w1s),            # (7, CP, CP)  bf16
                w3s=jnp.concatenate(w3s, 0),   # (36, CP, CP) bf16
                bs=jnp.stack(bs),              # (11, CP)     f32
                fc_w=fc_w, fc_b=fc_b)


# ------------------------------ wrappers -------------------------------------

def _fused_forward(x_ps, w1s, w3s, bs, h, w):
    n = x_ps.shape[0]
    ho, wo = h // 2, w // 2
    hv = ho - 2
    m1 = ho * wo

    m_sum = h * w + 3 * 11 * m1 + 9 * (hv * wo)        # total GEMM rows/sample
    cost = pl.CostEstimate(
        flops=2 * CP * CP * m_sum * n, transcendentals=0,
        bytes_accessed=(x_ps.size * 2 + w1s.size * 2 + w3s.size * 2
                        + bs.size * 4 + n * CP * 4))

    kernel = functools.partial(_fused_net_kernel, h=h, w=w)
    feats = pl.pallas_call(
        kernel,
        out_shape=jax.ShapeDtypeStruct((n, 1, CP), jnp.float32),
        grid=(n,),
        in_specs=[pl.BlockSpec((1, h * w, CP), lambda i: (i, 0, 0)),
                  pl.BlockSpec((7, CP, CP), lambda i: (0, 0, 0)),
                  pl.BlockSpec((36, CP, CP), lambda i: (0, 0, 0)),
                  pl.BlockSpec((11, CP), lambda i: (0, 0))],
        out_specs=pl.BlockSpec((1, 1, CP), lambda i: (i, 0, 0)),
        scratch_shapes=[pltpu.VMEM((4, ho + 1, wo + 1, CP), jnp.bfloat16),
                        pltpu.VMEM((ho + 2, wo + 2, CP), jnp.bfloat16)],
        compiler_params=pltpu.CompilerParams(
            dimension_semantics=("parallel",)),
        cost_estimate=cost,
    )(x_ps, w1s, w3s, bs)
    return feats.reshape(n, CP)


def _head_loss(feats, fc_w, fc_b, target, weight):
    n = feats.shape[0]
    kernel = functools.partial(_tail_kernel, n=n, ncls=2,
                               target=int(target), weight=float(weight))
    out = pl.pallas_call(
        kernel,
        out_shape=jax.ShapeDtypeStruct((1, CP), jnp.float32),
    )(feats, fc_w, fc_b)
    return out[0, 0]


# ------------------------------- forward -------------------------------------

@functools.partial(jax.jit, static_argnums=(2, 3, 4))
def resnet_two_discriminator_forward(prep, x_nchw, target, domain='source',
                                     sample_weights=0.5):
    # GradientReversal is the identity in the forward pass.
    x = jnp.transpose(x_nchw, (0, 2, 3, 1))                 # NCHW -> NHWC
    x = _pad_axis(x, CP, axis=3).astype(jnp.bfloat16)       # lane-pad channels
    n, h, w, _ = x.shape
    assert h % 2 == 0 and w % 2 == 0 and h // 2 >= 3 and w // 2 >= 3

    # Parity-split the input once in XLA (cheap, fused with the pad/transpose
    # above) so the stride-2 block needs only contiguous VMEM slices.
    x_ps = x.reshape(n, h // 2, 2, w // 2, 2, CP)
    x_ps = x_ps.transpose(0, 2, 4, 1, 3, 5).reshape(n, h * w, CP)

    feats = _fused_forward(x_ps, prep['w1s'], prep['w3s'], prep['bs'], h, w)

    weight = sample_weights if domain == 'source' else 1.0
    return _head_loss(feats, prep['fc_w'], prep['fc_b'], target, weight)


# --------------------------- deterministic init -----------------------------

def init_params(key, in_channels=16, planes=8, blocks=3, expansion=4):
    # TODO(synk): pretrained torchvision layer4 weights replaced by a
    # deterministic random initialization (no checkpoint loading here).
    def nrm(k, shape, std):
        return std * jax.random.normal(k, shape, dtype=jnp.float32)

    def bn(k, c):
        k1, k2, k3, k4 = jax.random.split(k, 4)
        return dict(
            gamma=jax.random.uniform(k1, (c,), minval=0.5, maxval=1.5,
                                     dtype=jnp.float32),
            beta=0.1 * jax.random.normal(k2, (c,), dtype=jnp.float32),
            mean=0.1 * jax.random.normal(k3, (c,), dtype=jnp.float32),
            var=jax.random.uniform(k4, (c,), minval=0.5, maxval=1.5,
                                   dtype=jnp.float32))

    out_c = planes * expansion
    layer4 = []
    for b in range(blocks):
        cin = in_channels if b == 0 else out_c
        key, *ks = jax.random.split(key, 9)
        blk = dict(
            conv1_w=nrm(ks[0], (1, 1, cin, planes), (2.0 / cin) ** 0.5),
            bn1=bn(ks[1], planes),
            conv2_w=nrm(ks[2], (3, 3, planes, planes),
                        (2.0 / (9 * planes)) ** 0.5),
            bn2=bn(ks[3], planes),
            conv3_w=nrm(ks[4], (1, 1, planes, out_c), (2.0 / planes) ** 0.5),
            bn3=bn(ks[5], out_c),
        )
        if b == 0:
            blk['ds_w'] = nrm(ks[6], (1, 1, cin, out_c), (2.0 / cin) ** 0.5)
            blk['ds_bn'] = bn(ks[7], out_c)
        layer4.append(blk)

    key, k1, k2, k3 = jax.random.split(key, 4)
    return dict(
        layer4=layer4,
        cls_w=nrm(k1, (3, 3, out_c, out_c), (2.0 / (9 * out_c)) ** 0.5),
        cls_b=0.01 * jax.random.normal(k3, (out_c,), dtype=jnp.float32),
        # dis_score: Linear(out_c, 2); nn.init.normal_(std=0.01), bias=0.
        fc_w=nrm(k2, (out_c, 2), 0.01),            # stored transposed (C, 2)
        fc_b=jnp.zeros((2,), jnp.float32),
    )


# --------------------------------- main -------------------------------------

if __name__ == "__main__":
    key = jax.random.PRNGKey(0)
    kp, kx = jax.random.split(key)
    params = init_params(kp, in_channels=16, planes=8, blocks=3, expansion=4)
    prep = prepare_params(params)            # BN fold / pad / stack: done once

    # Input to layer4, NCHW: (batch=2, C=16, H=16, W=16)
    x = jax.random.normal(kx, (2, 16, 16, 16), dtype=jnp.float32)

    loss = resnet_two_discriminator_forward(prep, x, 0, 'source', 0.5)
    jax.block_until_ready(loss)
    assert loss.shape == () and bool(jnp.isfinite(loss))
    print("KERNEL_OK")
</pallas_src>

<mosaic_0001>
module attributes {stable_mosaic.version = 11 : i64} {
  func.func @_fused_net_kernel(%arg0: i32, %arg1: memref<1x256x128xbf16, #tpu.memory_space<vmem>>, %arg2: memref<7x128x128xbf16, #tpu.memory_space<vmem>>, %arg3: memref<36x128x128xbf16, #tpu.memory_space<vmem>>, %arg4: memref<11x128xf32, #tpu.memory_space<vmem>>, %arg5: memref<1x1x128xf32, #tpu.memory_space<vmem>>, %arg6: memref<4x9x9x128xbf16, #tpu.memory_space<vmem>>, %arg7: memref<10x10x128xbf16, #tpu.memory_space<vmem>>) attributes {dimension_semantics = [#tpu.dimension_semantics<parallel>], iteration_bounds = array<i64: 2>, scalar_prefetch = 0 : i64, scratch_operands = 2 : i64, tpu.core_type = #tpu.core_type<tc>, window_params = [{transform_indices = @transform_0, window_bounds = array<i64: 1, 256, 128>}, {pipeline_mode = #tpu.pipeline_mode<synchronous>, transform_indices = @transform_1, window_bounds = array<i64: 7, 128, 128>}, {pipeline_mode = #tpu.pipeline_mode<synchronous>, transform_indices = @transform_2, window_bounds = array<i64: 36, 128, 128>}, {pipeline_mode = #tpu.pipeline_mode<synchronous>, transform_indices = @transform_3, window_bounds = array<i64: 11, 128>}, {transform_indices = @transform_4, window_bounds = array<i64: 1, 1, 128>}]} {
    %c0 = arith.constant 0 : index
    %c0_0 = arith.constant 0 : index
    %c0_1 = arith.constant 0 : index
    %0 = vector.load %arg1[%c0, %c0_0, %c0_1] : memref<1x256x128xbf16, #tpu.memory_space<vmem>>, vector<1x256x128xbf16>
    %1 = vector.shape_cast %0 : vector<1x256x128xbf16> to vector<256x128xbf16>
    %c0_2 = arith.constant 0 : index
    %c0_3 = arith.constant 0 : index
    %c0_4 = arith.constant 0 : index
    %2 = vector.load %arg2[%c0_2, %c0_3, %c0_4] : memref<7x128x128xbf16, #tpu.memory_space<vmem>>, vector<1x128x128xbf16>
    %3 = vector.shape_cast %2 : vector<1x128x128xbf16> to vector<128x128xbf16>
    %cst = arith.constant dense<0.000000e+00> : vector<256x128xf32>
    %4 = tpu.matmul %1, %3, %cst {dimension_numbers = #tpu.dot_dimension_numbers<[1], [0], [0], [1], [0, 0, 1, 1], [], []>} : vector<256x128xbf16>, vector<128x128xbf16>, vector<256x128xf32> -> vector<256x128xf32>
    %c0_5 = arith.constant 0 : index
    %c0_6 = arith.constant 0 : index
    %5 = vector.load %arg4[%c0_5, %c0_6] : memref<11x128xf32, #tpu.memory_space<vmem>>, vector<1x128xf32>
    %6 = vector.broadcast %5 : vector<1x128xf32> to vector<256x128xf32>
    %7 = arith.addf %4, %6 : vector<256x128xf32>
    %cst_7 = arith.constant 0.000000e+00 : f32
    %8 = vector.broadcast %cst_7 : f32 to vector<256x128xf32>
    %9 = arith.maximumf %7, %8 : vector<256x128xf32>
    %10 = arith.truncf %9 : vector<256x128xf32> to vector<256x128xbf16>
    %cst_8 = arith.constant 0.000000e+00 : bf16
    %11 = vector.broadcast %cst_8 : bf16 to vector<4x9x9x128xbf16>
    %c0_9 = arith.constant 0 : index
    %c0_10 = arith.constant 0 : index
    %c0_11 = arith.constant 0 : index
    %c0_12 = arith.constant 0 : index
    %12 = vector.load %arg6[%c0_9, %c0_10, %c0_11, %c0_12] : memref<4x9x9x128xbf16, #tpu.memory_space<vmem>>, vector<4x9x9x128xbf16>
    tpu.vector_store %arg6[%c0_9, %c0_10, %c0_11, %c0_12], %11 {strides = array<i32>} : memref<4x9x9x128xbf16, #tpu.memory_space<vmem>>, vector<4x9x9x128xbf16>,
    %13 = vector.extract_strided_slice %10 {offsets = [192, 0], sizes = [64, 128], strides = [1, 1]} : vector<256x128xbf16> to vector<64x128xbf16>
    %14 = vector.shape_cast %13 : vector<64x128xbf16> to vector<8x8x128xbf16>
    %c0_13 = arith.constant 0 : index
    %c1 = arith.constant 1 : index
    %c1_14 = arith.constant 1 : index
    %c0_15 = arith.constant 0 : index
    %15 = vector.load %arg6[%c0_13, %c1, %c1_14, %c0_15] : memref<4x9x9x128xbf16, #tpu.memory_space<vmem>>, vector<1x8x8x128xbf16>
    %16 = vector.shape_cast %15 : vector<1x8x8x128xbf16> to vector<8x8x128xbf16>
    %17 = vector.shape_cast %14 : vector<8x8x128xbf16> to vector<1x8x8x128xbf16>
    tpu.vector_store %arg6[%c0_13, %c1, %c1_14, %c0_15], %17 {strides = array<i32>} : memref<4x9x9x128xbf16, #tpu.memory_space<vmem>>, vector<1x8x8x128xbf16>,
    %18 = vector.extract_strided_slice %10 {offsets = [128, 0], sizes = [64, 128], strides = [1, 1]} : vector<256x128xbf16> to vector<64x128xbf16>
    %19 = vector.shape_cast %18 : vector<64x128xbf16> to vector<8x8x128xbf16>
    %c1_16 = arith.constant 1 : index
    %c1_17 = arith.constant 1 : index
    %c0_18 = arith.constant 0 : index
    %c0_19 = arith.constant 0 : index
    %20 = vector.load %arg6[%c1_16, %c1_17, %c0_18, %c0_19] : memref<4x9x9x128xbf16, #tpu.memory_space<vmem>>, vector<1x8x8x128xbf16>
    %21 = vector.shape_cast %20 : vector<1x8x8x128xbf16> to vector<8x8x128xbf16>
    %22 = vector.shape_cast %19 : vector<8x8x128xbf16> to vector<1x8x8x128xbf16>
    tpu.vector_store %arg6[%c1_16, %c1_17, %c0_18, %c0_19], %22 {strides = array<i32>} : memref<4x9x9x128xbf16, #tpu.memory_space<vmem>>, vector<1x8x8x128xbf16>,
    %23 = vector.extract_strided_slice %10 {offsets = [64, 0], sizes = [64, 128], strides = [1, 1]} : vector<256x128xbf16> to vector<64x128xbf16>
    %24 = vector.shape_cast %23 : vector<64x128xbf16> to vector<8x8x128xbf16>
    %c2 = arith.constant 2 : index
    %c0_20 = arith.constant 0 : index
    %c1_21 = arith.constant 1 : index
    %c0_22 = arith.constant 0 : index
    %25 = vector.load %arg6[%c2, %c0_20, %c1_21, %c0_22] : memref<4x9x9x128xbf16, #tpu.memory_space<vmem>>, vector<1x8x8x128xbf16>
    %26 = vector.shape_cast %25 : vector<1x8x8x128xbf16> to vector<8x8x128xbf16>
    %27 = vector.shape_cast %24 : vector<8x8x128xbf16> to vector<1x8x8x128xbf16>
    tpu.vector_store %arg6[%c2, %c0_20, %c1_21, %c0_22], %27 {strides = array<i32>} : memref<4x9x9x128xbf16, #tpu.memory_space<vmem>>, vector<1x8x8x128xbf16>,
    %28 = vector.extract_strided_slice %10 {offsets = [0, 0], sizes = [64, 128], strides = [1, 1]} : vector<256x128xbf16> to vector<64x128xbf16>
    %29 = vector.shape_cast %28 : vector<64x128xbf16> to vector<8x8x128xbf16>
    %c3 = arith.constant 3 : index
    %c0_23 = arith.constant 0 : index
    %c0_24 = arith.constant 0 : index
    %c0_25 = arith.constant 0 : index
    %30 = vector.load %arg6[%c3, %c0_23, %c0_24, %c0_25] : memref<4x9x9x128xbf16, #tpu.memory_space<vmem>>, vector<1x8x8x128xbf16>
    %31 = vector.shape_cast %30 : vector<1x8x8x128xbf16> to vector<8x8x128xbf16>
    %32 = vector.shape_cast %29 : vector<8x8x128xbf16> to vector<1x8x8x128xbf16>
    tpu.vector_store %arg6[%c3, %c0_23, %c0_24, %c0_25], %32 {strides = array<i32>} : memref<4x9x9x128xbf16, #tpu.memory_space<vmem>>, vector<1x8x8x128xbf16>,
    %cst_26 = arith.constant 0.000000e+00 : f32
    %33 = vector.broadcast %cst_26 : f32 to vector<64x128xf32>
    %c0_27 = arith.constant 0 : index
    %c0_28 = arith.constant 0 : index
    %c0_29 = arith.constant 0 : index
    %c0_30 = arith.constant 0 : index
    %34 = vector.load %arg6[%c0_27, %c0_28, %c0_29, %c0_30] : memref<4x9x9x128xbf16, #tpu.memory_space<vmem>>, vector<1x8x8x128xbf16>
    %35 = vector.shape_cast %34 : vector<1x8x8x128xbf16> to vector<8x8x128xbf16>
    %36 = vector.shape_cast %35 : vector<8x8x128xbf16> to vector<64x128xbf16>
    %c0_31 = arith.constant 0 : index
    %c0_32 = arith.constant 0 : index
    %c0_33 = arith.constant 0 : index
    %37 = vector.load %arg3[%c0_31, %c0_32, %c0_33] : memref<36x128x128xbf16, #tpu.memory_space<vmem>>, vector<1x128x128xbf16>
    %38 = vector.shape_cast %37 : vector<1x128x128xbf16> to vector<128x128xbf16>
    %cst_34 = arith.constant dense<0.000000e+00> : vector<64x128xf32>
    %39 = tpu.matmul %36, %38, %cst_34 {dimension_numbers = #tpu.dot_dimension_numbers<[1], [0], [0], [1], [0, 0, 1, 1], [], []>} : vector<64x128xbf16>, vector<128x128xbf16>, vector<64x128xf32> -> vector<64x128xf32>
    %40 = arith.addf %33, %39 : vector<64x128xf32>
    %c1_35 = arith.constant 1 : index
    %c0_36 = arith.constant 0 : index
    %c0_37 = arith.constant 0 : index
    %c0_38 = arith.constant 0 : index
    %41 = vector.load %arg6[%c1_35, %c0_36, %c0_37, %c0_38] : memref<4x9x9x128xbf16, #tpu.memory_space<vmem>>, vector<1x8x8x128xbf16>
    %42 = vector.shape_cast %41 : vector<1x8x8x128xbf16> to vector<8x8x128xbf16>
    %43 = vector.shape_cast %42 : vector<8x8x128xbf16> to vector<64x128xbf16>
    %c1_39 = arith.constant 1 : index
    %c0_40 = arith.constant 0 : index
    %c0_41 = arith.constant 0 : index
    %44 = vector.load %arg3[%c1_39, %c0_40, %c0_41] : memref<36x128x128xbf16, #tpu.memory_space<vmem>>, vector<1x128x128xbf16>
    %45 = vector.shape_cast %44 : vector<1x128x128xbf16> to vector<128x128xbf16>
    %cst_42 = arith.constant dense<0.000000e+00> : vector<64x128xf32>
    %46 = tpu.matmul %43, %45, %cst_42 {dimension_numbers = #tpu.dot_dimension_numbers<[1], [0], [0], [1], [0, 0, 1, 1], [], []>} : vector<64x128xbf16>, vector<128x128xbf16>, vector<64x128xf32> -> vector<64x128xf32>
    %47 = arith.addf %40, %46 : vector<64x128xf32>
    %c0_43 = arith.constant 0 : index
    %c0_44 = arith.constant 0 : index
    %c1_45 = arith.constant 1 : index
    %c0_46 = arith.constant 0 : index
    %48 = vector.load %arg6[%c0_43, %c0_44, %c1_45, %c0_46] : memref<4x9x9x128xbf16, #tpu.memory_space<vmem>>, vector<1x8x8x128xbf16>
    %49 = vector.shape_cast %48 : vector<1x8x8x128xbf16> to vector<8x8x128xbf16>
    %50 = vector.shape_cast %49 : vector<8x8x128xbf16> to vector<64x128xbf16>
    %c2_47 = arith.constant 2 : index
    %c0_48 = arith.constant 0 : index
    %c0_49 = arith.constant 0 : index
    %51 = vector.load %arg3[%c2_47, %c0_48, %c0_49] : memref<36x128x128xbf16, #tpu.memory_space<vmem>>, vector<1x128x128xbf16>
    %52 = vector.shape_cast %51 : vector<1x128x128xbf16> to vector<128x128xbf16>
    %cst_50 = arith.constant dense<0.000000e+00> : vector<64x128xf32>
    %53 = tpu.matmul %50, %52, %cst_50 {dimension_numbers = #tpu.dot_dimension_numbers<[1], [0], [0], [1], [0, 0, 1, 1], [], []>} : vector<64x128xbf16>, vector<128x128xbf16>, vector<64x128xf32> -> vector<64x128xf32>
    %54 = arith.addf %47, %53 : vector<64x128xf32>
    %c2_51 = arith.constant 2 : index
    %c0_52 = arith.constant 0 : index
    %c0_53 = arith.constant 0 : index
    %c0_54 = arith.constant 0 : index
    %55 = vector.load %arg6[%c2_51, %c0_52, %c0_53, %c0_54] : memref<4x9x9x128xbf16, #tpu.memory_space<vmem>>, vector<1x8x8x128xbf16>
    %56 = vector.shape_cast %55 : vector<1x8x8x128xbf16> to vector<8x8x128xbf16>
    %57 = vector.shape_cast %56 : vector<8x8x128xbf16> to vector<64x128xbf16>
    %c3_55 = arith.constant 3 : index
    %c0_56 = arith.constant 0 : index
    %c0_57 = arith.constant 0 : index
    %58 = vector.load %arg3[%c3_55, %c0_56, %c0_57] : memref<36x128x128xbf16, #tpu.memory_space<vmem>>, vector<1x128x128xbf16>
    %59 = vector.shape_cast %58 : vector<1x128x128xbf16> to vector<128x128xbf16>
    %cst_58 = arith.constant dense<0.000000e+00> : vector<64x128xf32>
    %60 = tpu.matmul %57, %59, %cst_58 {dimension_numbers = #tpu.dot_dimension_numbers<[1], [0], [0], [1], [0, 0, 1, 1], [], []>} : vector<64x128xbf16>, vector<128x128xbf16>, vector<64x128xf32> -> vector<64x128xf32>
    %61 = arith.addf %54, %60 : vector<64x128xf32>
    %c3_59 = arith.constant 3 : index
    %c0_60 = arith.constant 0 : index
    %c0_61 = arith.constant 0 : index
    %c0_62 = arith.constant 0 : index
    %62 = vector.load %arg6[%c3_59, %c0_60, %c0_61, %c0_62] : memref<4x9x9x128xbf16, #tpu.memory_space<vmem>>, vector<1x8x8x128xbf16>
    %63 = vector.shape_cast %62 : vector<1x8x8x128xbf16> to vector<8x8x128xbf16>
    %64 = vector.shape_cast %63 : vector<8x8x128xbf16> to vector<64x128xbf16>
    %c4 = arith.constant 4 : index
    %c0_63 = arith.constant 0 : index
    %c0_64 = arith.constant 0 : index
    %65 = vector.load %arg3[%c4, %c0_63, %c0_64] : memref<36x128x128xbf16, #tpu.memory_space<vmem>>, vector<1x128x128xbf16>
    %66 = vector.shape_cast %65 : vector<1x128x128xbf16> to vector<128x128xbf16>
    %cst_65 = arith.constant dense<0.000000e+00> : vector<64x128xf32>
    %67 = tpu.matmul %64, %66, %cst_65 {dimension_numbers = #tpu.dot_dimension_numbers<[1], [0], [0], [1], [0, 0, 1, 1], [], []>} : vector<64x128xbf16>, vector<128x128xbf16>, vector<64x128xf32> -> vector<64x128xf32>
    %68 = arith.addf %61, %67 : vector<64x128xf32>
    %c2_66 = arith.constant 2 : index
    %c0_67 = arith.constant 0 : index
    %c1_68 = arith.constant 1 : index
    %c0_69 = arith.constant 0 : index
    %69 = vector.load %arg6[%c2_66, %c0_67, %c1_68, %c0_69] : memref<4x9x9x128xbf16, #tpu.memory_space<vmem>>, vector<1x8x8x128xbf16>
    %70 = vector.shape_cast %69 : vector<1x8x8x128xbf16> to vector<8x8x128xbf16>
    %71 = vector.shape_cast %70 : vector<8x8x128xbf16> to vector<64x128xbf16>
    %c5 = arith.constant 5 : index
    %c0_70 = arith.constant 0 : index
    %c0_71 = arith.constant 0 : index
    %72 = vector.load %arg3[%c5, %c0_70, %c0_71] : memref<36x128x128xbf16, #tpu.memory_space<vmem>>, vector<1x128x128xbf16>
    %73 = vector.shape_cast %72 : vector<1x128x128xbf16> to vector<128x128xbf16>
    %cst_72 = arith.constant dense<0.000000e+00> : vector<64x128xf32>
    %74 = tpu.matmul %71, %73, %cst_72 {dimension_numbers = #tpu.dot_dimension_numbers<[1], [0], [0], [1], [0, 0, 1, 1], [], []>} : vector<64x128xbf16>, vector<128x128xbf16>, vector<64x128xf32> -> vector<64x128xf32>
    %75 = arith.addf %68, %74 : vector<64x128xf32>
    %c0_73 = arith.constant 0 : index
    %c1_74 = arith.constant 1 : index
    %c0_75 = arith.constant 0 : index
    %c0_76 = arith.constant 0 : index
    %76 = vector.load %arg6[%c0_73, %c1_74, %c0_75, %c0_76] : memref<4x9x9x128xbf16, #tpu.memory_space<vmem>>, vector<1x8x8x128xbf16>
    %77 = vector.shape_cast %76 : vector<1x8x8x128xbf16> to vector<8x8x128xbf16>
    %78 = vector.shape_cast %77 : vector<8x8x128xbf16> to vector<64x128xbf16>
    %c6 = arith.constant 6 : index
    %c0_77 = arith.constant 0 : index
    %c0_78 = arith.constant 0 : index
    %79 = vector.load %arg3[%c6, %c0_77, %c0_78] : memref<36x128x128xbf16, #tpu.memory_space<vmem>>, vector<1x128x128xbf16>
    %80 = vector.shape_cast %79 : vector<1x128x128xbf16> to vector<128x128xbf16>
    %cst_79 = arith.constant dense<0.000000e+00> : vector<64x128xf32>
    %81 = tpu.matmul %78, %80, %cst_79 {dimension_numbers = #tpu.dot_dimension_numbers<[1], [0], [0], [1], [0, 0, 1, 1], [], []>} : vector<64x128xbf16>, vector<128x128xbf16>, vector<64x128xf32> -> vector<64x128xf32>
    %82 = arith.addf %75, %81 : vector<64x128xf32>
    %c1_80 = arith.constant 1 : index
    %c1_81 = arith.constant 1 : index
    %c0_82 = arith.constant 0 : index
    %c0_83 = arith.constant 0 : index
    %83 = vector.load %arg6[%c1_80, %c1_81, %c0_82, %c0_83] : memref<4x9x9x128xbf16, #tpu.memory_space<vmem>>, vector<1x8x8x128xbf16>
    %84 = vector.shape_cast %83 : vector<1x8x8x128xbf16> to vector<8x8x128xbf16>
    %85 = vector.shape_cast %84 : vector<8x8x128xbf16> to vector<64x128xbf16>
    %c7 = arith.constant 7 : index
    %c0_84 = arith.constant 0 : index
    %c0_85 = arith.constant 0 : index
    %86 = vector.load %arg3[%c7, %c0_84, %c0_85] : memref<36x128x128xbf16, #tpu.memory_space<vmem>>, vector<1x128x128xbf16>
    %87 = vector.shape_cast %86 : vector<1x128x128xbf16> to vector<128x128xbf16>
    %cst_86 = arith.constant dense<0.000000e+00> : vector<64x128xf32>
    %88 = tpu.matmul %85, %87, %cst_86 {dimension_numbers = #tpu.dot_dimension_numbers<[1], [0], [0], [1], [0, 0, 1, 1], [], []>} : vector<64x128xbf16>, vector<128x128xbf16>, vector<64x128xf32> -> vector<64x128xf32>
    %89 = arith.addf %82, %88 : vector<64x128xf32>
    %c0_87 = arith.constant 0 : index
    %c1_88 = arith.constant 1 : index
    %c1_89 = arith.constant 1 : index
    %c0_90 = arith.constant 0 : index
    %90 = vector.load %arg6[%c0_87, %c1_88, %c1_89, %c0_90] : memref<4x9x9x128xbf16, #tpu.memory_space<vmem>>, vector<1x8x8x128xbf16>
    %91 = vector.shape_cast %90 : vector<1x8x8x128xbf16> to vector<8x8x128xbf16>
    %92 = vector.shape_cast %91 : vector<8x8x128xbf16> to vector<64x128xbf16>
    %c8 = arith.constant 8 : index
    %c0_91 = arith.constant 0 : index
    %c0_92 = arith.constant 0 : index
    %93 = vector.load %arg3[%c8, %c0_91, %c0_92] : memref<36x128x128xbf16, #tpu.memory_space<vmem>>, vector<1x128x128xbf16>
    %94 = vector.shape_cast %93 : vector<1x128x128xbf16> to vector<128x128xbf16>
    %cst_93 = arith.constant dense<0.000000e+00> : vector<64x128xf32>
    %95 = tpu.matmul %92, %94, %cst_93 {dimension_numbers = #tpu.dot_dimension_numbers<[1], [0], [0], [1], [0, 0, 1, 1], [], []>} : vector<64x128xbf16>, vector<128x128xbf16>, vector<64x128xf32> -> vector<64x128xf32>
    %96 = arith.addf %89, %95 : vector<64x128xf32>
    %c1_94 = arith.constant 1 : index
    %c0_95 = arith.constant 0 : index
    %97 = vector.load %arg4[%c1_94, %c0_95] : memref<11x128xf32, #tpu.memory_space<vmem>>, vector<1x128xf32>
    %98 = vector.broadcast %97 : vector<1x128xf32> to vector<64x128xf32>
    %99 = arith.addf %96, %98 : vector<64x128xf32>
    %cst_96 = arith.constant 0.000000e+00 : f32
    %100 = vector.broadcast %cst_96 : f32 to vector<64x128xf32>
    %101 = arith.maximumf %99, %100 : vector<64x128xf32>
    %102 = arith.truncf %101 : vector<64x128xf32> to vector<64x128xbf16>
    %c1_97 = arith.constant 1 : index
    %c0_98 = arith.constant 0 : index
    %c0_99 = arith.constant 0 : index
    %103 = vector.load %arg2[%c1_97, %c0_98, %c0_99] : memref<7x128x128xbf16, #tpu.memory_space<vmem>>, vector<1x128x128xbf16>
    %104 = vector.shape_cast %103 : vector<1x128x128xbf16> to vector<128x128xbf16>
    %cst_100 = arith.constant dense<0.000000e+00> : vector<64x128xf32>
    %105 = tpu.matmul %102, %104, %cst_100 {dimension_numbers = #tpu.dot_dimension_numbers<[1], [0], [0], [1], [0, 0, 1, 1], [], []>} : vector<64x128xbf16>, vector<128x128xbf16>, vector<64x128xf32> -> vector<64x128xf32>
    %c2_101 = arith.constant 2 : index
    %c0_102 = arith.constant 0 : index
    %106 = vector.load %arg4[%c2_101, %c0_102] : memref<11x128xf32, #tpu.memory_space<vmem>>, vector<1x128xf32>
    %107 = vector.broadcast %106 : vector<1x128xf32> to vector<64x128xf32>
    %108 = arith.addf %105, %107 : vector<64x128xf32>
    %c0_103 = arith.constant 0 : index
    %c0_104 = arith.constant 0 : index
    %c0_105 = arith.constant 0 : index
    %109 = vector.load %arg1[%c0_103, %c0_104, %c0_105] : memref<1x256x128xbf16, #tpu.memory_space<vmem>>, vector<1x64x128xbf16>
    %110 = vector.shape_cast %109 : vector<1x64x128xbf16> to vector<64x128xbf16>
    %c2_106 = arith.constant 2 : index
    %c0_107 = arith.constant 0 : index
    %c0_108 = arith.constant 0 : index
    %111 = vector.load %arg2[%c2_106, %c0_107, %c0_108] : memref<7x128x128xbf16, #tpu.memory_space<vmem>>, vector<1x128x128xbf16>
    %112 = vector.shape_cast %111 : vector<1x128x128xbf16> to vector<128x128xbf16>
    %cst_109 = arith.constant dense<0.000000e+00> : vector<64x128xf32>
    %113 = tpu.matmul %110, %112, %cst_109 {dimension_numbers = #tpu.dot_dimension_numbers<[1], [0], [0], [1], [0, 0, 1, 1], [], []>} : vector<64x128xbf16>, vector<128x128xbf16>, vector<64x128xf32> -> vector<64x128xf32>
    %c3_110 = arith.constant 3 : index
    %c0_111 = arith.constant 0 : index
    %114 = vector.load %arg4[%c3_110, %c0_111] : memref<11x128xf32, #tpu.memory_space<vmem>>, vector<1x128xf32>
    %115 = vector.broadcast %114 : vector<1x128xf32> to vector<64x128xf32>
    %116 = arith.addf %113, %115 : vector<64x128xf32>
    %117 = arith.addf %108, %116 : vector<64x128xf32>
    %cst_112 = arith.constant 0.000000e+00 : f32
    %118 = vector.broadcast %cst_112 : f32 to vector<64x128xf32>
    %119 = arith.maximumf %117, %118 : vector<64x128xf32>
    %120 = arith.truncf %119 : vector<64x128xf32> to vector<64x128xbf16>
    %cst_113 = arith.constant 0.000000e+00 : bf16
    %121 = vector.broadcast %cst_113 : bf16 to vector<10x10x128xbf16>
    %c0_114 = arith.constant 0 : index
    %c0_115 = arith.constant 0 : index
    %c0_116 = arith.constant 0 : index
    %122 = vector.load %arg7[%c0_114, %c0_115, %c0_116] : memref<10x10x128xbf16, #tpu.memory_space<vmem>>, vector<10x10x128xbf16>
    tpu.vector_store %arg7[%c0_114, %c0_115, %c0_116], %121 {strides = array<i32>} : memref<10x10x128xbf16, #tpu.memory_space<vmem>>, vector<10x10x128xbf16>,
    %c3_117 = arith.constant 3 : index
    %c0_118 = arith.constant 0 : index
    %c0_119 = arith.constant 0 : index
    %123 = vector.load %arg2[%c3_117, %c0_118, %c0_119] : memref<7x128x128xbf16, #tpu.memory_space<vmem>>, vector<1x128x128xbf16>
    %124 = vector.shape_cast %123 : vector<1x128x128xbf16> to vector<128x128xbf16>
    %c4_120 = arith.constant 4 : index
    %c0_121 = arith.constant 0 : index
    %c0_122 = arith.constant 0 : index
    %125 = vector.load %arg2[%c4_120, %c0_121, %c0_122] : memref<7x128x128xbf16, #tpu.memory_space<vmem>>, vector<1x128x128xbf16>
    %126 = vector.shape_cast %125 : vector<1x128x128xbf16> to vector<128x128xbf16>
    %c4_123 = arith.constant 4 : index
    %c0_124 = arith.constant 0 : index
    %127 = vector.load %arg4[%c4_123, %c0_124] : memref<11x128xf32, #tpu.memory_space<vmem>>, vector<1x128xf32>
    %c5_125 = arith.constant 5 : index
    %c0_126 = arith.constant 0 : index
    %128 = vector.load %arg4[%c5_125, %c0_126] : memref<11x128xf32, #tpu.memory_space<vmem>>, vector<1x128xf32>
    %c6_127 = arith.constant 6 : index
    %c0_128 = arith.constant 0 : index
    %129 = vector.load %arg4[%c6_127, %c0_128] : memref<11x128xf32, #tpu.memory_space<vmem>>, vector<1x128xf32>
    %cst_129 = arith.constant dense<0.000000e+00> : vector<64x128xf32>
    %130 = tpu.matmul %120, %124, %cst_129 {dimension_numbers = #tpu.dot_dimension_numbers<[1], [0], [0], [1], [0, 0, 1, 1], [], []>} : vector<64x128xbf16>, vector<128x128xbf16>, vector<64x128xf32> -> vector<64x128xf32>
    %131 = vector.broadcast %127 : vector<1x128xf32> to vector<64x128xf32>
    %132 = arith.addf %130, %131 : vector<64x128xf32>
    %cst_130 = arith.constant 0.000000e+00 : f32
    %133 = vector.broadcast %cst_130 : f32 to vector<64x128xf32>
    %134 = arith.maximumf %132, %133 : vector<64x128xf32>
    %135 = arith.truncf %134 : vector<64x128xf32> to vector<64x128xbf16>
    %136 = vector.shape_cast %135 : vector<64x128xbf16> to vector<8x8x128xbf16>
    %c1_131 = arith.constant 1 : index
    %c1_132 = arith.constant 1 : index
    %c0_133 = arith.constant 0 : index
    %137 = vector.load %arg7[%c1_131, %c1_132, %c0_133] : memref<10x10x128xbf16, #tpu.memory_space<vmem>>, vector<8x8x128xbf16>
    tpu.vector_store %arg7[%c1_131, %c1_132, %c0_133], %136 {strides = array<i32>} : memref<10x10x128xbf16, #tpu.memory_space<vmem>>, vector<8x8x128xbf16>,
    %cst_134 = arith.constant 0.000000e+00 : f32
    %138 = vector.broadcast %cst_134 : f32 to vector<64x128xf32>
    %c0_135 = arith.constant 0 : index
    %c0_136 = arith.constant 0 : index
    %c0_137 = arith.constant 0 : index
    %139 = vector.load %arg7[%c0_135, %c0_136, %c0_137] : memref<10x10x128xbf16, #tpu.memory_space<vmem>>, vector<8x8x128xbf16>
    %140 = vector.shape_cast %139 : vector<8x8x128xbf16> to vector<64x128xbf16>
    %c9 = arith.constant 9 : index
    %c0_138 = arith.constant 0 : index
    %c0_139 = arith.constant 0 : index
    %141 = vector.load %arg3[%c9, %c0_138, %c0_139] : memref<36x128x128xbf16, #tpu.memory_space<vmem>>, vector<1x128x128xbf16>
    %142 = vector.shape_cast %141 : vector<1x128x128xbf16> to vector<128x128xbf16>
    %cst_140 = arith.constant dense<0.000000e+00> : vector<64x128xf32>
    %143 = tpu.matmul %140, %142, %cst_140 {dimension_numbers = #tpu.dot_dimension_numbers<[1], [0], [0], [1], [0, 0, 1, 1], [], []>} : vector<64x128xbf16>, vector<128x128xbf16>, vector<64x128xf32> -> vector<64x128xf32>
    %144 = arith.addf %138, %143 : vector<64x128xf32>
    %c0_141 = arith.constant 0 : index
    %c1_142 = arith.constant 1 : index
    %c0_143 = arith.constant 0 : index
    %145 = vector.load %arg7[%c0_141, %c1_142, %c0_143] : memref<10x10x128xbf16, #tpu.memory_space<vmem>>, vector<8x8x128xbf16>
    %146 = vector.shape_cast %145 : vector<8x8x128xbf16> to vector<64x128xbf16>
    %c10 = arith.constant 10 : index
    %c0_144 = arith.constant 0 : index
    %c0_145 = arith.constant 0 : index
    %147 = vector.load %arg3[%c10, %c0_144, %c0_145] : memref<36x128x128xbf16, #tpu.memory_space<vmem>>, vector<1x128x128xbf16>
    %148 = vector.shape_cast %147 : vector<1x128x128xbf16> to vector<128x128xbf16>
    %cst_146 = arith.constant dense<0.000000e+00> : vector<64x128xf32>
    %149 = tpu.matmul %146, %148, %cst_146 {dimension_numbers = #tpu.dot_dimension_numbers<[1], [0], [0], [1], [0, 0, 1, 1], [], []>} : vector<64x128xbf16>, vector<128x128xbf16>, vector<64x128xf32> -> vector<64x128xf32>
    %150 = arith.addf %144, %149 : vector<64x128xf32>
    %c0_147 = arith.constant 0 : index
    %c2_148 = arith.constant 2 : index
    %c0_149 = arith.constant 0 : index
    %151 = vector.load %arg7[%c0_147, %c2_148, %c0_149] : memref<10x10x128xbf16, #tpu.memory_space<vmem>>, vector<8x8x128xbf16>
    %152 = vector.shape_cast %151 : vector<8x8x128xbf16> to vector<64x128xbf16>
    %c11 = arith.constant 11 : index
    %c0_150 = arith.constant 0 : index
    %c0_151 = arith.constant 0 : index
    %153 = vector.load %arg3[%c11, %c0_150, %c0_151] : memref<36x128x128xbf16, #tpu.memory_space<vmem>>, vector<1x128x128xbf16>
    %154 = vector.shape_cast %153 : vector<1x128x128xbf16> to vector<128x128xbf16>
    %cst_152 = arith.constant dense<0.000000e+00> : vector<64x128xf32>
    %155 = tpu.matmul %152, %154, %cst_152 {dimension_numbers = #tpu.dot_dimension_numbers<[1], [0], [0], [1], [0, 0, 1, 1], [], []>} : vector<64x128xbf16>, vector<128x128xbf16>, vector<64x128xf32> -> vector<64x128xf32>
    %156 = arith.addf %150, %155 : vector<64x128xf32>
    %c1_153 = arith.constant 1 : index
    %c0_154 = arith.constant 0 : index
    %c0_155 = arith.constant 0 : index
    %157 = vector.load %arg7[%c1_153, %c0_154, %c0_155] : memref<10x10x128xbf16, #tpu.memory_space<vmem>>, vector<8x8x128xbf16>
    %158 = vector.shape_cast %157 : vector<8x8x128xbf16> to vector<64x128xbf16>
    %c12 = arith.constant 12 : index
    %c0_156 = arith.constant 0 : index
    %c0_157 = arith.constant 0 : index
    %159 = vector.load %arg3[%c12, %c0_156, %c0_157] : memref<36x128x128xbf16, #tpu.memory_space<vmem>>, vector<1x128x128xbf16>
    %160 = vector.shape_cast %159 : vector<1x128x128xbf16> to vector<128x128xbf16>
    %cst_158 = arith.constant dense<0.000000e+00> : vector<64x128xf32>
    %161 = tpu.matmul %158, %160, %cst_158 {dimension_numbers = #tpu.dot_dimension_numbers<[1], [0], [0], [1], [0, 0, 1, 1], [], []>} : vector<64x128xbf16>, vector<128x128xbf16>, vector<64x128xf32> -> vector<64x128xf32>
    %162 = arith.addf %156, %161 : vector<64x128xf32>
    %c1_159 = arith.constant 1 : index
    %c1_160 = arith.constant 1 : index
    %c0_161 = arith.constant 0 : index
    %163 = vector.load %arg7[%c1_159, %c1_160, %c0_161] : memref<10x10x128xbf16, #tpu.memory_space<vmem>>, vector<8x8x128xbf16>
    %164 = vector.shape_cast %163 : vector<8x8x128xbf16> to vector<64x128xbf16>
    %c13 = arith.constant 13 : index
    %c0_162 = arith.constant 0 : index
    %c0_163 = arith.constant 0 : index
    %165 = vector.load %arg3[%c13, %c0_162, %c0_163] : memref<36x128x128xbf16, #tpu.memory_space<vmem>>, vector<1x128x128xbf16>
    %166 = vector.shape_cast %165 : vector<1x128x128xbf16> to vector<128x128xbf16>
    %cst_164 = arith.constant dense<0.000000e+00> : vector<64x128xf32>
    %167 = tpu.matmul %164, %166, %cst_164 {dimension_numbers = #tpu.dot_dimension_numbers<[1], [0], [0], [1], [0, 0, 1, 1], [], []>} : vector<64x128xbf16>, vector<128x128xbf16>, vector<64x128xf32> -> vector<64x128xf32>
    %168 = arith.addf %162, %167 : vector<64x128xf32>
    %c1_165 = arith.constant 1 : index
    %c2_166 = arith.constant 2 : index
    %c0_167 = arith.constant 0 : index
    %169 = vector.load %arg7[%c1_165, %c2_166, %c0_167] : memref<10x10x128xbf16, #tpu.memory_space<vmem>>, vector<8x8x128xbf16>
    %170 = vector.shape_cast %169 : vector<8x8x128xbf16> to vector<64x128xbf16>
    %c14 = arith.constant 14 : index
    %c0_168 = arith.constant 0 : index
    %c0_169 = arith.constant 0 : index
    %171 = vector.load %arg3[%c14, %c0_168, %c0_169] : memref<36x128x128xbf16, #tpu.memory_space<vmem>>, vector<1x128x128xbf16>
    %172 = vector.shape_cast %171 : vector<1x128x128xbf16> to vector<128x128xbf16>
    %cst_170 = arith.constant dense<0.000000e+00> : vector<64x128xf32>
    %173 = tpu.matmul %170, %172, %cst_170 {dimension_numbers = #tpu.dot_dimension_numbers<[1], [0], [0], [1], [0, 0, 1, 1], [], []>} : vector<64x128xbf16>, vector<128x128xbf16>, vector<64x128xf32> -> vector<64x128xf32>
    %174 = arith.addf %168, %173 : vector<64x128xf32>
    %c2_171 = arith.constant 2 : index
    %c0_172 = arith.constant 0 : index
    %c0_173 = arith.constant 0 : index
    %175 = vector.load %arg7[%c2_171, %c0_172, %c0_173] : memref<10x10x128xbf16, #tpu.memory_space<vmem>>, vector<8x8x128xbf16>
    %176 = vector.shape_cast %175 : vector<8x8x128xbf16> to vector<64x128xbf16>
    %c15 = arith.constant 15 : index
    %c0_174 = arith.constant 0 : index
    %c0_175 = arith.constant 0 : index
    %177 = vector.load %arg3[%c15, %c0_174, %c0_175] : memref<36x128x128xbf16, #tpu.memory_space<vmem>>, vector<1x128x128xbf16>
    %178 = vector.shape_cast %177 : vector<1x128x128xbf16> to vector<128x128xbf16>
    %cst_176 = arith.constant dense<0.000000e+00> : vector<64x128xf32>
    %179 = tpu.matmul %176, %178, %cst_176 {dimension_numbers = #tpu.dot_dimension_numbers<[1], [0], [0], [1], [0, 0, 1, 1], [], []>} : vector<64x128xbf16>, vector<128x128xbf16>, vector<64x128xf32> -> vector<64x128xf32>
    %180 = arith.addf %174, %179 : vector<64x128xf32>
    %c2_177 = arith.constant 2 : index
    %c1_178 = arith.constant 1 : index
    %c0_179 = arith.constant 0 : index
    %181 = vector.load %arg7[%c2_177, %c1_178, %c0_179] : memref<10x10x128xbf16, #tpu.memory_space<vmem>>, vector<8x8x128xbf16>
    %182 = vector.shape_cast %181 : vector<8x8x128xbf16> to vector<64x128xbf16>
    %c16 = arith.constant 16 : index
    %c0_180 = arith.constant 0 : index
    %c0_181 = arith.constant 0 : index
    %183 = vector.load %arg3[%c16, %c0_180, %c0_181] : memref<36x128x128xbf16, #tpu.memory_space<vmem>>, vector<1x128x128xbf16>
    %184 = vector.shape_cast %183 : vector<1x128x128xbf16> to vector<128x128xbf16>
    %cst_182 = arith.constant dense<0.000000e+00> : vector<64x128xf32>
    %185 = tpu.matmul %182, %184, %cst_182 {dimension_numbers = #tpu.dot_dimension_numbers<[1], [0], [0], [1], [0, 0, 1, 1], [], []>} : vector<64x128xbf16>, vector<128x128xbf16>, vector<64x128xf32> -> vector<64x128xf32>
    %186 = arith.addf %180, %185 : vector<64x128xf32>
    %c2_183 = arith.constant 2 : index
    %c2_184 = arith.constant 2 : index
    %c0_185 = arith.constant 0 : index
    %187 = vector.load %arg7[%c2_183, %c2_184, %c0_185] : memref<10x10x128xbf16, #tpu.memory_space<vmem>>, vector<8x8x128xbf16>
    %188 = vector.shape_cast %187 : vector<8x8x128xbf16> to vector<64x128xbf16>
    %c17 = arith.constant 17 : index
    %c0_186 = arith.constant 0 : index
    %c0_187 = arith.constant 0 : index
    %189 = vector.load %arg3[%c17, %c0_186, %c0_187] : memref<36x128x128xbf16, #tpu.memory_space<vmem>>, vector<1x128x128xbf16>
    %190 = vector.shape_cast %189 : vector<1x128x128xbf16> to vector<128x128xbf16>
    %cst_188 = arith.constant dense<0.000000e+00> : vector<64x128xf32>
    %191 = tpu.matmul %188, %190, %cst_188 {dimension_numbers = #tpu.dot_dimension_numbers<[1], [0], [0], [1], [0, 0, 1, 1], [], []>} : vector<64x128xbf16>, vector<128x128xbf16>, vector<64x128xf32> -> vector<64x128xf32>
    %192 = arith.addf %186, %191 : vector<64x128xf32>
    %193 = vector.broadcast %128 : vector<1x128xf32> to vector<64x128xf32>
    %194 = arith.addf %192, %193 : vector<64x128xf32>
    %cst_189 = arith.constant 0.000000e+00 : f32
    %195 = vector.broadcast %cst_189 : f32 to vector<64x128xf32>
    %196 = arith.maximumf %194, %195 : vector<64x128xf32>
    %197 = arith.truncf %196 : vector<64x128xf32> to vector<64x128xbf16>
    %cst_190 = arith.constant dense<0.000000e+00> : vector<64x128xf32>
    %198 = tpu.matmul %197, %126, %cst_190 {dimension_numbers = #tpu.dot_dimension_numbers<[1], [0], [0], [1], [0, 0, 1, 1], [], []>} : vector<64x128xbf16>, vector<128x128xbf16>, vector<64x128xf32> -> vector<64x128xf32>
    %199 = vector.broadcast %129 : vector<1x128xf32> to vector<64x128xf32>
    %200 = arith.addf %198, %199 : vector<64x128xf32>
    %201 = arith.extf %120 : vector<64x128xbf16> to vector<64x128xf32>
    %202 = arith.addf %200, %201 : vector<64x128xf32>
    %cst_191 = arith.constant 0.000000e+00 : f32
    %203 = vector.broadcast %cst_191 : f32 to vector<64x128xf32>
    %204 = arith.maximumf %202, %203 : vector<64x128xf32>
    %205 = arith.truncf %204 : vector<64x128xf32> to vector<64x128xbf16>
    %c5_192 = arith.constant 5 : index
    %c0_193 = arith.constant 0 : index
    %c0_194 = arith.constant 0 : index
    %206 = vector.load %arg2[%c5_192, %c0_193, %c0_194] : memref<7x128x128xbf16, #tpu.memory_space<vmem>>, vector<1x128x128xbf16>
    %207 = vector.shape_cast %206 : vector<1x128x128xbf16> to vector<128x128xbf16>
    %c6_195 = arith.constant 6 : index
    %c0_196 = arith.constant 0 : index
    %c0_197 = arith.constant 0 : index
    %208 = vector.load %arg2[%c6_195, %c0_196, %c0_197] : memref<7x128x128xbf16, #tpu.memory_space<vmem>>, vector<1x128x128xbf16>
    %209 = vector.shape_cast %208 : vector<1x128x128xbf16> to vector<128x128xbf16>
    %c7_198 = arith.constant 7 : index
    %c0_199 = arith.constant 0 : index
    %210 = vector.load %arg4[%c7_198, %c0_199] : memref<11x128xf32, #tpu.memory_space<vmem>>, vector<1x128xf32>
    %c8_200 = arith.constant 8 : index
    %c0_201 = arith.constant 0 : index
    %211 = vector.load %arg4[%c8_200, %c0_201] : memref<11x128xf32, #tpu.memory_space<vmem>>, vector<1x128xf32>
    %c9_202 = arith.constant 9 : index
    %c0_203 = arith.constant 0 : index
    %212 = vector.load %arg4[%c9_202, %c0_203] : memref<11x128xf32, #tpu.memory_space<vmem>>, vector<1x128xf32>
    %cst_204 = arith.constant dense<0.000000e+00> : vector<64x128xf32>
    %213 = tpu.matmul %205, %207, %cst_204 {dimension_numbers = #tpu.dot_dimension_numbers<[1], [0], [0], [1], [0, 0, 1, 1], [], []>} : vector<64x128xbf16>, vector<128x128xbf16>, vector<64x128xf32> -> vector<64x128xf32>
    %214 = vector.broadcast %210 : vector<1x128xf32> to vector<64x128xf32>
    %215 = arith.addf %213, %214 : vector<64x128xf32>
    %cst_205 = arith.constant 0.000000e+00 : f32
    %216 = vector.broadcast %cst_205 : f32 to vector<64x128xf32>
    %217 = arith.maximumf %215, %216 : vector<64x128xf32>
    %218 = arith.truncf %217 : vector<64x128xf32> to vector<64x128xbf16>
    %219 = vector.shape_cast %218 : vector<64x128xbf16> to vector<8x8x128xbf16>
    %c1_206 = arith.constant 1 : index
    %c1_207 = arith.constant 1 : index
    %c0_208 = arith.constant 0 : index
    %220 = vector.load %arg7[%c1_206, %c1_207, %c0_208] : memref<10x10x128xbf16, #tpu.memory_space<vmem>>, vector<8x8x128xbf16>
    tpu.vector_store %arg7[%c1_206, %c1_207, %c0_208], %219 {strides = array<i32>} : memref<10x10x128xbf16, #tpu.memory_space<vmem>>, vector<8x8x128xbf16>,
    %cst_209 = arith.constant 0.000000e+00 : f32
    %221 = vector.broadcast %cst_209 : f32 to vector<64x128xf32>
    %c0_210 = arith.constant 0 : index
    %c0_211 = arith.constant 0 : index
    %c0_212 = arith.constant 0 : index
    %222 = vector.load %arg7[%c0_210, %c0_211, %c0_212] : memref<10x10x128xbf16, #tpu.memory_space<vmem>>, vector<8x8x128xbf16>
    %223 = vector.shape_cast %222 : vector<8x8x128xbf16> to vector<64x128xbf16>
    %c18 = arith.constant 18 : index
    %c0_213 = arith.constant 0 : index
    %c0_214 = arith.constant 0 : index
    %224 = vector.load %arg3[%c18, %c0_213, %c0_214] : memref<36x128x128xbf16, #tpu.memory_space<vmem>>, vector<1x128x128xbf16>
    %225 = vector.shape_cast %224 : vector<1x128x128xbf16> to vector<128x128xbf16>
    %cst_215 = arith.constant dense<0.000000e+00> : vector<64x128xf32>
    %226 = tpu.matmul %223, %225, %cst_215 {dimension_numbers = #tpu.dot_dimension_numbers<[1], [0], [0], [1], [0, 0, 1, 1], [], []>} : vector<64x128xbf16>, vector<128x128xbf16>, vector<64x128xf32> -> vector<64x128xf32>
    %227 = arith.addf %221, %226 : vector<64x128xf32>
    %c0_216 = arith.constant 0 : index
    %c1_217 = arith.constant 1 : index
    %c0_218 = arith.constant 0 : index
    %228 = vector.load %arg7[%c0_216, %c1_217, %c0_218] : memref<10x10x128xbf16, #tpu.memory_space<vmem>>, vector<8x8x128xbf16>
    %229 = vector.shape_cast %228 : vector<8x8x128xbf16> to vector<64x128xbf16>
    %c19 = arith.constant 19 : index
    %c0_219 = arith.constant 0 : index
    %c0_220 = arith.constant 0 : index
    %230 = vector.load %arg3[%c19, %c0_219, %c0_220] : memref<36x128x128xbf16, #tpu.memory_space<vmem>>, vector<1x128x128xbf16>
    %231 = vector.shape_cast %230 : vector<1x128x128xbf16> to vector<128x128xbf16>
    %cst_221 = arith.constant dense<0.000000e+00> : vector<64x128xf32>
    %232 = tpu.matmul %229, %231, %cst_221 {dimension_numbers = #tpu.dot_dimension_numbers<[1], [0], [0], [1], [0, 0, 1, 1], [], []>} : vector<64x128xbf16>, vector<128x128xbf16>, vector<64x128xf32> -> vector<64x128xf32>
    %233 = arith.addf %227, %232 : vector<64x128xf32>
    %c0_222 = arith.constant 0 : index
    %c2_223 = arith.constant 2 : index
    %c0_224 = arith.constant 0 : index
    %234 = vector.load %arg7[%c0_222, %c2_223, %c0_224] : memref<10x10x128xbf16, #tpu.memory_space<vmem>>, vector<8x8x128xbf16>
    %235 = vector.shape_cast %234 : vector<8x8x128xbf16> to vector<64x128xbf16>
    %c20 = arith.constant 20 : index
    %c0_225 = arith.constant 0 : index
    %c0_226 = arith.constant 0 : index
    %236 = vector.load %arg3[%c20, %c0_225, %c0_226] : memref<36x128x128xbf16, #tpu.memory_space<vmem>>, vector<1x128x128xbf16>
    %237 = vector.shape_cast %236 : vector<1x128x128xbf16> to vector<128x128xbf16>
    %cst_227 = arith.constant dense<0.000000e+00> : vector<64x128xf32>
    %238 = tpu.matmul %235, %237, %cst_227 {dimension_numbers = #tpu.dot_dimension_numbers<[1], [0], [0], [1], [0, 0, 1, 1], [], []>} : vector<64x128xbf16>, vector<128x128xbf16>, vector<64x128xf32> -> vector<64x128xf32>
    %239 = arith.addf %233, %238 : vector<64x128xf32>
    %c1_228 = arith.constant 1 : index
    %c0_229 = arith.constant 0 : index
    %c0_230 = arith.constant 0 : index
    %240 = vector.load %arg7[%c1_228, %c0_229, %c0_230] : memref<10x10x128xbf16, #tpu.memory_space<vmem>>, vector<8x8x128xbf16>
    %241 = vector.shape_cast %240 : vector<8x8x128xbf16> to vector<64x128xbf16>
    %c21 = arith.constant 21 : index
    %c0_231 = arith.constant 0 : index
    %c0_232 = arith.constant 0 : index
    %242 = vector.load %arg3[%c21, %c0_231, %c0_232] : memref<36x128x128xbf16, #tpu.memory_space<vmem>>, vector<1x128x128xbf16>
    %243 = vector.shape_cast %242 : vector<1x128x128xbf16> to vector<128x128xbf16>
    %cst_233 = arith.constant dense<0.000000e+00> : vector<64x128xf32>
    %244 = tpu.matmul %241, %243, %cst_233 {dimension_numbers = #tpu.dot_dimension_numbers<[1], [0], [0], [1], [0, 0, 1, 1], [], []>} : vector<64x128xbf16>, vector<128x128xbf16>, vector<64x128xf32> -> vector<64x128xf32>
    %245 = arith.addf %239, %244 : vector<64x128xf32>
    %c1_234 = arith.constant 1 : index
    %c1_235 = arith.constant 1 : index
    %c0_236 = arith.constant 0 : index
    %246 = vector.load %arg7[%c1_234, %c1_235, %c0_236] : memref<10x10x128xbf16, #tpu.memory_space<vmem>>, vector<8x8x128xbf16>
    %247 = vector.shape_cast %246 : vector<8x8x128xbf16> to vector<64x128xbf16>
    %c22 = arith.constant 22 : index
    %c0_237 = arith.constant 0 : index
    %c0_238 = arith.constant 0 : index
    %248 = vector.load %arg3[%c22, %c0_237, %c0_238] : memref<36x128x128xbf16, #tpu.memory_space<vmem>>, vector<1x128x128xbf16>
    %249 = vector.shape_cast %248 : vector<1x128x128xbf16> to vector<128x128xbf16>
    %cst_239 = arith.constant dense<0.000000e+00> : vector<64x128xf32>
    %250 = tpu.matmul %247, %249, %cst_239 {dimension_numbers = #tpu.dot_dimension_numbers<[1], [0], [0], [1], [0, 0, 1, 1], [], []>} : vector<64x128xbf16>, vector<128x128xbf16>, vector<64x128xf32> -> vector<64x128xf32>
    %251 = arith.addf %245, %250 : vector<64x128xf32>
    %c1_240 = arith.constant 1 : index
    %c2_241 = arith.constant 2 : index
    %c0_242 = arith.constant 0 : index
    %252 = vector.load %arg7[%c1_240, %c2_241, %c0_242] : memref<10x10x128xbf16, #tpu.memory_space<vmem>>, vector<8x8x128xbf16>
    %253 = vector.shape_cast %252 : vector<8x8x128xbf16> to vector<64x128xbf16>
    %c23 = arith.constant 23 : index
    %c0_243 = arith.constant 0 : index
    %c0_244 = arith.constant 0 : index
    %254 = vector.load %arg3[%c23, %c0_243, %c0_244] : memref<36x128x128xbf16, #tpu.memory_space<vmem>>, vector<1x128x128xbf16>
    %255 = vector.shape_cast %254 : vector<1x128x128xbf16> to vector<128x128xbf16>
    %cst_245 = arith.constant dense<0.000000e+00> : vector<64x128xf32>
    %256 = tpu.matmul %253, %255, %cst_245 {dimension_numbers = #tpu.dot_dimension_numbers<[1], [0], [0], [1], [0, 0, 1, 1], [], []>} : vector<64x128xbf16>, vector<128x128xbf16>, vector<64x128xf32> -> vector<64x128xf32>
    %257 = arith.addf %251, %256 : vector<64x128xf32>
    %c2_246 = arith.constant 2 : index
    %c0_247 = arith.constant 0 : index
    %c0_248 = arith.constant 0 : index
    %258 = vector.load %arg7[%c2_246, %c0_247, %c0_248] : memref<10x10x128xbf16, #tpu.memory_space<vmem>>, vector<8x8x128xbf16>
    %259 = vector.shape_cast %258 : vector<8x8x128xbf16> to vector<64x128xbf16>
    %c24 = arith.constant 24 : index
    %c0_249 = arith.constant 0 : index
    %c0_250 = arith.constant 0 : index
    %260 = vector.load %arg3[%c24, %c0_249, %c0_250] : memref<36x128x128xbf16, #tpu.memory_space<vmem>>, vector<1x128x128xbf16>
    %261 = vector.shape_cast %260 : vector<1x128x128xbf16> to vector<128x128xbf16>
    %cst_251 = arith.constant dense<0.000000e+00> : vector<64x128xf32>
    %262 = tpu.matmul %259, %261, %cst_251 {dimension_numbers = #tpu.dot_dimension_numbers<[1], [0], [0], [1], [0, 0, 1, 1], [], []>} : vector<64x128xbf16>, vector<128x128xbf16>, vector<64x128xf32> -> vector<64x128xf32>
    %263 = arith.addf %257, %262 : vector<64x128xf32>
    %c2_252 = arith.constant 2 : index
    %c1_253 = arith.constant 1 : index
    %c0_254 = arith.constant 0 : index
    %264 = vector.load %arg7[%c2_252, %c1_253, %c0_254] : memref<10x10x128xbf16, #tpu.memory_space<vmem>>, vector<8x8x128xbf16>
    %265 = vector.shape_cast %264 : vector<8x8x128xbf16> to vector<64x128xbf16>
    %c25 = arith.constant 25 : index
    %c0_255 = arith.constant 0 : index
    %c0_256 = arith.constant 0 : index
    %266 = vector.load %arg3[%c25, %c0_255, %c0_256] : memref<36x128x128xbf16, #tpu.memory_space<vmem>>, vector<1x128x128xbf16>
    %267 = vector.shape_cast %266 : vector<1x128x128xbf16> to vector<128x128xbf16>
    %cst_257 = arith.constant dense<0.000000e+00> : vector<64x128xf32>
    %268 = tpu.matmul %265, %267, %cst_257 {dimension_numbers = #tpu.dot_dimension_numbers<[1], [0], [0], [1], [0, 0, 1, 1], [], []>} : vector<64x128xbf16>, vector<128x128xbf16>, vector<64x128xf32> -> vector<64x128xf32>
    %269 = arith.addf %263, %268 : vector<64x128xf32>
    %c2_258 = arith.constant 2 : index
    %c2_259 = arith.constant 2 : index
    %c0_260 = arith.constant 0 : index
    %270 = vector.load %arg7[%c2_258, %c2_259, %c0_260] : memref<10x10x128xbf16, #tpu.memory_space<vmem>>, vector<8x8x128xbf16>
    %271 = vector.shape_cast %270 : vector<8x8x128xbf16> to vector<64x128xbf16>
    %c26 = arith.constant 26 : index
    %c0_261 = arith.constant 0 : index
    %c0_262 = arith.constant 0 : index
    %272 = vector.load %arg3[%c26, %c0_261, %c0_262] : memref<36x128x128xbf16, #tpu.memory_space<vmem>>, vector<1x128x128xbf16>
    %273 = vector.shape_cast %272 : vector<1x128x128xbf16> to vector<128x128xbf16>
    %cst_263 = arith.constant dense<0.000000e+00> : vector<64x128xf32>
    %274 = tpu.matmul %271, %273, %cst_263 {dimension_numbers = #tpu.dot_dimension_numbers<[1], [0], [0], [1], [0, 0, 1, 1], [], []>} : vector<64x128xbf16>, vector<128x128xbf16>, vector<64x128xf32> -> vector<64x128xf32>
    %275 = arith.addf %269, %274 : vector<64x128xf32>
    %276 = vector.broadcast %211 : vector<1x128xf32> to vector<64x128xf32>
    %277 = arith.addf %275, %276 : vector<64x128xf32>
    %cst_264 = arith.constant 0.000000e+00 : f32
    %278 = vector.broadcast %cst_264 : f32 to vector<64x128xf32>
    %279 = arith.maximumf %277, %278 : vector<64x128xf32>
    %280 = arith.truncf %279 : vector<64x128xf32> to vector<64x128xbf16>
    %cst_265 = arith.constant dense<0.000000e+00> : vector<64x128xf32>
    %281 = tpu.matmul %280, %209, %cst_265 {dimension_numbers = #tpu.dot_dimension_numbers<[1], [0], [0], [1], [0, 0, 1, 1], [], []>} : vector<64x128xbf16>, vector<128x128xbf16>, vector<64x128xf32> -> vector<64x128xf32>
    %282 = vector.broadcast %212 : vector<1x128xf32> to vector<64x128xf32>
    %283 = arith.addf %281, %282 : vector<64x128xf32>
    %284 = arith.extf %205 : vector<64x128xbf16> to vector<64x128xf32>
    %285 = arith.addf %283, %284 : vector<64x128xf32>
    %cst_266 = arith.constant 0.000000e+00 : f32
    %286 = vector.broadcast %cst_266 : f32 to vector<64x128xf32>
    %287 = arith.maximumf %285, %286 : vector<64x128xf32>
    %288 = arith.truncf %287 : vector<64x128xf32> to vector<64x128xbf16>
    %289 = vector.shape_cast %288 : vector<64x128xbf16> to vector<8x8x128xbf16>
    %c0_267 = arith.constant 0 : index
    %c0_268 = arith.constant 0 : index
    %c0_269 = arith.constant 0 : index
    %290 = vector.load %arg7[%c0_267, %c0_268, %c0_269] : memref<10x10x128xbf16, #tpu.memory_space<vmem>>, vector<8x8x128xbf16>
    tpu.vector_store %arg7[%c0_267, %c0_268, %c0_269], %289 {strides = array<i32>} : memref<10x10x128xbf16, #tpu.memory_space<vmem>>, vector<8x8x128xbf16>,
    %cst_270 = arith.constant 0.000000e+00 : f32
    %291 = vector.broadcast %cst_270 : f32 to vector<48x128xf32>
    %c0_271 = arith.constant 0 : index
    %c0_272 = arith.constant 0 : index
    %c0_273 = arith.constant 0 : index
    %292 = vector.load %arg7[%c0_271, %c0_272, %c0_273] : memref<10x10x128xbf16, #tpu.memory_space<vmem>>, vector<6x8x128xbf16>
    %293 = vector.shape_cast %292 : vector<6x8x128xbf16> to vector<48x128xbf16>
    %c27 = arith.constant 27 : index
    %c0_274 = arith.constant 0 : index
    %c0_275 = arith.constant 0 : index
    %294 = vector.load %arg3[%c27, %c0_274, %c0_275] : memref<36x128x128xbf16, #tpu.memory_space<vmem>>, vector<1x128x128xbf16>
    %295 = vector.shape_cast %294 : vector<1x128x128xbf16> to vector<128x128xbf16>
    %cst_276 = arith.constant dense<0.000000e+00> : vector<48x128xf32>
    %296 = tpu.matmul %293, %295, %cst_276 {dimension_numbers = #tpu.dot_dimension_numbers<[1], [0], [0], [1], [0, 0, 1, 1], [], []>} : vector<48x128xbf16>, vector<128x128xbf16>, vector<48x128xf32> -> vector<48x128xf32>
    %297 = arith.addf %291, %296 : vector<48x128xf32>
    %c0_277 = arith.constant 0 : index
    %c1_278 = arith.constant 1 : index
    %c0_279 = arith.constant 0 : index
    %298 = vector.load %arg7[%c0_277, %c1_278, %c0_279] : memref<10x10x128xbf16, #tpu.memory_space<vmem>>, vector<6x8x128xbf16>
    %299 = vector.shape_cast %298 : vector<6x8x128xbf16> to vector<48x128xbf16>
    %c28 = arith.constant 28 : index
    %c0_280 = arith.constant 0 : index
    %c0_281 = arith.constant 0 : index
    %300 = vector.load %arg3[%c28, %c0_280, %c0_281] : memref<36x128x128xbf16, #tpu.memory_space<vmem>>, vector<1x128x128xbf16>
    %301 = vector.shape_cast %300 : vector<1x128x128xbf16> to vector<128x128xbf16>
    %cst_282 = arith.constant dense<0.000000e+00> : vector<48x128xf32>
    %302 = tpu.matmul %299, %301, %cst_282 {dimension_numbers = #tpu.dot_dimension_numbers<[1], [0], [0], [1], [0, 0, 1, 1], [], []>} : vector<48x128xbf16>, vector<128x128xbf16>, vector<48x128xf32> -> vector<48x128xf32>
    %303 = arith.addf %297, %302 : vector<48x128xf32>
    %c0_283 = arith.constant 0 : index
    %c2_284 = arith.constant 2 : index
    %c0_285 = arith.constant 0 : index
    %304 = vector.load %arg7[%c0_283, %c2_284, %c0_285] : memref<10x10x128xbf16, #tpu.memory_space<vmem>>, vector<6x8x128xbf16>
    %305 = vector.shape_cast %304 : vector<6x8x128xbf16> to vector<48x128xbf16>
    %c29 = arith.constant 29 : index
    %c0_286 = arith.constant 0 : index
    %c0_287 = arith.constant 0 : index
    %306 = vector.load %arg3[%c29, %c0_286, %c0_287] : memref<36x128x128xbf16, #tpu.memory_space<vmem>>, vector<1x128x128xbf16>
    %307 = vector.shape_cast %306 : vector<1x128x128xbf16> to vector<128x128xbf16>
    %cst_288 = arith.constant dense<0.000000e+00> : vector<48x128xf32>
    %308 = tpu.matmul %305, %307, %cst_288 {dimension_numbers = #tpu.dot_dimension_numbers<[1], [0], [0], [1], [0, 0, 1, 1], [], []>} : vector<48x128xbf16>, vector<128x128xbf16>, vector<48x128xf32> -> vector<48x128xf32>
    %309 = arith.addf %303, %308 : vector<48x128xf32>
    %c1_289 = arith.constant 1 : index
    %c0_290 = arith.constant 0 : index
    %c0_291 = arith.constant 0 : index
    %310 = vector.load %arg7[%c1_289, %c0_290, %c0_291] : memref<10x10x128xbf16, #tpu.memory_space<vmem>>, vector<6x8x128xbf16>
    %311 = vector.shape_cast %310 : vector<6x8x128xbf16> to vector<48x128xbf16>
    %c30 = arith.constant 30 : index
    %c0_292 = arith.constant 0 : index
    %c0_293 = arith.constant 0 : index
    %312 = vector.load %arg3[%c30, %c0_292, %c0_293] : memref<36x128x128xbf16, #tpu.memory_space<vmem>>, vector<1x128x128xbf16>
    %313 = vector.shape_cast %312 : vector<1x128x128xbf16> to vector<128x128xbf16>
    %cst_294 = arith.constant dense<0.000000e+00> : vector<48x128xf32>
    %314 = tpu.matmul %311, %313, %cst_294 {dimension_numbers = #tpu.dot_dimension_numbers<[1], [0], [0], [1], [0, 0, 1, 1], [], []>} : vector<48x128xbf16>, vector<128x128xbf16>, vector<48x128xf32> -> vector<48x128xf32>
    %315 = arith.addf %309, %314 : vector<48x128xf32>
    %c1_295 = arith.constant 1 : index
    %c1_296 = arith.constant 1 : index
    %c0_297 = arith.constant 0 : index
    %316 = vector.load %arg7[%c1_295, %c1_296, %c0_297] : memref<10x10x128xbf16, #tpu.memory_space<vmem>>, vector<6x8x128xbf16>
    %317 = vector.shape_cast %316 : vector<6x8x128xbf16> to vector<48x128xbf16>
    %c31 = arith.constant 31 : index
    %c0_298 = arith.constant 0 : index
    %c0_299 = arith.constant 0 : index
    %318 = vector.load %arg3[%c31, %c0_298, %c0_299] : memref<36x128x128xbf16, #tpu.memory_space<vmem>>, vector<1x128x128xbf16>
    %319 = vector.shape_cast %318 : vector<1x128x128xbf16> to vector<128x128xbf16>
    %cst_300 = arith.constant dense<0.000000e+00> : vector<48x128xf32>
    %320 = tpu.matmul %317, %319, %cst_300 {dimension_numbers = #tpu.dot_dimension_numbers<[1], [0], [0], [1], [0, 0, 1, 1], [], []>} : vector<48x128xbf16>, vector<128x128xbf16>, vector<48x128xf32> -> vector<48x128xf32>
    %321 = arith.addf %315, %320 : vector<48x128xf32>
    %c1_301 = arith.constant 1 : index
    %c2_302 = arith.constant 2 : index
    %c0_303 = arith.constant 0 : index
    %322 = vector.load %arg7[%c1_301, %c2_302, %c0_303] : memref<10x10x128xbf16, #tpu.memory_space<vmem>>, vector<6x8x128xbf16>
    %323 = vector.shape_cast %322 : vector<6x8x128xbf16> to vector<48x128xbf16>
    %c32 = arith.constant 32 : index
    %c0_304 = arith.constant 0 : index
    %c0_305 = arith.constant 0 : index
    %324 = vector.load %arg3[%c32, %c0_304, %c0_305] : memref<36x128x128xbf16, #tpu.memory_space<vmem>>, vector<1x128x128xbf16>
    %325 = vector.shape_cast %324 : vector<1x128x128xbf16> to vector<128x128xbf16>
    %cst_306 = arith.constant dense<0.000000e+00> : vector<48x128xf32>
    %326 = tpu.matmul %323, %325, %cst_306 {dimension_numbers = #tpu.dot_dimension_numbers<[1], [0], [0], [1], [0, 0, 1, 1], [], []>} : vector<48x128xbf16>, vector<128x128xbf16>, vector<48x128xf32> -> vector<48x128xf32>
    %327 = arith.addf %321, %326 : vector<48x128xf32>
    %c2_307 = arith.constant 2 : index
    %c0_308 = arith.constant 0 : index
    %c0_309 = arith.constant 0 : index
    %328 = vector.load %arg7[%c2_307, %c0_308, %c0_309] : memref<10x10x128xbf16, #tpu.memory_space<vmem>>, vector<6x8x128xbf16>
    %329 = vector.shape_cast %328 : vector<6x8x128xbf16> to vector<48x128xbf16>
    %c33 = arith.constant 33 : index
    %c0_310 = arith.constant 0 : index
    %c0_311 = arith.constant 0 : index
    %330 = vector.load %arg3[%c33, %c0_310, %c0_311] : memref<36x128x128xbf16, #tpu.memory_space<vmem>>, vector<1x128x128xbf16>
    %331 = vector.shape_cast %330 : vector<1x128x128xbf16> to vector<128x128xbf16>
    %cst_312 = arith.constant dense<0.000000e+00> : vector<48x128xf32>
    %332 = tpu.matmul %329, %331, %cst_312 {dimension_numbers = #tpu.dot_dimension_numbers<[1], [0], [0], [1], [0, 0, 1, 1], [], []>} : vector<48x128xbf16>, vector<128x128xbf16>, vector<48x128xf32> -> vector<48x128xf32>
    %333 = arith.addf %327, %332 : vector<48x128xf32>
    %c2_313 = arith.constant 2 : index
    %c1_314 = arith.constant 1 : index
    %c0_315 = arith.constant 0 : index
    %334 = vector.load %arg7[%c2_313, %c1_314, %c0_315] : memref<10x10x128xbf16, #tpu.memory_space<vmem>>, vector<6x8x128xbf16>
    %335 = vector.shape_cast %334 : vector<6x8x128xbf16> to vector<48x128xbf16>
    %c34 = arith.constant 34 : index
    %c0_316 = arith.constant 0 : index
    %c0_317 = arith.constant 0 : index
    %336 = vector.load %arg3[%c34, %c0_316, %c0_317] : memref<36x128x128xbf16, #tpu.memory_space<vmem>>, vector<1x128x128xbf16>
    %337 = vector.shape_cast %336 : vector<1x128x128xbf16> to vector<128x128xbf16>
    %cst_318 = arith.constant dense<0.000000e+00> : vector<48x128xf32>
    %338 = tpu.matmul %335, %337, %cst_318 {dimension_numbers = #tpu.dot_dimension_numbers<[1], [0], [0], [1], [0, 0, 1, 1], [], []>} : vector<48x128xbf16>, vector<128x128xbf16>, vector<48x128xf32> -> vector<48x128xf32>
    %339 = arith.addf %333, %338 : vector<48x128xf32>
    %c2_319 = arith.constant 2 : index
    %c2_320 = arith.constant 2 : index
    %c0_321 = arith.constant 0 : index
    %340 = vector.load %arg7[%c2_319, %c2_320, %c0_321] : memref<10x10x128xbf16, #tpu.memory_space<vmem>>, vector<6x8x128xbf16>
    %341 = vector.shape_cast %340 : vector<6x8x128xbf16> to vector<48x128xbf16>
    %c35 = arith.constant 35 : index
    %c0_322 = arith.constant 0 : index
    %c0_323 = arith.constant 0 : index
    %342 = vector.load %arg3[%c35, %c0_322, %c0_323] : memref<36x128x128xbf16, #tpu.memory_space<vmem>>, vector<1x128x128xbf16>
    %343 = vector.shape_cast %342 : vector<1x128x128xbf16> to vector<128x128xbf16>
    %cst_324 = arith.constant dense<0.000000e+00> : vector<48x128xf32>
    %344 = tpu.matmul %341, %343, %cst_324 {dimension_numbers = #tpu.dot_dimension_numbers<[1], [0], [0], [1], [0, 0, 1, 1], [], []>} : vector<48x128xbf16>, vector<128x128xbf16>, vector<48x128xf32> -> vector<48x128xf32>
    %345 = arith.addf %339, %344 : vector<48x128xf32>
    %346 = vector.shape_cast %345 : vector<48x128xf32> to vector<6x8x128xf32>
    %347 = vector.extract_strided_slice %346 {offsets = [0, 0, 0], sizes = [6, 6, 128], strides = [1, 1, 1]} : vector<6x8x128xf32> to vector<6x6x128xf32>
    %cst_325 = arith.constant dense<0.000000e+00> : vector<128xf32>
    %348 = vector.multi_reduction <add>, %347, %cst_325 [0, 1] : vector<6x6x128xf32> to vector<128xf32>
    %349 = vector.shape_cast %348 : vector<128xf32> to vector<1x128xf32>
    %cst_326 = arith.constant 0.027777778 : f32
    %350 = vector.broadcast %cst_326 : f32 to vector<1x128xf32>
    %351 = arith.mulf %349, %350 : vector<1x128xf32>
    %c10_327 = arith.constant 10 : index
    %c0_328 = arith.constant 0 : index
    %352 = vector.load %arg4[%c10_327, %c0_328] : memref<11x128xf32, #tpu.memory_space<vmem>>, vector<1x128xf32>
    %353 = arith.addf %351, %352 : vector<1x128xf32>
    %354 = vector.shape_cast %353 : vector<1x128xf32> to vector<1x1x128xf32>
    %c0_329 = arith.constant 0 : index
    %c0_330 = arith.constant 0 : index
    %c0_331 = arith.constant 0 : index
    %355 = vector.load %arg5[%c0_329, %c0_330, %c0_331] : memref<1x1x128xf32, #tpu.memory_space<vmem>>, vector<1x1x128xf32>
    tpu.vector_store %arg5[%c0_329, %c0_330, %c0_331], %354 {strides = array<i32>} : memref<1x1x128xf32, #tpu.memory_space<vmem>>, vector<1x1x128xf32>,
    return
  }
  func.func @transform_0(%arg0: i32) -> (i32, i32, i32) {
    %c0_i32 = arith.constant 0 : i32
    %c0_i32_0 = arith.constant 0 : i32
    %c0_i32_1 = arith.constant 0 : i32
    return %arg0, %c0_i32, %c0_i32_0 : i32, i32, i32
  }
  func.func @transform_1(%arg0: i32) -> (i32, i32, i32) {
    %c0_i32 = arith.constant 0 : i32
    %c0_i32_0 = arith.constant 0 : i32
    %c0_i32_1 = arith.constant 0 : i32
    %c0_i32_2 = arith.constant 0 : i32
    return %c0_i32, %c0_i32_0, %c0_i32_1 : i32, i32, i32
  }
  func.func @transform_2(%arg0: i32) -> (i32, i32, i32) {
    %c0_i32 = arith.constant 0 : i32
    %c0_i32_0 = arith.constant 0 : i32
    %c0_i32_1 = arith.constant 0 : i32
    %c0_i32_2 = arith.constant 0 : i32
    return %c0_i32, %c0_i32_0, %c0_i32_1 : i32, i32, i32
  }
  func.func @transform_3(%arg0: i32) -> (i32, i32) {
    %c0_i32 = arith.constant 0 : i32
    %c0_i32_0 = arith.constant 0 : i32
    %c0_i32_1 = arith.constant 0 : i32
    return %c0_i32, %c0_i32_0 : i32, i32
  }
  func.func @transform_4(%arg0: i32) -> (i32, i32, i32) {
    %c0_i32 = arith.constant 0 : i32
    %c0_i32_0 = arith.constant 0 : i32
    %c0_i32_1 = arith.constant 0 : i32
    return %arg0, %c0_i32, %c0_i32_0 : i32, i32, i32
  }
}

module attributes {stable_mosaic.version = 11 : i64} {
  func.func @_tail_kernel(%arg0: memref<2x128xf32, #tpu.memory_space<vmem>>, %arg1: memref<128x128xf32, #tpu.memory_space<vmem>>, %arg2: memref<1x128xf32, #tpu.memory_space<vmem>>, %arg3: memref<1x128xf32, #tpu.memory_space<vmem>>) attributes {dimension_semantics = [], scalar_prefetch = 0 : i64, scratch_operands = 0 : i64, tpu.core_type = #tpu.core_type<tc>} {
    %c0 = arith.constant 0 : index
    %c0_0 = arith.constant 0 : index
    %0 = vector.load %arg0[%c0, %c0_0] : memref<2x128xf32, #tpu.memory_space<vmem>>, vector<2x128xf32>
    %c0_1 = arith.constant 0 : index
    %c0_2 = arith.constant 0 : index
    %1 = vector.load %arg1[%c0_1, %c0_2] : memref<128x128xf32, #tpu.memory_space<vmem>>, vector<128x128xf32>
    %cst = arith.constant dense<0.000000e+00> : vector<2x128xf32>
    %2 = tpu.matmul %0, %1, %cst {dimension_numbers = #tpu.dot_dimension_numbers<[1], [0], [0], [1], [0, 0, 1, 1], [], []>} : vector<2x128xf32>, vector<128x128xf32>, vector<2x128xf32> -> vector<2x128xf32>
    %c0_3 = arith.constant 0 : index
    %c0_4 = arith.constant 0 : index
    %3 = vector.load %arg2[%c0_3, %c0_4] : memref<1x128xf32, #tpu.memory_space<vmem>>, vector<1x128xf32>
    %4 = vector.broadcast %3 : vector<1x128xf32> to vector<2x128xf32>
    %5 = arith.addf %2, %4 : vector<2x128xf32>
    %6 = tpu.iota {dimensions = array<i32: 1>} : vector<2x128xi32>
    %c2_i32 = arith.constant 2 : i32
    %7 = vector.broadcast %c2_i32 : i32 to vector<2x128xi32>
    %8 = arith.cmpi slt, %6, %7 : vector<2x128xi32>
    %cst_5 = arith.constant -1.000000e+30 : f32
    %9 = vector.broadcast %cst_5 : f32 to vector<2x128xf32>
    %10 = arith.select %8, %5, %9 : vector<2x128xi1>, vector<2x128xf32>
    %cst_6 = arith.constant dense<0xFF800000> : vector<2xf32>
    %11 = vector.multi_reduction <maximumf>, %10, %cst_6 [1] : vector<2x128xf32> to vector<2xf32>
    %12 = vector.shape_cast %11 : vector<2xf32> to vector<2x1xf32>
    %13 = vector.broadcast %12 : vector<2x1xf32> to vector<2x128xf32>
    %14 = arith.subf %10, %13 : vector<2x128xf32>
    %15 = math.exp %14 : vector<2x128xf32>
    %cst_7 = arith.constant dense<0.000000e+00> : vector<2xf32>
    %16 = vector.multi_reduction <add>, %15, %cst_7 [1] : vector<2x128xf32> to vector<2xf32>
    %17 = vector.shape_cast %16 : vector<2xf32> to vector<2x1xf32>
    %18 = math.log %17 : vector<2x1xf32>
    %19 = arith.addf %12, %18 : vector<2x1xf32>
    %20 = vector.extract_strided_slice %5 {offsets = [0, 0], sizes = [2, 1], strides = [1, 1]} : vector<2x128xf32> to vector<2x1xf32>
    %21 = arith.subf %20, %19 : vector<2x1xf32>
    %22 = vector.shape_cast %21 : vector<2x1xf32> to vector<1x2x1xf32>
    %cst_8 = arith.constant dense<0.000000e+00> : vector<1xf32>
    %23 = vector.multi_reduction <add>, %22, %cst_8 [1, 2] : vector<1x2x1xf32> to vector<1xf32>
    %24 = vector.shape_cast %23 : vector<1xf32> to vector<1x1x1xf32>
    %25 = vector.extract %24[0, 0, 0] : f32 from vector<1x1x1xf32>
    %cst_9 = arith.constant 5.000000e-01 : f32
    %26 = arith.mulf %25, %cst_9 : f32
    %cst_10 = arith.constant 0.000000e+00 : f32
    %27 = arith.subf %cst_10, %26 : f32
    %cst_11 = arith.constant 5.000000e-01 : f32
    %28 = arith.mulf %27, %cst_11 : f32
    %cst_12 = arith.constant 0.000000e+00 : f32
    %29 = vector.broadcast %cst_12 : f32 to vector<1x128xf32>
    %30 = vector.broadcast %28 : f32 to vector<1x128xf32>
    %31 = arith.addf %29, %30 : vector<1x128xf32>
    %c0_13 = arith.constant 0 : index
    %c0_14 = arith.constant 0 : index
    %32 = vector.load %arg3[%c0_13, %c0_14] : memref<1x128xf32, #tpu.memory_space<vmem>>, vector<1x128xf32>
    tpu.vector_store %arg3[%c0_13, %c0_14], %31 {strides = array<i32>} : memref<1x128xf32, #tpu.memory_space<vmem>>, vector<1x128xf32>,
    return
  }
}

</mosaic_0001>

<bundles_post_ra>
// kernel: resnet_two_discriminator_forward.3
= control target key start
LH: loop header
LB: loop body
LE: loop exit
PB: predicated region body
PF: predicated region fallthrough
CT: control target
= control target key end

     0   :  { %s219_s0 = inlined_call_operand.vmem [shape: f32[2,128], index: 0, kind: input, shape index: {}]   ;;  %s220_s1 = inlined_call_operand.vmem [shape: f32[128,128], index: 1, kind: input, shape index: {}]   ;;  %s221_s2 = inlined_call_operand.vmem [shape: f32[1,128], index: 2, kind: input, shape index: {}]   ;;  %s222_s3 = inlined_call_operand.hbm [shape: f32[1,128], index: 3, kind: output, shape index: {}]  }
   0x1   :  { %v31_v0 = vld [vmem:[%s220_s1 + $0x78] sm:$0xff]  ;;  %v30_v1 = vld [vmem:[%s220_s1 + $0x70] sm:$0xff]  ;;  %v29_v2 = vld [vmem:[%s220_s1 + $0x68] sm:$0xff] }
   0x2   :  { %36 = vmatpush.msra.mxu0 %v31_v0  ;;  %v28_v3 = vld [vmem:[%s220_s1 + $0x60] sm:$0xff]  ;;  %v27_v4 = vld [vmem:[%s220_s1 + $0x58] sm:$0xff] }
   0x4   :  { %37 = vmatpush.msra.mxu0 %v30_v1 }
   0x6   :  { %38 = vmatpush.msra.mxu0 %v29_v2 }
   0x7   :  { %8 = vsyncpa [#allocation3], 0  ;;  %v26_v5 = vld [vmem:[%s220_s1 + $0x50] sm:$0xff]  ;;  %v25_v6 = vld [vmem:[%s220_s1 + $0x48] sm:$0xff]  ;;  %v56_v17 = vlaneseq  ;;  %vm60_vm1 = vcmask 1041408   ;;  %vm74_vm2 = vcmask 1024  }
   0x8   :  { %39 = vmatpush.msra.mxu0 %v28_v3  ;;  %v24_v7 = vld [vmem:[%s220_s1 + $0x40] sm:$0xff]  ;;  %v23_v8 = vld [vmem:[%s220_s1 + $0x38] sm:$0xff]  ;;  %v22_v9 = vld [vmem:[%s220_s1 + $0x30] sm:$0xff]  ;;  %s98_s25 = sshll.u32 %s222_s3, 4  ;;  %s99_s25 = int_to_ptr.hbm [resolvable:$true] %s98_s25 }
   0x9   :  { %v21_v10 = vld [vmem:[%s220_s1 + $0x28] sm:$0xff]  ;;  %v20_v11 = vld [vmem:[%s220_s1 + $0x20] sm:$0xff]  ;;  %v19_v12 = vld [vmem:[%s220_s1 + $0x18] sm:$0xff]  ;;  %v57_v18 = vand.u32 127, %v56_v17 }
   0xa   :  { %40 = vmatpush.msra.mxu0 %v27_v4  ;;  %v18_v13 = vld [vmem:[%s220_s1 + $0x10] sm:$0xff]  ;;  %v17_v14 = vld [vmem:[%s220_s1 + $0x8] sm:$0xff]  ;;  %v16_v15 = vld [vmem:[%s220_s1] sm:$0xff] }
   0xb   :  { %v15_v16 = vld [vmem:[%s219_s0] sm:$0x3]  ;;  %vm58_vm0 = vcmp.lt.s32.totalorder %v57_v18, 2 }
   0xc   :  { %41 = vmatpush.msra.mxu0 %v26_v5  ;;  %v110_v19 = vld [vmem:[%s221_s2] ss:$0 sm:$0xff]  ;;  %s141_s2 = smov [#allocation2]  }
   0xd   :  { %s96_s21 = sshll.u32 %s141_s2, 4  ;;  %s97_s21 = int_to_ptr.vmem [resolvable:$true] %s96_s21 }
   0xe   :  { %42 = vmatpush.msra.mxu0 %v25_v6 }
  0x10   :  { %43 = vmatpush.msra.mxu0 %v24_v7 }
  0x12   :  { %44 = vmatpush.msra.mxu0 %v23_v8 }
  0x14   :  { %45 = vmatpush.msra.mxu0 %v22_v9 }
  0x16   :  { %46 = vmatpush.msra.mxu0 %v21_v10 }
  0x18   :  { %47 = vmatpush.msra.mxu0 %v20_v11 }
  0x1a   :  { %48 = vmatpush.msra.mxu0 %v19_v12 }
  0x1c   :  { %49 = vmatpush.msra.mxu0 %v18_v13 }
  0x1e   :  { %50 = vmatpush.msra.mxu0 %v17_v14 }
  0x20   :  { %51 = vmatpush.msra.mxu0 %v16_v15 }
  0x21   :  { %52 = vmatmul.f32.vlgmr.msra.gmra.mxu0 %v15_v16 }
  0x9e   :  { %v53_v20 = vpop.f32.mrf.mxu0 }
  0x9f   :  { %v54_v21 = vadd.f32 %v110_v19, %v53_v20 }
  0xa1   :  { %v59_v22 = vsel %vm58_vm0, %v54_v21, -1e+30 }
  0xa2   :  { %v61_v23 = vsel %vm60_vm1, %v59_v22, -inf }
  0xa3   :  { %62 = vmax.xlane.f32.xlu0 %v61_v23 }
 0x116   :  { %v63_v24 = vpop.xlane.xlu0 %62 }
 0x117   :  { %v64_v25 = vsub.f32 %v59_v22, %v63_v24 }
 0x119   :  { %v65_v26 = vmul.f32 1.442695, %v64_v25 }
 0x11b   :  { %111 = vpow2.f32 %v65_v26 }
 0x121   :  { %v112_v27 = vpop.eup %111 }
 0x122   :  { %v67_v28 = vsel %vm60_vm1, %v112_v27, 0.0 }
 0x123   :  { %68 = vadd.xlane.f32.xlu0 %v67_v28 }
 0x196   :  { %v69_v29 = vpop.xlane.xlu0 %68 }
 0x197   :  { %113 = vlog2.f32 %v69_v29 }
 0x19d   :  { %v114_v30 = vpop.eup %113 }
 0x19e   :  { %v71_v31 = vmul.f32 0.6931472, %v114_v30 }
 0x1a0   :  { %v72_v32 = vadd.f32 %v71_v31, %v63_v24 }
 0x1a2   :  { %v73_v33 = vsub.f32 %v54_v21, %v72_v32 }
 0x1a4   :  { %v75_v34 = vsel %vm74_vm2, %v73_v33, 0.0 }
 0x1a5   :  { %76 = vadd.xlane.f32.xlu1 %v75_v34 }
 0x218   :  { %v77_v35 = vpop.xlane.xlu1 %76 }
 0x219   :  { %v78_v36 = vrot.slane %v77_v35, 4 }
 0x21b   :  { %v79_v37 = vadd.f32 %v78_v36, %v77_v35 }
 0x21d   :  { %v80_v38 = vrot.slane %v79_v37, 2 }
 0x21f   :  { %v81_v39 = vadd.f32 %v80_v38, %v79_v37 }
 0x221   :  { %v82_v40 = vrot.slane %v81_v39, 1 }
 0x223   :  { %v83_v41 = vadd.f32 %v82_v40, %v81_v39 }
 0x225   :  { %107 = vpush %v83_v41 }
 0x256   :  { %s108_s0 = spop %107 }
 0x257   :  { %s85_s1 = smul.f32 0.5, %s108_s0 }
 0x259   :  { %s86_s22 = ssub.f32 0.0, %s85_s1 }
 0x25b   :  { %s87_s26 = smul.f32 0.5, %s86_s22 }
 0x25d   :  { %v88_v42 = vstv %s87_s26 }
 0x25e   :  { %90 = vst [vmem:[#allocation2] sm:$0x1] %v88_v42 }
 0x25f   :  { %101 = dma.vmem_to_hbm [thread:$0]  %s97_s21, 16, %s99_s25, [#allocation3]  }
 0x260   :  { %139 = dma.done.wait [#allocation3], 16  }
 0x261   :  { %140 = vsyncadd [#allocation3], 4294967280 }
 0x262   :  { %106 = vsyncpa [#allocation3], 1 }

// kernel: resnet_two_discriminator_forward.2
= control target key start
LH: loop header
LB: loop body
LE: loop exit
PB: predicated region body
PF: predicated region fallthrough
CT: control target
= control target key end

     0   :  { %9 = vsyncpa [#allocation5], 0  ;;  %s12181_s0 = inlined_call_operand.vmem [shape: bf16[2,256,128], index: 0, kind: input, shape index: {}]   ;;  %s12182_s1 = inlined_call_operand.hbm [shape: bf16[7,128,128], index: 1, kind: input, shape index: {}]   ;;  %s12183_s2 = inlined_call_operand.hbm [shape: bf16[36,128,128], index: 2, kind: input, shape index: {}]   ;;  %s12184_s3 = inlined_call_operand.hbm [shape: f32[11,128], index: 3, kind: input, shape index: {}]   ;;  %s12185_s4 = inlined_call_operand.vmem [shape: f32[2,1,128], index: 4, kind: output, shape index: {}]  }
   0x1   :  { %10 = vsyncpa [#allocation7], 0  ;;  %s10846_s15 = smov 0  }
   0x2 LB: > { %s10852_s16 = sadd.s32 4294967295, %s10811_s15   ;;  %p8450_p0 = scmp.ge.s32.totalorder %s10811_s15, 1  ;;  %s10811_s15 = sphi %s10846_s15, %s16_s15  }
   0x3   : > { %p136_p1 = scmp.lt.s32.totalorder %s10811_s15, 3  ;;  %p10673_p2 = scmp.eq.s32.totalorder %s10852_s16, 0 }
   0x4   : > { %s161_s19 = sshll.u32 %s12183_s2, 4  ;;  %s147_s23 = sshll.u32 %s12182_s1, 4  ;;  %s162_s19 = int_to_ptr.hbm [resolvable:$true] %s161_s19  ;;  %s148_s23 = int_to_ptr.hbm [resolvable:$true] %s147_s23 }
   0x5   : > { %p10860_p3 = pnand %p8450_p0, %p136_p1  ;;  %s10813_s24 = smov [#allocation6]  }
   0x6   : > { %s163_s25 = sshll.u32 %s10813_s24, 4  ;;  %s10814_s27 = smov [#allocation4]   ;;  %s164_s25 = int_to_ptr.vmem [resolvable:$true] %s163_s25 }
   0x7   : > { %p10663_p4 = pneg %p10860_p3  ;;  %s149_s28 = sshll.u32 %s10814_s27, 4  ;;  %s150_s28 = int_to_ptr.vmem [resolvable:$true] %s149_s28 }
   0x8   : > { %s175_s5 = sshll.u32 %s12184_s3, 4  ;;  %s10815_s6 = smov 64   ;;  %s176_s5 = int_to_ptr.hbm [resolvable:$true] %s175_s5 }
   0x9   : > { %p10871_p5 = pnand %p10673_p2, %p10663_p4  ;;  %s10816_s7 = smov 4  }
   0xa   : > { %s10817_s8 = smov [#allocation8]   ;;  %s10818_s10 = smov 128  }
   0xb   : > { %10669 = dma.hbm_to_vmem [thread:$0]  (!%p10871_p5), %s162_s19, 36864, %s164_s25, [#allocation7], %s10815_s6, %s10815_s6, %s10816_s7  }
   0xc   : > { %10666 = dma.hbm_to_vmem [thread:$0]  (!%p10871_p5), %s148_s23, 7168, %s150_s28, [#allocation5], %s10815_s6, %s10815_s6, %s10816_s7  }
   0xd   : > { %s177_s9 = sshll.u32 %s10817_s8, 4  ;;  %s10819_s11 = smov 8   ;;  %s178_s9 = int_to_ptr.vmem [resolvable:$true] %s177_s9 }
   0xe   : > { %10672 = dma.hbm_to_vmem [thread:$0]  (!%p10871_p5), %s176_s5, 256, %s178_s9, [#allocation7], %s10818_s10, %s10818_s10, %s10819_s11  }
   0xf   : > { %201 = sbr.rel (%p10860_p3) target bundleno = 2317 (0x90d), region = 36 }
  0x14   : > { %10802 = dma.done.wait (%p10673_p2), [#allocation5], 7168  }
  0x15   : > { %10804 = vsyncadd (%p10673_p2), [#allocation5], 4294960128 }
  0x16   : > { %10806 = dma.done.wait (%p10673_p2), [#allocation7], 37120  }
  0x17   : > { %10808 = vsyncadd (%p10673_p2), [#allocation7], 4294930176  ;;  %vm593_vm0 = vcmask 1040384   ;;  %vm594_vm1 = vsmask.f32 256  ;;  %v10820_v0 = vmov 0  }
  0x18   : > { %592 = vst [vmem:[#allocation2] sm:$0xf] %v10820_v0  ;;  %vm10897_vm2 = vmand %vm593_vm0, %vm594_vm1  ;;  %v632_v2 = vld [vmem:[#allocation2 + $0x4c] sm:$0x1]  ;;  %v636_v3 = vld [vmem:[#allocation2 + $0x54] sm:$0x1] }
  0x19   : > { %599 = vst [vmem:[#allocation2 + $0x8] sm:$0xf] %v10820_v0  ;;  %v640_v4 = vld [vmem:[#allocation2 + $0x5c] sm:$0x1]  ;;  %v633_v5 = vsel %vm10897_vm2, 0, %v632_v2  ;;  %v637_v6 = vsel %vm10897_vm2, 0, %v636_v3 }
  0x1a   : > { %603 = vst [vmem:[#allocation2 + $0x10] sm:$0xf] %v10820_v0  ;;  %v641_v7 = vsel %vm10897_vm2, 0, %v640_v4  ;;  %v644_v8 = vld [vmem:[#allocation2 + $0x64] sm:$0x1]  ;;  %v10237_v9 = vld [vmem:[#allocation4 + $0x38] sm:$0xff] }
  0x1b   : > { %607 = vst [vmem:[#allocation2 + $0x18] sm:$0xf] %v10820_v0  ;;  %v645_v10 = vsel %vm10897_vm2, 0, %v644_v8  ;;  %v648_v11 = vld [vmem:[#allocation2 + $0x6c] sm:$0x1]  ;;  %439 = vmatpush.bf16.msra.mxu0 %v10237_v9  ;;  %v10236_v14 = vld [vmem:[#allocation4 + $0x30] sm:$0xff] }
  0x1c   : > { %634 = vst [vmem:[#allocation2 + $0x4c] sm:$0x1] %v633_v5  ;;  %v649_v12 = vsel %vm10897_vm2, 0, %v648_v11  ;;  %v652_v13 = vld [vmem:[#allocation2 + $0x74] sm:$0x1]  ;;  %v10235_v23 = vld [vmem:[#allocation4 + $0x28] sm:$0xff] }
  0x1d   : > { %638 = vst [vmem:[#allocation2 + $0x54] sm:$0x1] %v637_v6  ;;  %v653_v15 = vsel %vm10897_vm2, 0, %v652_v13  ;;  %v656_v16 = vld [vmem:[#allocation2 + $0x7c] sm:$0x1]  ;;  %v10234_v32 = vld [vmem:[#allocation4 + $0x20] sm:$0xff] }
  0x1e   : > { %642 = vst [vmem:[#allocation2 + $0x5c] sm:$0x1] %v641_v7  ;;  %v657_v17 = vsel %vm10897_vm2, 0, %v656_v16  ;;  %v660_v18 = vld [vmem:[#allocation2 + $0x84] sm:$0x1]  ;;  %p236_p6 = scmp.lt.s32.totalorder %s10852_s16, 1 }
  0x1f   : > { %646 = vst [vmem:[#allocation2 + $0x64] sm:$0x1] %v645_v10  ;;  %v661_v19 = vsel %vm10897_vm2, 0, %v660_v18  ;;  %v664_v20 = vld [vmem:[#allocation2 + $0x8c] sm:$0x1]  ;;  %440 = vmatpush.bf16.msra.mxu0 %v10236_v14  ;;  %v10232_v45 = vld [vmem:[#allocation4 + $0x10] sm:$0xff] }
  0x20   : > { %650 = vst [vmem:[#allocation2 + $0x6c] sm:$0x1] %v649_v12  ;;  %v665_v21 = vsel %vm10897_vm2, 0, %v664_v20  ;;  %v700_v22 = vld [vmem:[#allocation2 + $0xd4] sm:$0x1]  ;;  %v10233_v41 = vld [vmem:[#allocation4 + $0x18] sm:$0xff] }
  0x21   : > { %654 = vst [vmem:[#allocation2 + $0x74] sm:$0x1] %v653_v15  ;;  %v701_v24 = vsel %vm10897_vm2, 0, %v700_v22  ;;  %v704_v25 = vld [vmem:[#allocation2 + $0xdc] sm:$0x1]  ;;  %s12197_s16 = smov (!%p236_p6, %s10852_s16), 1 }
  0x22   : > { %658 = vst [vmem:[#allocation2 + $0x7c] sm:$0x1] %v657_v17  ;;  %v705_v26 = vsel %vm10897_vm2, 0, %v704_v25  ;;  %v708_v27 = vld [vmem:[#allocation2 + $0xe4] sm:$0x1]  ;;  %v10231_v46 = vld [vmem:[#allocation4 + $0x8] sm:$0xff]  ;;  %s243_s20 = scalar_lea.vmem %s12185_s4, %s12197_s16 }
  0x23   : > { %662 = vst [vmem:[#allocation2 + $0x84] sm:$0x1] %v661_v19  ;;  %v709_v28 = vsel %vm10897_vm2, 0, %v708_v27  ;;  %v712_v29 = vld [vmem:[#allocation2 + $0xec] sm:$0x1]  ;;  %441 = vmatpush.bf16.msra.mxu0 %v10235_v23  ;;  %s10213_s12 = sshll.u32 %s12197_s16, 7 }
  0x24   : > { %666 = vst [vmem:[#allocation2 + $0x8c] sm:$0x1] %v665_v21  ;;  %v713_v30 = vsel %vm10897_vm2, 0, %v712_v29  ;;  %v716_v31 = vld [vmem:[#allocation2 + $0xf4] sm:$0x1]  ;;  %s10957_s17 = scalar_lea.vmem %s12181_s0, %s10213_s12  ;;  %vm820_vm3 = vcmask 1043456  }
  0x25   : > { %702 = vst [vmem:[#allocation2 + $0xd4] sm:$0x1] %v701_v24  ;;  %v717_v33 = vsel %vm10897_vm2, 0, %v716_v31  ;;  %v720_v34 = vld [vmem:[#allocation2 + $0xfc] sm:$0x1]  ;;  %v10230_v47 = vld [vmem:[#allocation4] sm:$0xff] }
  0x26   : > { %706 = vst [vmem:[#allocation2 + $0xdc] sm:$0x1] %v705_v26  ;;  %v721_v35 = vsel %vm10897_vm2, 0, %v720_v34  ;;  %v724_v36 = vld [vmem:[#allocation2 + $0x104] sm:$0x1]  ;;  %v10215_v49 = vld [vmem:[%s10957_s17 + $0x8] sm:$0xff] }
  0x27   : > { %710 = vst [vmem:[#allocation2 + $0xe4] sm:$0x1] %v709_v28  ;;  %v725_v37 = vsel %vm10897_vm2, 0, %v724_v36  ;;  %v728_v38 = vld [vmem:[#allocation2 + $0x10c] sm:$0x1]  ;;  %442 = vmatpush.bf16.msra.mxu0 %v10234_v32  ;;  %v10214_v48 = vld [vmem:[%s10957_s17] sm:$0xff] }
  0x28   : > { %714 = vst [vmem:[#allocation2 + $0xec] sm:$0x1] %v713_v30  ;;  %v729_v39 = vsel %vm10897_vm2, 0, %v728_v38  ;;  %v732_v40 = vld [vmem:[#allocation2 + $0x114] sm:$0x1]  ;;  %v10217_v51 = vld [vmem:[%s10957_s17 + $0x18] sm:$0xff] }
  0x29   : > { %718 = vst [vmem:[#allocation2 + $0xf4] sm:$0x1] %v717_v33  ;;  %v733_v42 = vsel %vm10897_vm2, 0, %v732_v40  ;;  %v736_v43 = vld [vmem:[#allocation2 + $0x11c] sm:$0x1]  ;;  %v10216_v50 = vld [vmem:[%s10957_s17 + $0x10] sm:$0xff] }
  0x2a   : > { %722 = vst [vmem:[#allocation2 + $0xfc] sm:$0x1] %v721_v35  ;;  %v737_v44 = vsel %vm10897_vm2, 0, %v736_v43  ;;  %v10218_v52 = vld [vmem:[%s10957_s17 + $0x20] sm:$0xff]  ;;  %v10219_v53 = vld [vmem:[%s10957_s17 + $0x28] sm:$0xff]  ;;  %v10220_v54 = vld [vmem:[%s10957_s17 + $0x30] sm:$0xff] }
  0x2b   : > { %726 = vst [vmem:[#allocation2 + $0x104] sm:$0x1] %v725_v37  ;;  %443 = vmatpush.bf16.msra.mxu0 %v10233_v41  ;;  %v10221_v55 = vld [vmem:[%s10957_s17 + $0x38] sm:$0xff]  ;;  %v11010_v56 = vld [vmem:[#allocation8] ss:$0 sm:$0xff]  ;;  %v10222_v57 = vld [vmem:[%s10957_s17 + $0x40] sm:$0xff] }
  0x2c   : > { %730 = vst [vmem:[#allocation2 + $0x10c] sm:$0x1] %v729_v39  ;;  %v10223_v3 = vld [vmem:[%s10957_s17 + $0x48] sm:$0xff]  ;;  %v10224_v12 = vld [vmem:[%s10957_s17 + $0x50] sm:$0xff]  ;;  %v672_v22 = vld [vmem:[#allocation2 + $0x9c] sm:$0x1] }
  0x2d   : > { %734 = vst [vmem:[#allocation2 + $0x114] sm:$0x1] %v733_v42  ;;  %v668_v16 = vld [vmem:[#allocation2 + $0x94] sm:$0x1]  ;;  %v673_v24 = vsel %vm10897_vm2, 0, %v672_v22  ;;  %v10225_v25 = vld [vmem:[%s10957_s17 + $0x58] sm:$0xff] }
  0x2e   : > { %738 = vst [vmem:[#allocation2 + $0x11c] sm:$0x1] %v737_v44  ;;  %v669_v17 = vsel %vm10897_vm2, 0, %v668_v16  ;;  %v676_v29 = vld [vmem:[#allocation2 + $0xa4] sm:$0x1]  ;;  %v10259_v22 = vld [vmem:[#allocation6 + $0x68] sm:$0xff] }
  0x2f   : > { %611 = vst [vmem:[#allocation2 + $0x20] sm:$0xf] %v10820_v0  ;;  %444 = vmatpush.bf16.msra.mxu0 %v10232_v45  ;;  %v677_v31 = vsel %vm10897_vm2, 0, %v676_v29  ;;  %v680_v35 = vld [vmem:[#allocation2 + $0xac] sm:$0x1]  ;;  %v10226_v38 = vld [vmem:[%s10957_s17 + $0x60] sm:$0xff] }
  0x30   : > { %615 = vst [vmem:[#allocation2 + $0x28] sm:$0xf] %v10820_v0  ;;  %v681_v37 = vsel %vm10897_vm2, 0, %v680_v35  ;;  %v684_v42 = vld [vmem:[#allocation2 + $0xb4] sm:$0x1]  ;;  %v10260_v16 = vld [vmem:[#allocation6 + $0x70] sm:$0xff] }
  0x31   : > { %619 = vst [vmem:[#allocation2 + $0x30] sm:$0xf] %v10820_v0  ;;  %v685_v44 = vsel %vm10897_vm2, 0, %v684_v42  ;;  %vm821_vm4 = vsmask.f32 7938  ;;  %v10228_v35 = vld [vmem:[%s10957_s17 + $0x70] sm:$0xff] }
  0x32   : > { %623 = vst [vmem:[#allocation2 + $0x38] sm:$0xf] %v10820_v0  ;;  %vm11037_vm5 = vmand %vm820_vm3, %vm821_vm4  ;;  %vm1286_vm6 = vsmask.f32 3328  ;;  %vm1287_vm7 = vsmask.f32 7440 }
  0x33   : > { %627 = vst [vmem:[#allocation2 + $0x40] sm:$0xf] %v10820_v0  ;;  %445 = vmatpush.bf16.msra.mxu0 %v10231_v46  ;;  %vm11126_vm8 = vmor %vm1286_vm6, %vm1287_vm7  ;;  %vm3501_vm9 = vcmask 1042432   ;;  %vm3502_vm10 = vcmask 1046532   ;;  %vm8348_vm12 = vcmask 1045504  }
  0x34   : > { %631 = vst [vmem:[#allocation2 + $0x48] sm:$0xf] %v10820_v0  ;;  %vm11367_vm11 = vmor %vm3501_vm9, %vm3502_vm10 }
  0x35   : > { %635 = vst [vmem:[#allocation2 + $0x50] sm:$0xf] %v10820_v0 }
  0x36   : > { %639 = vst [vmem:[#allocation2 + $0x58] sm:$0xf] %v10820_v0 }
  0x37   : > { %643 = vst [vmem:[#allocation2 + $0x60] sm:$0xf] %v10820_v0  ;;  %446 = vmatpush.bf16.msra.mxu0 %v10230_v47 }
  0x38   : > { %647 = vst [vmem:[#allocation2 + $0x68] sm:$0xf] %v10820_v0 }
  0x39   : > { %651 = vst [vmem:[#allocation2 + $0x70] sm:$0xf] %v10820_v0 }
  0x3a   : > { %655 = vst [vmem:[#allocation2 + $0x78] sm:$0xf] %v10820_v0  ;;  %447 = vmatmul.bf16.vlgmr.msra.gmra.mxu0 %v10214_v48 }
  0x3b   : > { %659 = vst [vmem:[#allocation2 + $0x80] sm:$0xf] %v10820_v0 }
  0x3c   : > { %663 = vst [vmem:[#allocation2 + $0x88] sm:$0xf] %v10820_v0 }
  0x3d   : > { %667 = vst [vmem:[#allocation2 + $0x90] sm:$0xf] %v10820_v0 }
  0x3e   : > { %671 = vst [vmem:[#allocation2 + $0x98] sm:$0xf] %v10820_v0 }
  0x3f   : > { %675 = vst [vmem:[#allocation2 + $0xa0] sm:$0xf] %v10820_v0 }
  0x40   : > { %679 = vst [vmem:[#allocation2 + $0xa8] sm:$0xf] %v10820_v0 }
  0x41   : > { %683 = vst [vmem:[#allocation2 + $0xb0] sm:$0xf] %v10820_v0 }
  0x42   : > { %687 = vst [vmem:[#allocation2 + $0xb8] sm:$0xf] %v10820_v0 }
  0x43   : > { %691 = vst [vmem:[#allocation2 + $0xc0] sm:$0xf] %v10820_v0 }
  0x44   : > { %695 = vst [vmem:[#allocation2 + $0xc8] sm:$0xf] %v10820_v0 }
  0x45   : > { %703 = vst [vmem:[#allocation2 + $0xd8] sm:$0xf] %v10820_v0 }
  0x46   : > { %707 = vst [vmem:[#allocation2 + $0xe0] sm:$0xf] %v10820_v0 }
  0x47   : > { %711 = vst [vmem:[#allocation2 + $0xe8] sm:$0xf] %v10820_v0 }
  0x48   : > { %715 = vst [vmem:[#allocation2 + $0xf0] sm:$0xf] %v10820_v0 }
  0x49   : > { %719 = vst [vmem:[#allocation2 + $0xf8] sm:$0xf] %v10820_v0 }
  0x4a   : > { %723 = vst [vmem:[#allocation2 + $0x100] sm:$0xf] %v10820_v0  ;;  %452 = vmatmul.bf16.gmra.mxu0 %v10215_v49 }
  0x4b   : > { %727 = vst [vmem:[#allocation2 + $0x108] sm:$0xf] %v10820_v0 }
  0x4c   : > { %731 = vst [vmem:[#allocation2 + $0x110] sm:$0xf] %v10820_v0 }
  0x4d   : > { %2817 = vst [vmem:[#allocation3] sm:$0xf] %v10820_v0 }
  0x4e   : > { %2818 = vst [vmem:[#allocation3 + $0x4] sm:$0x1] %v10820_v0 }
  0x4f   : > { %2819 = vst [vmem:[#allocation3 + $0x8] sm:$0xf] %v10820_v0 }
  0x50   : > { %2820 = vst [vmem:[#allocation3 + $0xc] sm:$0x1] %v10820_v0 }
  0x51   : > { %2821 = vst [vmem:[#allocation3 + $0x10] sm:$0xf] %v10820_v0 }
  0x52   : > { %2822 = vst [vmem:[#allocation3 + $0x14] sm:$0x1] %v10820_v0 }
  0x53   : > { %2823 = vst [vmem:[#allocation3 + $0x18] sm:$0xf] %v10820_v0 }
  0x54   : > { %2824 = vst [vmem:[#allocation3 + $0x1c] sm:$0x1] %v10820_v0 }
  0x55   : > { %2825 = vst [vmem:[#allocation3 + $0x20] sm:$0xf] %v10820_v0 }
  0x56   : > { %2826 = vst [vmem:[#allocation3 + $0x24] sm:$0x1] %v10820_v0 }
  0x57   : > { %2827 = vst [vmem:[#allocation3 + $0x28] sm:$0xf] %v10820_v0 }
  0x58   : > { %2828 = vst [vmem:[#allocation3 + $0x2c] sm:$0x1] %v10820_v0 }
  0x59   : > { %2829 = vst [vmem:[#allocation3 + $0x30] sm:$0xf] %v10820_v0 }
  0x5a   : > { %2830 = vst [vmem:[#allocation3 + $0x34] sm:$0x1] %v10820_v0  ;;  %457 = vmatmul.bf16.gmra.mxu0 %v10216_v50 }
  0x5b   : > { %2831 = vst [vmem:[#allocation3 + $0x38] sm:$0xf] %v10820_v0 }
  0x5c   : > { %2832 = vst [vmem:[#allocation3 + $0x3c] sm:$0x1] %v10820_v0 }
  0x5d   : > { %2833 = vst [vmem:[#allocation3 + $0x40] sm:$0xf] %v10820_v0 }
  0x5e   : > { %2834 = vst [vmem:[#allocation3 + $0x44] sm:$0x1] %v10820_v0 }
  0x5f   : > { %2835 = vst [vmem:[#allocation3 + $0x48] sm:$0xf] %v10820_v0 }
  0x60   : > { %2836 = vst [vmem:[#allocation3 + $0x4c] sm:$0x1] %v10820_v0 }
  0x61   : > { %670 = vst [vmem:[#allocation2 + $0x94] sm:$0x1] %v669_v17 }
  0x62   : > { %674 = vst [vmem:[#allocation2 + $0x9c] sm:$0x1] %v673_v24 }
  0x63   : > { %678 = vst [vmem:[#allocation2 + $0xa4] sm:$0x1] %v677_v31 }
  0x64   : > { %682 = vst [vmem:[#allocation2 + $0xac] sm:$0x1] %v681_v37 }
  0x65   : > { %686 = vst [vmem:[#allocation2 + $0xb4] sm:$0x1] %v685_v44 }
  0x6a   : > { %462 = vmatmul.bf16.gmra.mxu0 %v10217_v51  ;;  %v961_v51 = vld [vmem:[#allocation2 + $0x90] sm:$0xf]  ;;  %v976_v24 = vld [vmem:[#allocation2 + $0xa4] sm:$0x1] }
  0x6b   : > { %v982_v42 = vld [vmem:[#allocation2 + $0xac] sm:$0x1] }
  0x7a   : > { %467 = vmatmul.bf16.gmra.mxu0 %v10218_v52  ;;  %v964_v52 = vld [vmem:[#allocation2 + $0x94] sm:$0x1] }
  0x8a   : > { %472 = vmatmul.bf16.gmra.mxu0 %v10219_v53 }
  0x9a   : > { %477 = vmatmul.bf16.gmra.mxu0 %v10220_v54 }
  0xaa   : > { %482 = vmatmul.bf16.gmra.mxu0 %v10221_v55 }
  0xb7   : > { %v448_v58 = vpop.f32.mrf.mxu0 }
  0xb8   : > { %v449_v59 = vadd.f32 %v11010_v56, %v448_v58 }
  0xba   : > { %v528_v60 = vmax.f32 %v449_v59, 0.0  ;;  %487 = vmatmul.bf16.gmra.mxu0 %v10222_v57  ;;  %v688_v57 = vld [vmem:[#allocation2 + $0xbc] sm:$0x1] }
  0xbc   : > { %v560_v61 = vpack.c.bf16 %v528_v60, %v528_v60 }
  0xbe   : > { %1010 = vst [vmem:[#allocation2 + $0xd8] sm:$0xf] %v560_v61  ;;  %v689_v61 = vsel %vm10897_vm2, 0, %v688_v57  ;;  %v10255_v57 = vld [vmem:[#allocation6 + $0x48] sm:$0xff] }
  0xbf   : > { %v450_v62 = vpop.f32.mrf.mxu0  ;;  %690 = vst [vmem:[#allocation2 + $0xbc] sm:$0x1] %v689_v61 }
  0xc0   : > { %v451_v63 = vadd.f32 %v11010_v56, %v450_v62 }
  0xc2   : > { %v529_v0 = vmax.f32 %v451_v63, 0.0  ;;  %v10227_v63 = vld [vmem:[%s10957_s17 + $0x68] sm:$0xff] }
  0xc4   : > { %v561_v2 = vpack.c.bf16 %v529_v0, %v529_v0 }
  0xc6   : > { %1011 = vst [vmem:[#allocation2 + $0xe0] sm:$0xf] %v561_v2 }
  0xc7   : > { %v453_v4 = vpop.f32.mrf.mxu0 }
  0xc8   : > { %v454_v5 = vadd.f32 %v11010_v56, %v453_v4 }
  0xca   : > { %v530_v6 = vmax.f32 %v454_v5, 0.0  ;;  %492 = vmatmul.bf16.gmra.mxu0 %v10223_v3  ;;  %v10261_v5 = vld [vmem:[#allocation6 + $0x78] sm:$0xff] }
  0xcb   : > { %1140 = vmatpush.bf16.msra.mxu1 %v10261_v5  ;;  %10635 = vmatpush.bf16.msra.mxu3 %v10261_v5  ;;  %v10229_v5 = vld [vmem:[%s10957_s17 + $0x78] sm:$0xff] }
  0xcc   : > { %v562_v7 = vpack.c.bf16 %v530_v6, %v530_v6  ;;  %v967_v6 = vld [vmem:[#allocation2 + $0x98] sm:$0xf] }
  0xce   : > { %1012 = vst [vmem:[#allocation2 + $0xe8] sm:$0xf] %v562_v7  ;;  %v970_v7 = vld [vmem:[#allocation2 + $0x9c] sm:$0x1] }
  0xcf   : > { %v455_v8 = vpop.f32.mrf.mxu0  ;;  %1141 = vmatpush.bf16.msra.mxu1 %v10260_v16  ;;  %10636 = vmatpush.bf16.msra.mxu3 %v10260_v16 }
  0xd0   : > { %v456_v9 = vadd.f32 %v11010_v56, %v455_v8 }
  0xd2   : > { %v531_v10 = vmax.f32 %v456_v9, 0.0 }
  0xd3   : > { %1142 = vmatpush.bf16.msra.mxu1 %v10259_v22  ;;  %10637 = vmatpush.bf16.msra.mxu3 %v10259_v22 }
  0xd4   : > { %v563_v11 = vpack.c.bf16 %v531_v10, %v531_v10 }
  0xd6   : > { %1013 = vst [vmem:[#allocation2 + $0xf0] sm:$0xf] %v563_v11  ;;  %v692_v11 = vld [vmem:[#allocation2 + $0xc4] sm:$0x1] }
  0xd7   : > { %v458_v13 = vpop.f32.mrf.mxu0 }
  0xd8   : > { %v459_v14 = vadd.f32 %v11010_v56, %v458_v13 }
  0xda   : > { %v532_v15 = vmax.f32 %v459_v14, 0.0  ;;  %497 = vmatmul.bf16.gmra.mxu0 %v10224_v12 }
  0xdc   : > { %v564_v18 = vpack.c.bf16 %v532_v15, %v532_v15  ;;  %v693_v15 = vsel %vm10897_vm2, 0, %v692_v11  ;;  %v991_v11 = vld [vmem:[#allocation2 + $0xb8] sm:$0xf] }
  0xdd   : > { %694 = vst [vmem:[#allocation2 + $0xc4] sm:$0x1] %v693_v15 }
  0xde   : > { %1014 = vst [vmem:[#allocation2 + $0xf8] sm:$0xf] %v564_v18 }
  0xdf   : > { %v460_v19 = vpop.f32.mrf.mxu0 }
  0xe0   : > { %v461_v20 = vadd.f32 %v11010_v56, %v460_v19 }
  0xe2   : > { %v533_v21 = vmax.f32 %v461_v20, 0.0 }
  0xe4   : > { %v565_v23 = vpack.c.bf16 %v533_v21, %v533_v21 }
  0xe6   : > { %1015 = vst [vmem:[#allocation2 + $0x100] sm:$0xf] %v565_v23  ;;  %v973_v23 = vld [vmem:[#allocation2 + $0xa0] sm:$0xf] }
  0xe7   : > { %v463_v26 = vpop.f32.mrf.mxu0 }
  0xe8   : > { %v464_v27 = vadd.f32 %v11010_v56, %v463_v26 }
  0xea   : > { %v534_v28 = vmax.f32 %v464_v27, 0.0  ;;  %502 = vmatmul.bf16.gmra.mxu0 %v10225_v25 }
  0xec   : > { %v566_v30 = vpack.c.bf16 %v534_v28, %v534_v28  ;;  %v696_v28 = vld [vmem:[#allocation2 + $0xcc] sm:$0x1] }
  0xee   : > { %1016 = vst [vmem:[#allocation2 + $0x108] sm:$0xf] %v566_v30 }
  0xef   : > { %v465_v32 = vpop.f32.mrf.mxu0 }
  0xf0   : > { %v466_v33 = vadd.f32 %v11010_v56, %v465_v32  ;;  %v697_v32 = vsel %vm10897_vm2, 0, %v696_v28 }
  0xf1   : > { %698 = vst [vmem:[#allocation2 + $0xcc] sm:$0x1] %v697_v32 }
  0xf2   : > { %v535_v34 = vmax.f32 %v466_v33, 0.0  ;;  %v10258_v33 = vld [vmem:[#allocation6 + $0x60] sm:$0xff] }
  0xf3   : > { %1143 = vmatpush.bf16.msra.mxu1 %v10258_v33  ;;  %10638 = vmatpush.bf16.msra.mxu3 %v10258_v33 }
  0xf4   : > { %v567_v36 = vpack.c.bf16 %v535_v34, %v535_v34 }
  0xf6   : > { %1017 = vst [vmem:[#allocation2 + $0x110] sm:$0xf] %v567_v36 }
  0xf7   : > { %v468_v39 = vpop.f32.mrf.mxu0 }
  0xf8   : > { %v469_v40 = vadd.f32 %v11010_v56, %v468_v39 }
  0xfa   : > { %v536_v41 = vmax.f32 %v469_v40, 0.0  ;;  %507 = vmatmul.bf16.gmra.mxu0 %v10226_v38  ;;  %v10257_v40 = vld [vmem:[#allocation6 + $0x58] sm:$0xff] }
  0xfb   : > { %1144 = vmatpush.bf16.msra.mxu1 %v10257_v40  ;;  %10639 = vmatpush.bf16.msra.mxu3 %v10257_v40  ;;  %v10277_v40 = vld [vmem:[#allocation6 + $0xd8] sm:$0xff] }
  0xfc   : > { %v568_v43 = vpack.c.bf16 %v536_v41, %v536_v41  ;;  %v979_v41 = vld [vmem:[#allocation2 + $0xa8] sm:$0xf] }
  0xfe   : > { %v881_v45 = vshrl.u32 %v568_v43, 16  ;;  %v884_v48 = vshll.u32 %v568_v43, 16 }
  0xff   : > { %v470_v46 = vpop.f32.mrf.mxu0 }
 0x100   : > { %v883_v47 = vrot.slane %v881_v45, 7  ;;  %v471_v49 = vadd.f32 %v11010_v56, %v470_v46 }
 0x102   : > { %v886_v53 = vor.u32 %v884_v48, %v883_v47  ;;  %v887_v54 = vrot.slane %v883_v47, 4  ;;  %v537_v55 = vmax.f32 %v471_v49, 0.0  ;;  %v10256_v49 = vld [vmem:[#allocation6 + $0x50] sm:$0xff] }
 0x103   : > { %1145 = vmatpush.bf16.msra.mxu1 %v10256_v49  ;;  %10640 = vmatpush.bf16.msra.mxu3 %v10256_v49  ;;  %v10276_v49 = vld [vmem:[#allocation6 + $0xd0] sm:$0xff] }
 0x104   : > { %v962_v58 = vsel %vm11037_vm5, %v886_v53, %v961_v51  ;;  %v965_v59 = vsel %vm10897_vm2, %v887_v54, %v964_v52  ;;  %v569_v60 = vpack.c.bf16 %v537_v55, %v537_v55 }
 0x105   : > { %963 = vst [vmem:[#allocation2 + $0x90] sm:$0xf] %v962_v58  ;;  %v985_v58 = vld [vmem:[#allocation2 + $0xb0] sm:$0xf] }
 0x106   : > { %966 = vst [vmem:[#allocation2 + $0x94] sm:$0x1] %v965_v59  ;;  %v889_v62 = vshrl.u32 %v569_v60, 16  ;;  %v892_v3 = vshll.u32 %v569_v60, 16  ;;  %v988_v59 = vld [vmem:[#allocation2 + $0xb4] sm:$0x1] }
 0x107   : > { %v473_v0 = vpop.f32.mrf.mxu0  ;;  %1146 = vmatpush.bf16.msra.mxu1 %v10255_v57  ;;  %10641 = vmatpush.bf16.msra.mxu3 %v10255_v57  ;;  %v8559_v57 = vld [vmem:[#allocation2 + $0x48] sm:$0xf] }
 0x108   : > { %v891_v2 = vrot.slane %v889_v62, 7  ;;  %v474_v4 = vadd.f32 %v11010_v56, %v473_v0 }
 0x10a   : > { %v894_v8 = vor.u32 %v892_v3, %v891_v2  ;;  %v895_v9 = vrot.slane %v891_v2, 4  ;;  %v538_v10 = vmax.f32 %v474_v4, 0.0  ;;  %512 = vmatmul.bf16.gmra.mxu0 %v10227_v63  ;;  %v10254_v3 = vld [vmem:[#allocation6 + $0x40] sm:$0xff] }
 0x10b   : > { %1147 = vmatpush.bf16.msra.mxu1 %v10254_v3  ;;  %10642 = vmatpush.bf16.msra.mxu3 %v10254_v3  ;;  %v10249_v3 = vld [vmem:[#allocation6 + $0x38] sm:$0xff] }
 0x10c   : > { %v968_v12 = vsel %vm11037_vm5, %v894_v8, %v967_v6  ;;  %v971_v13 = vsel %vm10897_vm2, %v895_v9, %v970_v7  ;;  %v570_v14 = vpack.c.bf16 %v538_v10, %v538_v10  ;;  %v10281_v10 = vld [vmem:[#allocation6 + $0xf8] sm:$0xff]  ;;  %1241 = vmatpush.bf16.msra.mxu2 %v10249_v3 }
 0x10d   : > { %969 = vst [vmem:[#allocation2 + $0x98] sm:$0xf] %v968_v12  ;;  %v994_v12 = vld [vmem:[#allocation2 + $0xbc] sm:$0x1] }
 0x10e   : > { %972 = vst [vmem:[#allocation2 + $0x9c] sm:$0x1] %v971_v13  ;;  %v897_v17 = vshrl.u32 %v570_v14, 16  ;;  %v900_v20 = vshll.u32 %v570_v14, 16 }
 0x10f   : > { %v475_v18 = vpop.f32.mrf.mxu0  ;;  %1616 = vmatpush.bf16.msrb.mxu1 %v10281_v10 }
 0x110   : > { %v899_v19 = vrot.slane %v897_v17, 7  ;;  %v476_v21 = vadd.f32 %v11010_v56, %v475_v18 }
 0x112   : > { %v902_v25 = vor.u32 %v900_v20, %v899_v19  ;;  %v903_v26 = vrot.slane %v899_v19, 4  ;;  %v539_v27 = vmax.f32 %v476_v21, 0.0  ;;  %v10280_v19 = vld [vmem:[#allocation6 + $0xf0] sm:$0xff] }
 0x113   : > { %1617 = vmatpush.bf16.msrb.mxu1 %v10280_v19 }
 0x114   : > { %v974_v29 = vsel %vm11037_vm5, %v902_v25, %v973_v23  ;;  %v977_v30 = vsel %vm10897_vm2, %v903_v26, %v976_v24  ;;  %v571_v31 = vpack.c.bf16 %v539_v27, %v539_v27  ;;  %v10279_v25 = vld [vmem:[#allocation6 + $0xe8] sm:$0xff]  ;;  %v997_v26 = vld [vmem:[#allocation2 + $0xc0] sm:$0xf]  ;;  %v1000_v27 = vld [vmem:[#allocation2 + $0xc4] sm:$0x1] }
 0x115   : > { %975 = vst [vmem:[#allocation2 + $0xa0] sm:$0xf] %v974_v29 }
 0x116   : > { %978 = vst [vmem:[#allocation2 + $0xa4] sm:$0x1] %v977_v30  ;;  %v905_v34 = vshrl.u32 %v571_v31, 16  ;;  %v908_v38 = vshll.u32 %v571_v31, 16 }
 0x117   : > { %v478_v36 = vpop.f32.mrf.mxu0  ;;  %1618 = vmatpush.bf16.msrb.mxu1 %v10279_v25  ;;  %v10267_v25 = vld [vmem:[#allocation6 + $0xa8] sm:$0xff] }
 0x118   : > { %v907_v37 = vrot.slane %v905_v34, 7  ;;  %v479_v39 = vadd.f32 %v11010_v56, %v478_v36  ;;  %v10278_v34 = vld [vmem:[#allocation6 + $0xe0] sm:$0xff] }
 0x11a   : > { %v910_v43 = vor.u32 %v908_v38, %v907_v37  ;;  %v911_v44 = vrot.slane %v907_v37, 4  ;;  %v540_v45 = vmax.f32 %v479_v39, 0.0  ;;  %517 = vmatmul.bf16.gmra.mxu0 %v10228_v35 }
 0x11b   : > { %1619 = vmatpush.bf16.msrb.mxu1 %v10278_v34  ;;  %v8687_v34 = vld [vmem:[#allocation2 + $0x90] sm:$0xf] }
 0x11c   : > { %v980_v46 = vsel %vm11037_vm5, %v910_v43, %v979_v41  ;;  %v983_v47 = vsel %vm10897_vm2, %v911_v44, %v982_v42  ;;  %v572_v48 = vpack.c.bf16 %v540_v45, %v540_v45  ;;  %v1003_v41 = vld [vmem:[#allocation2 + $0xc8] sm:$0xf]  ;;  %v1006_v42 = vld [vmem:[#allocation2 + $0xcc] sm:$0x1]  ;;  %v8691_v3 = vld [vmem:[#allocation2 + $0xa0] sm:$0xf] }
 0x11d   : > { %981 = vst [vmem:[#allocation2 + $0xa8] sm:$0xf] %v980_v46 }
 0x11e   : > { %984 = vst [vmem:[#allocation2 + $0xac] sm:$0x1] %v983_v47  ;;  %v913_v51 = vshrl.u32 %v572_v48, 16  ;;  %v916_v54 = vshll.u32 %v572_v48, 16 }
 0x11f   : > { %v480_v52 = vpop.f32.mrf.mxu0  ;;  %1620 = vmatpush.bf16.msrb.mxu1 %v10277_v40  ;;  %v10313_v40 = vld [vmem:[#allocation6 + $0x1b8] sm:$0xff] }
 0x120   : > { %v915_v53 = vrot.slane %v913_v51, 7  ;;  %v481_v55 = vadd.f32 %v11010_v56, %v480_v52 }
 0x122   : > { %v918_v60 = vor.u32 %v916_v54, %v915_v53  ;;  %v919_v61 = vrot.slane %v915_v53, 4  ;;  %v541_v62 = vmax.f32 %v481_v55, 0.0  ;;  %v10275_v53 = vld [vmem:[#allocation6 + $0xc8] sm:$0xff] }
 0x123   : > { %1621 = vmatpush.bf16.msrb.mxu1 %v10276_v49  ;;  %v10312_v49 = vld [vmem:[#allocation6 + $0x1b0] sm:$0xff] }
 0x124   : > { %v986_v63 = vsel %vm11037_vm5, %v918_v60, %v985_v58  ;;  %v989_v0 = vsel %vm10897_vm2, %v919_v61, %v988_v59  ;;  %v573_v2 = vpack.c.bf16 %v541_v62, %v541_v62  ;;  %v10274_v58 = vld [vmem:[#allocation6 + $0xc0] sm:$0xff] }
 0x125   : > { %987 = vst [vmem:[#allocation2 + $0xb0] sm:$0xf] %v986_v63 }
 0x126   : > { %990 = vst [vmem:[#allocation2 + $0xb4] sm:$0x1] %v989_v0  ;;  %v921_v4 = vshrl.u32 %v573_v2, 16  ;;  %v924_v8 = vshll.u32 %v573_v2, 16 }
 0x127   : > { %v483_v6 = vpop.f32.mrf.mxu0  ;;  %1622 = vmatpush.bf16.msrb.mxu1 %v10275_v53 }
 0x128   : > { %v923_v7 = vrot.slane %v921_v4, 7  ;;  %v484_v9 = vadd.f32 %v11010_v56, %v483_v6  ;;  %v10248_v6 = vld [vmem:[#allocation6 + $0x30] sm:$0xff] }
 0x129   : > { %1242 = vmatpush.bf16.msra.mxu2 %v10248_v6 }
 0x12a   : > { %v926_v13 = vor.u32 %v924_v8, %v923_v7  ;;  %v927_v14 = vrot.slane %v923_v7, 4  ;;  %v542_v15 = vmax.f32 %v484_v9, 0.0  ;;  %522 = vmatmul.bf16.gmra.mxu0 %v10229_v5 }
 0x12b   : > { %1623 = vmatpush.bf16.msrb.mxu1 %v10274_v58  ;;  %v612_v58 = vld [vmem:[#allocation2 + $0x24] sm:$0x1] }
 0x12c   : > { %v992_v16 = vsel %vm11037_vm5, %v926_v13, %v991_v11  ;;  %v995_v17 = vsel %vm10897_vm2, %v927_v14, %v994_v12  ;;  %v574_v18 = vpack.c.bf16 %v542_v15, %v542_v15  ;;  %v10247_v12 = vld [vmem:[#allocation6 + $0x28] sm:$0xff]  ;;  %v10269_v15 = vld [vmem:[#allocation6 + $0xb8] sm:$0xff] }
 0x12d   : > { %993 = vst [vmem:[#allocation2 + $0xb8] sm:$0xf] %v992_v16  ;;  %1243 = vmatpush.bf16.msra.mxu2 %v10247_v12  ;;  %v600_v16 = vld [vmem:[#allocation2 + $0xc] sm:$0x1]  ;;  %1482 = vmatpush.bf16.msrb.mxu3 %v10269_v15 }
 0x12e   : > { %996 = vst [vmem:[#allocation2 + $0xbc] sm:$0x1] %v995_v17  ;;  %v929_v20 = vshrl.u32 %v574_v18, 16  ;;  %v932_v23 = vshll.u32 %v574_v18, 16  ;;  %v10246_v17 = vld [vmem:[#allocation6 + $0x20] sm:$0xff]  ;;  %v601_v19 = vsel %vm10897_vm2, 0, %v600_v16 }
 0x12f   : > { %v485_v21 = vpop.f32.mrf.mxu0  ;;  %602 = vst [vmem:[#allocation2 + $0xc] sm:$0x1] %v601_v19 }
 0x130   : > { %v931_v22 = vrot.slane %v929_v20, 7  ;;  %v486_v24 = vadd.f32 %v11010_v56, %v485_v21  ;;  %v10268_v20 = vld [vmem:[#allocation6 + $0xb0] sm:$0xff] }
 0x131   : > { %1244 = vmatpush.bf16.msra.mxu2 %v10246_v17  ;;  %1483 = vmatpush.bf16.msrb.mxu3 %v10268_v20 }
 0x132   : > { %v934_v28 = vor.u32 %v932_v23, %v931_v22  ;;  %v935_v29 = vrot.slane %v931_v22, 4  ;;  %v543_v30 = vmax.f32 %v486_v24, 0.0  ;;  %v10245_v22 = vld [vmem:[#allocation6 + $0x18] sm:$0xff] }
 0x134   : > { %v998_v31 = vsel %vm11037_vm5, %v934_v28, %v997_v26  ;;  %v1001_v32 = vsel %vm10897_vm2, %v935_v29, %v1000_v27  ;;  %v575_v33 = vpack.c.bf16 %v543_v30, %v543_v30  ;;  %v604_v26 = vld [vmem:[#allocation2 + $0x14] sm:$0x1]  ;;  %v10244_v27 = vld [vmem:[#allocation6 + $0x10] sm:$0xff]  ;;  %v10270_v29 = vld [vmem:[#allocation2 + $0x94] sm:$0xf0] }
 0x135   : > { %999 = vst [vmem:[#allocation2 + $0xc0] sm:$0xf] %v998_v31  ;;  %1245 = vmatpush.bf16.msra.mxu2 %v10245_v22  ;;  %v605_v30 = vsel %vm10897_vm2, 0, %v604_v26  ;;  %1484 = vmatpush.bf16.msrb.mxu3 %v10267_v25  ;;  %v10307_v22 = vld [vmem:[#allocation6 + $0x188] sm:$0xff] }
 0x136   : > { %1002 = vst [vmem:[#allocation2 + $0xc4] sm:$0x1] %v1001_v32  ;;  %v937_v35 = vshrl.u32 %v575_v33, 16  ;;  %v940_v38 = vshll.u32 %v575_v33, 16 }
 0x137   : > { %v488_v36 = vpop.f32.mrf.mxu0  ;;  %606 = vst [vmem:[#allocation2 + $0x14] sm:$0x1] %v605_v30  ;;  %v620_v30 = vld [vmem:[#allocation2 + $0x34] sm:$0x1] }
 0x138   : > { %v939_v37 = vrot.slane %v937_v35, 7  ;;  %v489_v39 = vadd.f32 %v11010_v56, %v488_v36  ;;  %v10266_v35 = vld [vmem:[#allocation6 + $0xa0] sm:$0xff] }
 0x139   : > { %1246 = vmatpush.bf16.msra.mxu2 %v10244_v27  ;;  %1485 = vmatpush.bf16.msrb.mxu3 %v10266_v35 }
 0x13a   : > { %v942_v43 = vor.u32 %v940_v38, %v939_v37  ;;  %v943_v44 = vrot.slane %v939_v37, 4  ;;  %v544_v45 = vmax.f32 %v489_v39, 0.0  ;;  %v8688_v37 = vor.u32 %v10270_v29, %v8687_v34  ;;  %v10243_v38 = vld [vmem:[#allocation6 + $0x8] sm:$0xff] }
 0x13b   : > { %v10272_v34 = vld [vmem:[#allocation2 + $0xb4] sm:$0xf0] }
 0x13c   : > { %v1004_v46 = vsel %vm11037_vm5, %v942_v43, %v1003_v41  ;;  %v1007_v47 = vsel %vm10897_vm2, %v943_v44, %v1006_v42  ;;  %v576_v48 = vpack.c.bf16 %v544_v45, %v544_v45  ;;  %v596_v41 = vld [vmem:[#allocation2 + $0x4] sm:$0x1]  ;;  %v10265_v44 = vld [vmem:[#allocation6 + $0x98] sm:$0xff]  ;;  %v608_v45 = vld [vmem:[#allocation2 + $0x1c] sm:$0x1] }
 0x13d   : > { %1005 = vst [vmem:[#allocation2 + $0xc8] sm:$0xf] %v1004_v46  ;;  %v597_v42 = vsel %vm10897_vm2, 0, %v596_v41  ;;  %1247 = vmatpush.bf16.msra.mxu2 %v10243_v38  ;;  %v10242_v46 = vld [vmem:[#allocation6] sm:$0xff]  ;;  %1486 = vmatpush.bf16.msrb.mxu3 %v10265_v44  ;;  %v10301_v41 = vld [vmem:[#allocation6 + $0x178] sm:$0xff] }
 0x13e   : > { %1008 = vst [vmem:[#allocation2 + $0xcc] sm:$0x1] %v1007_v47  ;;  %v8695_v38 = vld [vmem:[#allocation2 + $0xb0] sm:$0xf] }
 0x13f   : > { %872 = vst [vmem:[#allocation2 + $0x50] sm:$0xf] %v576_v48  ;;  %v490_v51 = vpop.f32.mrf.mxu0  ;;  %v609_v48 = vsel %vm10897_vm2, 0, %v608_v45 }
 0x140   : > { %v491_v52 = vadd.f32 %v11010_v56, %v490_v51  ;;  %598 = vst [vmem:[#allocation2 + $0x4] sm:$0x1] %v597_v42  ;;  %v10264_v51 = vld [vmem:[#allocation6 + $0x90] sm:$0xff] }
 0x141   : > { %610 = vst [vmem:[#allocation2 + $0x1c] sm:$0x1] %v609_v48  ;;  %1248 = vmatpush.bf16.msra.mxu2 %v10242_v46  ;;  %1487 = vmatpush.bf16.msrb.mxu3 %v10264_v51  ;;  %v832_v51 = vld [vmem:[#allocation2 + $0x14] sm:$0x1] }
 0x142   : > { %v545_v54 = vmax.f32 %v491_v52, 0.0 }
 0x144   : > { %v577_v55 = vpack.c.bf16 %v545_v54, %v545_v54  ;;  %v10311_v54 = vld [vmem:[#allocation6 + $0x1a8] sm:$0xff] }
 0x146   : > { %873 = vst [vmem:[#allocation2 + $0x58] sm:$0xf] %v577_v55  ;;  %v10250_v59 = vld [vmem:[#allocation2 + $0x4c] sm:$0xf0] }
 0x147   : > { %v493_v60 = vpop.f32.mrf.mxu0  ;;  %v8560_v61 = vor.u32 %v10250_v59, %v8559_v57  ;;  %v10263_v57 = vld [vmem:[#allocation6 + $0x88] sm:$0xff]  ;;  %v1271_v35 = vld [vmem:[#allocation2 + $0x4] sm:$0x1] }
 0x148   : > { %v494_v62 = vadd.f32 %v11010_v56, %v493_v60  ;;  %v10271_v60 = vld [vmem:[#allocation2 + $0xa4] sm:$0xf0]  ;;  %1488 = vmatpush.bf16.msrb.mxu3 %v10263_v57  ;;  %v1299_v45 = vshll.u32 %v1271_v35, 16 }
 0x149   : > { %1148 = vmatmul.bf16.vlgmr.msra.gmra.mxu1 %v8560_v61  ;;  %v613_v61 = vsel %vm10897_vm2, 0, %v612_v58  ;;  %v8692_v6 = vor.u32 %v10271_v60, %v8691_v3 }
 0x14a   : > { %v546_v63 = vmax.f32 %v494_v62, 0.0  ;;  %2130 = vmatpush.bf16.msra.mxu1 %v10313_v40  ;;  %v10310_v62 = vld [vmem:[#allocation6 + $0x1a0] sm:$0xff]  ;;  %614 = vst [vmem:[#allocation2 + $0x24] sm:$0x1] %v613_v61  ;;  %v10293_v40 = vld [vmem:[#allocation6 + $0x138] sm:$0xff]  ;;  %v1301_v58 = vrot.slane %v1299_v45, 5 }
 0x14b   : > { %1750 = vmatpush.bf16.msrb.mxu2 %v10293_v40 }
 0x14c   : > { %v578_v0 = vpack.c.bf16 %v546_v63, %v546_v63 }
 0x14d   : > { %v8563_v8 = vld [vmem:[#allocation2 + $0x58] sm:$0xf] }
 0x14e   : > { %874 = vst [vmem:[#allocation2 + $0x60] sm:$0xf] %v578_v0  ;;  %2131 = vmatpush.bf16.msra.mxu1 %v10312_v49  ;;  %v829_v49 = vld [vmem:[#allocation2 + $0x10] sm:$0xf] }
 0x14f   : > { %v495_v2 = vpop.f32.mrf.mxu0 }
 0x150   : > { %v496_v4 = vadd.f32 %v11010_v56, %v495_v2 }
 0x152   : > { %v547_v5 = vmax.f32 %v496_v4, 0.0  ;;  %2132 = vmatpush.bf16.msra.mxu1 %v10311_v54  ;;  %v10262_v4 = vld [vmem:[#allocation6 + $0x80] sm:$0xff] }
 0x153   : > { %1489 = vmatpush.bf16.msrb.mxu3 %v10262_v4 }
 0x154   : > { %v579_v7 = vpack.c.bf16 %v547_v5, %v547_v5 }
 0x155   : > { %v10251_v9 = vld [vmem:[#allocation2 + $0x5c] sm:$0xf0] }
 0x156   : > { %875 = vst [vmem:[#allocation2 + $0x68] sm:$0xf] %v579_v7  ;;  %v8564_v10 = vor.u32 %v10251_v9, %v8563_v8  ;;  %2133 = vmatpush.bf16.msra.mxu1 %v10310_v62  ;;  %v10309_v8 = vld [vmem:[#allocation6 + $0x198] sm:$0xff] }
 0x157   : > { %v498_v11 = vpop.f32.mrf.mxu0 }
 0x158   : > { %v499_v13 = vadd.f32 %v11010_v56, %v498_v11 }
 0x159   : > { %1153 = vmatmul.bf16.gmra.mxu1 %v8564_v10  ;;  %v616_v10 = vld [vmem:[#allocation2 + $0x2c] sm:$0x1] }
 0x15a   : > { %v548_v14 = vmax.f32 %v499_v13, 0.0  ;;  %2134 = vmatpush.bf16.msra.mxu1 %v10309_v8  ;;  %v617_v12 = vsel %vm10897_vm2, 0, %v616_v10  ;;  %v1270_v13 = vld [vmem:[#allocation2] sm:$0xf] }
 0x15b   : > { %618 = vst [vmem:[#allocation2 + $0x2c] sm:$0x1] %v617_v12  ;;  %v1290_v17 = vshrl.u32 %v1270_v13, 16  ;;  %v10292_v8 = vld [vmem:[#allocation6 + $0x130] sm:$0xff] }
 0x15c   : > { %v580_v18 = vpack.c.bf16 %v548_v14, %v548_v14  ;;  %v10308_v14 = vld [vmem:[#allocation6 + $0x190] sm:$0xff]  ;;  %1751 = vmatpush.bf16.msrb.mxu2 %v10292_v8  ;;  %v10290_v8 = vld [vmem:[#allocation6 + $0x120] sm:$0xff] }
 0x15d   : > { %v8567_v31 = vld [vmem:[#allocation2 + $0x68] sm:$0xf] }
 0x15e   : > { %876 = vst [vmem:[#allocation2 + $0x70] sm:$0xf] %v580_v18  ;;  %2135 = vmatpush.bf16.msra.mxu1 %v10308_v14  ;;  %v1293_v18 = vshll.u32 %v1270_v13, 16  ;;  %v10300_v13 = vld [vmem:[#allocation6 + $0x170] sm:$0xff] }
 0x15f   : > { %v500_v21 = vpop.f32.mrf.mxu0 }
 0x160   : > { %v501_v23 = vadd.f32 %v11010_v56, %v500_v21  ;;  %v1295_v29 = vrot.slane %v1293_v18, 5  ;;  %v835_v18 = vld [vmem:[#allocation2 + $0x18] sm:$0xf] }
 0x162   : > { %v549_v24 = vmax.f32 %v501_v23, 0.0  ;;  %v823_v23 = vld [vmem:[#allocation2 + $0x8] sm:$0xf]  ;;  %2136 = vmatpush.bf16.msra.mxu1 %v10307_v22 }
 0x164   : > { %v581_v28 = vpack.c.bf16 %v549_v24, %v549_v24  ;;  %v826_v24 = vld [vmem:[#allocation2 + $0xc] sm:$0x1] }
 0x165   : > { %v10252_v32 = vld [vmem:[#allocation2 + $0x6c] sm:$0xf0] }
 0x166   : > { %877 = vst [vmem:[#allocation2 + $0x78] sm:$0xf] %v581_v28  ;;  %v8568_v33 = vor.u32 %v10252_v32, %v8567_v31  ;;  %v1292_v28 = vrot.slane %v1290_v17, 4 }
 0x167   : > { %v503_v36 = vpop.f32.mrf.mxu0 }
 0x168   : > { %v504_v39 = vadd.f32 %v11010_v56, %v503_v36  ;;  %1158 = vmatmul.bf16.vlgmr.msra.gmra.mxu3 %v8568_v33  ;;  %v621_v36 = vsel %vm10897_vm2, 0, %v620_v30  ;;  %v1296_v44 = vor.u32 %v1295_v29, %v1292_v28  ;;  %v10273_v30 = vld [vmem:[#allocation2 + $0xc4] sm:$0xf0] }
 0x169   : > { %1624 = vmatmul.bf16.vlgmr.msrb.gmra.mxu1 %v8688_v37  ;;  %v10306_v37 = vld [vmem:[#allocation6 + $0x180] sm:$0xff]  ;;  %622 = vst [vmem:[#allocation2 + $0x34] sm:$0x1] %v621_v36  ;;  %1996 = vmatpush.bf16.msra.mxu3 %v10301_v41 }
 0x16a   : > { %v550_v43 = vmax.f32 %v504_v39, 0.0  ;;  %2137 = vmatpush.bf16.msra.mxu1 %v10306_v37  ;;  %v1297_v57 = vrot.slane %v1296_v44, 4  ;;  %v8699_v37 = vld [vmem:[#allocation2 + $0xc0] sm:$0xf]  ;;  %v10299_v44 = vld [vmem:[#allocation6 + $0x168] sm:$0xff] }
 0x16b   : > { %v8700_v41 = vor.u32 %v10273_v30, %v8699_v37  ;;  %v10288_v37 = vld [vmem:[#allocation6 + $0x110] sm:$0xff] }
 0x16c   : > { %v582_v47 = vpack.c.bf16 %v550_v43, %v550_v43  ;;  %v8696_v43 = vor.u32 %v10272_v34, %v8695_v38 }
 0x16d   : > { %v8571_v63 = vld [vmem:[#allocation2 + $0x78] sm:$0xf]  ;;  %1997 = vmatpush.bf16.msra.mxu3 %v10300_v13 }
 0x16e   : > { %878 = vst [vmem:[#allocation2 + $0x80] sm:$0xf] %v582_v47 }
 0x16f   : > { %v505_v52 = vpop.f32.mrf.mxu0 }
 0x170   : > { %v506_v53 = vadd.f32 %v11010_v56, %v505_v52 }
 0x171   : > { %1998 = vmatpush.bf16.msra.mxu3 %v10299_v44 }
 0x172   : > { %v551_v55 = vmax.f32 %v506_v53, 0.0 }
 0x174   : > { %v583_v59 = vpack.c.bf16 %v551_v55, %v551_v55  ;;  %v8607_v55 = vld [vmem:[#allocation2] sm:$0xf] }
 0x175   : > { %v10253_v0 = vld [vmem:[#allocation2 + $0x7c] sm:$0xf0] }
 0x176   : > { %879 = vst [vmem:[#allocation2 + $0x88] sm:$0xf] %v583_v59  ;;  %v8572_v2 = vor.u32 %v10253_v0, %v8571_v63  ;;  %v624_v59 = vld [vmem:[#allocation2 + $0x3c] sm:$0x1] }
 0x177   : > { %v508_v5 = vpop.f32.mrf.mxu0 }
 0x178   : > { %v509_v7 = vadd.f32 %v11010_v56, %v508_v5  ;;  %1163 = vmatmul.bf16.gmra.mxu3 %v8572_v2  ;;  %v625_v2 = vsel %vm10897_vm2, 0, %v624_v59 }
 0x179   : > { %1629 = vmatmul.bf16.gmra.mxu1 %v8692_v6  ;;  %626 = vst [vmem:[#allocation2 + $0x3c] sm:$0x1] %v625_v2 }
 0x17a   : > { %v552_v9 = vmax.f32 %v509_v7, 0.0 }
 0x17c   : > { %v584_v11 = vpack.c.bf16 %v552_v9, %v552_v9 }
 0x17e   : > { %v740_v15 = vshrl.u32 %v584_v11, 16  ;;  %v743_v20 = vshll.u32 %v584_v11, 16 }
 0x17f   : > { %v510_v16 = vpop.f32.mrf.mxu0 }
 0x180   : > { %v742_v19 = vrot.slane %v740_v15, 7  ;;  %v511_v21 = vadd.f32 %v11010_v56, %v510_v16 }
 0x182   : > { %v745_v25 = vor.u32 %v743_v20, %v742_v19  ;;  %v746_v26 = vrot.slane %v742_v19, 4  ;;  %v553_v27 = vmax.f32 %v511_v21, 0.0  ;;  %v838_v19 = vld [vmem:[#allocation2 + $0x1c] sm:$0x1]  ;;  %v1302_v20 = vsel %vm11126_vm8, %v1297_v57, %v1301_v58 }
 0x184   : > { %v824_v31 = vsel %vm11037_vm5, %v745_v25, %v823_v23  ;;  %v827_v32 = vsel %vm10897_vm2, %v746_v26, %v826_v24  ;;  %v585_v33 = vpack.c.bf16 %v553_v27, %v553_v27 }
 0x185   : > { %825 = vst [vmem:[#allocation2 + $0x8] sm:$0xf] %v824_v31  ;;  %v1418_v31 = vunpack.c.l.b16 %v1302_v20  ;;  %v10289_v20 = vld [vmem:[#allocation6 + $0x118] sm:$0xff] }
 0x186   : > { %828 = vst [vmem:[#allocation2 + $0xc] sm:$0x1] %v827_v32  ;;  %v748_v39 = vshrl.u32 %v585_v33, 16  ;;  %v751_v47 = vshll.u32 %v585_v33, 16 }
 0x187   : > { %v513_v42 = vpop.f32.mrf.mxu0 }
 0x188   : > { %v750_v46 = vrot.slane %v748_v39, 7  ;;  %v514_v48 = vadd.f32 %v11010_v56, %v513_v42  ;;  %v10291_v39 = vld [vmem:[#allocation6 + $0x128] sm:$0xff] }
 0x189   : > { %1634 = vmatmul.bf16.gmra.mxu1 %v8696_v43  ;;  %1752 = vmatpush.bf16.msrb.mxu2 %v10291_v39 }
 0x18a   : > { %v753_v52 = vor.u32 %v751_v47, %v750_v46  ;;  %v754_v53 = vrot.slane %v750_v46, 4  ;;  %v554_v54 = vmax.f32 %v514_v48, 0.0  ;;  %v841_v47 = vld [vmem:[#allocation2 + $0x20] sm:$0xf] }
 0x18c   : > { %v830_v60 = vsel %vm11037_vm5, %v753_v52, %v829_v49  ;;  %v833_v61 = vsel %vm10897_vm2, %v754_v53, %v832_v51  ;;  %v586_v62 = vpack.c.bf16 %v554_v54, %v554_v54  ;;  %v10238_v63 = vld [vmem:[#allocation2 + $0x4] sm:$0xf0]  ;;  %v628_v51 = vld [vmem:[#allocation2 + $0x44] sm:$0x1] }
 0x18d   : > { %v1272_v0 = vld [vmem:[#allocation2 + $0x8] sm:$0xf]  ;;  %831 = vst [vmem:[#allocation2 + $0x10] sm:$0xf] %v830_v60  ;;  %v8608_v3 = vor.u32 %v10238_v63, %v8607_v55  ;;  %v1273_v4 = vld [vmem:[#allocation2 + $0xc] sm:$0x1]  ;;  %1753 = vmatpush.bf16.msrb.mxu2 %v10290_v8 }
 0x18e   : > { %v1304_v5 = vshrl.u32 %v1272_v0, 16  ;;  %v1307_v6 = vshll.u32 %v1272_v0, 16  ;;  %834 = vst [vmem:[#allocation2 + $0x14] sm:$0x1] %v833_v61  ;;  %v756_v7 = vshrl.u32 %v586_v62, 16  ;;  %v1313_v12 = vshll.u32 %v1273_v4, 16 }
 0x18f   : > { %v515_v9 = vpop.f32.mrf.mxu0  ;;  %1249 = vmatmul.bf16.vlgmr.msra.gmra.mxu2 %v8608_v3  ;;  %v759_v15 = vshll.u32 %v586_v62, 16  ;;  %v844_v52 = vld [vmem:[#allocation2 + $0x24] sm:$0x1]  ;;  %v629_v54 = vsel %vm10897_vm2, 0, %v628_v51  ;;  %v10286_v8 = vld [vmem:[#allocation6 + $0x100] sm:$0xff] }
 0x190   : > { %v1306_v10 = vrot.slane %v1304_v5, 4  ;;  %v1309_v11 = vrot.slane %v1307_v6, 5  ;;  %v758_v14 = vrot.slane %v756_v7, 7  ;;  %v516_v16 = vadd.f32 %v11010_v56, %v515_v9  ;;  %630 = vst [vmem:[#allocation2 + $0x44] sm:$0x1] %v629_v54 }
 0x191   : > { %v1315_v26 = vrot.slane %v1313_v12, 5  ;;  %1754 = vmatpush.bf16.msrb.mxu2 %v10289_v20 }
 0x192   : > { %v1310_v21 = vor.u32 %v1309_v11, %v1306_v10  ;;  %v761_v22 = vor.u32 %v759_v15, %v758_v14  ;;  %v762_v23 = vrot.slane %v758_v14, 4  ;;  %v555_v24 = vmax.f32 %v516_v16, 0.0  ;;  %v10298_v14 = vld [vmem:[#allocation6 + $0x160] sm:$0xff] }
 0x193   : > { %1999 = vmatpush.bf16.msra.mxu3 %v10298_v14 }
 0x194   : > { %v1311_v25 = vrot.slane %v1310_v21, 4  ;;  %v836_v27 = vsel %vm11037_vm5, %v761_v22, %v835_v18  ;;  %v839_v28 = vsel %vm10897_vm2, %v762_v23, %v838_v19  ;;  %v587_v29 = vpack.c.bf16 %v555_v24, %v555_v24  ;;  %v1274_v32 = vld [vmem:[#allocation2 + $0x10] sm:$0xf]  ;;  %v847_v21 = vld [vmem:[#allocation2 + $0x28] sm:$0xf] }
 0x195   : > { %837 = vst [vmem:[#allocation2 + $0x18] sm:$0xf] %v836_v27  ;;  %v1318_v34 = vshrl.u32 %v1274_v32, 16  ;;  %v1321_v35 = vshll.u32 %v1274_v32, 16  ;;  %v1275_v53 = vld [vmem:[#allocation2 + $0x14] sm:$0x1]  ;;  %1755 = vmatpush.bf16.msrb.mxu2 %v10288_v37 }
 0x196   : > { %v1316_v33 = vsel %vm11126_vm8, %v1311_v25, %v1315_v26  ;;  %840 = vst [vmem:[#allocation2 + $0x1c] sm:$0x1] %v839_v28  ;;  %v764_v36 = vshrl.u32 %v587_v29, 16  ;;  %v767_v46 = vshll.u32 %v587_v29, 16  ;;  %v8611_v59 = vld [vmem:[#allocation2 + $0x10] sm:$0xf] }
 0x197   : > { %v1419_v38 = vunpack.c.l.b16 %v1316_v33  ;;  %v518_v40 = vpop.f32.mrf.mxu0  ;;  %v1320_v42 = vrot.slane %v1318_v34, 4  ;;  %v1323_v43 = vrot.slane %v1321_v35, 5  ;;  %v1327_v2 = vshll.u32 %v1275_v53, 16  ;;  %v11145_v18 = vld [vmem:[#allocation8] ss:$0 sm:$0xff]  ;;  %v10297_v25 = vld [vmem:[#allocation6 + $0x158] sm:$0xff] }
 0x198   : > { %v766_v45 = vrot.slane %v764_v36, 7  ;;  %v519_v48 = vadd.f32 %v11010_v56, %v518_v40  ;;  %v850_v22 = vld [vmem:[#allocation2 + $0x2c] sm:$0x1]  ;;  %v10302_v35 = vld [vmem:[#allocation2 + $0xc] sm:$0xf0]  ;;  %2000 = vmatpush.bf16.msra.mxu3 %v10297_v25 }
 0x199   : > { %v1426_v49 = vpack.c.b16 %v1419_v38, %v1418_v31  ;;  %1639 = vmatmul.bf16.gmra.mxu1 %v8700_v41  ;;  %v1324_v60 = vor.u32 %v1323_v43, %v1320_v42  ;;  %v1329_v23 = vrot.slane %v1327_v2, 5  ;;  %v10296_v41 = vld [vmem:[#allocation6 + $0x150] sm:$0xff]  ;;  %v8815_v43 = vld [vmem:[#allocation2 + $0x8] sm:$0xf]  ;;  %v859_v25 = vld [vmem:[#allocation2 + $0x38] sm:$0xf] }
 0x19a   : > { %v769_v55 = vor.u32 %v767_v46, %v766_v45  ;;  %v770_v57 = vrot.slane %v766_v45, 4  ;;  %v556_v58 = vmax.f32 %v519_v48, 0.0 }
 0x19b   : > { %1490 = vmatmul.bf16.vlgmr.msrb.gmra.mxu3 %v1426_v49  ;;  %v1325_v10 = vrot.slane %v1324_v60, 4 }
 0x19c   : > { %v842_v56 = vsel %vm11037_vm5, %v769_v55, %v841_v47  ;;  %v845_v61 = vsel %vm10897_vm2, %v770_v57, %v844_v52  ;;  %v588_v62 = vpack.c.bf16 %v556_v58, %v556_v58  ;;  %v10239_v63 = vld [vmem:[#allocation2 + $0x14] sm:$0xf0]  ;;  %v8816_v47 = vor.u32 %v10302_v35, %v8815_v43  ;;  %v853_v57 = vld [vmem:[#allocation2 + $0x30] sm:$0xf]  ;;  %v856_v58 = vld [vmem:[#allocation2 + $0x34] sm:$0x1]  ;;  %2001 = vmatpush.bf16.msra.mxu3 %v10296_v41 }
 0x19d   : > { %v1276_v0 = vld [vmem:[#allocation2 + $0x18] sm:$0xf]  ;;  %843 = vst [vmem:[#allocation2 + $0x20] sm:$0xf] %v842_v56  ;;  %v8612_v3 = vor.u32 %v10239_v63, %v8611_v59  ;;  %v1277_v4 = vld [vmem:[#allocation2 + $0x1c] sm:$0x1]  ;;  %v1330_v29 = vsel %vm11126_vm8, %v1325_v10, %v1329_v23 }
 0x19e   : > { %v1332_v5 = vshrl.u32 %v1276_v0, 16  ;;  %v1335_v6 = vshll.u32 %v1276_v0, 16  ;;  %846 = vst [vmem:[#allocation2 + $0x24] sm:$0x1] %v845_v61  ;;  %v772_v7 = vshrl.u32 %v588_v62, 16  ;;  %v1341_v13 = vshll.u32 %v1277_v4, 16 }
 0x19f   : > { %v520_v9 = vpop.f32.mrf.mxu0  ;;  %1254 = vmatmul.bf16.gmra.mxu2 %v8612_v3  ;;  %v775_v16 = vshll.u32 %v588_v62, 16  ;;  %v1420_v44 = vunpack.c.l.b16 %v1330_v29  ;;  %v10287_v55 = vld [vmem:[#allocation6 + $0x108] sm:$0xff] }
 0x1a0   : > { %v1334_v11 = vrot.slane %v1332_v5, 4  ;;  %v1337_v12 = vrot.slane %v1335_v6, 5  ;;  %v774_v15 = vrot.slane %v772_v7, 7  ;;  %v521_v19 = vadd.f32 %v11145_v18, %v520_v9  ;;  %v10295_v62 = vld [vmem:[#allocation6 + $0x148] sm:$0xff]  ;;  %1756 = vmatpush.bf16.msrb.mxu2 %v10287_v55 }
 0x1a1   : > { %v1343_v31 = vrot.slane %v1341_v13, 5  ;;  %2002 = vmatpush.bf16.msra.mxu3 %v10295_v62  ;;  %v8819_v43 = vld [vmem:[#allocation2 + $0x18] sm:$0xf] }
 0x1a2   : > { %v1338_v24 = vor.u32 %v1337_v12, %v1334_v11  ;;  %v777_v26 = vor.u32 %v775_v16, %v774_v15  ;;  %v778_v27 = vrot.slane %v774_v15, 4  ;;  %v557_v28 = vmax.f32 %v521_v19, 0.0 }
 0x1a4   : > { %v1339_v30 = vrot.slane %v1338_v24, 4  ;;  %v848_v32 = vsel %vm11037_vm5, %v777_v26, %v847_v21  ;;  %v851_v33 = vsel %vm10897_vm2, %v778_v27, %v850_v22  ;;  %v589_v34 = vpack.c.bf16 %v557_v28, %v557_v28  ;;  %v1278_v36 = vld [vmem:[#allocation2 + $0x20] sm:$0xf]  ;;  %v10294_v21 = vld [vmem:[#allocation6 + $0x140] sm:$0xff]  ;;  %1757 = vmatpush.bf16.msrb.mxu2 %v10286_v8  ;;  %v862_v26 = vld [vmem:[#allocation2 + $0x3c] sm:$0x1] }
 0x1a5   : > { %849 = vst [vmem:[#allocation2 + $0x28] sm:$0xf] %v848_v32  ;;  %v1346_v39 = vshrl.u32 %v1278_v36, 16  ;;  %v1349_v40 = vshll.u32 %v1278_v36, 16  ;;  %v1279_v59 = vld [vmem:[#allocation2 + $0x24] sm:$0x1]  ;;  %2003 = vmatpush.bf16.msra.mxu3 %v10294_v21 }
 0x1a6   : > { %v1344_v38 = vsel %vm11126_vm8, %v1339_v30, %v1343_v31  ;;  %852 = vst [vmem:[#allocation2 + $0x2c] sm:$0x1] %v851_v33  ;;  %v780_v42 = vshrl.u32 %v589_v34, 16  ;;  %v783_v52 = vshll.u32 %v589_v34, 16  ;;  %v8615_v63 = vld [vmem:[#allocation2 + $0x20] sm:$0xf] }
 0x1a7   : > { %v1421_v45 = vunpack.c.l.b16 %v1344_v38  ;;  %v523_v46 = vpop.f32.mrf.mxu0  ;;  %v1348_v48 = vrot.slane %v1346_v39, 4  ;;  %v1351_v49 = vrot.slane %v1349_v40, 5  ;;  %v1355_v7 = vshll.u32 %v1279_v59, 16  ;;  %v10303_v37 = vld [vmem:[#allocation2 + $0x1c] sm:$0xf0] }
 0x1a8   : > { %v782_v51 = vrot.slane %v780_v42, 7  ;;  %v524_v53 = vadd.f32 %v11145_v18, %v523_v46  ;;  %v8820_v46 = vor.u32 %v10303_v37, %v8819_v43  ;;  %v1787_v8 = vld [vmem:[#allocation2 + $0x90] sm:$0xf] }
 0x1a9   : > { %v1427_v54 = vpack.c.b16 %v1421_v45, %v1420_v44  ;;  %2138 = vmatmul.bf16.vlgmr.msra.gmra.mxu1 %v8816_v47  ;;  %v1352_v0 = vor.u32 %v1351_v49, %v1348_v48  ;;  %v1357_v27 = vrot.slane %v1355_v7, 5 }
 0x1aa   : > { %v785_v60 = vor.u32 %v783_v52, %v782_v51  ;;  %v786_v56 = vrot.slane %v782_v51, 4  ;;  %v558_v61 = vmax.f32 %v524_v53, 0.0  ;;  %v865_v52 = vld [vmem:[#allocation2 + $0x40] sm:$0xf] }
 0x1ab   : > { %1495 = vmatmul.bf16.gmra.mxu3 %v1427_v54  ;;  %v1353_v15 = vrot.slane %v1352_v0, 4  ;;  %v868_v54 = vld [vmem:[#allocation2 + $0x44] sm:$0x1] }
 0x1ac   : > { %v854_v2 = vsel %vm11037_vm5, %v785_v60, %v853_v57  ;;  %v857_v3 = vsel %vm10897_vm2, %v786_v56, %v856_v58  ;;  %v590_v4 = vpack.c.bf16 %v558_v61, %v558_v61  ;;  %v10240_v5 = vld [vmem:[#allocation2 + $0x24] sm:$0xf0] }
 0x1ad   : > { %v1280_v6 = vld [vmem:[#allocation2 + $0x28] sm:$0xf]  ;;  %855 = vst [vmem:[#allocation2 + $0x30] sm:$0xf] %v854_v2  ;;  %v8616_v9 = vor.u32 %v10240_v5, %v8615_v63  ;;  %v1281_v10 = vld [vmem:[#allocation2 + $0x2c] sm:$0x1]  ;;  %v1358_v32 = vsel %vm11126_vm8, %v1353_v15, %v1357_v27 }
 0x1ae   : > { %v1360_v11 = vshrl.u32 %v1280_v6, 16  ;;  %v1363_v12 = vshll.u32 %v1280_v6, 16  ;;  %858 = vst [vmem:[#allocation2 + $0x34] sm:$0x1] %v857_v3  ;;  %v788_v13 = vshrl.u32 %v590_v4, 16  ;;  %v1369_v20 = vshll.u32 %v1281_v10, 16 }
 0x1af   : > { %v525_v14 = vpop.f32.mrf.mxu0  ;;  %1259 = vmatmul.bf16.gmra.mxu2 %v8616_v9  ;;  %v791_v23 = vshll.u32 %v590_v4, 16  ;;  %v1422_v44 = vunpack.c.l.b16 %v1358_v32  ;;  %v10325_v57 = vld [vmem:[#allocation6 + $0x1f8] sm:$0xff]  ;;  %v1789_v9 = vld [vmem:[#allocation2 + $0x98] sm:$0xf]  ;;  %v10332_v15 = vld [vmem:[#allocation6 + $0x230] sm:$0xff] }
 0x1b0   : > { %v1362_v16 = vrot.slane %v1360_v11, 4  ;;  %v1365_v19 = vrot.slane %v1363_v12, 5  ;;  %v790_v22 = vrot.slane %v788_v13, 7  ;;  %v526_v24 = vadd.f32 %v11145_v18, %v525_v14  ;;  %v10333_v60 = vld [vmem:[#allocation6 + $0x238] sm:$0xff]  ;;  %2264 = vmatpush.bf16.msra.mxu2 %v10325_v57  ;;  %v10324_v14 = vld [vmem:[#allocation6 + $0x1f0] sm:$0xff] }
 0x1b1   : > { %v1371_v34 = vrot.slane %v1369_v20, 5  ;;  %2510 = vmatpush.bf16.msrb.mxu3 %v10333_v60  ;;  %v1818_v20 = vshrl.u32 %v1789_v9, 16  ;;  %v1821_v21 = vshll.u32 %v1789_v9, 16 }
 0x1b2   : > { %v1366_v28 = vor.u32 %v1365_v19, %v1362_v16  ;;  %v793_v29 = vor.u32 %v791_v23, %v790_v22  ;;  %v794_v30 = vrot.slane %v790_v22, 4  ;;  %v559_v31 = vmax.f32 %v526_v24, 0.0 }
 0x1b3   : > { %v1804_v22 = vshrl.u32 %v1787_v8, 16 }
 0x1b4   : > { %v1367_v33 = vrot.slane %v1366_v28, 4  ;;  %v860_v35 = vsel %vm11037_vm5, %v793_v29, %v859_v25  ;;  %v863_v18 = vsel %vm10897_vm2, %v794_v30, %v862_v26  ;;  %v591_v36 = vpack.c.bf16 %v559_v31, %v559_v31  ;;  %v1282_v38 = vld [vmem:[#allocation2 + $0x30] sm:$0xf]  ;;  %2265 = vmatpush.bf16.msra.mxu2 %v10324_v14  ;;  %v8823_v31 = vld [vmem:[#allocation2 + $0x28] sm:$0xf] }
 0x1b5   : > { %861 = vst [vmem:[#allocation2 + $0x38] sm:$0xf] %v860_v35  ;;  %v1374_v40 = vshrl.u32 %v1282_v38, 16  ;;  %v1377_v41 = vshll.u32 %v1282_v38, 16  ;;  %v1283_v55 = vld [vmem:[#allocation2 + $0x34] sm:$0x1]  ;;  %2511 = vmatpush.bf16.msrb.mxu3 %v10332_v15 }
 0x1b6   : > { %v1372_v39 = vsel %vm11126_vm8, %v1367_v33, %v1371_v34  ;;  %864 = vst [vmem:[#allocation2 + $0x3c] sm:$0x1] %v863_v18  ;;  %v796_v42 = vshrl.u32 %v591_v36, 16  ;;  %v799_v51 = vshll.u32 %v591_v36, 16  ;;  %v8619_v56 = vld [vmem:[#allocation2 + $0x30] sm:$0xf] }
 0x1b7   : > { %v1423_v45 = vunpack.c.l.b16 %v1372_v39  ;;  %v1376_v47 = vrot.slane %v1374_v40, 4  ;;  %v1379_v48 = vrot.slane %v1377_v41, 5  ;;  %v1383_v3 = vshll.u32 %v1283_v55, 16  ;;  %v10304_v27 = vld [vmem:[#allocation2 + $0x2c] sm:$0xf0]  ;;  %v10323_v34 = vld [vmem:[#allocation6 + $0x1e8] sm:$0xff] }
 0x1b8   : > { %v798_v49 = vrot.slane %v796_v42, 7  ;;  %v1807_v26 = vshll.u32 %v1787_v8, 16  ;;  %v1820_v29 = vrot.slane %v1818_v20, 4  ;;  %v1823_v30 = vrot.slane %v1821_v21, 5  ;;  %v1790_v38 = vld [vmem:[#allocation2 + $0x9c] sm:$0x1]  ;;  %2266 = vmatpush.bf16.msra.mxu2 %v10323_v34 }
 0x1b9   : > { %v1428_v53 = vpack.c.b16 %v1423_v45, %v1422_v44  ;;  %2143 = vmatmul.bf16.gmra.mxu1 %v8820_v46  ;;  %v1380_v61 = vor.u32 %v1379_v48, %v1376_v47  ;;  %v1385_v16 = vrot.slane %v1383_v3, 5  ;;  %v8824_v35 = vor.u32 %v10304_v27, %v8823_v31  ;;  %v10282_v40 = vld [vmem:[#allocation2 + $0xdc] sm:$0xf0]  ;;  %v1788_v41 = vld [vmem:[#allocation2 + $0x94] sm:$0x1]  ;;  %v10331_v42 = vld [vmem:[#allocation6 + $0x228] sm:$0xff] }
 0x1ba   : > { %v801_v58 = vor.u32 %v799_v51, %v798_v49  ;;  %v802_v59 = vrot.slane %v798_v49, 4  ;;  %v1806_v18 = vrot.slane %v1804_v22, 4  ;;  %v1809_v36 = vrot.slane %v1807_v26, 5  ;;  %v8735_v45 = vld [vmem:[#allocation2 + $0xd8] sm:$0xf]  ;;  %2512 = vmatpush.bf16.msrb.mxu3 %v10331_v42  ;;  %v10329_v15 = vld [vmem:[#allocation6 + $0x218] sm:$0xff] }
 0x1bb   : > { %1500 = vmatmul.bf16.gmra.mxu3 %v1428_v53  ;;  %v1381_v10 = vrot.slane %v1380_v61, 4  ;;  %v1824_v39 = vor.u32 %v1823_v30, %v1820_v29  ;;  %v1827_v44 = vshll.u32 %v1790_v38, 16  ;;  %v8736_v46 = vor.u32 %v10282_v40, %v8735_v45  ;;  %v1793_v49 = vld [vmem:[#allocation2 + $0xa8] sm:$0xf]  ;;  %v10322_v53 = vld [vmem:[#allocation6 + $0x1e0] sm:$0xff]  ;;  %v10320_v27 = vld [vmem:[#allocation6 + $0x1d0] sm:$0xff] }
 0x1bc   : > { %v866_v62 = vsel %vm11037_vm5, %v801_v58, %v865_v52  ;;  %v869_v63 = vsel %vm10897_vm2, %v802_v59, %v868_v54  ;;  %v10241_v0 = vld [vmem:[#allocation2 + $0x34] sm:$0xf0]  ;;  %v1810_v43 = vor.u32 %v1809_v36, %v1806_v18  ;;  %v1813_v47 = vshll.u32 %v1788_v41, 16  ;;  %v10330_v54 = vld [vmem:[#allocation6 + $0x220] sm:$0xff]  ;;  %v1791_v55 = vld [vmem:[#allocation2 + $0xa0] sm:$0xf]  ;;  %2267 = vmatpush.bf16.msra.mxu2 %v10322_v53 }
 0x1bd   : > { %v1284_v2 = vld [vmem:[#allocation2 + $0x38] sm:$0xf]  ;;  %867 = vst [vmem:[#allocation2 + $0x40] sm:$0xf] %v866_v62  ;;  %v8620_v4 = vor.u32 %v10241_v0, %v8619_v56  ;;  %v1285_v5 = vld [vmem:[#allocation2 + $0x3c] sm:$0x1]  ;;  %v1386_v23 = vsel %vm11126_vm8, %v1381_v10, %v1385_v16 }
 0x1be   : > { %v1388_v6 = vshrl.u32 %v1284_v2, 16  ;;  %v1391_v7 = vshll.u32 %v1284_v2, 16  ;;  %870 = vst [vmem:[#allocation2 + $0x44] sm:$0x1] %v869_v63  ;;  %v1397_v13 = vshll.u32 %v1285_v5, 16  ;;  %v1424_v32 = vunpack.c.l.b16 %v1386_v23  ;;  %2513 = vmatpush.bf16.msrb.mxu3 %v10330_v54  ;;  %v10319_v40 = vld [vmem:[#allocation6 + $0x1c8] sm:$0xff] }
 0x1bf   : > { %1264 = vmatmul.bf16.gmra.mxu2 %v8620_v4  ;;  %v1825_v48 = vrot.slane %v1824_v39, 4  ;;  %v1811_v51 = vrot.slane %v1810_v43, 4  ;;  %v1829_v52 = vrot.slane %v1827_v44, 5  ;;  %v1815_v57 = vrot.slane %v1813_v47, 5  ;;  %v8827_v4 = vld [vmem:[#allocation2 + $0x38] sm:$0xf] }
 0x1c0   : > { %v1390_v11 = vrot.slane %v1388_v6, 4  ;;  %v1393_v12 = vrot.slane %v1391_v7, 5  ;;  %v1399_v25 = vrot.slane %v1397_v13, 5  ;;  %v1846_v59 = vshrl.u32 %v1793_v49, 16  ;;  %v10321_v6 = vld [vmem:[#allocation6 + $0x1d8] sm:$0xff] }
 0x1c1   : > { %v1830_v58 = vsel %vm11126_vm8, %v1825_v48, %v1829_v52  ;;  %v1849_v60 = vshll.u32 %v1793_v49, 16  ;;  %v1816_v56 = vsel %vm11126_vm8, %v1811_v51, %v1815_v57  ;;  %v1832_v61 = vshrl.u32 %v1791_v55, 16  ;;  %2268 = vmatpush.bf16.msra.mxu2 %v10321_v6  ;;  %v10283_v13 = vld [vmem:[#allocation2 + $0xec] sm:$0xf0]  ;;  %v1792_v14 = vld [vmem:[#allocation2 + $0xa4] sm:$0x1] }
 0x1c2   : > { %v1394_v19 = vor.u32 %v1393_v12, %v1390_v11  ;;  %v1835_v62 = vshll.u32 %v1791_v55, 16  ;;  %v1933_v0 = vunpack.c.l.b16 %v1830_v58  ;;  %v1848_v2 = vrot.slane %v1846_v59, 4  ;;  %v1794_v11 = vld [vmem:[#allocation2 + $0xac] sm:$0x1]  ;;  %v8739_v20 = vld [vmem:[#allocation2 + $0xe8] sm:$0xf]  ;;  %2514 = vmatpush.bf16.msrb.mxu3 %v10329_v15 }
 0x1c3   : > { %v1851_v3 = vrot.slane %v1849_v60, 5  ;;  %v1932_v5 = vunpack.c.l.b16 %v1816_v56  ;;  %v1834_v8 = vrot.slane %v1832_v61, 4  ;;  %v8740_v21 = vor.u32 %v10283_v13, %v8739_v20  ;;  %v1795_v29 = vld [vmem:[#allocation2 + $0xb0] sm:$0xf]  ;;  %v1798_v44 = vld [vmem:[#allocation2 + $0xbc] sm:$0x1] }
 0x1c4   : > { %v1395_v24 = vrot.slane %v1394_v19, 4  ;;  %v10305_v63 = vld [vmem:[#allocation2 + $0x3c] sm:$0xf0]  ;;  %v1837_v9 = vrot.slane %v1835_v62, 5  ;;  %v1855_v19 = vshll.u32 %v1794_v11, 16  ;;  %v1841_v22 = vshll.u32 %v1792_v14, 16 }
 0x1c5   : > { %v8828_v7 = vor.u32 %v10305_v63, %v8827_v4  ;;  %v1940_v10 = vpack.c.b16 %v1933_v0, %v1932_v5  ;;  %v1852_v12 = vor.u32 %v1851_v3, %v1848_v2  ;;  %2269 = vmatpush.bf16.msra.mxu2 %v10320_v27  ;;  %v1863_v18 = vshll.u32 %v1795_v29, 16  ;;  %v10284_v45 = vld [vmem:[#allocation2 + $0xfc] sm:$0xf0]  ;;  %v1796_v47 = vld [vmem:[#allocation2 + $0xb4] sm:$0x1]  ;;  %v10327_v48 = vld [vmem:[#allocation6 + $0x208] sm:$0xff] }
 0x1c6   : > { %v1400_v28 = vsel %vm11126_vm8, %v1395_v24, %v1399_v25  ;;  %v1838_v16 = vor.u32 %v1837_v9, %v1834_v8  ;;  %v1797_v24 = vld [vmem:[#allocation2 + $0xb8] sm:$0xf]  ;;  %v1857_v26 = vrot.slane %v1855_v19, 5  ;;  %v1843_v30 = vrot.slane %v1841_v22, 5  ;;  %v10318_v49 = vld [vmem:[#allocation6 + $0x1c0] sm:$0xff]  ;;  %v11186_v51 = vpop.f32.mrf.mxu1 }
 0x1c7   : > { %v1425_v33 = vunpack.c.l.b16 %v1400_v28  ;;  %v1853_v23 = vrot.slane %v1852_v12, 4  ;;  %v10328_v28 = vld [vmem:[#allocation6 + $0x210] sm:$0xff]  ;;  %v1865_v42 = vrot.slane %v1863_v18, 5  ;;  %v1883_v53 = vshll.u32 %v1798_v44, 16  ;;  %v8743_v54 = vld [vmem:[#allocation2 + $0xf8] sm:$0xf] }
 0x1c8   : > { %v1839_v25 = vrot.slane %v1838_v16, 4  ;;  %2515 = vmatpush.bf16.msrb.mxu3 %v10328_v28  ;;  %v8744_v55 = vor.u32 %v10284_v45, %v8743_v54  ;;  %v1869_v57 = vshll.u32 %v1796_v47, 16  ;;  %v1801_v59 = vld [vmem:[#allocation2 + $0xc8] sm:$0xf]  ;;  %v1799_v61 = vld [vmem:[#allocation2 + $0xc0] sm:$0xf] }
 0x1c9   : > { %v1429_v37 = vpack.c.b16 %v1425_v33, %v1424_v32  ;;  %2148 = vmatmul.bf16.gmra.mxu1 %v8824_v35  ;;  %v1858_v31 = vsel %vm11126_vm8, %v1853_v23, %v1857_v26  ;;  %v1874_v32 = vshrl.u32 %v1797_v24, 16  ;;  %v1877_v33 = vshll.u32 %v1797_v24, 16  ;;  %2270 = vmatpush.bf16.msra.mxu2 %v10319_v40  ;;  %v10326_v6 = vld [vmem:[#allocation6 + $0x200] sm:$0xff]  ;;  %v1802_v16 = vld [vmem:[#allocation2 + $0xcc] sm:$0x1] }
 0x1ca   : > { %v1844_v34 = vsel %vm11126_vm8, %v1839_v25, %v1843_v30  ;;  %v1860_v35 = vshrl.u32 %v1795_v29, 16  ;;  %v1935_v36 = vunpack.c.l.b16 %v1858_v31  ;;  %v1885_v56 = vrot.slane %v1883_v53, 5  ;;  %v10285_v20 = vld [vmem:[#allocation2 + $0x10c] sm:$0xf0]  ;;  %v8747_v24 = vld [vmem:[#allocation2 + $0x108] sm:$0xf] }
 0x1cb   : > { %1505 = vmatmul.bf16.gmra.mxu3 %v1429_v37  ;;  %v1876_v37 = vrot.slane %v1874_v32, 4  ;;  %v1879_v38 = vrot.slane %v1877_v33, 5  ;;  %v1934_v39 = vunpack.c.l.b16 %v1844_v34  ;;  %v1871_v62 = vrot.slane %v1869_v57, 5  ;;  %v2303_v28 = vld [vmem:[#allocation2 + $0x10] sm:$0xf] }
 0x1cc   : > { %v1862_v41 = vrot.slane %v1860_v35, 4  ;;  %2516 = vmatpush.bf16.msrb.mxu3 %v10327_v48  ;;  %v1902_v0 = vshrl.u32 %v1801_v59, 16  ;;  %v1905_v2 = vshll.u32 %v1801_v59, 16  ;;  %v1888_v4 = vshrl.u32 %v1799_v61, 16  ;;  %v2301_v32 = vld [vmem:[#allocation2 + $0x8] sm:$0xf] }
 0x1cd   : > { %v1941_v43 = vpack.c.b16 %v1935_v36, %v1934_v39  ;;  %2271 = vmatpush.bf16.msra.mxu2 %v10318_v49  ;;  %v1891_v5 = vshll.u32 %v1799_v61, 16  ;;  %v1911_v23 = vshll.u32 %v1802_v16, 16  ;;  %v8748_v25 = vor.u32 %v10285_v20, %v8747_v24  ;;  %v2304_v47 = vld [vmem:[#allocation2 + $0x14] sm:$0x1]  ;;  %v2302_v53 = vld [vmem:[#allocation2 + $0xc] sm:$0x1] }
 0x1ce   : > { %v1866_v52 = vor.u32 %v1865_v42, %v1862_v41  ;;  %v11192_v8 = vpop.f32.mrf.mxu1  ;;  %v1904_v9 = vrot.slane %v1902_v0, 4  ;;  %v1890_v13 = vrot.slane %v1888_v4, 4  ;;  %v2332_v18 = vshrl.u32 %v2303_v28, 16  ;;  %v2307_v61 = vld [vmem:[#allocation2 + $0x20] sm:$0xf] }
 0x1cf   : > { %1758 = vmatmul.bf16.vlgmr.msrb.gmra.mxu2 %v8736_v46  ;;  %v1880_v46 = vor.u32 %v1879_v38, %v1876_v37  ;;  %v1893_v14 = vrot.slane %v1891_v5, 5  ;;  %v1913_v31 = vrot.slane %v1911_v23, 5  ;;  %v2335_v36 = vshll.u32 %v2303_v28, 16  ;;  %v2305_v0 = vld [vmem:[#allocation2 + $0x18] sm:$0xf] }
 0x1d0   : > { %v1867_v60 = vrot.slane %v1866_v52, 4  ;;  %2517 = vmatpush.bf16.msrb.mxu3 %v10326_v6  ;;  %v2318_v38 = vshrl.u32 %v2301_v32, 16  ;;  %v2321_v39 = vshll.u32 %v2301_v32, 16  ;;  %v2334_v41 = vrot.slane %v2332_v18, 4  ;;  %v10314_v52 = vld [vmem:[#allocation2 + $0x54] sm:$0xf0] }
 0x1d1   : > { %v1881_v58 = vrot.slane %v1880_v46, 4  ;;  %v1894_v22 = vor.u32 %v1893_v14, %v1890_v13  ;;  %v2337_v42 = vrot.slane %v2335_v36, 5  ;;  %v2341_v57 = vshll.u32 %v2304_v47, 16  ;;  %v2308_v23 = vld [vmem:[#allocation2 + $0x24] sm:$0x1] }
 0x1d2   : > { %v1872_v3 = vsel %vm11126_vm8, %v1867_v60, %v1871_v62  ;;  %v2320_v44 = vrot.slane %v2318_v38, 4  ;;  %v2323_v45 = vrot.slane %v2321_v39, 5  ;;  %v2327_v60 = vshll.u32 %v2302_v53, 16  ;;  %v8867_v32 = vld [vmem:[#allocation2 + $0x60] sm:$0xf] }
 0x1d3   : > { %v1886_v63 = vsel %vm11126_vm8, %v1881_v58, %v1885_v56  ;;  %v1936_v11 = vunpack.c.l.b16 %v1872_v3  ;;  %v1895_v30 = vrot.slane %v1894_v22, 4  ;;  %v2338_v49 = vor.u32 %v2337_v42, %v2334_v41  ;;  %v8863_v58 = vld [vmem:[#allocation2 + $0x50] sm:$0xf]  ;;  %v2309_v42 = vld [vmem:[#allocation2 + $0x28] sm:$0xf] }
 0x1d4   : > { %v8864_v59 = vor.u32 %v10314_v52, %v8863_v58  ;;  %v2360_v4 = vshrl.u32 %v2307_v61, 16  ;;  %v2363_v5 = vshll.u32 %v2307_v61, 16  ;;  %v2311_v39 = vld [vmem:[#allocation2 + $0x30] sm:$0xf]  ;;  %v2374_v52 = vshrl.u32 %v2309_v42, 16 }
 0x1d5   : > { %v2339_v56 = vrot.slane %v2338_v49, 4  ;;  %v2377_v53 = vshll.u32 %v2309_v42, 16 }
 0x1d6   : > { %v11196_v29 = vpop.f32.mrf.mxu1  ;;  %v2365_v16 = vrot.slane %v2363_v5, 5  ;;  %v2376_v61 = vrot.slane %v2374_v52, 4  ;;  %v2310_v5 = vld [vmem:[#allocation2 + $0x2c] sm:$0x1] }
 0x1d9   : > { %2153 = vmatmul.bf16.gmra.mxu1 %v8828_v7  ;;  %v1937_v7 = vunpack.c.l.b16 %v1886_v63  ;;  %v2343_v63 = vrot.slane %v2341_v57, 5 }
 0x1db   : > { %2004 = vmatmul.bf16.vlgmr.msra.gmra.mxu3 %v1940_v10  ;;  %v1907_v10 = vrot.slane %v1905_v2, 5  ;;  %v1942_v15 = vpack.c.b16 %v1937_v7, %v1936_v11  ;;  %v2329_v2 = vrot.slane %v2327_v60, 5  ;;  %v2344_v3 = vsel %vm11126_vm8, %v2339_v56, %v2343_v63 }
 0x1dc   : > { %v2349_v11 = vshll.u32 %v2305_v0, 16  ;;  %v2447_v13 = vunpack.c.l.b16 %v2344_v3 }
 0x1dd   : > { %v1908_v19 = vor.u32 %v1907_v10, %v1904_v9  ;;  %v2346_v10 = vshrl.u32 %v2305_v0, 16  ;;  %v2312_v0 = vld [vmem:[#allocation2 + $0x34] sm:$0x1] }
 0x1de   : > { %v11204_v48 = vpop.f32.mrf.mxu1 }
 0x1df   : > { %1763 = vmatmul.bf16.gmra.mxu2 %v8740_v21  ;;  %v1800_v21 = vld [vmem:[#allocation2 + $0xc4] sm:$0x1]  ;;  %v1909_v27 = vrot.slane %v1908_v19, 4  ;;  %v2348_v20 = vrot.slane %v2346_v10, 4  ;;  %v8871_v10 = vld [vmem:[#allocation2 + $0x70] sm:$0xf] }
 0x1e0   : > { %v1897_v26 = vshll.u32 %v1800_v21, 16  ;;  %v2351_v21 = vrot.slane %v2349_v11, 5 }
 0x1e1   : > { %v1914_v35 = vsel %vm11126_vm8, %v1909_v27, %v1913_v31  ;;  %v2306_v27 = vld [vmem:[#allocation2 + $0x1c] sm:$0x1] }
 0x1e2   : > { %v1899_v34 = vrot.slane %v1897_v26, 5  ;;  %v1939_v40 = vunpack.c.l.b16 %v1914_v35  ;;  %v10315_v26 = vld [vmem:[#allocation2 + $0x64] sm:$0xf0]  ;;  %v2352_v28 = vor.u32 %v2351_v21, %v2348_v20  ;;  %v2355_v36 = vshll.u32 %v2306_v27, 16  ;;  %v2315_v20 = vld [vmem:[#allocation2 + $0x40] sm:$0xf] }
 0x1e3   : > { %v8868_v18 = vor.u32 %v10315_v26, %v8867_v32 }
 0x1e4   : > { %v1900_v37 = vsel %vm11126_vm8, %v1895_v30, %v1899_v34  ;;  %v2369_v30 = vshll.u32 %v2308_v23, 16  ;;  %v2313_v23 = vld [vmem:[#allocation2 + $0x38] sm:$0xf] }
 0x1e6   : > { %v1625_v7 = vpop.f32.mrf.mxu1  ;;  %v2371_v41 = vrot.slane %v2369_v30, 5  ;;  %v2419_v30 = vshll.u32 %v2315_v20, 16 }
 0x1eb   : > { %2009 = vmatmul.bf16.gmra.mxu3 %v1941_v43  ;;  %v11194_v12 = vpop.f32.mrf.mxu3  ;;  %v1938_v43 = vunpack.c.l.b16 %v1900_v37 }
 0x1ed   : > { %v1943_v46 = vpack.c.b16 %v1939_v40, %v1938_v43  ;;  %v2353_v40 = vrot.slane %v2352_v28, 4 }
 0x1ee   : > { %v11217_v34 = vpop.f32.mrf.mxu1 }
 0x1ef   : > { %1768 = vmatmul.bf16.gmra.mxu2 %v8744_v55  ;;  %v2324_v55 = vor.u32 %v2323_v45, %v2320_v44  ;;  %v2357_v44 = vrot.slane %v2355_v36, 5  ;;  %v2405_v36 = vshll.u32 %v2313_v23, 16 }
 0x1f1   : > { %v2325_v62 = vrot.slane %v2324_v55, 4  ;;  %v2358_v49 = vsel %vm11126_vm8, %v2353_v40, %v2357_v44  ;;  %v2421_v40 = vrot.slane %v2419_v30, 5  ;;  %v2407_v44 = vrot.slane %v2405_v36, 5 }
 0x1f2   : > { %v2448_v60 = vunpack.c.l.b16 %v2358_v49  ;;  %v2314_v49 = vld [vmem:[#allocation2 + $0x3c] sm:$0x1] }
 0x1f3   : > { %v11198_v33 = vpop.f32.mrf.mxu3  ;;  %v2330_v9 = vsel %vm11126_vm8, %v2325_v62, %v2329_v2  ;;  %v2379_v62 = vrot.slane %v2377_v53, 5 }
 0x1f4   : > { %v2446_v19 = vunpack.c.l.b16 %v2330_v9 }
 0x1f6   : > { %v2454_v22 = vpack.c.b16 %v2447_v13, %v2446_v19  ;;  %v1630_v56 = vpop.f32.mrf.mxu1 }
 0x1fb   : > { %2014 = vmatmul.bf16.gmra.mxu3 %v1942_v15  ;;  %v11206_v54 = vpop.f32.mrf.mxu3  ;;  %v2362_v15 = vrot.slane %v2360_v4, 4  ;;  %v10316_v4 = vld [vmem:[#allocation2 + $0x74] sm:$0xf0] }
 0x1fc   : > { %v8872_v13 = vor.u32 %v10316_v4, %v8871_v10 }
 0x1fd   : > { %v2366_v24 = vor.u32 %v2365_v16, %v2362_v15  ;;  %v2383_v15 = vshll.u32 %v2310_v5, 16 }
 0x1fe   : > { %v11232_v26 = vpop.f32.mrf.mxu1 }
 0x1ff   : > { %1773 = vmatmul.bf16.gmra.mxu2 %v8748_v25  ;;  %v2367_v37 = vrot.slane %v2366_v24, 4  ;;  %v2385_v27 = vrot.slane %v2383_v15, 5 }
 0x201   : > { %v2372_v45 = vsel %vm11126_vm8, %v2367_v37, %v2371_v41 }
 0x202   : > { %v2449_v55 = vunpack.c.l.b16 %v2372_v45 }
 0x203   : > { %v11212_v14 = vpop.f32.mrf.mxu3 }
 0x204   : > { %v2455_v63 = vpack.c.b16 %v2449_v55, %v2448_v60 }
 0x206   : > { %v1635_v52 = vpop.f32.mrf.mxu1 }
 0x20b   : > { %2019 = vmatmul.bf16.gmra.mxu3 %v1943_v46  ;;  %v2391_v46 = vshll.u32 %v2311_v39, 16 }
 0x20f   : > { %2272 = vmatmul.bf16.vlgmr.msra.gmra.mxu2 %v8864_v59  ;;  %v2393_v59 = vrot.slane %v2391_v46, 5 }
 0x212   : > { %v1250_v6 = vpop.f32.mrf.mxu2 }
 0x213   : > { %v1251_v31 = vadd.f32 %v1250_v6, %v11186_v51  ;;  %v2388_v51 = vshrl.u32 %v2311_v39, 16  ;;  %v2380_v6 = vor.u32 %v2379_v62, %v2376_v61 }
 0x215   : > { %v2390_v58 = vrot.slane %v2388_v51, 4  ;;  %v2381_v21 = vrot.slane %v2380_v6, 4  ;;  %v2316_v51 = vld [vmem:[#allocation2 + $0x44] sm:$0x1] }
 0x216   : > { %v2425_v55 = vshll.u32 %v2316_v51, 16  ;;  %v10349_v51 = vld [vmem:[#allocation4 + $0x98] sm:$0xff] }
 0x217   : > { %v2394_v2 = vor.u32 %v2393_v59, %v2390_v58  ;;  %v8875_v58 = vld [vmem:[#allocation2 + $0x80] sm:$0xf] }
 0x219   : > { %v2395_v16 = vrot.slane %v2394_v2, 4 }
 0x21a   : > { %v11214_v25 = vpop.f32.mrf.mxu2 }
 0x21b   : > { %2518 = vmatmul.bf16.vlgmr.msrb.gmra.mxu3 %v2454_v22 }
 0x21e   : > { %v1491_v35 = vpop.f32.mrf.mxu3 }
 0x21f   : > { %v1511_v38 = vadd.f32 %v1491_v35, %v1251_v31  ;;  %2277 = vmatmul.bf16.gmra.mxu2 %v8868_v18  ;;  %v2386_v35 = vsel %vm11126_vm8, %v2381_v21, %v2385_v27  ;;  %v2402_v18 = vshrl.u32 %v2313_v23, 16  ;;  %v10341_v23 = vld [vmem:[#allocation4 + $0x78] sm:$0xff]  ;;  %v10352_v27 = vld [vmem:[#allocation4 + $0xb0] sm:$0xff] }
 0x220   : > { %v2450_v41 = vunpack.c.l.b16 %v2386_v35  ;;  %2636 = vmatpush.bf16.msrb.mxu1 %v10341_v23  ;;  %v10351_v35 = vld [vmem:[#allocation4 + $0xa8] sm:$0xff] }
 0x221   : > { %v11219_v43 = vadd.f32 %v1625_v7, %v1511_v38  ;;  %v2397_v7 = vshll.u32 %v2312_v0, 16  ;;  %v2404_v42 = vrot.slane %v2402_v18, 4  ;;  %v2427_v0 = vrot.slane %v2425_v55, 5 }
 0x222   : > { %v1255_v47 = vpop.f32.mrf.mxu2 }
 0x223   : > { %v1256_v9 = vadd.f32 %v1255_v47, %v11196_v29  ;;  %v2399_v22 = vrot.slane %v2397_v7, 5  ;;  %v2416_v29 = vshrl.u32 %v2315_v20, 16  ;;  %v2408_v53 = vor.u32 %v2407_v44, %v2404_v42 }
 0x225   : > { %v2400_v28 = vsel %vm11126_vm8, %v2395_v16, %v2399_v22  ;;  %v2418_v39 = vrot.slane %v2416_v29, 4  ;;  %v10353_v16 = vld [vmem:[#allocation4 + $0xb8] sm:$0xff] }
 0x226   : > { %v11225_v57 = vpop.f32.mrf.mxu3  ;;  %v2451_v37 = vunpack.c.l.b16 %v2400_v28  ;;  %2764 = vmatpush.bf16.msrb.mxu2 %v10353_v16 }
 0x227   : > { %v2422_v46 = vor.u32 %v2421_v40, %v2418_v39  ;;  %v10339_v39 = vld [vmem:[#allocation4 + $0x68] sm:$0xff]  ;;  %v10350_v40 = vld [vmem:[#allocation4 + $0xa0] sm:$0xff] }
 0x228   : > { %v2456_v45 = vpack.c.b16 %v2451_v37, %v2450_v41 }
 0x229   : > { %v2423_v61 = vrot.slane %v2422_v46, 4 }
 0x22a   : > { %v11227_v3 = vpop.f32.mrf.mxu2  ;;  %2765 = vmatpush.bf16.msrb.mxu2 %v10352_v27 }
 0x22b   : > { %2523 = vmatmul.bf16.gmra.mxu3 %v2455_v63  ;;  %v2409_v63 = vrot.slane %v2408_v53, 4  ;;  %v2428_v5 = vsel %vm11126_vm8, %v2423_v61, %v2427_v0  ;;  %v10346_v0 = vld [vmem:[#allocation4 + $0x80] sm:$0xff] }
 0x22c   : > { %v2453_v10 = vunpack.c.l.b16 %v2428_v5 }
 0x22e   : > { %v1496_v11 = vpop.f32.mrf.mxu3  ;;  %2766 = vmatpush.bf16.msrb.mxu2 %v10351_v35 }
 0x22f   : > { %v1513_v19 = vadd.f32 %v1496_v11, %v1256_v9  ;;  %2282 = vmatmul.bf16.gmra.mxu2 %v8872_v13  ;;  %v11248_v11 = vpop.f32.mrf.mxu1 }
 0x231   : > { %v11230_v24 = vadd.f32 %v1630_v56, %v1513_v19  ;;  %v2411_v56 = vshll.u32 %v2314_v49, 16  ;;  %v10337_v49 = vld [vmem:[#allocation4 + $0x58] sm:$0xff] }
 0x232   : > { %v1260_v31 = vpop.f32.mrf.mxu2  ;;  %2767 = vmatpush.bf16.msrb.mxu2 %v10350_v40 }
 0x233   : > { %v1261_v32 = vadd.f32 %v1260_v31, %v11194_v12  ;;  %v10317_v12 = vld [vmem:[#allocation2 + $0x84] sm:$0xf0]  ;;  %v2413_v4 = vrot.slane %v2411_v56, 5 }
 0x234   : > { %v8876_v60 = vor.u32 %v10317_v12, %v8875_v58 }
 0x235   : > { %v2414_v9 = vsel %vm11126_vm8, %v2409_v63, %v2413_v4  ;;  %v10335_v4 = vld [vmem:[#allocation4 + $0x48] sm:$0xff] }
 0x236   : > { %v11239_v38 = vpop.f32.mrf.mxu3  ;;  %v2452_v15 = vunpack.c.l.b16 %v2414_v9  ;;  %2768 = vmatpush.bf16.msrb.mxu2 %v10349_v51  ;;  %v1258_v51 = vadd.f32 %v11227_v3, %v11204_v48 }
 0x238   : > { %v2457_v19 = vpack.c.b16 %v2453_v10, %v2452_v15  ;;  %v10334_v10 = vld [vmem:[#allocation4 + $0x40] sm:$0xff] }
 0x23a   : > { %v11241_v47 = vpop.f32.mrf.mxu2 }
 0x23b   : > { %2528 = vmatmul.bf16.gmra.mxu3 %v2456_v45  ;;  %v10338_v45 = vld [vmem:[#allocation4 + $0x60] sm:$0xff] }
 0x23e   : > { %v1501_v59 = vpop.f32.mrf.mxu3 }
 0x23f   : > { %v1515_v62 = vadd.f32 %v1501_v59, %v1261_v32  ;;  %2287 = vmatmul.bf16.gmra.mxu2 %v8876_v60  ;;  %v10340_v32 = vld [vmem:[#allocation4 + $0x70] sm:$0xff] }
 0x240   : > { %2637 = vmatpush.bf16.msrb.mxu1 %v10340_v32  ;;  %v10336_v59 = vld [vmem:[#allocation4 + $0x50] sm:$0xff] }
 0x241   : > { %v1649_v2 = vadd.f32 %v1635_v52, %v1515_v62  ;;  %v10348_v52 = vld [vmem:[#allocation4 + $0x90] sm:$0xff] }
 0x242   : > { %v1265_v6 = vpop.f32.mrf.mxu2  ;;  %2769 = vmatpush.bf16.msrb.mxu2 %v10348_v52 }
 0x243   : > { %v1266_v7 = vadd.f32 %v1265_v6, %v11206_v54  ;;  %v1640_v54 = vpop.f32.mrf.mxu1  ;;  %v10342_v6 = vld [vmem:[%s10957_s17] sm:$0xff] }
 0x244   : > { %2638 = vmatpush.bf16.msrb.mxu1 %v10339_v39 }
 0x246   : > { %v11250_v13 = vpop.f32.mrf.mxu3 }
 0x248   : > { %2639 = vmatpush.bf16.msrb.mxu1 %v10338_v45  ;;  %v11282_v45 = vld [vmem:[#allocation8 + $0x1] ss:$0 sm:$0xff] }
 0x24a   : > { %v11252_v20 = vpop.f32.mrf.mxu2 }
 0x24b   : > { %2533 = vmatmul.bf16.gmra.mxu3 %v2457_v19  ;;  %v11266_v62 = vpop.f32.mrf.mxu1 }
 0x24c   : > { %2640 = vmatpush.bf16.msrb.mxu1 %v10337_v49 }
 0x24e   : > { %v1506_v21 = vpop.f32.mrf.mxu3 }
 0x24f   : > { %v1517_v22 = vadd.f32 %v1506_v21, %v1266_v7  ;;  %v10343_v21 = vld [vmem:[%s10957_s17 + $0x8] sm:$0xff] }
 0x250   : > { %2641 = vmatpush.bf16.msrb.mxu1 %v10336_v59 }
 0x251   : > { %v1651_v28 = vadd.f32 %v1640_v54, %v1517_v22  ;;  %v1253_v22 = vadd.f32 %v11214_v25, %v11192_v8  ;;  %v10344_v25 = vld [vmem:[%s10957_s17 + $0x10] sm:$0xff] }
 0x252   : > { %v1759_v29 = vpop.f32.mrf.mxu2 }
 0x253   : > { %v1779_v30 = vadd.f32 %v1759_v29, %v11219_v43  ;;  %v2139_v7 = vpop.f32.mrf.mxu1  ;;  %v1512_v54 = vadd.f32 %v11225_v57, %v1253_v22 }
 0x254   : > { %2642 = vmatpush.bf16.msrb.mxu1 %v10335_v4 }
 0x256   : > { %v11255_v31 = vpop.f32.mrf.mxu3 }
 0x258   : > { %2643 = vmatpush.bf16.msrb.mxu1 %v10334_v10 }
 0x25a   : > { %v1761_v18 = vpop.f32.mrf.mxu2 }
 0x25b   : > { %v2141_v23 = vpop.f32.mrf.mxu1 }
 0x25e   : > { %v2005_v36 = vpop.f32.mrf.mxu3 }
 0x25f   : > { %v2025_v37 = vadd.f32 %v2005_v36, %v1779_v30 }
 0x261   : > { %v2159_v39 = vadd.f32 %v2139_v7, %v2025_v37  ;;  %v10345_v7 = vld [vmem:[%s10957_s17 + $0x18] sm:$0xff] }
 0x262   : > { %v1764_v41 = vpop.f32.mrf.mxu2 }
 0x263   : > { %v1781_v42 = vadd.f32 %v1764_v41, %v11230_v24  ;;  %v10347_v24 = vld [vmem:[#allocation4 + $0x88] sm:$0xff]  ;;  %v2144_v35 = vpop.f32.mrf.mxu1 }
 0x264   : > { %2770 = vmatpush.bf16.msrb.mxu2 %v10347_v24 }
 0x266   : > { %v2007_v44 = vpop.f32.mrf.mxu3 }
 0x268   : > { %2771 = vmatpush.bf16.msrb.mxu2 %v10346_v0 }
 0x26a   : > { %v11258_v43 = vpop.f32.mrf.mxu2 }
 0x26b   : > { %2772 = vmatmul.bf16.vlgmr.msrb.gmra.mxu2 %v10342_v6 }
 0x26e   : > { %v2010_v46 = vpop.f32.mrf.mxu3 }
 0x26f   : > { %v11260_v12 = vadd.f32 %v2010_v46, %v1781_v42 }
 0x272   : > { %v1769_v53 = vpop.f32.mrf.mxu2 }
 0x273   : > { %v1783_v55 = vadd.f32 %v1769_v53, %v1649_v2 }
 0x276   : > { %v2012_v58 = vpop.f32.mrf.mxu3 }
 0x27a   : > { %v11262_v60 = vpop.f32.mrf.mxu2 }
 0x27b   : > { %2777 = vmatmul.bf16.gmra.mxu2 %v10343_v21 }
 0x27e   : > { %v2015_v56 = vpop.f32.mrf.mxu3 }
 0x27f   : > { %v11264_v61 = vadd.f32 %v2015_v56, %v1783_v55 }
 0x282   : > { %v1774_v63 = vpop.f32.mrf.mxu2 }
 0x283   : > { %v1785_v5 = vadd.f32 %v1774_v63, %v1651_v28  ;;  %v1646_v28 = vadd.f32 %v11217_v34, %v1512_v54  ;;  %v1514_v34 = vadd.f32 %v11239_v38, %v1258_v51  ;;  %v2161_v38 = vadd.f32 %v2144_v35, %v11260_v12  ;;  %v10361_v35 = vld [vmem:[#allocation4 + $0xf8] sm:$0xff] }
 0x284   : > { %2947 = vmatpush.bf16.msra.mxu3 %v10361_v35 }
 0x285   : > { %v1780_v30 = vadd.f32 %v1761_v18, %v1646_v28  ;;  %v1648_v52 = vadd.f32 %v11232_v26, %v1514_v34  ;;  %v1263_v26 = vadd.f32 %v11241_v47, %v11198_v33 }
 0x286   : > { %v11269_v2 = vpop.f32.mrf.mxu3 }
 0x287   : > { %v2026_v36 = vadd.f32 %v2007_v44, %v1780_v30  ;;  %v2146_v44 = vpop.f32.mrf.mxu1  ;;  %v1782_v24 = vadd.f32 %v11258_v43, %v1648_v52  ;;  %v10357_v52 = vld [vmem:[#allocation4 + $0xd8] sm:$0xff] }
 0x289   : > { %v2160_v41 = vadd.f32 %v2141_v23, %v2026_v36  ;;  %v2028_v56 = vadd.f32 %v2012_v58, %v1782_v24 }
 0x28a   : > { %v11271_v9 = vpop.f32.mrf.mxu2 }
 0x28b   : > { %2782 = vmatmul.bf16.gmra.mxu2 %v10344_v25  ;;  %v2162_v4 = vadd.f32 %v2146_v44, %v2028_v56 }
 0x28e   : > { %v2020_v15 = vpop.f32.mrf.mxu3 }
 0x28f   : > { %v11273_v16 = vadd.f32 %v2020_v15, %v1785_v5  ;;  %v2149_v0 = vpop.f32.mrf.mxu1 }
 0x292   : > { %v2273_v19 = vpop.f32.mrf.mxu2 }
 0x293   : > { %v2293_v40 = vadd.f32 %v2273_v19, %v2159_v39  ;;  %v1516_v19 = vadd.f32 %v11250_v13, %v1263_v26  ;;  %v2163_v13 = vadd.f32 %v2149_v0, %v11264_v61  ;;  %v10388_v39 = vld [vmem:[#allocation6 + $0x2b0] sm:$0xff] }
 0x295   : > { %v1650_v58 = vadd.f32 %v11248_v11, %v1516_v19  ;;  %v10360_v11 = vld [vmem:[#allocation4 + $0xf0] sm:$0xff]  ;;  %v11314_v19 = vld [vmem:[#allocation8 + $0x3] ss:$0 sm:$0xff] }
 0x296   : > { %v11278_v27 = vpop.f32.mrf.mxu3  ;;  %2948 = vmatpush.bf16.msra.mxu3 %v10360_v11 }
 0x297   : > { %v2151_v54 = vpop.f32.mrf.mxu1  ;;  %v1784_v28 = vadd.f32 %v11262_v60, %v1650_v58  ;;  %v1268_v60 = vadd.f32 %v11252_v20, %v11212_v14 }
 0x299   : > { %v2030_v47 = vadd.f32 %v11269_v2, %v1784_v28  ;;  %v1518_v61 = vadd.f32 %v11255_v31, %v1268_v60 }
 0x29a   : > { %v2275_v29 = vpop.f32.mrf.mxu2 }
 0x29b   : > { %v2294_v57 = vadd.f32 %v2275_v29, %v2160_v41  ;;  %2787 = vmatmul.bf16.gmra.mxu2 %v10345_v7  ;;  %v10355_v7 = vld [vmem:[#allocation4 + $0xc8] sm:$0xff] }
 0x29e   : > { %v2519_v32 = vpop.f32.mrf.mxu3 }
 0x29f   : > { %v2539_v42 = vadd.f32 %v2519_v32, %v2293_v40  ;;  %v10389_v32 = vld [vmem:[#allocation6 + $0x2b8] sm:$0xff]  ;;  %v2164_v40 = vadd.f32 %v2151_v54, %v2030_v47 }
 0x2a0   : > { %3347 = vmatpush.bf16.msrb.mxu0 %v10389_v32 }
 0x2a1   : > { %v2549_v18 = vadd.f32 %v11282_v45, %v2539_v42 }
 0x2a2   : > { %v2278_v8 = vpop.f32.mrf.mxu2 }
 0x2a3   : > { %v2557_v53 = vmax.f32 %v2549_v18, 0.0  ;;  %v2295_v63 = vadd.f32 %v2278_v8, %v2161_v38  ;;  %v10359_v8 = vld [vmem:[#allocation4 + $0xe8] sm:$0xff]  ;;  %v10358_v18 = vld [vmem:[#allocation4 + $0xe0] sm:$0xff] }
 0x2a4   : > { %3348 = vmatpush.bf16.msrb.mxu0 %v10388_v39  ;;  %2949 = vmatpush.bf16.msra.mxu3 %v10359_v8 }
 0x2a6   : > { %v2521_v46 = vpop.f32.mrf.mxu3 }
 0x2a7   : > { %v2540_v49 = vadd.f32 %v2521_v46, %v2294_v57  ;;  %v2154_v57 = vpop.f32.mrf.mxu1 }
 0x2a8   : > { %2950 = vmatpush.bf16.msra.mxu3 %v10358_v18 }
 0x2a9   : > { %v2550_v37 = vadd.f32 %v11282_v45, %v2540_v49  ;;  %v1652_v49 = vadd.f32 %v11266_v62, %v1518_v61 }
 0x2aa   : > { %v2280_v59 = vpop.f32.mrf.mxu2 }
 0x2ab   : > { %v2558_v55 = vmax.f32 %v2550_v37, 0.0  ;;  %v2296_v10 = vadd.f32 %v2280_v59, %v2162_v4  ;;  %v1786_v20 = vadd.f32 %v11271_v9, %v1652_v49  ;;  %v10385_v49 = vld [vmem:[#allocation6 + $0x298] sm:$0xff] }
 0x2ac   : > { %2951 = vmatpush.bf16.msra.mxu3 %v10357_v52 }
 0x2ad   : > { %v2565_v48 = vpack.c.bf16 %v2558_v55, %v2557_v53  ;;  %v2032_v31 = vadd.f32 %v11278_v27, %v1786_v20  ;;  %v2165_v55 = vadd.f32 %v2154_v57, %v11273_v16  ;;  %v10387_v27 = vld [vmem:[#allocation6 + $0x2a8] sm:$0xff]  ;;  %v10356_v16 = vld [vmem:[#allocation4 + $0xd0] sm:$0xff] }
 0x2ae   : > { %v2524_v3 = vpop.f32.mrf.mxu3  ;;  %3349 = vmatpush.bf16.msrb.mxu0 %v10387_v27 }
 0x2af   : > { %2644 = vmatmul.bf16.vlgmr.msrb.gmra.mxu1 %v2565_v48  ;;  %v2541_v5 = vadd.f32 %v2524_v3, %v2295_v63  ;;  %v2156_v24 = vpop.f32.mrf.mxu1 }
 0x2b0   : > { %v2166_v3 = vadd.f32 %v2156_v24, %v2032_v31  ;;  %2952 = vmatpush.bf16.msra.mxu3 %v10356_v16  ;;  %v10381_v24 = vld [vmem:[#allocation6 + $0x278] sm:$0xff] }
 0x2b1   : > { %v2551_v43 = vadd.f32 %v11282_v45, %v2541_v5  ;;  %3448 = vmatpush.bf16.msra.mxu1 %v10381_v24  ;;  %v10403_v24 = vld [vmem:[#allocation6 + $0x308] sm:$0xff] }
 0x2b2   : > { %v2283_v6 = vpop.f32.mrf.mxu2 }
 0x2b3   : > { %v2559_v22 = vmax.f32 %v2551_v43, 0.0  ;;  %v2297_v36 = vadd.f32 %v2283_v6, %v2163_v13  ;;  %v11316_v43 = vld [vmem:[#allocation8 + $0x2] ss:$0 sm:$0xff] }
 0x2b4   : > { %2953 = vmatpush.bf16.msra.mxu3 %v10355_v7 }
 0x2b6   : > { %v2526_v15 = vpop.f32.mrf.mxu3 }
 0x2b7   : > { %v2542_v21 = vadd.f32 %v2526_v15, %v2296_v10  ;;  %v10354_v10 = vld [vmem:[#allocation4 + $0xc0] sm:$0xff] }
 0x2b8   : > { %2954 = vmatpush.bf16.msra.mxu3 %v10354_v10 }
 0x2b9   : > { %v2552_v12 = vadd.f32 %v11282_v45, %v2542_v21  ;;  %v10386_v21 = vld [vmem:[#allocation6 + $0x2a0] sm:$0xff] }
 0x2ba   : > { %v2285_v30 = vpop.f32.mrf.mxu2  ;;  %3350 = vmatpush.bf16.msrb.mxu0 %v10386_v21 }
 0x2bb   : > { %v2560_v23 = vmax.f32 %v2552_v12, 0.0  ;;  %v2298_v42 = vadd.f32 %v2285_v30, %v2164_v40 }
 0x2bd   : > { %v2566_v29 = vpack.c.bf16 %v2560_v23, %v2559_v22 }
 0x2be   : > { %v2529_v33 = vpop.f32.mrf.mxu3  ;;  %3351 = vmatpush.bf16.msrb.mxu0 %v10385_v49  ;;  %v10405_v49 = vld [vmem:[#allocation6 + $0x318] sm:$0xff] }
 0x2bf   : > { %2649 = vmatmul.bf16.gmra.mxu1 %v2566_v29  ;;  %v2543_v41 = vadd.f32 %v2529_v33, %v2297_v36 }
 0x2c1   : > { %v2553_v25 = vadd.f32 %v11282_v45, %v2543_v41 }
 0x2c2   : > { %v2288_v46 = vpop.f32.mrf.mxu2 }
 0x2c3   : > { %v2561_v44 = vmax.f32 %v2553_v25, 0.0  ;;  %v2299_v59 = vadd.f32 %v2288_v46, %v2165_v55 }
 0x2c6   : > { %v2531_v2 = vpop.f32.mrf.mxu3 }
 0x2c7   : > { %v2544_v51 = vadd.f32 %v2531_v2, %v2298_v42 }
 0x2c9   : > { %v2554_v34 = vadd.f32 %v11282_v45, %v2544_v51 }
 0x2ca   : > { %v2290_v48 = vpop.f32.mrf.mxu2 }
 0x2cb   : > { %v2562_v14 = vmax.f32 %v2554_v34, 0.0  ;;  %v2300_v62 = vadd.f32 %v2290_v48, %v2166_v3  ;;  %v10397_v48 = vld [vmem:[#allocation6 + $0x2f8] sm:$0xff]  ;;  %v10383_v3 = vld [vmem:[#allocation6 + $0x288] sm:$0xff] }
 0x2cc   : > { %3617 = vmatpush.bf16.msra.mxu2 %v10397_v48  ;;  %v10390_v48 = vld [vmem:[#allocation6 + $0x2c0] sm:$0xff] }
 0x2cd   : > { %v2567_v37 = vpack.c.bf16 %v2562_v14, %v2561_v44 }
 0x2ce   : > { %v2534_v53 = vpop.f32.mrf.mxu3 }
 0x2cf   : > { %2654 = vmatmul.bf16.gmra.mxu1 %v2567_v37  ;;  %v2545_v56 = vadd.f32 %v2534_v53, %v2299_v59  ;;  %v10384_v59 = vld [vmem:[#allocation6 + $0x290] sm:$0xff] }
 0x2d0   : > { %3352 = vmatpush.bf16.msrb.mxu0 %v10384_v59 }
 0x2d1   : > { %v2555_v63 = vadd.f32 %v11282_v45, %v2545_v56  ;;  %v10380_v56 = vld [vmem:[#allocation6 + $0x270] sm:$0xff] }
 0x2d2   : > { %3449 = vmatpush.bf16.msra.mxu1 %v10380_v56 }
 0x2d3   : > { %v2563_v4 = vmax.f32 %v2555_v63, 0.0 }
 0x2d4   : > { %3353 = vmatpush.bf16.msrb.mxu0 %v10383_v3 }
 0x2d6   : > { %v2536_v38 = vpop.f32.mrf.mxu3 }
 0x2d7   : > { %v2546_v9 = vadd.f32 %v2536_v38, %v2300_v62 }
 0x2d9   : > { %v2556_v0 = vadd.f32 %v11282_v45, %v2546_v9 }
 0x2db   : > { %v2564_v5 = vmax.f32 %v2556_v0, 0.0 }
 0x2dd   : > { %v2568_v6 = vpack.c.bf16 %v2564_v5, %v2563_v4 }
 0x2df   : > { %2659 = vmatmul.bf16.gmra.mxu1 %v2568_v6 }
 0x2ee   : > { %v2773_v26 = vpop.f32.mrf.mxu2 }
 0x2ef   : > { %v2774_v12 = vadd.f32 %v11314_v19, %v2773_v26 }
 0x2f6   : > { %v2775_v15 = vpop.f32.mrf.mxu2 }
 0x2f7   : > { %v2776_v29 = vadd.f32 %v11314_v19, %v2775_v15 }
 0x2fe   : > { %v2778_v22 = vpop.f32.mrf.mxu2 }
 0x2ff   : > { %v2779_v40 = vadd.f32 %v11314_v19, %v2778_v22 }
 0x306   : > { %v2780_v32 = vpop.f32.mrf.mxu2 }
 0x307   : > { %v2781_v25 = vadd.f32 %v11314_v19, %v2780_v32 }
 0x30e   : > { %v2783_v2 = vpop.f32.mrf.mxu2 }
 0x30f   : > { %v2784_v20 = vadd.f32 %v11314_v19, %v2783_v2  ;;  %v10394_v2 = vld [vmem:[#allocation6 + $0x2e0] sm:$0xff] }
 0x316   : > { %v2785_v53 = vpop.f32.mrf.mxu2 }
 0x317   : > { %v2786_v63 = vadd.f32 %v11314_v19, %v2785_v53  ;;  %v10391_v53 = vld [vmem:[#allocation6 + $0x2c8] sm:$0xff] }
 0x31e   : > { %v2788_v4 = vpop.f32.mrf.mxu2 }
 0x31f   : > { %v2789_v26 = vadd.f32 %v11314_v19, %v2788_v4  ;;  %v3076_v4 = vld [vmem:[#allocation3 + $0xc] sm:$0x1] }
 0x32c   : > { %v2645_v45 = vpop.f32.mrf.mxu1 }
 0x32d   : > { %v2646_v58 = vadd.f32 %v11316_v43, %v2645_v45 }
 0x32f   : > { %v2793_v23 = vadd.f32 %v2774_v12, %v2646_v58  ;;  %v2790_v12 = vpop.f32.mrf.mxu2 }
 0x331   : > { %v2801_v28 = vmax.f32 %v2793_v23, 0.0  ;;  %v2791_v23 = vadd.f32 %v11314_v19, %v2790_v12  ;;  %v10378_v19 = vld [vmem:[#allocation6 + $0x260] sm:$0xff]  ;;  %v3477_v12 = vld [vmem:[#allocation3] sm:$0xe] }
 0x333   : > { %v11322_v47 = vpack.c.bf16 %v2801_v28, %v2801_v28 }
 0x334   : > { %v2647_v54 = vpop.f32.mrf.mxu1 }
 0x335   : > { %v2648_v30 = vadd.f32 %v11316_v43, %v2647_v54  ;;  %v2883_v39 = vunpack.c.l.b16 %v11322_v47 }
 0x337   : > { %v2794_v33 = vadd.f32 %v2776_v29, %v2648_v30 }
 0x339   : > { %v2802_v13 = vmax.f32 %v2794_v33, 0.0 }
 0x33b   : > { %v11324_v35 = vpack.c.bf16 %v2802_v13, %v2802_v13 }
 0x33c   : > { %v2650_v36 = vpop.f32.mrf.mxu1 }
 0x33d   : > { %v2884_v11 = vunpack.c.l.b16 %v11324_v35  ;;  %v2651_v41 = vadd.f32 %v11316_v43, %v2650_v36 }
 0x33f   : > { %v2891_v60 = vpack.c.b16 %v2884_v11, %v2883_v39  ;;  %v2795_v42 = vadd.f32 %v2779_v40, %v2651_v41  ;;  %v10379_v39 = vld [vmem:[#allocation6 + $0x268] sm:$0xff]  ;;  %v10409_v11 = vld [vmem:[#allocation6 + $0x338] sm:$0xff]  ;;  %v10396_v40 = vld [vmem:[#allocation6 + $0x2f0] sm:$0xff] }
 0x340   : > { %v10382_v41 = vld [vmem:[#allocation6 + $0x280] sm:$0xff]  ;;  %3450 = vmatpush.bf16.msra.mxu1 %v10379_v39  ;;  %3751 = vmatpush.bf16.msrb.mxu3 %v10409_v11 }
 0x341   : > { %2955 = vmatmul.bf16.vlgmr.msra.gmra.mxu3 %v2891_v60  ;;  %v2803_v61 = vmax.f32 %v2795_v42, 0.0  ;;  %3618 = vmatpush.bf16.msra.mxu2 %v10396_v40  ;;  %v10395_v60 = vld [vmem:[#allocation6 + $0x2e8] sm:$0xff]  ;;  %v10377_v42 = vld [vmem:[#allocation6 + $0x258] sm:$0xff]  ;;  %v3079_v40 = vld [vmem:[#allocation3 + $0x10] sm:$0xf] }
 0x342   : > { %3354 = vmatpush.bf16.msrb.mxu0 %v10382_v41  ;;  %v3082_v41 = vld [vmem:[#allocation3 + $0x14] sm:$0x1] }
 0x343   : > { %v11332_v46 = vpack.c.bf16 %v2803_v61, %v2803_v61  ;;  %v10376_v61 = vld [vmem:[#allocation6 + $0x250] sm:$0xff] }
 0x344   : > { %v2652_v8 = vpop.f32.mrf.mxu1  ;;  %3451 = vmatpush.bf16.msra.mxu1 %v10378_v19 }
 0x345   : > { %v2653_v51 = vadd.f32 %v11316_v43, %v2652_v8  ;;  %v2885_v14 = vunpack.c.l.b16 %v11332_v46  ;;  %3619 = vmatpush.bf16.msra.mxu2 %v10395_v60  ;;  %v10407_v8 = vld [vmem:[#allocation6 + $0x328] sm:$0xff] }
 0x347   : > { %v2796_v57 = vadd.f32 %v2781_v25, %v2653_v51  ;;  %v10406_v25 = vld [vmem:[#allocation6 + $0x320] sm:$0xff]  ;;  %v10393_v51 = vld [vmem:[#allocation6 + $0x2d8] sm:$0xff] }
 0x348   : > { %3452 = vmatpush.bf16.msra.mxu1 %v10377_v42 }
 0x349   : > { %v2804_v34 = vmax.f32 %v2796_v57, 0.0  ;;  %3620 = vmatpush.bf16.msra.mxu2 %v10394_v2  ;;  %v11358_v57 = vld [vmem:[#allocation8 + $0x4] ss:$0 sm:$0xff] }
 0x34b   : > { %v11334_v18 = vpack.c.bf16 %v2804_v34, %v2804_v34  ;;  %v10375_v34 = vld [vmem:[#allocation6 + $0x248] sm:$0xff] }
 0x34c   : > { %v2655_v44 = vpop.f32.mrf.mxu1  ;;  %3453 = vmatpush.bf16.msra.mxu1 %v10376_v61 }
 0x34d   : > { %v2656_v37 = vadd.f32 %v11316_v43, %v2655_v44  ;;  %v2886_v52 = vunpack.c.l.b16 %v11334_v18  ;;  %3621 = vmatpush.bf16.msra.mxu2 %v10393_v51  ;;  %v10392_v44 = vld [vmem:[#allocation6 + $0x2d0] sm:$0xff] }
 0x34f   : > { %v2892_v31 = vpack.c.b16 %v2886_v52, %v2885_v14  ;;  %v2797_v55 = vadd.f32 %v2784_v20, %v2656_v37  ;;  %v10374_v37 = vld [vmem:[#allocation6 + $0x240] sm:$0xff]  ;;  %v10404_v52 = vld [vmem:[#allocation6 + $0x310] sm:$0xff] }
 0x350   : > { %3454 = vmatpush.bf16.msra.mxu1 %v10375_v34 }
 0x351   : > { %2960 = vmatmul.bf16.gmra.mxu3 %v2892_v31  ;;  %v2805_v38 = vmax.f32 %v2797_v55, 0.0  ;;  %3622 = vmatpush.bf16.msra.mxu2 %v10392_v44 }
 0x353   : > { %v11342_v5 = vpack.c.bf16 %v2805_v38, %v2805_v38 }
 0x354   : > { %v2657_v62 = vpop.f32.mrf.mxu1  ;;  %3455 = vmatpush.bf16.msra.mxu1 %v10374_v37 }
 0x355   : > { %v2658_v9 = vadd.f32 %v11316_v43, %v2657_v62  ;;  %v2887_v7 = vunpack.c.l.b16 %v11342_v5  ;;  %3623 = vmatpush.bf16.msra.mxu2 %v10391_v53 }
 0x357   : > { %v2798_v0 = vadd.f32 %v2786_v63, %v2658_v9  ;;  %v10402_v63 = vld [vmem:[#allocation6 + $0x300] sm:$0xff]  ;;  %v3121_v9 = vld [vmem:[#allocation3] sm:$0xf] }
 0x359   : > { %v2806_v6 = vmax.f32 %v2798_v0, 0.0  ;;  %v3073_v0 = vld [vmem:[#allocation3 + $0x8] sm:$0xf]  ;;  %3624 = vmatpush.bf16.msra.mxu2 %v10390_v48 }
 0x35b   : > { %v11344_v27 = vpack.c.bf16 %v2806_v6, %v2806_v6 }
 0x35c   : > { %v2660_v16 = vpop.f32.mrf.mxu1 }
 0x35d   : > { %v2661_v10 = vadd.f32 %v11316_v43, %v2660_v16  ;;  %v2888_v15 = vunpack.c.l.b16 %v11344_v27 }
 0x35f   : > { %v2893_v21 = vpack.c.b16 %v2888_v15, %v2887_v7  ;;  %v2799_v45 = vadd.f32 %v2789_v26, %v2661_v10  ;;  %v3155_v26 = vshrl.u32 %v3121_v9, 16  ;;  %v3158_v10 = vshll.u32 %v3121_v9, 16 }
 0x361   : > { %2965 = vmatmul.bf16.gmra.mxu3 %v2893_v21  ;;  %v2807_v22 = vmax.f32 %v2799_v45, 0.0 }
 0x363   : > { %v11352_v29 = vpack.c.bf16 %v2807_v22, %v2807_v22 }
 0x364   : > { %v2662_v58 = vpop.f32.mrf.mxu1 }
 0x365   : > { %v2663_v54 = vadd.f32 %v11316_v43, %v2662_v58  ;;  %v2889_v13 = vunpack.c.l.b16 %v11352_v29  ;;  %v10408_v43 = vld [vmem:[#allocation6 + $0x330] sm:$0xff] }
 0x366   : > { %3752 = vmatpush.bf16.msrb.mxu3 %v10408_v43  ;;  %v3146_v58 = vld [vmem:[#allocation3 + $0x4] sm:$0x1] }
 0x367   : > { %v2800_v28 = vadd.f32 %v2791_v23, %v2663_v54  ;;  %v10417_v23 = vld [vmem:[#allocation6 + $0x378] sm:$0xff]  ;;  %v3506_v11 = vrot.slane %v3146_v58, 5  ;;  %v3164_v61 = vshll.u32 %v3146_v58, 16 }
 0x368   : > { %3997 = vmatpush.bf16.msra.mxu0 %v10417_v23 }
 0x369   : > { %v2808_v30 = vmax.f32 %v2800_v28, 0.0  ;;  %v9133_v28 = vrot.slane %v3477_v12, 9 }
 0x36a   : > { %3753 = vmatpush.bf16.msrb.mxu3 %v10407_v8  ;;  %v9087_v8 = vld [vmem:[#allocation3] sm:$0xf] }
 0x36b   : > { %v11354_v33 = vpack.c.bf16 %v2808_v30, %v2808_v30  ;;  %v3157_v30 = vrot.slane %v3155_v26, 4 }
 0x36d   : > { %v2890_v32 = vunpack.c.l.b16 %v11354_v33 }
 0x36e   : > { %3754 = vmatpush.bf16.msrb.mxu3 %v10406_v25 }
 0x36f   : > { %v2894_v36 = vpack.c.b16 %v2890_v32, %v2889_v13  ;;  %v3160_v13 = vrot.slane %v3158_v10, 5 }
 0x371   : > { %2970 = vmatmul.bf16.gmra.mxu3 %v2894_v36  ;;  %v3161_v2 = vor.u32 %v3160_v13, %v3157_v30 }
 0x372   : > { %3755 = vmatpush.bf16.msrb.mxu3 %v10405_v49 }
 0x376   : > { %3756 = vmatpush.bf16.msrb.mxu3 %v10404_v52 }
 0x37a   : > { %3757 = vmatpush.bf16.msrb.mxu3 %v10403_v24 }
 0x37e   : > { %3758 = vmatpush.bf16.msrb.mxu3 %v10402_v63 }
 0x3c4   : > { %v2956_v14 = vpop.f32.mrf.mxu3 }
 0x3c5   : > { %v2957_v20 = vadd.f32 %v11358_v57, %v2956_v14  ;;  %v3507_v14 = vsel %vm11367_vm11, %v9133_v28, %v3506_v11 }
 0x3c6   : > { %v3553_v24 = vunpack.c.l.b16 %v3507_v14 }
 0x3c7   : > { %v2976_v31 = vmax.f32 %v2957_v20, 0.0 }
 0x3c9   : > { %v2984_v55 = vpack.c.bf16 %v2976_v31, %v2976_v31 }
 0x3cb   : > { %v2993_v59 = vshrl.u32 %v2984_v55, 16  ;;  %v2996_v62 = vshll.u32 %v2984_v55, 16 }
 0x3cc   : > { %v2958_v3 = vpop.f32.mrf.mxu3 }
 0x3cd   : > { %v2995_v56 = vrot.slane %v2993_v59, 7  ;;  %v2959_v38 = vadd.f32 %v11358_v57, %v2958_v3  ;;  %v3162_v3 = vrot.slane %v3161_v2, 4  ;;  %v10415_v2 = vld [vmem:[#allocation6 + $0x368] sm:$0xff] }
 0x3cf   : > { %v2998_v6 = vor.u32 %v2996_v62, %v2995_v56  ;;  %v2999_v16 = vrot.slane %v2995_v56, 4  ;;  %v2977_v7 = vmax.f32 %v2959_v38, 0.0  ;;  %v3166_v56 = vrot.slane %v3164_v61, 5  ;;  %v10416_v62 = vld [vmem:[#allocation6 + $0x370] sm:$0xff] }
 0x3d0   : > { %3998 = vmatpush.bf16.msra.mxu0 %v10416_v62 }
 0x3d1   : > { %v3074_v15 = vsel %vm11037_vm5, %v2998_v6, %v3073_v0  ;;  %v3077_v21 = vsel %vm10897_vm2, %v2999_v16, %v3076_v4  ;;  %v2985_v45 = vpack.c.bf16 %v2977_v7, %v2977_v7  ;;  %v3085_v4 = vld [vmem:[#allocation3 + $0x18] sm:$0xf]  ;;  %v3088_v6 = vld [vmem:[#allocation3 + $0x1c] sm:$0x1]  ;;  %v3167_v13 = vsel %vm11126_vm8, %v3162_v3, %v3166_v56 }
 0x3d2   : > { %3075 = vst [vmem:[#allocation3 + $0x8] sm:$0xf] %v3074_v15 }
 0x3d3   : > { %3078 = vst [vmem:[#allocation3 + $0xc] sm:$0x1] %v3077_v21  ;;  %v3001_v22 = vshrl.u32 %v2985_v45, 16  ;;  %v3004_v36 = vshll.u32 %v2985_v45, 16 }
 0x3d4   : > { %v2961_v54 = vpop.f32.mrf.mxu3  ;;  %3999 = vmatpush.bf16.msra.mxu0 %v10415_v2 }
 0x3d5   : > { %v3003_v32 = vrot.slane %v3001_v22, 7  ;;  %v2962_v39 = vadd.f32 %v11358_v57, %v2961_v54 }
 0x3d7   : > { %v3006_v43 = vor.u32 %v3004_v36, %v3003_v32  ;;  %v3007_v60 = vrot.slane %v3003_v32, 4  ;;  %v2978_v42 = vmax.f32 %v2962_v39, 0.0 }
 0x3d9   : > { %v3080_v25 = vsel %vm11037_vm5, %v3006_v43, %v3079_v40  ;;  %v3083_v51 = vsel %vm10897_vm2, %v3007_v60, %v3082_v41  ;;  %v2986_v34 = vpack.c.bf16 %v2978_v42, %v2978_v42  ;;  %v10370_v49 = vld [vmem:[#allocation3 + $0x4] sm:$0xf0]  ;;  %v3283_v42 = vunpack.c.l.b16 %v3167_v13 }
 0x3da   : > { %v3478_v44 = vld [vmem:[#allocation3 + $0x8] sm:$0xe]  ;;  %3081 = vst [vmem:[#allocation3 + $0x10] sm:$0xf] %v3080_v25  ;;  %v9088_v20 = vor.u32 %v10370_v49, %v9087_v8  ;;  %v3147_v37 = vld [vmem:[#allocation3 + $0xc] sm:$0x1] }
 0x3db   : > { %v9134_v52 = vrot.slane %v3478_v44, 9  ;;  %3084 = vst [vmem:[#allocation3 + $0x14] sm:$0x1] %v3083_v51  ;;  %v3009_v53 = vshrl.u32 %v2986_v34, 16  ;;  %v3510_v31 = vrot.slane %v3147_v37, 5  ;;  %v3012_v55 = vshll.u32 %v2986_v34, 16 }
 0x3dc   : > { %v2963_v59 = vpop.f32.mrf.mxu3  ;;  %3456 = vmatmul.bf16.vlgmr.msra.gmra.mxu1 %v9088_v20  ;;  %v3122_v48 = vld [vmem:[#allocation3 + $0x8] sm:$0xf]  ;;  %v3178_v58 = vshll.u32 %v3147_v37, 16  ;;  %v3091_v51 = vld [vmem:[#allocation3 + $0x20] sm:$0xf] }
 0x3dd   : > { %v3011_v38 = vrot.slane %v3009_v53, 7  ;;  %v2964_v63 = vadd.f32 %v11358_v57, %v2963_v59  ;;  %v3511_v9 = vsel %vm11367_vm11, %v9134_v52, %v3510_v31  ;;  %v3169_v0 = vshrl.u32 %v3122_v48, 16  ;;  %v9175_v28 = vld [vmem:[#allocation3 + $0x8] sm:$0xf]  ;;  %v3094_v44 = vld [vmem:[#allocation3 + $0x24] sm:$0x1] }
 0x3de   : > { %v3554_v16 = vunpack.c.l.b16 %v3511_v9  ;;  %v3172_v7 = vshll.u32 %v3122_v48, 16  ;;  %v3180_v60 = vrot.slane %v3178_v58, 5 }
 0x3df   : > { %v3014_v26 = vor.u32 %v3012_v55, %v3011_v38  ;;  %v3015_v10 = vrot.slane %v3011_v38, 4  ;;  %v2979_v15 = vmax.f32 %v2964_v63, 0.0  ;;  %v3171_v21 = vrot.slane %v3169_v0, 4 }
 0x3e0   : > { %v3561_v45 = vpack.c.b16 %v3554_v16, %v3553_v24  ;;  %v3174_v12 = vrot.slane %v3172_v7, 5 }
 0x3e1   : > { %v3086_v22 = vsel %vm11037_vm5, %v3014_v26, %v3085_v4  ;;  %v3089_v23 = vsel %vm10897_vm2, %v3015_v10, %v3088_v6  ;;  %v2987_v54 = vpack.c.bf16 %v2979_v15, %v2979_v15  ;;  %v10398_v30 = vld [vmem:[#allocation3 + $0xc] sm:$0xf0] }
 0x3e2   : > { %3087 = vst [vmem:[#allocation3 + $0x18] sm:$0xf] %v3086_v22  ;;  %3625 = vmatmul.bf16.vlgmr.msra.gmra.mxu2 %v3561_v45  ;;  %v9176_v32 = vor.u32 %v10398_v30, %v9175_v28  ;;  %v3175_v36 = vor.u32 %v3174_v12, %v3171_v21  ;;  %v3479_v39 = vld [vmem:[#allocation3 + $0x10] sm:$0xe]  ;;  %v3148_v40 = vld [vmem:[#allocation3 + $0x14] sm:$0x1] }
 0x3e3   : > { %3090 = vst [vmem:[#allocation3 + $0x1c] sm:$0x1] %v3089_v23  ;;  %v3017_v11 = vshrl.u32 %v2987_v54, 16  ;;  %v3123_v8 = vld [vmem:[#allocation3 + $0x10] sm:$0xf]  ;;  %v3020_v25 = vshll.u32 %v2987_v54, 16 }
 0x3e4   : > { %v2966_v41 = vpop.f32.mrf.mxu3  ;;  %3759 = vmatmul.bf16.vlgmr.msrb.gmra.mxu3 %v9176_v32  ;;  %v3176_v43 = vrot.slane %v3175_v36, 4  ;;  %v3183_v49 = vshrl.u32 %v3123_v8, 16  ;;  %v9135_v20 = vrot.slane %v3479_v39, 9  ;;  %v3514_v37 = vrot.slane %v3148_v40, 5  ;;  %v9091_v63 = vld [vmem:[#allocation3 + $0x10] sm:$0xf] }
 0x3e5   : > { %v3019_v61 = vrot.slane %v3017_v11, 7  ;;  %v2967_v34 = vadd.f32 %v11358_v57, %v2966_v41  ;;  %v3186_v52 = vshll.u32 %v3123_v8, 16  ;;  %v3192_v26 = vshll.u32 %v3148_v40, 16  ;;  %v10425_v23 = vld [vmem:[#allocation6 + $0x3b8] sm:$0xff]  ;;  %v10414_v36 = vld [vmem:[#allocation6 + $0x360] sm:$0xff] }
 0x3e6   : > { %v3181_v14 = vsel %vm11126_vm8, %v3176_v43, %v3180_v60  ;;  %v3185_v24 = vrot.slane %v3183_v49, 4  ;;  %v3515_v15 = vsel %vm11367_vm11, %v9135_v20, %v3514_v37  ;;  %v3097_v28 = vld [vmem:[#allocation3 + $0x28] sm:$0xf]  ;;  %v3100_v11 = vld [vmem:[#allocation3 + $0x2c] sm:$0x1]  ;;  %4171 = vmatpush.bf16.msrb.mxu1 %v10425_v23  ;;  %4000 = vmatpush.bf16.msra.mxu0 %v10414_v36 }
 0x3e7   : > { %v3022_v53 = vor.u32 %v3020_v25, %v3019_v61  ;;  %v3023_v31 = vrot.slane %v3019_v61, 4  ;;  %v2980_v55 = vmax.f32 %v2967_v34, 0.0  ;;  %v3284_v59 = vunpack.c.l.b16 %v3181_v14  ;;  %v10437_v39 = vld [vmem:[#allocation6 + $0x3f8] sm:$0xff]  ;;  %v10436_v34 = vld [vmem:[#allocation6 + $0x3f0] sm:$0xff] }
 0x3e8   : > { %v3188_v48 = vrot.slane %v3186_v52, 5  ;;  %v3555_v40 = vunpack.c.l.b16 %v3515_v15  ;;  %v3194_v43 = vrot.slane %v3192_v26, 5  ;;  %v10445_v8 = vld [vmem:[#allocation6 + $0x438] sm:$0xff]  ;;  %4306 = vmatpush.bf16.msrb.mxu2 %v10437_v39  ;;  %v10412_v26 = vld [vmem:[#allocation6 + $0x350] sm:$0xff] }
 0x3e9   : > { %v3092_v3 = vsel %vm11037_vm5, %v3022_v53, %v3091_v51  ;;  %v3095_v56 = vsel %vm10897_vm2, %v3023_v31, %v3094_v44  ;;  %v2988_v62 = vpack.c.bf16 %v2980_v55, %v2980_v55  ;;  %v3291_v38 = vpack.c.b16 %v3284_v59, %v3283_v42  ;;  %v10371_v9 = vld [vmem:[#allocation3 + $0x14] sm:$0xf0]  ;;  %v10424_v42 = vld [vmem:[#allocation6 + $0x3b0] sm:$0xff]  ;;  %v10413_v49 = vld [vmem:[#allocation6 + $0x358] sm:$0xff]  ;;  %4552 = vmatpush.bf16.msra.mxu3 %v10445_v8 }
 0x3ea   : > { %v3480_v0 = vld [vmem:[#allocation3 + $0x18] sm:$0xe]  ;;  %3093 = vst [vmem:[#allocation3 + $0x20] sm:$0xf] %v3092_v3  ;;  %v9092_v4 = vor.u32 %v10371_v9, %v9091_v63  ;;  %v11393_v6 = vld [vmem:[#allocation3 + $0x1c] sm:$0x1]  ;;  %v3189_v7 = vor.u32 %v3188_v48, %v3185_v24  ;;  %4172 = vmatpush.bf16.msrb.mxu1 %v10424_v42  ;;  %4001 = vmatpush.bf16.msra.mxu0 %v10413_v49 }
 0x3eb   : > { %v9136_v16 = vrot.slane %v3480_v0, 9  ;;  %3096 = vst [vmem:[#allocation3 + $0x24] sm:$0x1] %v3095_v56  ;;  %v3025_v10 = vshrl.u32 %v2988_v62, 16  ;;  %3355 = vmatmul.bf16.vlgmr.msrb.gmra.mxu0 %v3291_v38  ;;  %v3518_v21 = vrot.slane %v11393_v6, 5  ;;  %v3028_v45 = vshll.u32 %v2988_v62, 16 }
 0x3ec   : > { %v2968_v12 = vpop.f32.mrf.mxu3  ;;  %3461 = vmatmul.bf16.gmra.mxu1 %v9092_v4  ;;  %v3124_v58 = vld [vmem:[#allocation3 + $0x18] sm:$0xf]  ;;  %v3190_v22 = vrot.slane %v3189_v7, 4  ;;  %v3206_v20 = vshll.u32 %v11393_v6, 16  ;;  %v10444_v24 = vld [vmem:[#allocation6 + $0x430] sm:$0xff]  ;;  %4307 = vmatpush.bf16.msrb.mxu2 %v10436_v34  ;;  %v10442_v34 = vld [vmem:[#allocation6 + $0x420] sm:$0xff] }
 0x3ed   : > { %v3027_v54 = vrot.slane %v3025_v10, 7  ;;  %v2969_v30 = vadd.f32 %v11358_v57, %v2968_v12  ;;  %v3519_v13 = vsel %vm11367_vm11, %v9136_v16, %v3518_v21  ;;  %v3197_v32 = vshrl.u32 %v3124_v58, 16  ;;  %v9179_v31 = vld [vmem:[#allocation3 + $0x18] sm:$0xf]  ;;  %v3103_v21 = vld [vmem:[#allocation3 + $0x30] sm:$0xf]  ;;  %4553 = vmatpush.bf16.msra.mxu3 %v10444_v24 }
 0x3ee   : > { %v3556_v41 = vunpack.c.l.b16 %v3519_v13  ;;  %v3200_v60 = vshll.u32 %v3124_v58, 16  ;;  %v3195_v59 = vsel %vm11126_vm8, %v3190_v22, %v3194_v43  ;;  %v10423_v62 = vld [vmem:[#allocation6 + $0x3a8] sm:$0xff]  ;;  %v3208_v6 = vrot.slane %v3206_v20, 5  ;;  %v3106_v22 = vld [vmem:[#allocation3 + $0x34] sm:$0x1]  ;;  %4002 = vmatpush.bf16.msra.mxu0 %v10412_v26 }
 0x3ef   : > { %v3030_v2 = vor.u32 %v3028_v45, %v3027_v54  ;;  %v3031_v61 = vrot.slane %v3027_v54, 4  ;;  %v2981_v25 = vmax.f32 %v2969_v30, 0.0  ;;  %v3199_v51 = vrot.slane %v3197_v32, 4  ;;  %v10435_v9 = vld [vmem:[#allocation6 + $0x3e8] sm:$0xff]  ;;  %4173 = vmatpush.bf16.msrb.mxu1 %v10423_v62  ;;  %v10422_v13 = vld [vmem:[#allocation6 + $0x3a0] sm:$0xff] }
 0x3f0   : > { %v3562_v44 = vpack.c.b16 %v3556_v41, %v3555_v40  ;;  %v3202_v14 = vrot.slane %v3200_v60, 5  ;;  %v3285_v16 = vunpack.c.l.b16 %v3195_v59  ;;  %v10443_v58 = vld [vmem:[#allocation6 + $0x428] sm:$0xff]  ;;  %4308 = vmatpush.bf16.msrb.mxu2 %v10435_v9  ;;  %v10434_v40 = vld [vmem:[#allocation6 + $0x3e0] sm:$0xff] }
 0x3f1   : > { %v3098_v37 = vsel %vm11037_vm5, %v3030_v2, %v3097_v28  ;;  %v3101_v52 = vsel %vm10897_vm2, %v3031_v61, %v3100_v11  ;;  %v2989_v53 = vpack.c.bf16 %v2981_v25, %v2981_v25  ;;  %v10399_v55 = vld [vmem:[#allocation3 + $0x1c] sm:$0xf0]  ;;  %4554 = vmatpush.bf16.msra.mxu3 %v10443_v58 }
 0x3f2   : > { %3099 = vst [vmem:[#allocation3 + $0x28] sm:$0xf] %v3098_v37  ;;  %3630 = vmatmul.bf16.gmra.mxu2 %v3562_v44  ;;  %v9180_v48 = vor.u32 %v10399_v55, %v9179_v31  ;;  %v3203_v3 = vor.u32 %v3202_v14, %v3199_v51  ;;  %v3481_v56 = vld [vmem:[#allocation3 + $0x20] sm:$0xe]  ;;  %v11408_v63 = vld [vmem:[#allocation3 + $0x24] sm:$0x1] }
 0x3f3   : > { %3102 = vst [vmem:[#allocation3 + $0x2c] sm:$0x1] %v3101_v52  ;;  %v3033_v38 = vshrl.u32 %v2989_v53, 16  ;;  %v3125_v7 = vld [vmem:[#allocation3 + $0x20] sm:$0xf]  ;;  %v3036_v15 = vshll.u32 %v2989_v53, 16  ;;  %4174 = vmatpush.bf16.msrb.mxu1 %v10422_v13 }
 0x3f4   : > { %v2971_v0 = vpop.f32.mrf.mxu3  ;;  %3764 = vmatmul.bf16.gmra.mxu3 %v9180_v48  ;;  %v3204_v4 = vrot.slane %v3203_v3, 4  ;;  %v3211_v12 = vshrl.u32 %v3125_v7, 16  ;;  %v9137_v54 = vrot.slane %v3481_v56, 9  ;;  %v3522_v28 = vrot.slane %v11408_v63, 5  ;;  %v9095_v41 = vld [vmem:[#allocation3 + $0x20] sm:$0xf]  ;;  %4309 = vmatpush.bf16.msrb.mxu2 %v10434_v40 }
 0x3f5   : > { %v3035_v10 = vrot.slane %v3033_v38, 7  ;;  %v2972_v45 = vadd.f32 %v11358_v57, %v2971_v0  ;;  %v3214_v30 = vshll.u32 %v3125_v7, 16  ;;  %v10421_v37 = vld [vmem:[#allocation6 + $0x398] sm:$0xff]  ;;  %v3220_v3 = vshll.u32 %v11408_v63, 16  ;;  %v10411_v56 = vld [vmem:[#allocation6 + $0x348] sm:$0xff]  ;;  %4555 = vmatpush.bf16.msra.mxu3 %v10442_v34  ;;  %v10440_v40 = vld [vmem:[#allocation6 + $0x410] sm:$0xff] }
 0x3f6   : > { %v3209_v23 = vsel %vm11126_vm8, %v3204_v4, %v3208_v6  ;;  %v3213_v43 = vrot.slane %v3211_v12, 4  ;;  %v3523_v53 = vsel %vm11367_vm11, %v9137_v54, %v3522_v28  ;;  %v10433_v55 = vld [vmem:[#allocation6 + $0x3d8] sm:$0xff]  ;;  %v3109_v38 = vld [vmem:[#allocation3 + $0x38] sm:$0xf]  ;;  %4003 = vmatpush.bf16.msra.mxu0 %v10411_v56  ;;  %v11440_v34 = vld [vmem:[#allocation3 + $0x10] sm:$0xe] }
 0x3f7   : > { %v3038_v32 = vor.u32 %v3036_v15, %v3035_v10  ;;  %v3039_v36 = vrot.slane %v3035_v10, 4  ;;  %v2982_v39 = vmax.f32 %v2972_v45, 0.0  ;;  %v3286_v11 = vunpack.c.l.b16 %v3209_v23  ;;  %v10441_v6 = vld [vmem:[#allocation6 + $0x418] sm:$0xff]  ;;  %4175 = vmatpush.bf16.msrb.mxu1 %v10421_v37  ;;  %v4345_v37 = vld [vmem:[#allocation3 + $0x18] sm:$0xf] }
 0x3f8   : > { %v3216_v60 = vrot.slane %v3214_v30, 5  ;;  %v3557_v7 = vunpack.c.l.b16 %v3523_v53  ;;  %4310 = vmatpush.bf16.msrb.mxu2 %v10433_v55 }
 0x3f9   : > { %v3104_v42 = vsel %vm11037_vm5, %v3038_v32, %v3103_v21  ;;  %v3107_v8 = vsel %vm10897_vm2, %v3039_v36, %v3106_v22  ;;  %v2990_v2 = vpack.c.bf16 %v2982_v39, %v2982_v39  ;;  %v3292_v61 = vpack.c.b16 %v3286_v11, %v3285_v16  ;;  %v10372_v25 = vld [vmem:[#allocation3 + $0x24] sm:$0xf0]  ;;  %v3112_v16 = vld [vmem:[#allocation3 + $0x3c] sm:$0x1]  ;;  %v10420_v21 = vld [vmem:[#allocation6 + $0x390] sm:$0xff]  ;;  %4556 = vmatpush.bf16.msra.mxu3 %v10441_v6 }
 0x3fa   : > { %v3482_v51 = vld [vmem:[#allocation3 + $0x28] sm:$0xe]  ;;  %3105 = vst [vmem:[#allocation3 + $0x30] sm:$0xf] %v3104_v42  ;;  %v9096_v49 = vor.u32 %v10372_v25, %v9095_v41  ;;  %v11418_v44 = vld [vmem:[#allocation3 + $0x2c] sm:$0x1]  ;;  %v3217_v20 = vor.u32 %v3216_v60, %v3213_v43 }
 0x3fb   : > { %v9138_v14 = vrot.slane %v3482_v51, 9  ;;  %3108 = vst [vmem:[#allocation3 + $0x34] sm:$0x1] %v3107_v8  ;;  %v3041_v52 = vshrl.u32 %v2990_v2, 16  ;;  %3360 = vmatmul.bf16.gmra.mxu0 %v3292_v61  ;;  %v3526_v31 = vrot.slane %v11418_v44, 5  ;;  %v3044_v59 = vshll.u32 %v2990_v2, 16  ;;  %4176 = vmatpush.bf16.msrb.mxu1 %v10420_v21 }
 0x3fc   : > { %v2973_v24 = vpop.f32.mrf.mxu3  ;;  %3466 = vmatmul.bf16.gmra.mxu1 %v9096_v49  ;;  %v3126_v48 = vld [vmem:[#allocation3 + $0x28] sm:$0xf]  ;;  %v3218_v10 = vrot.slane %v3217_v20, 4  ;;  %v10410_v22 = vld [vmem:[#allocation6 + $0x340] sm:$0xff]  ;;  %v3234_v28 = vshll.u32 %v11418_v44, 16  ;;  %v3222_v11 = vrot.slane %v3220_v3, 5 }
 0x3fd   : > { %v3043_v62 = vrot.slane %v3041_v52, 7  ;;  %v2974_v9 = vadd.f32 %v11358_v57, %v2973_v24  ;;  %v3527_v0 = vsel %vm11367_vm11, %v9138_v14, %v3526_v31  ;;  %v3225_v4 = vshrl.u32 %v3126_v48, 16  ;;  %v10432_v57 = vld [vmem:[#allocation6 + $0x3d0] sm:$0xff]  ;;  %v9183_v36 = vld [vmem:[#allocation3 + $0x28] sm:$0xf]  ;;  %v10419_v42 = vld [vmem:[#allocation6 + $0x388] sm:$0xff]  ;;  %4004 = vmatpush.bf16.msra.mxu0 %v10410_v22  ;;  %4557 = vmatpush.bf16.msra.mxu3 %v10440_v40 }
 0x3fe   : > { %v3558_v26 = vunpack.c.l.b16 %v3527_v0  ;;  %v3228_v15 = vshll.u32 %v3126_v48, 16  ;;  %v3223_v2 = vsel %vm11126_vm8, %v3218_v10, %v3222_v11  ;;  %4311 = vmatpush.bf16.msrb.mxu2 %v10432_v57  ;;  %v10431_v25 = vld [vmem:[#allocation6 + $0x3c8] sm:$0xff]  ;;  %v11438_v51 = vld [vmem:[#allocation3 + $0x14] sm:$0x1]  ;;  %v3115_v49 = vld [vmem:[#allocation3 + $0x40] sm:$0xf] }
 0x3ff   : > { %v3046_v63 = vor.u32 %v3044_v59, %v3043_v62  ;;  %v3047_v45 = vrot.slane %v3043_v62, 4  ;;  %v2983_v12 = vmax.f32 %v2974_v9, 0.0  ;;  %v3227_v58 = vrot.slane %v3225_v4, 4  ;;  %v10439_v59 = vld [vmem:[#allocation6 + $0x408] sm:$0xff]  ;;  %v3118_v24 = vld [vmem:[#allocation3 + $0x44] sm:$0x1]  ;;  %4177 = vmatpush.bf16.msrb.mxu1 %v10419_v42 }
 0x400   : > { %v3563_v23 = vpack.c.b16 %v3558_v26, %v3557_v7  ;;  %v3230_v54 = vrot.slane %v3228_v15, 5  ;;  %v3236_v14 = vrot.slane %v3234_v28, 5  ;;  %v3287_v3 = vunpack.c.l.b16 %v3223_v2  ;;  %v4343_v7 = vld [vmem:[#allocation3 + $0x10] sm:$0xf] }
 0x401   : > { %v3110_v30 = vsel %vm11037_vm5, %v3046_v63, %v3109_v38  ;;  %v3113_v13 = vsel %vm10897_vm2, %v3047_v45, %v3112_v16  ;;  %v2991_v32 = vpack.c.bf16 %v2983_v12, %v2983_v12  ;;  %v10400_v39 = vld [vmem:[#allocation3 + $0x2c] sm:$0xf0]  ;;  %v9254_v15 = vrot.slane %v11440_v34, 9  ;;  %4558 = vmatpush.bf16.msra.mxu3 %v10439_v59  ;;  %v10453_v34 = vld [vmem:[#allocation6 + $0x478] sm:$0xff] }
 0x402   : > { %3111 = vst [vmem:[#allocation3 + $0x38] sm:$0xf] %v3110_v30  ;;  %3635 = vmatmul.bf16.gmra.mxu2 %v3563_v23  ;;  %v9184_v41 = vor.u32 %v10400_v39, %v9183_v36  ;;  %v3231_v43 = vor.u32 %v3230_v54, %v3227_v58  ;;  %v11432_v60 = vld [vmem:[#allocation3 + $0x30] sm:$0xe]  ;;  %v11436_v61 = vld [vmem:[#allocation3 + $0x34] sm:$0x1]  ;;  %4726 = vmatpush.bf16.msrb.mxu0 %v10453_v34 }
 0x403   : > { %3114 = vst [vmem:[#allocation3 + $0x3c] sm:$0x1] %v3113_v13  ;;  %v3049_v8 = vshrl.u32 %v2991_v32, 16  ;;  %v3127_v20 = vld [vmem:[#allocation3 + $0x30] sm:$0xf]  ;;  %v3052_v53 = vshll.u32 %v2991_v32, 16  ;;  %4312 = vmatpush.bf16.msrb.mxu2 %v10431_v25 }
 0x404   : > { %3769 = vmatmul.bf16.gmra.mxu3 %v9184_v41  ;;  %v3232_v44 = vrot.slane %v3231_v43, 4  ;;  %v3239_v31 = vshrl.u32 %v3127_v20, 16  ;;  %v3242_v55 = vshll.u32 %v3127_v20, 16  ;;  %v9139_v56 = vrot.slane %v11432_v60, 9  ;;  %v10418_v38 = vld [vmem:[#allocation6 + $0x380] sm:$0xff] }
 0x405   : > { %v3051_v52 = vrot.slane %v3049_v8, 7  ;;  %v3530_v62 = vrot.slane %v11436_v61, 5  ;;  %v10430_v16 = vld [vmem:[#allocation6 + $0x3c0] sm:$0xff]  ;;  %v4064_v21 = vrot.slane %v11438_v51, 5  ;;  %v4374_v63 = vshrl.u32 %v4345_v37, 16  ;;  %4178 = vmatpush.bf16.msrb.mxu1 %v10418_v38 }
 0x406   : > { %v3237_v48 = vsel %vm11126_vm8, %v3232_v44, %v3236_v14  ;;  %v3241_v6 = vrot.slane %v3239_v31, 4  ;;  %v9099_v26 = vld [vmem:[#allocation3 + $0x30] sm:$0xf]  ;;  %v3244_v10 = vrot.slane %v3242_v55, 5  ;;  %v4377_v54 = vshll.u32 %v4345_v37, 16 }
 0x407   : > { %v3054_v9 = vor.u32 %v3052_v53, %v3051_v52  ;;  %v3055_v0 = vrot.slane %v3051_v52, 4  ;;  %v3288_v4 = vunpack.c.l.b16 %v3237_v48  ;;  %v10438_v23 = vld [vmem:[#allocation6 + $0x400] sm:$0xff]  ;;  %v11452_v36 = vld [vmem:[#allocation3 + $0xc] sm:$0x1]  ;;  %v4034_v39 = vld [vmem:[#allocation3 + $0x8] sm:$0xe]  ;;  %v3531_v40 = vsel %vm11367_vm11, %v9139_v56, %v3530_v62  ;;  %4313 = vmatpush.bf16.msrb.mxu2 %v10430_v16 }
 0x408   : > { %v3245_v32 = vor.u32 %v3244_v10, %v3241_v6  ;;  %v4360_v11 = vshrl.u32 %v4343_v7, 16  ;;  %v3248_v60 = vshll.u32 %v11436_v61, 16  ;;  %v4363_v2 = vshll.u32 %v4343_v7, 16  ;;  %4559 = vmatpush.bf16.msra.mxu3 %v10438_v23  ;;  %v10452_v61 = vld [vmem:[#allocation6 + $0x470] sm:$0xff]  ;;  %v3790_v48 = vld [vmem:[#allocation3 + $0x10] sm:$0xf] }
 0x409   : > { %v3116_v45 = vsel %vm11037_vm5, %v3054_v9, %v3115_v49  ;;  %v3119_v12 = vsel %vm10897_vm2, %v3055_v0, %v3118_v24  ;;  %v3293_v58 = vpack.c.b16 %v3288_v4, %v3287_v3  ;;  %v10373_v57 = vld [vmem:[#allocation3 + $0x34] sm:$0xf0]  ;;  %v4376_v25 = vrot.slane %v4374_v63, 4  ;;  %v11460_v62 = vld [vmem:[#allocation3 + $0x1c] sm:$0x1]  ;;  %4727 = vmatpush.bf16.msrb.mxu0 %v10452_v61 }
 0x40a   : > { %v3484_v22 = vld [vmem:[#allocation3 + $0x38] sm:$0xe]  ;;  %3117 = vst [vmem:[#allocation3 + $0x40] sm:$0xf] %v3116_v45  ;;  %v9100_v28 = vor.u32 %v10373_v57, %v9099_v26  ;;  %v3153_v30 = vld [vmem:[#allocation3 + $0x3c] sm:$0x1]  ;;  %v3559_v37 = vunpack.c.l.b16 %v3531_v40  ;;  %v4065_v26 = vsel %vm11367_vm11, %v9254_v15, %v4064_v21 }
 0x40b   : > { %v9140_v13 = vrot.slane %v3484_v22, 9  ;;  %3120 = vst [vmem:[#allocation3 + $0x44] sm:$0x1] %v3119_v12  ;;  %3365 = vmatmul.bf16.gmra.mxu0 %v3293_v58  ;;  %v3534_v41 = vrot.slane %v3153_v30, 5  ;;  %v3128_v43 = vld [vmem:[#allocation3 + $0x38] sm:$0xf] }
 0x40c   : > { %3471 = vmatmul.bf16.gmra.mxu1 %v9100_v28  ;;  %v3253_v42 = vshrl.u32 %v3128_v43, 16  ;;  %v3256_v8 = vshll.u32 %v3128_v43, 16  ;;  %v3246_v44 = vrot.slane %v3245_v32, 4  ;;  %v3262_v14 = vshll.u32 %v3153_v30, 16  ;;  %v3788_v0 = vld [vmem:[#allocation3 + $0x8] sm:$0xf] }
 0x40d   : > { %v3535_v49 = vsel %vm11367_vm11, %v9140_v13, %v3534_v41  ;;  %v4379_v20 = vrot.slane %v4377_v54, 5  ;;  %v3250_v55 = vrot.slane %v3248_v60, 5  ;;  %v9253_v59 = vrot.slane %v4034_v39, 9  ;;  %v9187_v4 = vld [vmem:[#allocation3 + $0x38] sm:$0xf] }
 0x40e   : > { %v3560_v52 = vunpack.c.l.b16 %v3535_v49  ;;  %v3255_v53 = vrot.slane %v3253_v42, 4  ;;  %v3258_v31 = vrot.slane %v3256_v8, 5  ;;  %v4060_v24 = vrot.slane %v11452_v36, 5  ;;  %v11466_v12 = vld [vmem:[#allocation3 + $0x14] sm:$0x1] }
 0x40f   : > { %v4362_v38 = vrot.slane %v4360_v11, 4  ;;  %v4365_v9 = vrot.slane %v4363_v2, 5  ;;  %v3251_v16 = vsel %vm11126_vm8, %v3246_v44, %v3250_v55  ;;  %v3264_v7 = vrot.slane %v3262_v14, 5  ;;  %v4349_v2 = vld [vmem:[#allocation3 + $0x28] sm:$0xf] }
 0x410   : > { %v3564_v3 = vpack.c.b16 %v3560_v52, %v3559_v37  ;;  %v3259_v56 = vor.u32 %v3258_v31, %v3255_v53  ;;  %v4380_v10 = vor.u32 %v4379_v20, %v4376_v25  ;;  %v3819_v58 = vshrl.u32 %v3790_v48, 16  ;;  %v4347_v14 = vld [vmem:[#allocation3 + $0x20] sm:$0xf]  ;;  %v11476_v52 = vld [vmem:[#allocation3 + $0x24] sm:$0x1] }
 0x411   : > { %v10401_v6 = vld [vmem:[#allocation3 + $0x3c] sm:$0xf0]  ;;  %v3822_v57 = vshll.u32 %v3790_v48, 16  ;;  %v3805_v22 = vshrl.u32 %v3788_v0, 16  ;;  %v3808_v23 = vshll.u32 %v3788_v0, 16  ;;  %v4061_v28 = vsel %vm11367_vm11, %v9253_v59, %v4060_v24  ;;  %v10451_v24 = vld [vmem:[#allocation6 + $0x468] sm:$0xff] }
 0x412   : > { %3640 = vmatmul.bf16.gmra.mxu2 %v3564_v3  ;;  %v9188_v63 = vor.u32 %v10401_v6, %v9187_v4  ;;  %v3260_v45 = vrot.slane %v3259_v56, 4  ;;  %v4366_v30 = vor.u32 %v4365_v9, %v4362_v38  ;;  %v4383_v15 = vshll.u32 %v11460_v62, 16  ;;  %v4037_v53 = vld [vmem:[#allocation3 + $0x20] sm:$0xe]  ;;  %v11478_v59 = vld [vmem:[#allocation3 + $0x1c] sm:$0x1]  ;;  %4728 = vmatpush.bf16.msrb.mxu0 %v10451_v24 }
 0x413   : > { %v3289_v21 = vunpack.c.l.b16 %v3251_v16  ;;  %v4108_v32 = vunpack.c.l.b16 %v4065_v26  ;;  %v4369_v39 = vshll.u32 %v11466_v12, 16  ;;  %v4381_v11 = vrot.slane %v4380_v10, 4  ;;  %v4036_v56 = vld [vmem:[#allocation3 + $0x18] sm:$0xe]  ;;  %v10450_v26 = vld [vmem:[#allocation6 + $0x460] sm:$0xff] }
 0x414   : > { %3774 = vmatmul.bf16.gmra.mxu3 %v9188_v63  ;;  %v3265_v54 = vsel %vm11126_vm8, %v3260_v45, %v3264_v7  ;;  %v3821_v40 = vrot.slane %v3819_v58, 4  ;;  %v3824_v41 = vrot.slane %v3822_v57, 5  ;;  %v4107_v60 = vunpack.c.l.b16 %v4061_v28  ;;  %v10426_v0 = vld [vmem:[#allocation3 + $0x14] sm:$0xf0]  ;;  %v9295_v10 = vld [vmem:[#allocation3 + $0x10] sm:$0xf] }
 0x415   : > { %v3290_v13 = vunpack.c.l.b16 %v3265_v54  ;;  %v3807_v42 = vrot.slane %v3805_v22, 4  ;;  %v3810_v8 = vrot.slane %v3808_v23, 5  ;;  %v4367_v25 = vrot.slane %v4366_v30, 4  ;;  %v3794_v54 = vld [vmem:[#allocation3 + $0x20] sm:$0xf] }
 0x416   : > { %v4385_v34 = vrot.slane %v4383_v15, 5  ;;  %v4115_v49 = vpack.c.b16 %v4108_v32, %v4107_v60  ;;  %v4371_v44 = vrot.slane %v4369_v39, 5  ;;  %v3825_v37 = vor.u32 %v3824_v41, %v3821_v40  ;;  %v11488_v39 = vld [vmem:[#allocation3 + $0x2c] sm:$0x1]  ;;  %4729 = vmatpush.bf16.msrb.mxu0 %v10450_v26  ;;  %v11492_v41 = vld [vmem:[#allocation3 + $0x24] sm:$0x1] }
 0x417   : > { %v3294_v43 = vpack.c.b16 %v3290_v13, %v3289_v21  ;;  %v4402_v31 = vshrl.u32 %v4349_v2, 16  ;;  %v4405_v61 = vshll.u32 %v4349_v2, 16  ;;  %v3811_v55 = vor.u32 %v3810_v8, %v3807_v42 }
 0x418   : > { %v4386_v20 = vsel %vm11126_vm8, %v4381_v11, %v4385_v34  ;;  %v4372_v48 = vsel %vm11126_vm8, %v4367_v25, %v4371_v44  ;;  %v3828_v3 = vshll.u32 %v11438_v51, 16  ;;  %v4388_v38 = vshrl.u32 %v4347_v14, 16  ;;  %v3792_v11 = vld [vmem:[#allocation3 + $0x18] sm:$0xf] }
 0x419   : > { %v4391_v9 = vshll.u32 %v4347_v14, 16  ;;  %v4489_v4 = vunpack.c.l.b16 %v4386_v20  ;;  %v3814_v6 = vshll.u32 %v11452_v36, 16  ;;  %v9256_v16 = vrot.slane %v4037_v53, 9 }
 0x41a   : > { %v4072_v7 = vrot.slane %v11476_v52, 5  ;;  %v3826_v63 = vrot.slane %v3825_v37, 4  ;;  %v4404_v45 = vrot.slane %v4402_v31, 4  ;;  %v4407_v58 = vrot.slane %v4405_v61, 5 }
 0x41b   : > { %3370 = vmatmul.bf16.gmra.mxu0 %v3294_v43  ;;  %v4488_v57 = vunpack.c.l.b16 %v4372_v48  ;;  %v3812_v22 = vrot.slane %v3811_v55, 4  ;;  %v9255_v23 = vrot.slane %v4036_v56, 9  ;;  %v4068_v51 = vrot.slane %v11478_v59, 5  ;;  %v4353_v48 = vld [vmem:[#allocation3 + $0x38] sm:$0xf] }
 0x41c   : > { %4179 = vmatmul.bf16.vlgmr.msrb.gmra.mxu1 %v4115_v49  ;;  %v9296_v28 = vor.u32 %v10426_v0, %v9295_v10  ;;  %v3830_v30 = vrot.slane %v3828_v3, 5  ;;  %v4390_v15 = vrot.slane %v4388_v38, 4  ;;  %v4393_v21 = vrot.slane %v4391_v9, 5  ;;  %v11502_v10 = vld [vmem:[#allocation3 + $0x34] sm:$0x1] }
 0x41d   : > { %v4496_v36 = vpack.c.b16 %v4489_v4, %v4488_v57  ;;  %v3816_v13 = vrot.slane %v3814_v6, 5  ;;  %v4073_v32 = vsel %vm11367_vm11, %v9256_v16, %v4072_v7  ;;  %v4408_v43 = vor.u32 %v4407_v58, %v4404_v45  ;;  %v4039_v16 = vld [vmem:[#allocation3 + $0x30] sm:$0xe] }
 0x41e   : > { %v3831_v40 = vsel %vm11126_vm8, %v3826_v63, %v3830_v30  ;;  %v3847_v60 = vshrl.u32 %v3794_v54, 16  ;;  %v3850_v42 = vshll.u32 %v3794_v54, 16  ;;  %v4069_v2 = vsel %vm11367_vm11, %v9255_v23, %v4068_v51  ;;  %v4351_v63 = vld [vmem:[#allocation3 + $0x30] sm:$0xf]  ;;  %v10427_v23 = vld [vmem:[#allocation3 + $0x24] sm:$0xf0] }
 0x41f   : > { %v3817_v8 = vsel %vm11126_vm8, %v3812_v22, %v3816_v13  ;;  %v4394_v25 = vor.u32 %v4393_v21, %v4390_v15  ;;  %v4411_v34 = vshll.u32 %v11488_v39, 16  ;;  %v3833_v49 = vshrl.u32 %v3792_v11, 16  ;;  %v10449_v22 = vld [vmem:[#allocation6 + $0x458] sm:$0xff] }
 0x420   : > { %v3836_v44 = vshll.u32 %v3792_v11, 16  ;;  %v3934_v14 = vunpack.c.l.b16 %v3831_v40  ;;  %v4110_v20 = vunpack.c.l.b16 %v4073_v32  ;;  %v4397_v37 = vshll.u32 %v11492_v41, 16  ;;  %v11508_v30 = vld [vmem:[#allocation3 + $0x2c] sm:$0x1]  ;;  %4730 = vmatpush.bf16.msrb.mxu0 %v10449_v22  ;;  %v9299_v40 = vld [vmem:[#allocation3 + $0x20] sm:$0xf] }
 0x421   : > { %v4409_v53 = vrot.slane %v4408_v43, 4  ;;  %v3849_v31 = vrot.slane %v3847_v60, 4  ;;  %v3852_v61 = vrot.slane %v3850_v42, 5  ;;  %v3933_v55 = vunpack.c.l.b16 %v3817_v8 }
 0x422   : > { %4314 = vmatmul.bf16.vlgmr.msrb.gmra.mxu2 %v9296_v28  ;;  %v4109_v24 = vunpack.c.l.b16 %v4069_v2  ;;  %v4395_v3 = vrot.slane %v4394_v25, 4  ;;  %v4413_v56 = vrot.slane %v4411_v34, 5  ;;  %v3835_v38 = vrot.slane %v3833_v49, 4  ;;  %v3798_v34 = vld [vmem:[#allocation3 + $0x30] sm:$0xf] }
 0x423   : > { %v3838_v9 = vrot.slane %v3836_v44, 5  ;;  %v3941_v0 = vpack.c.b16 %v3934_v14, %v3933_v55  ;;  %v4399_v6 = vrot.slane %v4397_v37, 5  ;;  %v3853_v26 = vor.u32 %v3852_v61, %v3849_v31  ;;  %v3796_v55 = vld [vmem:[#allocation3 + $0x28] sm:$0xf] }
 0x424   : > { %4560 = vmatmul.bf16.vlgmr.msra.gmra.mxu3 %v4496_v36  ;;  %v4116_v4 = vpack.c.b16 %v4110_v20, %v4109_v24  ;;  %v4414_v7 = vsel %vm11126_vm8, %v4409_v53, %v4413_v56  ;;  %v4430_v45 = vshrl.u32 %v4353_v48, 16  ;;  %v4433_v58 = vshll.u32 %v4353_v48, 16  ;;  %v4038_v36 = vld [vmem:[#allocation3 + $0x28] sm:$0xe]  ;;  %v11512_v20 = vld [vmem:[#allocation3 + $0x3c] sm:$0x1] }
 0x425   : > { %v3842_v57 = vshll.u32 %v11478_v59, 16  ;;  %v4400_v51 = vsel %vm11126_vm8, %v4395_v3, %v4399_v6  ;;  %v3839_v54 = vor.u32 %v3838_v9, %v3835_v38  ;;  %v3856_v28 = vshll.u32 %v11476_v52, 16  ;;  %v10448_v59 = vld [vmem:[#allocation6 + $0x450] sm:$0xff]  ;;  %v11518_v38 = vld [vmem:[#allocation3 + $0x34] sm:$0x1] }
 0x426   : > { %v9258_v15 = vrot.slane %v4039_v16, 9  ;;  %v4491_v21 = vunpack.c.l.b16 %v4414_v7  ;;  %v4080_v13 = vrot.slane %v11502_v10, 5  ;;  %v4416_v32 = vshrl.u32 %v4351_v63, 16  ;;  %4731 = vmatpush.bf16.msrb.mxu0 %v10448_v59 }
 0x427   : > { %v4419_v11 = vshll.u32 %v4351_v63, 16  ;;  %v3854_v43 = vrot.slane %v3853_v26, 4  ;;  %v4432_v60 = vrot.slane %v4430_v45, 4  ;;  %v4435_v42 = vrot.slane %v4433_v58, 5 }
 0x428   : > { %v9300_v8 = vor.u32 %v10427_v23, %v9299_v40  ;;  %v4490_v2 = vunpack.c.l.b16 %v4400_v51  ;;  %v3844_v25 = vrot.slane %v3842_v57, 5  ;;  %v3840_v52 = vrot.slane %v3839_v54, 4 }
 0x429   : > { %v3858_v49 = vrot.slane %v3856_v28, 5  ;;  %v9257_v44 = vrot.slane %v4038_v36, 9  ;;  %v4076_v14 = vrot.slane %v11508_v30, 5  ;;  %v4081_v53 = vsel %vm11367_vm11, %v9258_v15, %v4080_v13  ;;  %v4357_v36 = vld [vmem:[#allocation3 + $0x48] sm:$0xf] }
 0x42a   : > { %v4497_v37 = vpack.c.b16 %v4491_v21, %v4490_v2  ;;  %v4418_v31 = vrot.slane %v4416_v32, 4  ;;  %v4421_v61 = vrot.slane %v4419_v11, 5  ;;  %v4436_v48 = vor.u32 %v4435_v42, %v4432_v60  ;;  %v4355_v21 = vld [vmem:[#allocation3 + $0x40] sm:$0xf]  ;;  %v11528_v60 = vld [vmem:[#allocation3 + $0x44] sm:$0x1] }
 0x42b   : > { %4005 = vmatmul.bf16.vlgmr.msra.gmra.mxu0 %v3941_v0  ;;  %v3859_v24 = vsel %vm11126_vm8, %v3854_v43, %v3858_v49  ;;  %v3875_v3 = vshrl.u32 %v3798_v34, 16  ;;  %v3878_v56 = vshll.u32 %v3798_v34, 16  ;;  %v4439_v9 = vshll.u32 %v11512_v20, 16  ;;  %v4041_v42 = vld [vmem:[#allocation3 + $0x40] sm:$0xe] }
 0x42c   : > { %4184 = vmatmul.bf16.gmra.mxu1 %v4116_v4  ;;  %v3845_v0 = vsel %vm11126_vm8, %v3840_v52, %v3844_v25  ;;  %v3861_v4 = vshrl.u32 %v3796_v55, 16  ;;  %v3864_v6 = vshll.u32 %v3796_v55, 16  ;;  %v3936_v16 = vunpack.c.l.b16 %v3859_v24  ;;  %v10447_v52 = vld [vmem:[#allocation6 + $0x448] sm:$0xff]  ;;  %v10446_v55 = vld [vmem:[#allocation6 + $0x440] sm:$0xff] }
 0x42d   : > { %v4077_v7 = vsel %vm11367_vm11, %v9257_v44, %v4076_v14  ;;  %v4112_v26 = vunpack.c.l.b16 %v4081_v53  ;;  %v4422_v63 = vor.u32 %v4421_v61, %v4418_v31  ;;  %v4425_v45 = vshll.u32 %v11518_v38, 16  ;;  %v9303_v14 = vld [vmem:[#allocation3 + $0x30] sm:$0xf]  ;;  %v11534_v61 = vld [vmem:[#allocation3 + $0x3c] sm:$0x1]  ;;  %4732 = vmatpush.bf16.msrb.mxu0 %v10447_v52 }
 0x42e   : > { %v4437_v58 = vrot.slane %v4436_v48, 4  ;;  %v3877_v57 = vrot.slane %v3875_v3, 4  ;;  %v3880_v22 = vrot.slane %v3878_v56, 5  ;;  %v3935_v23 = vunpack.c.l.b16 %v3845_v0  ;;  %v4040_v3 = vld [vmem:[#allocation3 + $0x38] sm:$0xe] }
 0x42f   : > { %v4441_v51 = vrot.slane %v4439_v9, 5  ;;  %v4111_v54 = vunpack.c.l.b16 %v4077_v7  ;;  %v3863_v28 = vrot.slane %v3861_v4, 4  ;;  %v3866_v15 = vrot.slane %v3864_v6, 5 }
 0x430   : > { %v3942_v13 = vpack.c.b16 %v3936_v16, %v3935_v23  ;;  %v4423_v32 = vrot.slane %v4422_v63, 4  ;;  %v4427_v59 = vrot.slane %v4425_v45, 5  ;;  %v3881_v43 = vor.u32 %v3880_v22, %v3877_v57  ;;  %v3802_v16 = vld [vmem:[#allocation3 + $0x40] sm:$0xf]  ;;  %v3800_v22 = vld [vmem:[#allocation3 + $0x38] sm:$0xf] }
 0x431   : > { %v4117_v11 = vpack.c.b16 %v4112_v26, %v4111_v54  ;;  %v4442_v40 = vsel %vm11126_vm8, %v4437_v58, %v4441_v51  ;;  %v4447_v2 = vshll.u32 %v4355_v21, 16  ;;  %v4458_v25 = vshrl.u32 %v4357_v36, 16  ;;  %4733 = vmatpush.bf16.msrb.mxu0 %v10446_v55  ;;  %v11540_v54 = vld [vmem:[#allocation3 + $0x44] sm:$0x1] }
 0x432   : > { %4319 = vmatmul.bf16.gmra.mxu2 %v9300_v8  ;;  %v4444_v8 = vshrl.u32 %v4355_v21, 16  ;;  %v4461_v34 = vshll.u32 %v4357_v36, 16  ;;  %v3867_v49 = vor.u32 %v3866_v15, %v3863_v28  ;;  %v3884_v44 = vshll.u32 %v11502_v10, 16  ;;  %v11542_v28 = vld [vmem:[#allocation3 + $0x4c] sm:$0x1] }
 0x433   : > { %v4428_v53 = vsel %vm11126_vm8, %v4423_v32, %v4427_v59  ;;  %v3870_v31 = vshll.u32 %v11508_v30, 16  ;;  %v4493_v24 = vunpack.c.l.b16 %v4442_v40  ;;  %v3882_v48 = vrot.slane %v3881_v43, 4 }
 0x434   : > { %4565 = vmatmul.bf16.gmra.mxu3 %v4497_v37  ;;  %v10428_v37 = vld [vmem:[#allocation3 + $0x34] sm:$0xf0]  ;;  %v9260_v56 = vrot.slane %v4041_v42, 9  ;;  %v4088_v9 = vrot.slane %v11528_v60, 5  ;;  %v4446_v0 = vrot.slane %v4444_v8, 4  ;;  %v4449_v4 = vrot.slane %v4447_v2, 5 }
 0x435   : > { %v4460_v10 = vrot.slane %v4458_v25, 4  ;;  %v4463_v6 = vrot.slane %v4461_v34, 5  ;;  %v9304_v7 = vor.u32 %v10428_v37, %v9303_v14  ;;  %v4492_v26 = vunpack.c.l.b16 %v4428_v53 }
 0x436   : > { %v3868_v63 = vrot.slane %v3867_v49, 4  ;;  %v3886_v45 = vrot.slane %v3884_v44, 5  ;;  %v3872_v30 = vrot.slane %v3870_v31, 5  ;;  %v9259_v58 = vrot.slane %v4040_v3, 9 }
 0x437   : > { %v4084_v57 = vrot.slane %v11534_v61, 5  ;;  %v4498_v23 = vpack.c.b16 %v4493_v24, %v4492_v26  ;;  %v3903_v15 = vshrl.u32 %v3802_v16, 16  ;;  %v3906_v21 = vshll.u32 %v3802_v16, 16  ;;  %v10429_v16 = vld [vmem:[#allocation3 + $0x44] sm:$0xf0] }
 0x438   : > { %v3887_v51 = vsel %vm11126_vm8, %v3882_v48, %v3886_v45  ;;  %v4089_v36 = vsel %vm11367_vm11, %v9260_v56, %v4088_v9  ;;  %v4464_v32 = vor.u32 %v4463_v6, %v4460_v10  ;;  %v3873_v59 = vsel %vm11126_vm8, %v3868_v63, %v3872_v30  ;;  %v9307_v6 = vld [vmem:[#allocation3 + $0x40] sm:$0xf] }
 0x439   : > { %v3889_v40 = vshrl.u32 %v3800_v22, 16  ;;  %v3892_v43 = vshll.u32 %v3800_v22, 16  ;;  %v3938_v42 = vunpack.c.l.b16 %v3887_v51  ;;  %v4085_v8 = vsel %vm11367_vm11, %v9259_v58, %v4084_v57 }
 0x43a   : > { %v4453_v2 = vshll.u32 %v11540_v54, 16  ;;  %v4114_v25 = vunpack.c.l.b16 %v4089_v36  ;;  %v3905_v34 = vrot.slane %v3903_v15, 4  ;;  %v3908_v52 = vrot.slane %v3906_v21, 5 }
 0x43b   : > { %4010 = vmatmul.bf16.gmra.mxu0 %v3942_v13  ;;  %v4450_v13 = vor.u32 %v4449_v4, %v4446_v0  ;;  %v3937_v49 = vunpack.c.l.b16 %v3873_v59  ;;  %v4465_v14 = vrot.slane %v4464_v32, 4  ;;  %v4113_v53 = vunpack.c.l.b16 %v4085_v8  ;;  %v4589_v32 = vld [vmem:[#allocation3 + $0x10] sm:$0xe] }
 0x43c   : > { %4189 = vmatmul.bf16.gmra.mxu1 %v4117_v11  ;;  %v4467_v11 = vshll.u32 %v11542_v28, 16  ;;  %v3891_v31 = vrot.slane %v3889_v40, 4  ;;  %v3894_v55 = vrot.slane %v3892_v43, 5  ;;  %v4455_v48 = vrot.slane %v4453_v2, 5 }
 0x43d   : > { %v4451_v44 = vrot.slane %v4450_v13, 4  ;;  %v3943_v24 = vpack.c.b16 %v3938_v42, %v3937_v49  ;;  %v4118_v3 = vpack.c.b16 %v4114_v25, %v4113_v53  ;;  %v3909_v56 = vor.u32 %v3908_v52, %v3905_v34  ;;  %v4590_v13 = vld [vmem:[#allocation3 + $0x18] sm:$0xe] }
 0x43e   : > { %v4469_v37 = vrot.slane %v4467_v11, 5  ;;  %v3895_v4 = vor.u32 %v3894_v55, %v3891_v31  ;;  %v3912_v10 = vshll.u32 %v11528_v60, 16  ;;  %v3898_v63 = vshll.u32 %v11534_v61, 16  ;;  %v4591_v55 = vld [vmem:[#allocation3 + $0x20] sm:$0xe] }
 0x43f   : > { %v4456_v9 = vsel %vm11126_vm8, %v4451_v44, %v4455_v48  ;;  %v3910_v45 = vrot.slane %v3909_v56, 4  ;;  %v9308_v30 = vor.u32 %v10429_v16, %v9307_v6  ;;  %v9374_v11 = vrot.slane %v4590_v13, 9 }
 0x440   : > { %v4470_v0 = vsel %vm11126_vm8, %v4465_v14, %v4469_v37  ;;  %v3896_v58 = vrot.slane %v3895_v4, 4  ;;  %v3914_v57 = vrot.slane %v3912_v10, 5  ;;  %v4619_v59 = vrot.slane %v11460_v62, 5  ;;  %v4592_v62 = vld [vmem:[#allocation3 + $0x28] sm:$0xe] }
 0x441   : > { %v4495_v26 = vunpack.c.l.b16 %v4470_v0  ;;  %v9373_v40 = vrot.slane %v4589_v32, 9  ;;  %v4615_v43 = vrot.slane %v11466_v12, 5  ;;  %v4627_v48 = vrot.slane %v11488_v39, 5 }
 0x442   : > { %4324 = vmatmul.bf16.gmra.mxu2 %v9304_v7  ;;  %v4494_v7 = vunpack.c.l.b16 %v4456_v9  ;;  %v3915_v51 = vsel %vm11126_vm8, %v3910_v45, %v3914_v57  ;;  %v4620_v42 = vsel %vm11367_vm11, %v9374_v11, %v4619_v59  ;;  %v9375_v0 = vrot.slane %v4591_v55, 9 }
 0x443   : > { %v3940_v15 = vunpack.c.l.b16 %v3915_v51  ;;  %v4616_v8 = vsel %vm11367_vm11, %v9373_v40, %v4615_v43  ;;  %v4663_v25 = vunpack.c.l.b16 %v4620_v42  ;;  %v4623_v4 = vrot.slane %v11492_v41, 5  ;;  %v4593_v51 = vld [vmem:[#allocation3 + $0x30] sm:$0xe] }
 0x444   : > { %4570 = vmatmul.bf16.gmra.mxu3 %v4498_v23  ;;  %v4499_v22 = vpack.c.b16 %v4495_v26, %v4494_v7  ;;  %v3900_v23 = vrot.slane %v3898_v63, 5  ;;  %v4662_v49 = vunpack.c.l.b16 %v4616_v8  ;;  %v9377_v13 = vrot.slane %v4593_v51, 9 }
 0x445   : > { %v4624_v6 = vsel %vm11367_vm11, %v9375_v0, %v4623_v4  ;;  %v4643_v55 = vrot.slane %v11542_v28, 5 }
 0x446   : > { %v3901_v60 = vsel %vm11126_vm8, %v3896_v58, %v3900_v23  ;;  %v4670_v37 = vpack.c.b16 %v4663_v25, %v4662_v49  ;;  %v4664_v63 = vunpack.c.l.b16 %v4624_v6  ;;  %v4595_v49 = vld [vmem:[#allocation3 + $0x40] sm:$0xe] }
 0x447   : > { %v3939_v21 = vunpack.c.l.b16 %v3901_v60 }
 0x449   : > { %v3944_v36 = vpack.c.b16 %v3940_v15, %v3939_v21  ;;  %v4635_v15 = vrot.slane %v11512_v20, 5 }
 0x44b   : > { %4015 = vmatmul.bf16.gmra.mxu0 %v3943_v24  ;;  %v9376_v24 = vrot.slane %v4592_v62, 9 }
 0x44c   : > { %4194 = vmatmul.bf16.gmra.mxu1 %v4118_v3 }
 0x44d   : > { %v4628_v10 = vsel %vm11367_vm11, %v9376_v24, %v4627_v48 }
 0x44e   : > { %v4665_v7 = vunpack.c.l.b16 %v4628_v10 }
 0x452   : > { %4329 = vmatmul.bf16.gmra.mxu2 %v9308_v30  ;;  %v4671_v30 = vpack.c.b16 %v4665_v7, %v4664_v63 }
 0x454   : > { %4575 = vmatmul.bf16.gmra.mxu3 %v4499_v22  ;;  %v4594_v22 = vld [vmem:[#allocation3 + $0x38] sm:$0xe] }
 0x455   : > { %v9378_v60 = vrot.slane %v4594_v22, 9  ;;  %v10368_v22 = vld [vmem:[#allocation4 + $0x130] sm:$0xff] }
 0x457   : > { %v4636_v32 = vsel %vm11367_vm11, %v9378_v60, %v4635_v15  ;;  %v10367_v15 = vld [vmem:[#allocation4 + $0x128] sm:$0xff] }
 0x458   : > { %v4667_v43 = vunpack.c.l.b16 %v4636_v32 }
 0x459   : > { %v3457_v61 = vpop.f32.mrf.mxu1 }
 0x45b   : > { %4020 = vmatmul.bf16.gmra.mxu0 %v3944_v36 }
 0x461   : > { %v11568_v34 = vpop.f32.mrf.mxu1 }
 0x465   : > { %v3626_v2 = vpop.f32.mrf.mxu2 }
 0x467   : > { %v3760_v52 = vpop.f32.mrf.mxu3 }
 0x468   : > { %v3356_v44 = vpop.f32.mrf.mxu0 }
 0x469   : > { %v3458_v14 = vadd.f32 %v3457_v61, %v3356_v44  ;;  %v3462_v56 = vpop.f32.mrf.mxu1  ;;  %v4631_v61 = vrot.slane %v11518_v38, 5  ;;  %v4596_v44 = vld [vmem:[#allocation3 + $0x48] sm:$0xe] }
 0x46a   : > { %v9380_v62 = vrot.slane %v4596_v44, 9 }
 0x46b   : > { %v3646_v53 = vadd.f32 %v3626_v2, %v3458_v14  ;;  %4734 = vmatmul.bf16.vlgmr.msrb.gmra.mxu0 %v4670_v37  ;;  %v4632_v59 = vsel %vm11367_vm11, %v9377_v13, %v4631_v61  ;;  %v9379_v37 = vrot.slane %v4595_v49, 9  ;;  %v10366_v61 = vld [vmem:[#allocation4 + $0x120] sm:$0xff] }
 0x46c   : > { %v4666_v8 = vunpack.c.l.b16 %v4632_v59  ;;  %v4644_v4 = vsel %vm11367_vm11, %v9380_v62, %v4643_v55  ;;  %v10365_v59 = vld [vmem:[#allocation4 + $0x118] sm:$0xff] }
 0x46d   : > { %v11570_v31 = vadd.f32 %v3760_v52, %v3646_v53  ;;  %v11572_v12 = vpop.f32.mrf.mxu2  ;;  %v4639_v53 = vrot.slane %v11540_v54, 5  ;;  %v4669_v6 = vunpack.c.l.b16 %v4644_v4 }
 0x46e   : > { %v4672_v25 = vpack.c.b16 %v4667_v43, %v4666_v8  ;;  %v10364_v43 = vld [vmem:[#allocation4 + $0x110] sm:$0xff] }
 0x46f   : > { %v11575_v3 = vpop.f32.mrf.mxu3  ;;  %v4640_v0 = vsel %vm11367_vm11, %v9379_v37, %v4639_v53 }
 0x470   : > { %v11577_v9 = vpop.f32.mrf.mxu0  ;;  %v4668_v10 = vunpack.c.l.b16 %v4640_v0 }
 0x471   : > { %v11584_v58 = vpop.f32.mrf.mxu1  ;;  %v3460_v62 = vadd.f32 %v11568_v34, %v11577_v9 }
 0x473   : > { %v3647_v0 = vadd.f32 %v11572_v12, %v3460_v62 }
 0x475   : > { %v3631_v16 = vpop.f32.mrf.mxu2 }
 0x477   : > { %v3765_v26 = vpop.f32.mrf.mxu3 }
 0x478   : > { %v3361_v45 = vpop.f32.mrf.mxu0 }
 0x479   : > { %v3463_v39 = vadd.f32 %v3462_v56, %v3361_v45  ;;  %v3467_v11 = vpop.f32.mrf.mxu1 }
 0x47b   : > { %v3648_v57 = vadd.f32 %v3631_v16, %v3463_v39  ;;  %4739 = vmatmul.bf16.gmra.mxu0 %v4671_v30  ;;  %v10369_v30 = vld [vmem:[#allocation4 + $0x138] sm:$0xff] }
 0x47c   : > { %4833 = vmatpush.bf16.msra.mxu1 %v10369_v30 }
 0x47d   : > { %v3782_v23 = vadd.f32 %v3765_v26, %v3648_v57  ;;  %v11586_v41 = vpop.f32.mrf.mxu2  ;;  %v4673_v26 = vpack.c.b16 %v4669_v6, %v4668_v10  ;;  %v3781_v6 = vadd.f32 %v11575_v3, %v3647_v0 }
 0x47f   : > { %v11589_v21 = vpop.f32.mrf.mxu3 }
 0x480   : > { %v11591_v36 = vpop.f32.mrf.mxu0  ;;  %4834 = vmatpush.bf16.msra.mxu1 %v10368_v22 }
 0x481   : > { %v11598_v38 = vpop.f32.mrf.mxu1  ;;  %v3465_v34 = vadd.f32 %v11584_v58, %v11591_v36 }
 0x483   : > { %v3649_v12 = vadd.f32 %v11586_v41, %v3465_v34 }
 0x484   : > { %4835 = vmatpush.bf16.msra.mxu1 %v10367_v15  ;;  %v11634_v15 = vld [vmem:[#allocation8 + $0x5] ss:$0 sm:$0xff] }
 0x485   : > { %v3636_v40 = vpop.f32.mrf.mxu2 }
 0x487   : > { %v3770_v42 = vpop.f32.mrf.mxu3 }
 0x488   : > { %v3366_v2 = vpop.f32.mrf.mxu0  ;;  %4836 = vmatpush.bf16.msra.mxu1 %v10366_v61 }
 0x489   : > { %v3468_v20 = vadd.f32 %v3467_v11, %v3366_v2  ;;  %v3472_v16 = vpop.f32.mrf.mxu1 }
 0x48b   : > { %v3650_v52 = vadd.f32 %v3636_v40, %v3468_v20  ;;  %4744 = vmatmul.bf16.gmra.mxu0 %v4672_v25 }
 0x48c   : > { %4837 = vmatpush.bf16.msra.mxu1 %v10365_v59 }
 0x48d   : > { %v3784_v14 = vadd.f32 %v3770_v42, %v3650_v52  ;;  %v11602_v24 = vpop.f32.mrf.mxu2 }
 0x48f   : > { %v11606_v56 = vpop.f32.mrf.mxu3 }
 0x490   : > { %v11604_v48 = vpop.f32.mrf.mxu0  ;;  %4838 = vmatpush.bf16.msra.mxu1 %v10364_v43 }
 0x491   : > { %v11615_v42 = vpop.f32.mrf.mxu1 }
 0x495   : > { %v3641_v63 = vpop.f32.mrf.mxu2 }
 0x497   : > { %v3775_v28 = vpop.f32.mrf.mxu3 }
 0x498   : > { %v3371_v7 = vpop.f32.mrf.mxu0 }
 0x499   : > { %v3473_v54 = vadd.f32 %v3472_v16, %v3371_v7  ;;  %v4180_v52 = vpop.f32.mrf.mxu1 }
 0x49b   : > { %v3652_v45 = vadd.f32 %v3641_v63, %v3473_v54  ;;  %4749 = vmatmul.bf16.gmra.mxu0 %v4673_v26 }
 0x49d   : > { %v3786_v39 = vadd.f32 %v3775_v28, %v3652_v45  ;;  %v11619_v20 = vpop.f32.mrf.mxu2 }
 0x49f   : > { %v11621_v25 = vpop.f32.mrf.mxu3 }
 0x4a0   : > { %v11612_v57 = vpop.f32.mrf.mxu0 }
 0x4a5   : > { %v4315_v44 = vpop.f32.mrf.mxu2 }
 0x4a7   : > { %v4561_v37 = vpop.f32.mrf.mxu3 }
 0x4a8   : > { %v4006_v51 = vpop.f32.mrf.mxu0 }
 0x4a9   : > { %v4026_v60 = vadd.f32 %v4006_v51, %v11570_v31  ;;  %v10363_v31 = vld [vmem:[#allocation4 + $0x108] sm:$0xff] }
 0x4aa   : > { %4839 = vmatpush.bf16.msra.mxu1 %v10363_v31 }
 0x4ab   : > { %v4200_v7 = vadd.f32 %v4180_v52, %v4026_v60 }
 0x4ad   : > { %v4317_v4 = vpop.f32.mrf.mxu2  ;;  %v4335_v63 = vadd.f32 %v4315_v44, %v4200_v7 }
 0x4af   : > { %v4563_v16 = vpop.f32.mrf.mxu3  ;;  %v4581_v9 = vadd.f32 %v4561_v37, %v4335_v63 }
 0x4b0   : > { %v4008_v13 = vpop.f32.mrf.mxu0 }
 0x4b1   : > { %v4027_v54 = vadd.f32 %v4008_v13, %v3781_v6  ;;  %v3783_v13 = vadd.f32 %v11589_v21, %v3649_v12 }
 0x4b5   : > { %v4320_v45 = vpop.f32.mrf.mxu2 }
 0x4b7   : > { %v4566_v22 = vpop.f32.mrf.mxu3 }
 0x4b8   : > { %v4011_v32 = vpop.f32.mrf.mxu0 }
 0x4b9   : > { %v4028_v11 = vadd.f32 %v4011_v32, %v3782_v23  ;;  %v10362_v23 = vld [vmem:[#allocation4 + $0x100] sm:$0xff] }
 0x4ba   : > { %4840 = vmatpush.bf16.msra.mxu1 %v10362_v23 }
 0x4bd   : > { %v4322_v43 = vpop.f32.mrf.mxu2 }
 0x4bf   : > { %v4568_v44 = vpop.f32.mrf.mxu3 }
 0x4c0   : > { %v4013_v40 = vpop.f32.mrf.mxu0 }
 0x4c1   : > { %v4029_v31 = vadd.f32 %v4013_v40, %v3783_v13 }
 0x4c8   : > { %v4016_v8 = vpop.f32.mrf.mxu0 }
 0x4c9   : > { %v11617_v2 = vadd.f32 %v4016_v8, %v3784_v14  ;;  %v4182_v14 = vpop.f32.mrf.mxu1 }
 0x4ca   : > { %v4201_v28 = vadd.f32 %v4182_v14, %v4027_v54  ;;  %v3470_v14 = vadd.f32 %v11598_v38, %v11604_v48 }
 0x4d0   : > { %v4018_v49 = vpop.f32.mrf.mxu0 }
 0x4d1   : > { %v4185_v26 = vpop.f32.mrf.mxu1 }
 0x4d2   : > { %v4202_v8 = vadd.f32 %v4185_v26, %v4028_v11  ;;  %v3651_v11 = vadd.f32 %v11602_v24, %v3470_v14 }
 0x4d4   : > { %v4337_v41 = vadd.f32 %v4320_v45, %v4202_v8  ;;  %v3785_v54 = vadd.f32 %v11606_v56, %v3651_v11  ;;  %v10461_v56 = vld [vmem:[#allocation4 + $0x178] sm:$0xff] }
 0x4d5   : > { %5004 = vmatpush.bf16.msra.mxu2 %v10461_v56  ;;  %v4863_v56 = vunpack.c.l.bf16 %v11324_v35 }
 0x4d6   : > { %v4583_v21 = vadd.f32 %v4566_v22, %v4337_v41  ;;  %v10458_v41 = vld [vmem:[#allocation4 + $0x160] sm:$0xff] }
 0x4d8   : > { %v4021_v53 = vpop.f32.mrf.mxu0 }
 0x4d9   : > { %v11625_v55 = vadd.f32 %v4021_v53, %v3786_v39  ;;  %v4336_v39 = vadd.f32 %v4317_v4, %v4201_v28  ;;  %v4187_v3 = vpop.f32.mrf.mxu1  ;;  %v4325_v4 = vpop.f32.mrf.mxu2 }
 0x4da   : > { %v4203_v23 = vadd.f32 %v4187_v3, %v4029_v31 }
 0x4db   : > { %v4582_v61 = vadd.f32 %v4563_v16, %v4336_v39  ;;  %v4571_v16 = vpop.f32.mrf.mxu3 }
 0x4dc   : > { %v4338_v0 = vadd.f32 %v4322_v43, %v4203_v23  ;;  %v10459_v43 = vld [vmem:[#allocation4 + $0x168] sm:$0xff] }
 0x4de   : > { %v4584_v6 = vadd.f32 %v4568_v44, %v4338_v0 }
 0x4e0   : > { %v11628_v10 = vpop.f32.mrf.mxu0 }
 0x4e1   : > { %v4190_v53 = vpop.f32.mrf.mxu1 }
 0x4e2   : > { %v4204_v45 = vadd.f32 %v4190_v53, %v11617_v2  ;;  %v10460_v2 = vld [vmem:[#allocation4 + $0x170] sm:$0xff] }
 0x4e3   : > { %v4573_v3 = vpop.f32.mrf.mxu3  ;;  %5005 = vmatpush.bf16.msra.mxu2 %v10460_v2 }
 0x4e4   : > { %v4339_v39 = vadd.f32 %v4325_v4, %v4204_v45 }
 0x4e7   : > { %5006 = vmatpush.bf16.msra.mxu2 %v10459_v43  ;;  %v4864_v43 = vunpack.c.l.bf16 %v11332_v46 }
 0x4e8   : > { %v4735_v30 = vpop.f32.mrf.mxu0 }
 0x4e9   : > { %v4755_v51 = vadd.f32 %v4735_v30, %v4581_v9  ;;  %v4192_v28 = vpop.f32.mrf.mxu1  ;;  %v4031_v30 = vadd.f32 %v4018_v49, %v3785_v54  ;;  %v4327_v9 = vpop.f32.mrf.mxu2 }
 0x4eb   : > { %v4764_v32 = vadd.f32 %v11634_v15, %v4755_v51  ;;  %v4205_v24 = vadd.f32 %v4192_v28, %v4031_v30  ;;  %v3475_v51 = vadd.f32 %v11615_v42, %v11612_v57  ;;  %5007 = vmatpush.bf16.msra.mxu2 %v10458_v41 }
 0x4ed   : > { %v4772_v36 = vmax.f32 %v4764_v32, 0.0  ;;  %v3653_v13 = vadd.f32 %v11619_v20, %v3475_v51  ;;  %v4576_v20 = vpop.f32.mrf.mxu3 }
 0x4f0   : > { %v4737_v60 = vpop.f32.mrf.mxu0 }
 0x4f1   : > { %v4756_v59 = vadd.f32 %v4737_v60, %v4582_v61  ;;  %v4585_v61 = vadd.f32 %v4571_v16, %v4339_v39  ;;  %v4340_v60 = vadd.f32 %v4327_v9, %v4205_v24  ;;  %v4195_v49 = vpop.f32.mrf.mxu1  ;;  %v4330_v8 = vpop.f32.mrf.mxu2  ;;  %v4862_v24 = vunpack.c.l.bf16 %v11322_v47 }
 0x4f3   : > { %v4765_v58 = vadd.f32 %v11634_v15, %v4756_v59  ;;  %v4586_v59 = vadd.f32 %v4573_v3, %v4340_v60 }
 0x4f5   : > { %v4773_v52 = vmax.f32 %v4765_v58, 0.0  ;;  %v3787_v58 = vadd.f32 %v11621_v25, %v3653_v13  ;;  %v10457_v25 = vld [vmem:[#allocation4 + $0x158] sm:$0xff] }
 0x4f6   : > { %5008 = vmatpush.bf16.msra.mxu2 %v10457_v25  ;;  %v10497_v25 = vld [vmem:[#allocation6 + $0x538] sm:$0xff] }
 0x4f7   : > { %v4780_v37 = vpack.c.bf16 %v4773_v52, %v4772_v36  ;;  %v4206_v36 = vadd.f32 %v4195_v49, %v11625_v55  ;;  %v4033_v52 = vadd.f32 %v11628_v10, %v3787_v58  ;;  %v10456_v10 = vld [vmem:[#allocation4 + $0x150] sm:$0xff]  ;;  %5669 = vmatpush.bf16.msrb.mxu1 %v10497_v25 }
 0x4f8   : > { %v4740_v62 = vpop.f32.mrf.mxu0 }
 0x4f9   : > { %4841 = vmatmul.bf16.vlgmr.msra.gmra.mxu1 %v4780_v37  ;;  %v4757_v40 = vadd.f32 %v4740_v62, %v4583_v21  ;;  %v4197_v53 = vpop.f32.mrf.mxu1  ;;  %v4341_v62 = vadd.f32 %v4330_v8, %v4206_v36  ;;  %v4332_v4 = vpop.f32.mrf.mxu2 }
 0x4fa   : > { %v4207_v14 = vadd.f32 %v4197_v53, %v4033_v52  ;;  %5009 = vmatpush.bf16.msra.mxu2 %v10456_v10  ;;  %v4867_v10 = vunpack.c.l.bf16 %v11344_v27  ;;  %v4868_v27 = vunpack.c.l.bf16 %v11352_v29 }
 0x4fb   : > { %v4766_v26 = vadd.f32 %v11634_v15, %v4757_v40  ;;  %v4587_v11 = vadd.f32 %v4576_v20, %v4341_v62 }
 0x4fc   : > { %v4342_v55 = vadd.f32 %v4332_v4, %v4207_v14  ;;  %v10489_v14 = vld [vmem:[#allocation6 + $0x4f8] sm:$0xff]  ;;  %v10480_v4 = vld [vmem:[#allocation6 + $0x4b0] sm:$0xff] }
 0x4fd   : > { %v4774_v48 = vmax.f32 %v4766_v26, 0.0  ;;  %5402 = vmatpush.bf16.msrb.mxu3 %v10489_v14  ;;  %v10491_v14 = vld [vmem:[#allocation6 + $0x508] sm:$0xff] }
 0x500   : > { %v4742_v7 = vpop.f32.mrf.mxu0 }
 0x501   : > { %v4758_v63 = vadd.f32 %v4742_v7, %v4584_v6  ;;  %v4578_v6 = vpop.f32.mrf.mxu3 }
 0x502   : > { %v4588_v16 = vadd.f32 %v4578_v6, %v4342_v55 }
 0x503   : > { %v4767_v38 = vadd.f32 %v11634_v15, %v4758_v63 }
 0x505   : > { %v4775_v34 = vmax.f32 %v4767_v38, 0.0  ;;  %v10455_v38 = vld [vmem:[#allocation4 + $0x148] sm:$0xff] }
 0x506   : > { %5010 = vmatpush.bf16.msra.mxu2 %v10455_v38 }
 0x507   : > { %v4781_v22 = vpack.c.bf16 %v4775_v34, %v4774_v48  ;;  %v10454_v48 = vld [vmem:[#allocation4 + $0x140] sm:$0xff] }
 0x508   : > { %v4745_v12 = vpop.f32.mrf.mxu0  ;;  %v11656_v34 = vld [vmem:[#allocation8 + $0x6] ss:$0 sm:$0xff] }
 0x509   : > { %4846 = vmatmul.bf16.gmra.mxu1 %v4781_v22  ;;  %v4759_v32 = vadd.f32 %v4745_v12, %v4585_v61 }
 0x50a   : > { %5011 = vmatpush.bf16.msra.mxu2 %v10454_v48 }
 0x50b   : > { %v4768_v57 = vadd.f32 %v11634_v15, %v4759_v32 }
 0x50d   : > { %v4776_v23 = vmax.f32 %v4768_v57, 0.0  ;;  %v4865_v57 = vunpack.c.l.bf16 %v11334_v18  ;;  %v10481_v18 = vld [vmem:[#allocation6 + $0x4b8] sm:$0xff] }
 0x50e   : > { %5503 = vmatpush.bf16.msra.mxu0 %v10481_v18 }
 0x510   : > { %v4747_v31 = vpop.f32.mrf.mxu0 }
 0x511   : > { %v4760_v42 = vadd.f32 %v4747_v31, %v4586_v59 }
 0x512   : > { %5504 = vmatpush.bf16.msra.mxu0 %v10480_v4  ;;  %v10490_v4 = vld [vmem:[#allocation6 + $0x500] sm:$0xff] }
 0x513   : > { %v4769_v44 = vadd.f32 %v11634_v15, %v4760_v42 }
 0x515   : > { %v4777_v37 = vmax.f32 %v4769_v44, 0.0 }
 0x517   : > { %v4782_v21 = vpack.c.bf16 %v4777_v37, %v4776_v23  ;;  %v4866_v37 = vunpack.c.l.bf16 %v11342_v5  ;;  %v10487_v5 = vld [vmem:[#allocation6 + $0x4e8] sm:$0xff] }
 0x518   : > { %v4750_v0 = vpop.f32.mrf.mxu0 }
 0x519   : > { %4851 = vmatmul.bf16.gmra.mxu1 %v4782_v21  ;;  %v4761_v40 = vadd.f32 %v4750_v0, %v4587_v11  ;;  %v10488_v21 = vld [vmem:[#allocation6 + $0x4f0] sm:$0xff] }
 0x51a   : > { %5403 = vmatpush.bf16.msrb.mxu3 %v10488_v21 }
 0x51b   : > { %v4770_v54 = vadd.f32 %v11634_v15, %v4761_v40 }
 0x51d   : > { %v4778_v28 = vmax.f32 %v4770_v54, 0.0  ;;  %v10486_v54 = vld [vmem:[#allocation6 + $0x4e0] sm:$0xff] }
 0x51e   : > { %5404 = vmatpush.bf16.msrb.mxu3 %v10487_v5 }
 0x520   : > { %v4752_v7 = vpop.f32.mrf.mxu0 }
 0x521   : > { %v4762_v26 = vadd.f32 %v4752_v7, %v4588_v16 }
 0x522   : > { %5405 = vmatpush.bf16.msrb.mxu3 %v10486_v54 }
 0x523   : > { %v4771_v63 = vadd.f32 %v11634_v15, %v4762_v26 }
 0x525   : > { %v4779_v45 = vmax.f32 %v4771_v63, 0.0 }
 0x527   : > { %v4783_v30 = vpack.c.bf16 %v4779_v45, %v4778_v28 }
 0x529   : > { %4856 = vmatmul.bf16.gmra.mxu1 %v4783_v30 }
 0x576   : > { %v4842_v9 = vpop.f32.mrf.mxu1 }
 0x577   : > { %v4843_v39 = vadd.f32 %v11656_v34, %v4842_v9 }
 0x579   : > { %v4870_v22 = vadd.f32 %v4862_v24, %v4843_v39  ;;  %v4869_v24 = vunpack.c.l.bf16 %v11354_v33  ;;  %v10508_v33 = vld [vmem:[#allocation6 + $0x570] sm:$0xff] }
 0x57b   : > { %v4878_v51 = vmax.f32 %v4870_v22, 0.0 }
 0x57d   : > { %v11662_v61 = vpack.c.bf16 %v4878_v51, %v4878_v51 }
 0x57e   : > { %v4844_v12 = vpop.f32.mrf.mxu1 }
 0x57f   : > { %v4845_v15 = vadd.f32 %v11656_v34, %v4844_v12  ;;  %v4940_v13 = vunpack.c.l.b16 %v11662_v61 }
 0x581   : > { %v4871_v3 = vadd.f32 %v4863_v56, %v4845_v15 }
 0x583   : > { %v4879_v60 = vmax.f32 %v4871_v3, 0.0 }
 0x585   : > { %v11664_v2 = vpack.c.bf16 %v4879_v60, %v4879_v60  ;;  %v10479_v60 = vld [vmem:[#allocation6 + $0x4a8] sm:$0xff] }
 0x586   : > { %v4847_v49 = vpop.f32.mrf.mxu1  ;;  %5505 = vmatpush.bf16.msra.mxu0 %v10479_v60 }
 0x587   : > { %v4941_v32 = vunpack.c.l.b16 %v11664_v2  ;;  %v4848_v47 = vadd.f32 %v11656_v34, %v4847_v49  ;;  %v10509_v49 = vld [vmem:[#allocation6 + $0x578] sm:$0xff] }
 0x588   : > { %5803 = vmatpush.bf16.msrb.mxu2 %v10509_v49 }
 0x589   : > { %v4948_v59 = vpack.c.b16 %v4941_v32, %v4940_v13  ;;  %v4872_v8 = vadd.f32 %v4864_v43, %v4848_v47  ;;  %v10496_v13 = vld [vmem:[#allocation6 + $0x530] sm:$0xff]  ;;  %v10485_v32 = vld [vmem:[#allocation6 + $0x4d8] sm:$0xff]  ;;  %v10495_v47 = vld [vmem:[#allocation6 + $0x528] sm:$0xff] }
 0x58a   : > { %5670 = vmatpush.bf16.msrb.mxu1 %v10496_v13  ;;  %5406 = vmatpush.bf16.msrb.mxu3 %v10485_v32  ;;  %v10507_v43 = vld [vmem:[#allocation6 + $0x568] sm:$0xff] }
 0x58b   : > { %5012 = vmatmul.bf16.vlgmr.msra.gmra.mxu2 %v4948_v59  ;;  %v4880_v35 = vmax.f32 %v4872_v8, 0.0  ;;  %v10477_v59 = vld [vmem:[#allocation6 + $0x498] sm:$0xff]  ;;  %v10494_v8 = vld [vmem:[#allocation6 + $0x520] sm:$0xff] }
 0x58c   : > { %5804 = vmatpush.bf16.msrb.mxu2 %v10508_v33 }
 0x58d   : > { %v11672_v36 = vpack.c.bf16 %v4880_v35, %v4880_v35  ;;  %v10476_v35 = vld [vmem:[#allocation6 + $0x490] sm:$0xff] }
 0x58e   : > { %v4849_v31 = vpop.f32.mrf.mxu1  ;;  %5671 = vmatpush.bf16.msrb.mxu1 %v10495_v47 }
 0x58f   : > { %v4850_v58 = vadd.f32 %v11656_v34, %v4849_v31  ;;  %v4942_v20 = vunpack.c.l.b16 %v11672_v36  ;;  %v10484_v31 = vld [vmem:[#allocation6 + $0x4d0] sm:$0xff] }
 0x590   : > { %5805 = vmatpush.bf16.msrb.mxu2 %v10507_v43  ;;  %5407 = vmatpush.bf16.msrb.mxu3 %v10484_v31  ;;  %v5134_v31 = vld [vmem:[#allocation3 + $0x10] sm:$0xf] }
 0x591   : > { %v4873_v42 = vadd.f32 %v4865_v57, %v4850_v58  ;;  %v10506_v58 = vld [vmem:[#allocation6 + $0x560] sm:$0xff]  ;;  %v10493_v57 = vld [vmem:[#allocation6 + $0x518] sm:$0xff] }
 0x592   : > { %5672 = vmatpush.bf16.msrb.mxu1 %v10494_v8  ;;  %v9511_v8 = vld [vmem:[#allocation3] sm:$0xf] }
 0x593   : > { %v4881_v52 = vmax.f32 %v4873_v42, 0.0  ;;  %v11698_v42 = vld [vmem:[#allocation8 + $0x7] ss:$0 sm:$0xff] }
 0x594   : > { %5806 = vmatpush.bf16.msrb.mxu2 %v10506_v58 }
 0x595   : > { %v11674_v44 = vpack.c.bf16 %v4881_v52, %v4881_v52  ;;  %v10475_v52 = vld [vmem:[#allocation6 + $0x488] sm:$0xff] }
 0x596   : > { %v4852_v41 = vpop.f32.mrf.mxu1  ;;  %5673 = vmatpush.bf16.msrb.mxu1 %v10493_v57 }
 0x597   : > { %v4853_v23 = vadd.f32 %v11656_v34, %v4852_v41  ;;  %v4943_v46 = vunpack.c.l.b16 %v11674_v44  ;;  %v10505_v41 = vld [vmem:[#allocation6 + $0x558] sm:$0xff] }
 0x598   : > { %5807 = vmatpush.bf16.msrb.mxu2 %v10505_v41 }
 0x599   : > { %v4949_v53 = vpack.c.b16 %v4943_v46, %v4942_v20  ;;  %v4874_v62 = vadd.f32 %v4866_v37, %v4853_v23  ;;  %v10492_v20 = vld [vmem:[#allocation6 + $0x510] sm:$0xff]  ;;  %v10483_v46 = vld [vmem:[#allocation6 + $0x4c8] sm:$0xff] }
 0x59a   : > { %5674 = vmatpush.bf16.msrb.mxu1 %v10492_v20  ;;  %5408 = vmatpush.bf16.msrb.mxu3 %v10483_v46 }
 0x59b   : > { %5017 = vmatmul.bf16.gmra.mxu2 %v4949_v53  ;;  %v4882_v11 = vmax.f32 %v4874_v62, 0.0  ;;  %v10474_v53 = vld [vmem:[#allocation6 + $0x480] sm:$0xff]  ;;  %v10504_v62 = vld [vmem:[#allocation6 + $0x550] sm:$0xff] }
 0x59c   : > { %5808 = vmatpush.bf16.msrb.mxu2 %v10504_v62 }
 0x59d   : > { %v11682_v6 = vpack.c.bf16 %v4882_v11, %v4882_v11 }
 0x59e   : > { %v4854_v0 = vpop.f32.mrf.mxu1  ;;  %5675 = vmatpush.bf16.msrb.mxu1 %v10491_v14 }
 0x59f   : > { %v4855_v55 = vadd.f32 %v11656_v34, %v4854_v0  ;;  %v4944_v63 = vunpack.c.l.b16 %v11682_v6  ;;  %v10503_v0 = vld [vmem:[#allocation6 + $0x548] sm:$0xff] }
 0x5a0   : > { %5809 = vmatpush.bf16.msrb.mxu2 %v10503_v0 }
 0x5a1   : > { %v4875_v40 = vadd.f32 %v4867_v10, %v4855_v55  ;;  %v10482_v55 = vld [vmem:[#allocation6 + $0x4c0] sm:$0xff] }
 0x5a2   : > { %5676 = vmatpush.bf16.msrb.mxu1 %v10490_v4  ;;  %5409 = vmatpush.bf16.msrb.mxu3 %v10482_v55 }
 0x5a3   : > { %v4883_v16 = vmax.f32 %v4875_v40, 0.0 }
 0x5a5   : > { %v11684_v7 = vpack.c.bf16 %v4883_v16, %v4883_v16  ;;  %v10502_v16 = vld [vmem:[#allocation6 + $0x540] sm:$0xff] }
 0x5a6   : > { %v4857_v26 = vpop.f32.mrf.mxu1  ;;  %5810 = vmatpush.bf16.msrb.mxu2 %v10502_v16 }
 0x5a7   : > { %v4858_v28 = vadd.f32 %v11656_v34, %v4857_v26  ;;  %v4945_v45 = vunpack.c.l.b16 %v11684_v7 }
 0x5a9   : > { %v4950_v30 = vpack.c.b16 %v4945_v45, %v4944_v63  ;;  %v4876_v38 = vadd.f32 %v4868_v27, %v4858_v28  ;;  %v5131_v28 = vld [vmem:[#allocation3 + $0xc] sm:$0x1]  ;;  %v10706_v45 = vld [vmem:[#allocation3 + $0x8] sm:$0xf] }
 0x5ab   : > { %5022 = vmatmul.bf16.gmra.mxu2 %v4950_v30  ;;  %v4884_v9 = vmax.f32 %v4876_v38, 0.0 }
 0x5ad   : > { %v11692_v12 = vpack.c.bf16 %v4884_v9, %v4884_v9  ;;  %v5201_v9 = vld [vmem:[#allocation3 + $0x4] sm:$0x1] }
 0x5ae   : > { %v4859_v48 = vpop.f32.mrf.mxu1  ;;  %v5558_v32 = vrot.slane %v5201_v9, 5  ;;  %v5219_v57 = vshll.u32 %v5201_v9, 16  ;;  %v5143_v9 = vld [vmem:[#allocation3 + $0x1c] sm:$0x1] }
 0x5af   : > { %v4860_v39 = vadd.f32 %v11656_v34, %v4859_v48  ;;  %v4946_v56 = vunpack.c.l.b16 %v11692_v12  ;;  %v10478_v34 = vld [vmem:[#allocation6 + $0x4a0] sm:$0xff]  ;;  %v5532_v48 = vld [vmem:[#allocation3] sm:$0xe] }
 0x5b0   : > { %5506 = vmatpush.bf16.msra.mxu0 %v10478_v34 }
 0x5b1   : > { %v4877_v22 = vadd.f32 %v4869_v24, %v4860_v39  ;;  %v5176_v24 = vld [vmem:[#allocation3] sm:$0xf] }
 0x5b3   : > { %v4885_v51 = vmax.f32 %v4877_v22, 0.0 }
 0x5b4   : > { %5507 = vmatpush.bf16.msra.mxu0 %v10477_v59 }
 0x5b5   : > { %v11694_v15 = vpack.c.bf16 %v4885_v51, %v4885_v51  ;;  %v9557_v51 = vrot.slane %v5532_v48, 9  ;;  %v5140_v48 = vld [vmem:[#allocation3 + $0x18] sm:$0xf] }
 0x5b7   : > { %v4947_v29 = vunpack.c.l.b16 %v11694_v15 }
 0x5b8   : > { %5508 = vmatpush.bf16.msra.mxu0 %v10476_v35  ;;  %v5137_v35 = vld [vmem:[#allocation3 + $0x14] sm:$0x1] }
 0x5b9   : > { %v4951_v3 = vpack.c.b16 %v4947_v29, %v4946_v56  ;;  %v5210_v56 = vshrl.u32 %v5176_v24, 16  ;;  %v5213_v29 = vshll.u32 %v5176_v24, 16 }
 0x5bb   : > { %5027 = vmatmul.bf16.gmra.mxu2 %v4951_v3  ;;  %v10517_v3 = vld [vmem:[#allocation6 + $0x5b8] sm:$0xff]  ;;  %v5212_v34 = vrot.slane %v5210_v56, 4  ;;  %v5215_v33 = vrot.slane %v5213_v29, 5 }
 0x5bc   : > { %5509 = vmatpush.bf16.msra.mxu0 %v10475_v52  ;;  %6049 = vmatpush.bf16.msra.mxu3 %v10517_v3 }
 0x5bd   : > { %v5216_v58 = vor.u32 %v5215_v33, %v5212_v34 }
 0x5bf   : > { %v5217_v55 = vrot.slane %v5216_v58, 4 }
 0x5c0   : > { %5510 = vmatpush.bf16.msra.mxu0 %v10474_v53 }
 0x60e   : > { %v5013_v23 = vpop.f32.mrf.mxu2 }
 0x60f   : > { %v5014_v37 = vadd.f32 %v11698_v42, %v5013_v23 }
 0x611   : > { %v5033_v18 = vmax.f32 %v5014_v37, 0.0  ;;  %v5559_v37 = vsel %vm11367_vm11, %v9557_v51, %v5558_v32 }
 0x612   : > { %v5605_v4 = vunpack.c.l.b16 %v5559_v37 }
 0x613   : > { %v5041_v21 = vpack.c.bf16 %v5033_v18, %v5033_v18 }
 0x615   : > { %v5050_v25 = vshrl.u32 %v5041_v21, 16  ;;  %v5053_v40 = vshll.u32 %v5041_v21, 16 }
 0x616   : > { %v5015_v11 = vpop.f32.mrf.mxu2 }
 0x617   : > { %v5052_v10 = vrot.slane %v5050_v25, 7  ;;  %v5016_v5 = vadd.f32 %v11698_v42, %v5015_v11 }
 0x619   : > { %v5055_v54 = vor.u32 %v5053_v40, %v5052_v10  ;;  %v5056_v26 = vrot.slane %v5052_v10, 4  ;;  %v5034_v63 = vmax.f32 %v5016_v5, 0.0  ;;  %v5221_v10 = vrot.slane %v5219_v57, 5  ;;  %v10516_v40 = vld [vmem:[#allocation6 + $0x5b0] sm:$0xff] }
 0x61a   : > { %6050 = vmatpush.bf16.msra.mxu3 %v10516_v40 }
 0x61b   : > { %v5129_v27 = vsel %vm11037_vm5, %v5055_v54, %v10706_v45  ;;  %v5132_v30 = vsel %vm10897_vm2, %v5056_v26, %v5131_v28  ;;  %v5042_v38 = vpack.c.bf16 %v5034_v63, %v5034_v63 }
 0x61c   : > { %5130 = vst [vmem:[#allocation3 + $0x8] sm:$0xf] %v5129_v27 }
 0x61d   : > { %5133 = vst [vmem:[#allocation3 + $0xc] sm:$0x1] %v5132_v30  ;;  %v5058_v39 = vshrl.u32 %v5042_v38, 16  ;;  %v5061_v49 = vshll.u32 %v5042_v38, 16 }
 0x61e   : > { %v5018_v22 = vpop.f32.mrf.mxu2 }
 0x61f   : > { %v5060_v60 = vrot.slane %v5058_v39, 7  ;;  %v5019_v13 = vadd.f32 %v11698_v42, %v5018_v22 }
 0x621   : > { %v5063_v47 = vor.u32 %v5061_v49, %v5060_v60  ;;  %v5064_v59 = vrot.slane %v5060_v60, 4  ;;  %v5035_v43 = vmax.f32 %v5019_v13, 0.0  ;;  %v5222_v60 = vsel %vm11126_vm8, %v5217_v55, %v5221_v10 }
 0x623   : > { %v5135_v52 = vsel %vm11037_vm5, %v5063_v47, %v5134_v31  ;;  %v5138_v41 = vsel %vm10897_vm2, %v5064_v59, %v5137_v35  ;;  %v5043_v20 = vpack.c.bf16 %v5035_v43, %v5035_v43  ;;  %v10470_v23 = vld [vmem:[#allocation3 + $0x4] sm:$0xf0]  ;;  %v5338_v35 = vunpack.c.l.b16 %v5222_v60 }
 0x624   : > { %v5533_v46 = vld [vmem:[#allocation3 + $0x8] sm:$0xe]  ;;  %5139 = vst [vmem:[#allocation3 + $0x14] sm:$0x1] %v5138_v41  ;;  %v9512_v53 = vor.u32 %v10470_v23, %v9511_v8  ;;  %v5202_v62 = vld [vmem:[#allocation3 + $0xc] sm:$0x1] }
 0x625   : > { %v9558_v14 = vrot.slane %v5533_v46, 9  ;;  %5136 = vst [vmem:[#allocation3 + $0x10] sm:$0xf] %v5135_v52  ;;  %v5066_v18 = vshrl.u32 %v5043_v20, 16  ;;  %v5562_v21 = vrot.slane %v5202_v62, 5  ;;  %v5069_v25 = vshll.u32 %v5043_v20, 16 }
 0x626   : > { %v5020_v0 = vpop.f32.mrf.mxu2  ;;  %5511 = vmatmul.bf16.vlgmr.msra.gmra.mxu0 %v9512_v53  ;;  %v5177_v11 = vld [vmem:[#allocation3 + $0x8] sm:$0xf]  ;;  %v5233_v22 = vshll.u32 %v5202_v62, 16  ;;  %v10515_v23 = vld [vmem:[#allocation6 + $0x5a8] sm:$0xff] }
 0x627   : > { %v5068_v5 = vrot.slane %v5066_v18, 7  ;;  %v5021_v16 = vadd.f32 %v11698_v42, %v5020_v0  ;;  %v5563_v54 = vsel %vm11367_vm11, %v9558_v14, %v5562_v21  ;;  %v5224_v26 = vshrl.u32 %v5177_v11, 16  ;;  %v9599_v3 = vld [vmem:[#allocation3 + $0x8] sm:$0xf]  ;;  %6051 = vmatpush.bf16.msra.mxu3 %v10515_v23  ;;  %v5149_v0 = vld [vmem:[#allocation3 + $0x24] sm:$0x1] }
 0x628   : > { %v5606_v63 = vunpack.c.l.b16 %v5563_v54  ;;  %v5227_v28 = vshll.u32 %v5177_v11, 16  ;;  %v5235_v31 = vrot.slane %v5233_v22, 5 }
 0x629   : > { %v5071_v45 = vor.u32 %v5069_v25, %v5068_v5  ;;  %v5072_v27 = vrot.slane %v5068_v5, 4  ;;  %v5036_v30 = vmax.f32 %v5021_v16, 0.0  ;;  %v5226_v38 = vrot.slane %v5224_v26, 4  ;;  %v5146_v25 = vld [vmem:[#allocation3 + $0x20] sm:$0xf] }
 0x62a   : > { %v5613_v39 = vpack.c.b16 %v5606_v63, %v5605_v4  ;;  %v5229_v24 = vrot.slane %v5227_v28, 5 }
 0x62b   : > { %v5141_v51 = vsel %vm11037_vm5, %v5071_v45, %v5140_v48  ;;  %v5144_v56 = vsel %vm10897_vm2, %v5072_v27, %v5143_v9  ;;  %v5044_v29 = vpack.c.bf16 %v5036_v30, %v5036_v30  ;;  %v11722_v32 = vld [vmem:[#allocation3 + $0x14] sm:$0x1]  ;;  %v10525_v48 = vld [vmem:[#allocation6 + $0x5f8] sm:$0xff] }
 0x62c   : > { %5145 = vst [vmem:[#allocation3 + $0x1c] sm:$0x1] %v5144_v56  ;;  %5677 = vmatmul.bf16.vlgmr.msrb.gmra.mxu1 %v5613_v39  ;;  %v10498_v49 = vld [vmem:[#allocation3 + $0xc] sm:$0xf0]  ;;  %v5230_v13 = vor.u32 %v5229_v24, %v5226_v38  ;;  %v5566_v53 = vrot.slane %v11722_v32, 5  ;;  %6223 = vmatpush.bf16.msrb.mxu0 %v10525_v48 }
 0x62d   : > { %5142 = vst [vmem:[#allocation3 + $0x18] sm:$0xf] %v5141_v51  ;;  %v5074_v34 = vshrl.u32 %v5044_v29, 16  ;;  %v9600_v33 = vor.u32 %v10498_v49, %v9599_v3  ;;  %v5534_v47 = vld [vmem:[#allocation3 + $0x10] sm:$0xe]  ;;  %v5077_v59 = vshll.u32 %v5044_v29, 16 }
 0x62e   : > { %v5023_v43 = vpop.f32.mrf.mxu2  ;;  %v5231_v8 = vrot.slane %v5230_v13, 4  ;;  %v5178_v58 = vld [vmem:[#allocation3 + $0x10] sm:$0xf]  ;;  %v9559_v37 = vrot.slane %v5534_v47, 9  ;;  %v5247_v51 = vshll.u32 %v11722_v32, 16  ;;  %v10537_v13 = vld [vmem:[#allocation6 + $0x638] sm:$0xff] }
 0x62f   : > { %v5076_v57 = vrot.slane %v5074_v34, 7  ;;  %v5024_v52 = vadd.f32 %v11698_v42, %v5023_v43  ;;  %5811 = vmatmul.bf16.vlgmr.msrb.gmra.mxu2 %v9600_v33  ;;  %v5238_v41 = vshrl.u32 %v5178_v58, 16  ;;  %v5241_v20 = vshll.u32 %v5178_v58, 16  ;;  %v9515_v16 = vld [vmem:[#allocation3 + $0x10] sm:$0xf]  ;;  %6357 = vmatpush.bf16.msra.mxu1 %v10537_v13 }
 0x630   : > { %v5236_v46 = vsel %vm11126_vm8, %v5231_v8, %v5235_v31  ;;  %v5567_v30 = vsel %vm11367_vm11, %v9559_v37, %v5566_v53  ;;  %v10514_v49 = vld [vmem:[#allocation6 + $0x5a0] sm:$0xff]  ;;  %v5152_v34 = vld [vmem:[#allocation3 + $0x28] sm:$0xf]  ;;  %v10524_v8 = vld [vmem:[#allocation6 + $0x5f0] sm:$0xff] }
 0x631   : > { %v5079_v62 = vor.u32 %v5077_v59, %v5076_v57  ;;  %v5080_v14 = vrot.slane %v5076_v57, 4  ;;  %v5037_v18 = vmax.f32 %v5024_v52, 0.0  ;;  %v5339_v21 = vunpack.c.l.b16 %v5236_v46  ;;  %v10545_v31 = vld [vmem:[#allocation6 + $0x678] sm:$0xff]  ;;  %6052 = vmatpush.bf16.msra.mxu3 %v10514_v49  ;;  %v10536_v53 = vld [vmem:[#allocation6 + $0x630] sm:$0xff]  ;;  %6224 = vmatpush.bf16.msrb.mxu0 %v10524_v8  ;;  %v5158_v13 = vld [vmem:[#allocation3 + $0x30] sm:$0xf] }
 0x632   : > { %v5240_v4 = vrot.slane %v5238_v41, 4  ;;  %v5243_v11 = vrot.slane %v5241_v20, 5  ;;  %v5607_v47 = vunpack.c.l.b16 %v5567_v30  ;;  %v5155_v58 = vld [vmem:[#allocation3 + $0x2c] sm:$0x1]  ;;  %v5249_v20 = vrot.slane %v5247_v51, 5  ;;  %6603 = vmatpush.bf16.msra.mxu2 %v10545_v31  ;;  %v10535_v30 = vld [vmem:[#allocation6 + $0x628] sm:$0xff] }
 0x633   : > { %v5147_v55 = vsel %vm11037_vm5, %v5079_v62, %v5146_v25  ;;  %v5150_v10 = vsel %vm10897_vm2, %v5080_v14, %v5149_v0  ;;  %v5045_v40 = vpack.c.bf16 %v5037_v18, %v5037_v18  ;;  %v5346_v5 = vpack.c.b16 %v5339_v21, %v5338_v35  ;;  %v5204_v54 = vld [vmem:[#allocation3 + $0x1c] sm:$0x1]  ;;  %v10513_v41 = vld [vmem:[#allocation6 + $0x598] sm:$0xff]  ;;  %v10544_v62 = vld [vmem:[#allocation6 + $0x670] sm:$0xff]  ;;  %6358 = vmatpush.bf16.msra.mxu1 %v10536_v53 }
 0x634   : > { %5151 = vst [vmem:[#allocation3 + $0x24] sm:$0x1] %v5150_v10  ;;  %v10471_v26 = vld [vmem:[#allocation3 + $0x14] sm:$0xf0]  ;;  %v5244_v28 = vor.u32 %v5243_v11, %v5240_v4  ;;  %v5570_v24 = vrot.slane %v5204_v54, 5  ;;  %v5261_v43 = vshll.u32 %v5204_v54, 16 }
 0x635   : > { %v5535_v63 = vld [vmem:[#allocation3 + $0x18] sm:$0xe]  ;;  %5148 = vst [vmem:[#allocation3 + $0x20] sm:$0xf] %v5147_v55  ;;  %v5082_v45 = vshrl.u32 %v5045_v40, 16  ;;  %5410 = vmatmul.bf16.vlgmr.msrb.gmra.mxu3 %v5346_v5  ;;  %v9516_v27 = vor.u32 %v10471_v26, %v9515_v16  ;;  %v5085_v9 = vshll.u32 %v5045_v40, 16 }
 0x636   : > { %v9560_v38 = vrot.slane %v5535_v63, 9  ;;  %v5025_v39 = vpop.f32.mrf.mxu2  ;;  %v5179_v22 = vld [vmem:[#allocation3 + $0x18] sm:$0xf]  ;;  %v5245_v59 = vrot.slane %v5244_v28, 4  ;;  %v5263_v37 = vrot.slane %v5261_v43, 5  ;;  %6053 = vmatpush.bf16.msra.mxu3 %v10513_v41  ;;  %v10512_v26 = vld [vmem:[#allocation6 + $0x590] sm:$0xff]  ;;  %6604 = vmatpush.bf16.msra.mxu2 %v10544_v62 }
 0x637   : > { %v5084_v56 = vrot.slane %v5082_v45, 7  ;;  %v5026_v29 = vadd.f32 %v11698_v42, %v5025_v39  ;;  %5516 = vmatmul.bf16.gmra.mxu0 %v9516_v27  ;;  %v5252_v3 = vshrl.u32 %v5179_v22, 16  ;;  %v5255_v60 = vshll.u32 %v5179_v22, 16  ;;  %v9603_v0 = vld [vmem:[#allocation3 + $0x18] sm:$0xf]  ;;  %6359 = vmatpush.bf16.msra.mxu1 %v10535_v30  ;;  %v10534_v31 = vld [vmem:[#allocation6 + $0x620] sm:$0xff] }
 0x638   : > { %v5571_v33 = vsel %vm11367_vm11, %v9560_v38, %v5570_v24  ;;  %v10523_v4 = vld [vmem:[#allocation6 + $0x5e8] sm:$0xff]  ;;  %v5250_v16 = vsel %vm11126_vm8, %v5245_v59, %v5249_v20  ;;  %v10520_v30 = vld [vmem:[#allocation6 + $0x5d0] sm:$0xff]  ;;  %v11783_v1 = vld [vmem:[#allocation3 + $0x14] sm:$0x1] }
 0x639   : > { %v5087_v35 = vor.u32 %v5085_v9, %v5084_v56  ;;  %v5088_v32 = vrot.slane %v5084_v56, 4  ;;  %v5038_v57 = vmax.f32 %v5026_v29, 0.0  ;;  %v5608_v52 = vunpack.c.l.b16 %v5571_v33  ;;  %v10543_v38 = vld [vmem:[#allocation6 + $0x668] sm:$0xff]  ;;  %6225 = vmatpush.bf16.msrb.mxu0 %v10523_v4 }
 0x63a   : > { %v5254_v23 = vrot.slane %v5252_v3, 4  ;;  %v5257_v46 = vrot.slane %v5255_v60, 5  ;;  %v5340_v51 = vunpack.c.l.b16 %v5250_v16  ;;  %v10522_v3 = vld [vmem:[#allocation6 + $0x5e0] sm:$0xff]  ;;  %6054 = vmatpush.bf16.msra.mxu3 %v10512_v26  ;;  %6605 = vmatpush.bf16.msra.mxu2 %v10543_v38 }
 0x63b   : > { %v5153_v14 = vsel %vm11037_vm5, %v5087_v35, %v5152_v34  ;;  %v5156_v18 = vsel %vm10897_vm2, %v5088_v32, %v5155_v58  ;;  %v5046_v21 = vpack.c.bf16 %v5038_v57, %v5038_v57  ;;  %v5614_v25 = vpack.c.b16 %v5608_v52, %v5607_v47  ;;  %v11742_v10 = vld [vmem:[#allocation3 + $0x24] sm:$0x1]  ;;  %v5161_v34 = vld [vmem:[#allocation3 + $0x34] sm:$0x1]  ;;  %6360 = vmatpush.bf16.msra.mxu1 %v10534_v31  ;;  %v10531_v31 = vld [vmem:[#allocation6 + $0x608] sm:$0xff] }
 0x63c   : > { %5157 = vst [vmem:[#allocation3 + $0x2c] sm:$0x1] %v5156_v18  ;;  %v10499_v11 = vld [vmem:[#allocation3 + $0x1c] sm:$0xf0]  ;;  %v5258_v55 = vor.u32 %v5257_v46, %v5254_v23  ;;  %v5574_v29 = vrot.slane %v11742_v10, 5  ;;  %v5275_v8 = vshll.u32 %v11742_v10, 16 }
 0x63d   : > { %5154 = vst [vmem:[#allocation3 + $0x28] sm:$0xf] %v5153_v14  ;;  %v5090_v40 = vshrl.u32 %v5046_v21, 16  ;;  %5682 = vmatmul.bf16.gmra.mxu1 %v5614_v25  ;;  %v9604_v5 = vor.u32 %v10499_v11, %v9603_v0  ;;  %v5536_v54 = vld [vmem:[#allocation3 + $0x20] sm:$0xe]  ;;  %v5093_v63 = vshll.u32 %v5046_v21, 16  ;;  %6226 = vmatpush.bf16.msrb.mxu0 %v10522_v3 }
 0x63e   : > { %v5028_v28 = vpop.f32.mrf.mxu2  ;;  %v5259_v45 = vrot.slane %v5258_v55, 4  ;;  %v5180_v27 = vld [vmem:[#allocation3 + $0x20] sm:$0xf]  ;;  %v9561_v56 = vrot.slane %v5536_v54, 9  ;;  %v10542_v35 = vld [vmem:[#allocation6 + $0x660] sm:$0xff]  ;;  %v10521_v23 = vld [vmem:[#allocation6 + $0x5d8] sm:$0xff] }
 0x63f   : > { %v5092_v48 = vrot.slane %v5090_v40, 7  ;;  %v5029_v9 = vadd.f32 %v11698_v42, %v5028_v28  ;;  %5816 = vmatmul.bf16.gmra.mxu2 %v9604_v5  ;;  %v5266_v39 = vshrl.u32 %v5180_v27, 16  ;;  %v5269_v24 = vshll.u32 %v5180_v27, 16  ;;  %v9519_v41 = vld [vmem:[#allocation3 + $0x20] sm:$0xf]  ;;  %v10511_v25 = vld [vmem:[#allocation6 + $0x588] sm:$0xff] }
 0x640   : > { %v5264_v22 = vsel %vm11126_vm8, %v5259_v45, %v5263_v37  ;;  %v5575_v18 = vsel %vm11367_vm11, %v9561_v56, %v5574_v29  ;;  %6606 = vmatpush.bf16.msra.mxu2 %v10542_v35  ;;  %v10533_v10 = vld [vmem:[#allocation6 + $0x618] sm:$0xff]  ;;  %6055 = vmatpush.bf16.msra.mxu3 %v10511_v25  ;;  %v5277_v27 = vrot.slane %v5275_v8, 5  ;;  %v10532_v29 = vld [vmem:[#allocation6 + $0x610] sm:$0xff]  ;;  %v10519_v8 = vld [vmem:[#allocation6 + $0x5c8] sm:$0xff] }
 0x641   : > { %v5095_v60 = vor.u32 %v5093_v63, %v5092_v48  ;;  %v5096_v49 = vrot.slane %v5092_v48, 4  ;;  %v5039_v33 = vmax.f32 %v5029_v9, 0.0  ;;  %v5341_v47 = vunpack.c.l.b16 %v5264_v22  ;;  %v10541_v40 = vld [vmem:[#allocation6 + $0x658] sm:$0xff]  ;;  %6227 = vmatpush.bf16.msrb.mxu0 %v10521_v23  ;;  %v5164_v9 = vld [vmem:[#allocation3 + $0x38] sm:$0xf]  ;;  %6361 = vmatpush.bf16.msra.mxu1 %v10533_v10  ;;  %v10540_v3 = vld [vmem:[#allocation6 + $0x650] sm:$0xff] }
 0x642   : > { %v5268_v59 = vrot.slane %v5266_v39, 4  ;;  %v5271_v43 = vrot.slane %v5269_v24, 5  ;;  %v5609_v28 = vunpack.c.l.b16 %v5575_v18  ;;  %v5167_v39 = vld [vmem:[#allocation3 + $0x3c] sm:$0x1]  ;;  %v5170_v18 = vld [vmem:[#allocation3 + $0x40] sm:$0xf] }
 0x643   : > { %v5159_v32 = vsel %vm11037_vm5, %v5095_v60, %v5158_v13  ;;  %v5162_v58 = vsel %vm10897_vm2, %v5096_v49, %v5161_v34  ;;  %v5047_v57 = vpack.c.bf16 %v5039_v33, %v5039_v33  ;;  %v5347_v52 = vpack.c.b16 %v5341_v47, %v5340_v51  ;;  %v11755_v20 = vld [vmem:[#allocation3 + $0x2c] sm:$0x1]  ;;  %v10510_v60 = vld [vmem:[#allocation6 + $0x580] sm:$0xff] }
 0x644   : > { %5163 = vst [vmem:[#allocation3 + $0x34] sm:$0x1] %v5162_v58  ;;  %v10472_v46 = vld [vmem:[#allocation3 + $0x24] sm:$0xf0]  ;;  %v5272_v53 = vor.u32 %v5271_v43, %v5268_v59  ;;  %v5578_v11 = vrot.slane %v11755_v20, 5  ;;  %v5289_v56 = vshll.u32 %v11755_v20, 16  ;;  %6607 = vmatpush.bf16.msra.mxu2 %v10541_v40  ;;  %6056 = vmatpush.bf16.msra.mxu3 %v10510_v60 }
 0x645   : > { %v5537_v37 = vld [vmem:[#allocation3 + $0x28] sm:$0xe]  ;;  %5160 = vst [vmem:[#allocation3 + $0x30] sm:$0xf] %v5159_v32  ;;  %v5098_v62 = vshrl.u32 %v5047_v57, 16  ;;  %5415 = vmatmul.bf16.gmra.mxu3 %v5347_v52  ;;  %v9520_v14 = vor.u32 %v10472_v46, %v9519_v41  ;;  %v5101_v0 = vshll.u32 %v5047_v57, 16  ;;  %6228 = vmatpush.bf16.msrb.mxu0 %v10520_v30 }
 0x646   : > { %v9562_v21 = vrot.slane %v5537_v37, 9  ;;  %v5030_v4 = vpop.f32.mrf.mxu2  ;;  %v5181_v55 = vld [vmem:[#allocation3 + $0x28] sm:$0xf]  ;;  %v5273_v45 = vrot.slane %v5272_v53, 4  ;;  %v10539_v52 = vld [vmem:[#allocation6 + $0x648] sm:$0xff]  ;;  %v5291_v20 = vrot.slane %v5289_v56, 5  ;;  %6362 = vmatpush.bf16.msra.mxu1 %v10532_v29 }
 0x647   : > { %v5100_v5 = vrot.slane %v5098_v62, 7  ;;  %v5031_v16 = vadd.f32 %v11698_v42, %v5030_v4  ;;  %5521 = vmatmul.bf16.gmra.mxu0 %v9520_v14  ;;  %v5280_v54 = vshrl.u32 %v5181_v55, 16  ;;  %v5283_v26 = vshll.u32 %v5181_v55, 16  ;;  %v9607_v47 = vld [vmem:[#allocation3 + $0x28] sm:$0xf]  ;;  %v10538_v30 = vld [vmem:[#allocation6 + $0x640] sm:$0xff] }
 0x648   : > { %v5579_v63 = vsel %vm11367_vm11, %v9562_v21, %v5578_v11  ;;  %v5278_v58 = vsel %vm11126_vm8, %v5273_v45, %v5277_v27  ;;  %6608 = vmatpush.bf16.msra.mxu2 %v10540_v3  ;;  %v5173_v21 = vld [vmem:[#allocation3 + $0x44] sm:$0x1]  ;;  %v10518_v11 = vld [vmem:[#allocation6 + $0x5c0] sm:$0xff]  ;;  %v11772_v55 = vld [vmem:[#allocation3 + $0x8] sm:$0xe] }
 0x649   : > { %v5103_v38 = vor.u32 %v5101_v0, %v5100_v5  ;;  %v5104_v48 = vrot.slane %v5100_v5, 4  ;;  %v5040_v24 = vmax.f32 %v5031_v16, 0.0  ;;  %v5610_v22 = vunpack.c.l.b16 %v5579_v63  ;;  %6229 = vmatpush.bf16.msrb.mxu0 %v10519_v8 }
 0x64a   : > { %v5282_v51 = vrot.slane %v5280_v54, 4  ;;  %v5285_v42 = vrot.slane %v5283_v26, 5  ;;  %v5342_v0 = vunpack.c.l.b16 %v5278_v58  ;;  %v11774_v54 = vld [vmem:[#allocation3 + $0xc] sm:$0x1]  ;;  %v10530_v26 = vld [vmem:[#allocation6 + $0x600] sm:$0xff]  ;;  %6363 = vmatpush.bf16.msra.mxu1 %v10531_v31 }
 0x64b   : > { %v5165_v49 = vsel %vm11037_vm5, %v5103_v38, %v5164_v9  ;;  %v5168_v13 = vsel %vm10897_vm2, %v5104_v48, %v5167_v39  ;;  %v5048_v34 = vpack.c.bf16 %v5040_v24, %v5040_v24  ;;  %v5615_v33 = vpack.c.b16 %v5610_v22, %v5609_v28  ;;  %v5207_v23 = vld [vmem:[#allocation3 + $0x34] sm:$0x1]  ;;  %v6394_v22 = vld [vmem:[#allocation3 + $0x10] sm:$0xf] }
 0x64c   : > { %5169 = vst [vmem:[#allocation3 + $0x3c] sm:$0x1] %v5168_v13  ;;  %v10500_v59 = vld [vmem:[#allocation3 + $0x2c] sm:$0xf0]  ;;  %v5286_v43 = vor.u32 %v5285_v42, %v5282_v51  ;;  %v5582_v16 = vrot.slane %v5207_v23, 5  ;;  %v5303_v27 = vshll.u32 %v5207_v23, 16  ;;  %6609 = vmatpush.bf16.msra.mxu2 %v10539_v52 }
 0x64d   : > { %5166 = vst [vmem:[#allocation3 + $0x38] sm:$0xf] %v5165_v49  ;;  %v5106_v35 = vshrl.u32 %v5048_v34, 16  ;;  %5687 = vmatmul.bf16.gmra.mxu1 %v5615_v33  ;;  %v9608_v32 = vor.u32 %v10500_v59, %v9607_v47  ;;  %v5538_v57 = vld [vmem:[#allocation3 + $0x30] sm:$0xe]  ;;  %v5109_v53 = vshll.u32 %v5048_v34, 16  ;;  %6230 = vmatpush.bf16.msrb.mxu0 %v10518_v11 }
 0x64e   : > { %v5287_v41 = vrot.slane %v5286_v43, 4  ;;  %v5182_v46 = vld [vmem:[#allocation3 + $0x30] sm:$0xf]  ;;  %v9563_v4 = vrot.slane %v5538_v57, 9  ;;  %v9677_v24 = vrot.slane %v11772_v55, 9  ;;  %v5305_v34 = vrot.slane %v5303_v27, 5  ;;  %6364 = vmatpush.bf16.msra.mxu1 %v10530_v26 }
 0x64f   : > { %v5108_v37 = vrot.slane %v5106_v35, 7  ;;  %5821 = vmatmul.bf16.gmra.mxu2 %v9608_v32  ;;  %v5294_v62 = vshrl.u32 %v5182_v46, 16  ;;  %v5297_v14 = vshll.u32 %v5182_v46, 16  ;;  %v9523_v63 = vld [vmem:[#allocation3 + $0x30] sm:$0xf]  ;;  %v6112_v33 = vrot.slane %v11774_v54, 5 }
 0x650   : > { %v5292_v25 = vsel %vm11126_vm8, %v5287_v41, %v5291_v20  ;;  %v5583_v50 = vsel %vm11367_vm11, %v9563_v4, %v5582_v16  ;;  %v6087_v49 = vld [vmem:[#allocation3 + $0x10] sm:$0xe]  ;;  %6610 = vmatpush.bf16.msra.mxu2 %v10538_v30  ;;  %v6411_v47 = vshrl.u32 %v6394_v22, 16  ;;  %v10553_v59 = vld [vmem:[#allocation6 + $0x6b8] sm:$0xff]  ;;  %v6396_v35 = vld [vmem:[#allocation3 + $0x18] sm:$0xf] }
 0x651   : > { %v5111_v10 = vor.u32 %v5109_v53, %v5108_v37  ;;  %v5112_v40 = vrot.slane %v5108_v37, 4  ;;  %v5343_v5 = vunpack.c.l.b16 %v5292_v25  ;;  %v5296_v28 = vrot.slane %v5294_v62, 4  ;;  %v5840_v20 = vld [vmem:[#allocation3 + $0x8] sm:$0xf]  ;;  %6777 = vmatpush.bf16.msrb.mxu3 %v10553_v59  ;;  %v10552_v23 = vld [vmem:[#allocation6 + $0x6b0] sm:$0xff] }
 0x652   : > { %v5299_v45 = vrot.slane %v5297_v14, 5  ;;  %v6414_v32 = vshll.u32 %v6394_v22, 16  ;;  %v5611_v58 = vunpack.c.l.b16 %v5583_v50  ;;  %v9678_v53 = vrot.slane %v6087_v49, 9 }
 0x653   : > { %v5171_v38 = vsel %vm11037_vm5, %v5111_v10, %v5170_v18  ;;  %v5174_v48 = vsel %vm10897_vm2, %v5112_v40, %v5173_v21  ;;  %v5348_v9 = vpack.c.b16 %v5343_v5, %v5342_v0  ;;  %v5208_v39 = vld [vmem:[#allocation3 + $0x3c] sm:$0x1]  ;;  %v6413_v62 = vrot.slane %v6411_v47, 4  ;;  %v11789_v21 = vld [vmem:[#allocation3 + $0x14] sm:$0x1] }
 0x654   : > { %5175 = vst [vmem:[#allocation3 + $0x44] sm:$0x1] %v5174_v48  ;;  %v10473_v51 = vld [vmem:[#allocation3 + $0x34] sm:$0xf0]  ;;  %v5300_v56 = vor.u32 %v5299_v45, %v5296_v28  ;;  %v5586_v60 = vrot.slane %v5208_v39, 5  ;;  %v5317_v41 = vshll.u32 %v5208_v39, 16 }
 0x655   : > { %v5539_v42 = vld [vmem:[#allocation3 + $0x38] sm:$0xe]  ;;  %5172 = vst [vmem:[#allocation3 + $0x40] sm:$0xf] %v5171_v38  ;;  %5420 = vmatmul.bf16.gmra.mxu3 %v5348_v9  ;;  %v9524_v29 = vor.u32 %v10473_v51, %v9523_v63  ;;  %v6116_v18 = vrot.slane %v11783_v1, 5  ;;  %v6416_v25 = vrot.slane %v6414_v32, 5 }
 0x656   : > { %v9564_v3 = vrot.slane %v5539_v42, 9  ;;  %v5183_v13 = vld [vmem:[#allocation3 + $0x38] sm:$0xf]  ;;  %v5301_v52 = vrot.slane %v5300_v56, 4  ;;  %v6425_v0 = vshrl.u32 %v6396_v35, 16  ;;  %v6428_v10 = vshll.u32 %v6396_v35, 16  ;;  %6778 = vmatpush.bf16.msrb.mxu3 %v10552_v23 }
 0x657   : > { %5526 = vmatmul.bf16.gmra.mxu0 %v9524_v29  ;;  %v5308_v8 = vshrl.u32 %v5183_v13, 16  ;;  %v5311_v31 = vshll.u32 %v5183_v13, 16  ;;  %v9611_v4 = vld [vmem:[#allocation3 + $0x38] sm:$0xf]  ;;  %v5842_v40 = vld [vmem:[#allocation3 + $0x10] sm:$0xf]  ;;  %v6417_v48 = vor.u32 %v6416_v25, %v6413_v62  ;;  %v6117_v39 = vsel %vm11367_vm11, %v9678_v53, %v6116_v18 }
 0x658   : > { %v5587_v43 = vsel %vm11367_vm11, %v9564_v3, %v5586_v60  ;;  %v5857_v5 = vshrl.u32 %v5840_v20, 16  ;;  %v5306_v26 = vsel %vm11126_vm8, %v5301_v52, %v5305_v34  ;;  %v5319_v63 = vrot.slane %v5317_v41, 5  ;;  %v11793_v38 = vld [vmem:[#allocation3 + $0x1c] sm:$0x1]  ;;  %v10526_v35 = vld [vmem:[#allocation3 + $0x14] sm:$0xf0] }
 0x659   : > { %v5612_v57 = vunpack.c.l.b16 %v5587_v43  ;;  %v5310_v46 = vrot.slane %v5308_v8, 4  ;;  %v5313_v37 = vrot.slane %v5311_v31, 5  ;;  %v6427_v28 = vrot.slane %v6425_v0, 4  ;;  %v9719_v52 = vld [vmem:[#allocation3 + $0x10] sm:$0xf]  ;;  %v10551_v25 = vld [vmem:[#allocation6 + $0x6a8] sm:$0xff] }
 0x65a   : > { %v5860_v45 = vshll.u32 %v5840_v20, 16  ;;  %v6430_v9 = vrot.slane %v6428_v10, 5  ;;  %v6420_v22 = vshll.u32 %v11789_v21, 16  ;;  %v5859_v51 = vrot.slane %v5857_v5, 4  ;;  %v6398_v23 = vld [vmem:[#allocation3 + $0x20] sm:$0xf]  ;;  %6779 = vmatpush.bf16.msrb.mxu3 %v10551_v25 }
 0x65b   : > { %v5616_v14 = vpack.c.b16 %v5612_v57, %v5611_v58  ;;  %v5314_v11 = vor.u32 %v5313_v37, %v5310_v46  ;;  %v5871_v50 = vshrl.u32 %v5842_v40, 16  ;;  %v5874_v3 = vshll.u32 %v5842_v40, 16  ;;  %v11806_v37 = vld [vmem:[#allocation3 + $0x1c] sm:$0x1]  ;;  %v6088_v18 = vld [vmem:[#allocation3 + $0x18] sm:$0xe] }
 0x65c   : > { %v10501_v16 = vld [vmem:[#allocation3 + $0x3c] sm:$0xf0]  ;;  %v5862_v42 = vrot.slane %v5860_v45, 5  ;;  %v6431_v29 = vor.u32 %v6430_v9, %v6427_v28  ;;  %v5344_v60 = vunpack.c.l.b16 %v5306_v26  ;;  %v6113_v13 = vsel %vm11367_vm11, %v9677_v24, %v6112_v33  ;;  %v11808_v24 = vld [vmem:[#allocation3 + $0x24] sm:$0x1]  ;;  %v10550_v28 = vld [vmem:[#allocation6 + $0x6a0] sm:$0xff] }
 0x65d   : > { %5692 = vmatmul.bf16.gmra.mxu1 %v5616_v14  ;;  %v9612_v27 = vor.u32 %v10501_v16, %v9611_v4  ;;  %v5315_v30 = vrot.slane %v5314_v11, 4  ;;  %v6434_v34 = vshll.u32 %v11793_v38, 16  ;;  %v6160_v47 = vunpack.c.l.b16 %v6117_v39  ;;  %v6089_v33 = vld [vmem:[#allocation3 + $0x20] sm:$0xe]  ;;  %v5844_v40 = vld [vmem:[#allocation3 + $0x18] sm:$0xf] }
 0x65e   : > { %v6418_v59 = vrot.slane %v6417_v48, 4  ;;  %v5873_v43 = vrot.slane %v5871_v50, 4  ;;  %v5876_v8 = vrot.slane %v5874_v3, 5  ;;  %v6432_v32 = vrot.slane %v6431_v29, 4  ;;  %6780 = vmatpush.bf16.msrb.mxu3 %v10550_v28  ;;  %v6404_v28 = vld [vmem:[#allocation3 + $0x38] sm:$0xf] }
 0x65f   : > { %5826 = vmatmul.bf16.gmra.mxu2 %v9612_v27  ;;  %v5320_v56 = vsel %vm11126_vm8, %v5315_v30, %v5319_v63  ;;  %v5866_v58 = vshll.u32 %v11774_v54, 16  ;;  %v6159_v57 = vunpack.c.l.b16 %v6113_v13  ;;  %v6422_v41 = vrot.slane %v6420_v22, 5  ;;  %v6400_v54 = vld [vmem:[#allocation3 + $0x28] sm:$0xf]  ;;  %v11821_v13 = vld [vmem:[#allocation3 + $0x24] sm:$0x1] }
 0x660   : > { %v5345_v49 = vunpack.c.l.b16 %v5320_v56  ;;  %v5863_v20 = vor.u32 %v5862_v42, %v5859_v51  ;;  %v6436_v55 = vrot.slane %v6434_v34, 5  ;;  %v5877_v46 = vor.u32 %v5876_v8, %v5873_v43 }
 0x661   : > { %v6167_v53 = vpack.c.b16 %v6160_v47, %v6159_v57  ;;  %v9720_v62 = vor.u32 %v10526_v35, %v9719_v52  ;;  %v6423_v14 = vsel %vm11126_vm8, %v6418_v59, %v6422_v41  ;;  %v5868_v4 = vrot.slane %v5866_v58, 5 }
 0x662   : > { %v5349_v31 = vpack.c.b16 %v5345_v49, %v5344_v60  ;;  %v6437_v0 = vsel %vm11126_vm8, %v6432_v32, %v6436_v55  ;;  %v5880_v11 = vshll.u32 %v11783_v1, 16  ;;  %v6439_v10 = vshrl.u32 %v6398_v23, 16  ;;  %v5846_v1 = vld [vmem:[#allocation3 + $0x20] sm:$0xf]  ;;  %v11827_v32 = vld [vmem:[#allocation3 + $0x2c] sm:$0x1] }
 0x663   : > { %v5864_v5 = vrot.slane %v5863_v20, 4  ;;  %v9680_v16 = vrot.slane %v6089_v33, 9  ;;  %v6124_v26 = vrot.slane %v11808_v24, 5  ;;  %v6442_v63 = vshll.u32 %v6398_v23, 16  ;;  %v11830_v33 = vld [vmem:[#allocation3 + $0x24] sm:$0xf0] }
 0x664   : > { %v5878_v45 = vrot.slane %v5877_v46, 4  ;;  %v6441_v27 = vrot.slane %v6439_v10, 4  ;;  %v6453_v30 = vshrl.u32 %v6400_v54, 16  ;;  %v6456_v48 = vshll.u32 %v6400_v54, 16  ;;  %v11835_v10 = vld [vmem:[#allocation3 + $0x28] sm:$0xe] }
 0x665   : > { %5425 = vmatmul.bf16.gmra.mxu3 %v5349_v31  ;;  %v6540_v9 = vunpack.c.l.b16 %v6437_v0  ;;  %v9679_v39 = vrot.slane %v6088_v18, 9  ;;  %v6120_v22 = vrot.slane %v11806_v37, 5  ;;  %v6444_v51 = vrot.slane %v6442_v63, 5  ;;  %v6402_v18 = vld [vmem:[#allocation3 + $0x30] sm:$0xf] }
 0x666   : > { %v5882_v42 = vrot.slane %v5880_v11, 5  ;;  %v6455_v56 = vrot.slane %v6453_v30, 4  ;;  %v6458_v29 = vrot.slane %v6456_v48, 5  ;;  %v5885_v50 = vshrl.u32 %v5844_v40, 16  ;;  %v9723_v0 = vld [vmem:[#allocation3 + $0x20] sm:$0xf] }
 0x667   : > { %6231 = vmatmul.bf16.vlgmr.msrb.gmra.mxu0 %v6167_v53  ;;  %v6539_v3 = vunpack.c.l.b16 %v6423_v14  ;;  %v5869_v60 = vsel %vm11126_vm8, %v5864_v5, %v5868_v4  ;;  %v6125_v49 = vsel %vm11367_vm11, %v9680_v16, %v6124_v26  ;;  %v5888_v34 = vshll.u32 %v5844_v40, 16  ;;  %v11838_v63 = vld [vmem:[#allocation3 + $0x2c] sm:$0x1] }
 0x668   : > { %v5883_v47 = vsel %vm11126_vm8, %v5878_v45, %v5882_v42  ;;  %v6445_v59 = vor.u32 %v6444_v51, %v6441_v27  ;;  %v5899_v43 = vshrl.u32 %v5846_v1, 16  ;;  %v5902_v8 = vshll.u32 %v5846_v1, 16  ;;  %v6091_v51 = vld [vmem:[#allocation3 + $0x30] sm:$0xe] }
 0x669   : > { %v6547_v31 = vpack.c.b16 %v6540_v9, %v6539_v3  ;;  %v6121_v35 = vsel %vm11367_vm11, %v9679_v39, %v6120_v22  ;;  %v5887_v58 = vrot.slane %v5885_v50, 4  ;;  %v5890_v57 = vrot.slane %v5888_v34, 5  ;;  %v5848_v9 = vld [vmem:[#allocation3 + $0x28] sm:$0xf] }
 0x66a   : > { %v6448_v52 = vshll.u32 %v11821_v13, 16  ;;  %v6459_v41 = vor.u32 %v6458_v29, %v6455_v56  ;;  %v5901_v20 = vrot.slane %v5899_v43, 4  ;;  %v5904_v23 = vrot.slane %v5902_v8, 5  ;;  %v10549_v3 = vld [vmem:[#allocation6 + $0x698] sm:$0xff]  ;;  %v11848_v8 = vld [vmem:[#allocation3 + $0x3c] sm:$0x1] }
 0x66b   : > { %v5986_v55 = vunpack.c.l.b16 %v5883_v47  ;;  %v6162_v46 = vunpack.c.l.b16 %v6125_v49  ;;  %v6446_v53 = vrot.slane %v6445_v59, 4  ;;  %v5894_v14 = vshll.u32 %v11806_v37, 16  ;;  %v11840_v37 = vld [vmem:[#allocation3 + $0x34] sm:$0x1]  ;;  %v5850_v47 = vld [vmem:[#allocation3 + $0x30] sm:$0xf]  ;;  %6781 = vmatpush.bf16.msrb.mxu3 %v10549_v3 }
 0x66c   : > { %v5985_v54 = vunpack.c.l.b16 %v5869_v60  ;;  %v6161_v25 = vunpack.c.l.b16 %v6121_v35  ;;  %v5891_v4 = vor.u32 %v5890_v57, %v5887_v58  ;;  %v5908_v11 = vshll.u32 %v11808_v24, 16 }
 0x66d   : > { %6365 = vmatmul.bf16.vlgmr.msra.gmra.mxu1 %v9720_v62  ;;  %v6462_v62 = vshll.u32 %v11827_v32, 16  ;;  %v9724_v40 = vor.u32 %v11830_v33, %v9723_v0  ;;  %v6450_v5 = vrot.slane %v6448_v52, 5  ;;  %v6460_v16 = vrot.slane %v6459_v41, 4  ;;  %v11853_v33 = vld [vmem:[#allocation3 + $0x34] sm:$0x1] }
 0x66e   : > { %v5905_v26 = vor.u32 %v5904_v23, %v5901_v20  ;;  %v5993_v45 = vpack.c.b16 %v5986_v55, %v5985_v54  ;;  %v6168_v27 = vpack.c.b16 %v6162_v46, %v6161_v25  ;;  %v6467_v30 = vshrl.u32 %v6402_v18, 16  ;;  %v10548_v23 = vld [vmem:[#allocation6 + $0x690] sm:$0xff] }
 0x66f   : > { %6611 = vmatmul.bf16.vlgmr.msra.gmra.mxu2 %v6547_v31  ;;  %v6470_v48 = vshll.u32 %v6402_v18, 16  ;;  %v6451_v24 = vsel %vm11126_vm8, %v6446_v53, %v6450_v5  ;;  %v6464_v39 = vrot.slane %v6462_v62, 5  ;;  %v5896_v22 = vrot.slane %v5894_v14, 5  ;;  %6782 = vmatpush.bf16.msrb.mxu3 %v10548_v23 }
 0x670   : > { %v9681_v1 = vrot.slane %v11835_v10, 9  ;;  %v5892_v42 = vrot.slane %v5891_v4, 4  ;;  %v5910_v56 = vrot.slane %v5908_v11, 5  ;;  %v6128_v29 = vrot.slane %v11838_v63, 5 }
 0x671   : > { %v6481_v50 = vshrl.u32 %v6404_v28, 16  ;;  %v6465_v60 = vsel %vm11126_vm8, %v6460_v16, %v6464_v39  ;;  %v5906_v49 = vrot.slane %v5905_v26, 4  ;;  %v6484_v34 = vshll.u32 %v6404_v28, 16  ;;  %v11865_v39 = vld [vmem:[#allocation3 + $0x44] sm:$0x1] }
 0x672   : > { %v5913_v59 = vshrl.u32 %v5848_v9, 16  ;;  %v6541_v43 = vunpack.c.l.b16 %v6451_v24  ;;  %v6469_v31 = vrot.slane %v6467_v30, 4  ;;  %v6472_v35 = vrot.slane %v6470_v48, 5  ;;  %v11863_v24 = vld [vmem:[#allocation3 + $0x3c] sm:$0x1] }
 0x673   : > { %v6483_v58 = vrot.slane %v6481_v50, 4  ;;  %v9682_v57 = vrot.slane %v6091_v51, 9  ;;  %v6132_v52 = vrot.slane %v11840_v37, 5  ;;  %v6486_v41 = vrot.slane %v6484_v34, 5  ;;  %v6406_v34 = vld [vmem:[#allocation3 + $0x40] sm:$0xf] }
 0x674   : > { %v5916_v20 = vshll.u32 %v5848_v9, 16  ;;  %v6542_v55 = vunpack.c.l.b16 %v6465_v60  ;;  %v5897_v46 = vsel %vm11126_vm8, %v5892_v42, %v5896_v22  ;;  %v5927_v53 = vshrl.u32 %v5850_v47, 16  ;;  %v6093_v22 = vld [vmem:[#allocation3 + $0x40] sm:$0xe] }
 0x675   : > { %6057 = vmatmul.bf16.vlgmr.msra.gmra.mxu3 %v5993_v45  ;;  %v5930_v62 = vshll.u32 %v5850_v47, 16  ;;  %v5911_v14 = vsel %vm11126_vm8, %v5906_v49, %v5910_v56  ;;  %v6487_v18 = vor.u32 %v6486_v41, %v6483_v58  ;;  %v5915_v54 = vrot.slane %v5913_v59, 4  ;;  %v6092_v45 = vld [vmem:[#allocation3 + $0x38] sm:$0xe]  ;;  %v6408_v58 = vld [vmem:[#allocation3 + $0x48] sm:$0xf] }
 0x676   : > { %v5918_v25 = vrot.slane %v5916_v20, 5  ;;  %v6473_v0 = vor.u32 %v6472_v35, %v6469_v31  ;;  %v6490_v4 = vshll.u32 %v11848_v8, 16  ;;  %v5929_v11 = vrot.slane %v5927_v53, 4  ;;  %v10528_v53 = vld [vmem:[#allocation3 + $0x34] sm:$0xf0] }
 0x677   : > { %6236 = vmatmul.bf16.gmra.mxu0 %v6168_v27  ;;  %v5932_v10 = vrot.slane %v5930_v62, 5  ;;  %v6133_v5 = vsel %vm11367_vm11, %v9682_v57, %v6132_v52  ;;  %v6476_v16 = vshll.u32 %v11853_v33, 16  ;;  %v6548_v26 = vpack.c.b16 %v6542_v55, %v6541_v43 }
 0x678   : > { %v6488_v28 = vrot.slane %v6487_v18, 4  ;;  %v5987_v27 = vunpack.c.l.b16 %v5897_v46  ;;  %v5988_v30 = vunpack.c.l.b16 %v5911_v14  ;;  %v6129_v48 = vsel %vm11367_vm11, %v9681_v1, %v6128_v29  ;;  %v6640_v46 = vld [vmem:[#allocation3 + $0x10] sm:$0xe] }
 0x679   : > { %v5919_v9 = vor.u32 %v5918_v25, %v5915_v54  ;;  %v6164_v51 = vunpack.c.l.b16 %v6133_v5  ;;  %v6474_v42 = vrot.slane %v6473_v0, 4  ;;  %v6492_v56 = vrot.slane %v6490_v4, 5  ;;  %v10547_v25 = vld [vmem:[#allocation6 + $0x688] sm:$0xff]  ;;  %v9727_v0 = vld [vmem:[#allocation3 + $0x30] sm:$0xf] }
 0x67a   : > { %v5933_v50 = vor.u32 %v5932_v10, %v5929_v11  ;;  %v5922_v3 = vshll.u32 %v11838_v63, 16  ;;  %v5936_v60 = vshll.u32 %v11840_v37, 16  ;;  %v9683_v49 = vrot.slane %v6092_v45, 9  ;;  %v6641_v10 = vld [vmem:[#allocation3 + $0x18] sm:$0xe]  ;;  %6783 = vmatpush.bf16.msrb.mxu3 %v10547_v25 }
 0x67b   : > { %v6493_v1 = vsel %vm11126_vm8, %v6488_v28, %v6492_v56  ;;  %v6136_v29 = vrot.slane %v11863_v24, 5  ;;  %v9684_v47 = vrot.slane %v6093_v22, 9  ;;  %v6140_v59 = vrot.slane %v11865_v39, 5  ;;  %v11891_v22 = vld [vmem:[#allocation3 + $0x4c] sm:$0x1] }
 0x67c   : > { %v5994_v43 = vpack.c.b16 %v5988_v30, %v5987_v27  ;;  %v6163_v31 = vunpack.c.l.b16 %v6129_v48  ;;  %v5920_v35 = vrot.slane %v5919_v9, 4  ;;  %v5934_v63 = vrot.slane %v5933_v50, 4 }
 0x67d   : > { %6370 = vmatmul.bf16.gmra.mxu1 %v9724_v40  ;;  %v6478_v40 = vrot.slane %v6476_v16, 5  ;;  %v6495_v52 = vshrl.u32 %v6406_v34, 16  ;;  %v6498_v37 = vshll.u32 %v6406_v34, 16  ;;  %v6544_v20 = vunpack.c.l.b16 %v6493_v1  ;;  %v11887_v16 = vld [vmem:[#allocation3 + $0x44] sm:$0x1] }
 0x67e   : > { %v6169_v41 = vpack.c.b16 %v6164_v51, %v6163_v31  ;;  %v5924_v23 = vrot.slane %v5922_v3, 5  ;;  %v5938_v55 = vrot.slane %v5936_v60, 5  ;;  %v11877_v62 = vsel %vm11367_vm11, %v9683_v49, %v6136_v29  ;;  %v5852_v51 = vld [vmem:[#allocation3 + $0x38] sm:$0xf]  ;;  %v5854_v3 = vld [vmem:[#allocation3 + $0x40] sm:$0xf] }
 0x67f   : > { %6616 = vmatmul.bf16.gmra.mxu2 %v6548_v26  ;;  %v6479_v57 = vsel %vm11126_vm8, %v6474_v42, %v6478_v40  ;;  %v11881_v14 = vsel %vm11367_vm11, %v9684_v47, %v6140_v59  ;;  %v6509_v18 = vshrl.u32 %v6408_v58, 16  ;;  %v6512_v54 = vshll.u32 %v6408_v58, 16  ;;  %v6642_v42 = vld [vmem:[#allocation3 + $0x20] sm:$0xe]  ;;  %v10546_v60 = vld [vmem:[#allocation6 + $0x680] sm:$0xff] }
 0x680   : > { %v6543_v4 = vunpack.c.l.b16 %v6479_v57  ;;  %v5925_v11 = vsel %vm11126_vm8, %v5920_v35, %v5924_v23  ;;  %v5939_v5 = vsel %vm11126_vm8, %v5934_v63, %v5938_v55  ;;  %v6497_v26 = vrot.slane %v6495_v52, 4  ;;  %v6643_v59 = vld [vmem:[#allocation3 + $0x28] sm:$0xe]  ;;  %6784 = vmatpush.bf16.msrb.mxu3 %v10546_v60 }
 0x681   : > { %v6500_v28 = vrot.slane %v6498_v37, 5  ;;  %v9797_v45 = vrot.slane %v6640_v46, 9  ;;  %v9728_v27 = vor.u32 %v10528_v53, %v9727_v0  ;;  %v6165_v48 = vunpack.c.l.b16 %v11877_v62 }
 0x682   : > { %v6549_v30 = vpack.c.b16 %v6544_v20, %v6543_v4  ;;  %v6166_v9 = vunpack.c.l.b16 %v11881_v14  ;;  %v5989_v56 = vunpack.c.l.b16 %v5925_v11  ;;  %v6511_v50 = vrot.slane %v6509_v18, 4 }
 0x683   : > { %v6514_v40 = vrot.slane %v6512_v54, 5  ;;  %v6666_v49 = vrot.slane %v11789_v21, 5  ;;  %v5990_v34 = vunpack.c.l.b16 %v5939_v5  ;;  %v6504_v1 = vshll.u32 %v11887_v16, 16  ;;  %v6644_v21 = vld [vmem:[#allocation3 + $0x30] sm:$0xe] }
 0x684   : > { %v6518_v29 = vshll.u32 %v11891_v22, 16  ;;  %v9798_v47 = vrot.slane %v6641_v10, 9  ;;  %v6670_v35 = vrot.slane %v11793_v38, 5  ;;  %v9799_v58 = vrot.slane %v6642_v42, 9  ;;  %v6645_v10 = vld [vmem:[#allocation3 + $0x38] sm:$0xe] }
 0x685   : > { %6062 = vmatmul.bf16.gmra.mxu3 %v5994_v43  ;;  %v6501_v43 = vor.u32 %v6500_v28, %v6497_v26  ;;  %v6667_v31 = vsel %vm11367_vm11, %v9797_v45, %v6666_v49  ;;  %v5941_v57 = vshrl.u32 %v5852_v51, 16  ;;  %v5944_v63 = vshll.u32 %v5852_v51, 16 }
 0x686   : > { %v5955_v52 = vshrl.u32 %v5854_v3, 16  ;;  %v5958_v37 = vshll.u32 %v5854_v3, 16  ;;  %v6671_v20 = vsel %vm11367_vm11, %v9798_v47, %v6670_v35  ;;  %v6674_v23 = vrot.slane %v11821_v13, 5 }
 0x687   : > { %6241 = vmatmul.bf16.gmra.mxu0 %v6169_v41  ;;  %v6515_v41 = vor.u32 %v6514_v40, %v6511_v50  ;;  %v9800_v55 = vrot.slane %v6643_v59, 9  ;;  %v6520_v46 = vrot.slane %v6518_v29, 5  ;;  %v6713_v53 = vunpack.c.l.b16 %v6667_v31 }
 0x688   : > { %v6714_v62 = vunpack.c.l.b16 %v6671_v20  ;;  %v6678_v14 = vrot.slane %v11827_v32, 5  ;;  %v6502_v38 = vrot.slane %v6501_v43, 4  ;;  %v6675_v18 = vsel %vm11367_vm11, %v9799_v58, %v6674_v23  ;;  %v6646_v58 = vld [vmem:[#allocation3 + $0x40] sm:$0xe] }
 0x689   : > { %v9801_v54 = vrot.slane %v6644_v21, 9  ;;  %v6682_v25 = vrot.slane %v11853_v33, 5  ;;  %v5957_v0 = vrot.slane %v5955_v52, 4  ;;  %v5960_v4 = vrot.slane %v5958_v37, 5 }
 0x68a   : > { %v6721_v11 = vpack.c.b16 %v6714_v62, %v6713_v53  ;;  %v6679_v13 = vsel %vm11367_vm11, %v9800_v55, %v6678_v14  ;;  %v6516_v5 = vrot.slane %v6515_v41, 4  ;;  %v6715_v26 = vunpack.c.l.b16 %v6675_v18 }
 0x68b   : > { %v6716_v28 = vunpack.c.l.b16 %v6679_v13  ;;  %v9802_v45 = vrot.slane %v6645_v10, 9  ;;  %v5943_v32 = vrot.slane %v5941_v57, 4  ;;  %v6686_v51 = vrot.slane %v11848_v8, 5  ;;  %v6647_v57 = vld [vmem:[#allocation3 + $0x48] sm:$0xe] }
 0x68c   : > { %v5995_v42 = vpack.c.b16 %v5990_v34, %v5989_v56  ;;  %v6506_v33 = vrot.slane %v6504_v1, 5  ;;  %v6170_v40 = vpack.c.b16 %v6166_v9, %v6165_v48  ;;  %v5961_v3 = vor.u32 %v5960_v4, %v5957_v0  ;;  %v9731_v56 = vld [vmem:[#allocation3 + $0x40] sm:$0xf]  ;;  %v10529_v34 = vld [vmem:[#allocation3 + $0x44] sm:$0xf0] }
 0x68d   : > { %6375 = vmatmul.bf16.gmra.mxu1 %v9728_v27  ;;  %v5946_v27 = vrot.slane %v5944_v63, 5  ;;  %v6722_v50 = vpack.c.b16 %v6716_v28, %v6715_v26  ;;  %v6687_v60 = vsel %vm11367_vm11, %v9802_v45, %v6686_v51  ;;  %v6521_v29 = vsel %vm11126_vm8, %v6516_v5, %v6520_v46 }
 0x68e   : > { %v6507_v49 = vsel %vm11126_vm8, %v6502_v38, %v6506_v33  ;;  %v6718_v59 = vunpack.c.l.b16 %v6687_v60  ;;  %v5964_v8 = vshll.u32 %v11865_v39, 16  ;;  %v6546_v1 = vunpack.c.l.b16 %v6521_v29 }
 0x68f   : > { %6621 = vmatmul.bf16.gmra.mxu2 %v6549_v30  ;;  %v6683_v30 = vsel %vm11367_vm11, %v9801_v54, %v6682_v25  ;;  %v5947_v43 = vor.u32 %v5946_v27, %v5943_v32  ;;  %v6545_v9 = vunpack.c.l.b16 %v6507_v49  ;;  %v5950_v31 = vshll.u32 %v11863_v24, 16 }
 0x690   : > { %v6717_v47 = vunpack.c.l.b16 %v6683_v30  ;;  %v5962_v35 = vrot.slane %v5961_v3, 4  ;;  %v9803_v63 = vrot.slane %v6646_v58, 9  ;;  %v6690_v52 = vrot.slane %v11887_v16, 5 }
 0x691   : > { %v9804_v37 = vrot.slane %v6647_v57, 9  ;;  %v6694_v21 = vrot.slane %v11891_v22, 5  ;;  %v5948_v41 = vrot.slane %v5947_v43, 4  ;;  %v5966_v20 = vrot.slane %v5964_v8, 5 }
 0x692   : > { %v6723_v48 = vpack.c.b16 %v6718_v59, %v6717_v47  ;;  %v9732_v39 = vor.u32 %v10529_v34, %v9731_v56  ;;  %v6691_v23 = vsel %vm11367_vm11, %v9803_v63, %v6690_v52  ;;  %v5952_v46 = vrot.slane %v5950_v31, 5  ;;  %v10469_v63 = vld [vmem:[#allocation4 + $0x1b8] sm:$0xff] }
 0x693   : > { %v6695_v55 = vsel %vm11367_vm11, %v9804_v37, %v6694_v21  ;;  %v5967_v24 = vsel %vm11126_vm8, %v5962_v35, %v5966_v20  ;;  %v6719_v53 = vunpack.c.l.b16 %v6691_v23  ;;  %v6550_v16 = vpack.c.b16 %v6546_v1, %v6545_v9  ;;  %6884 = vmatpush.bf16.msra.mxu0 %v10469_v63  ;;  %v10468_v21 = vld [vmem:[#allocation4 + $0x1b0] sm:$0xff] }
 0x694   : > { %v6720_v62 = vunpack.c.l.b16 %v6695_v55  ;;  %v5953_v22 = vsel %vm11126_vm8, %v5948_v41, %v5952_v46  ;;  %v5992_v38 = vunpack.c.l.b16 %v5967_v24  ;;  %v10467_v55 = vld [vmem:[#allocation4 + $0x1a8] sm:$0xff] }
 0x695   : > { %6067 = vmatmul.bf16.gmra.mxu3 %v5995_v42  ;;  %v5991_v18 = vunpack.c.l.b16 %v5953_v22 }
 0x696   : > { %v6724_v14 = vpack.c.b16 %v6720_v62, %v6719_v53  ;;  %v10466_v53 = vld [vmem:[#allocation4 + $0x1a0] sm:$0xff] }
 0x697   : > { %6246 = vmatmul.bf16.gmra.mxu0 %v6170_v40  ;;  %v5996_v54 = vpack.c.b16 %v5992_v38, %v5991_v18  ;;  %v10464_v18 = vld [vmem:[#allocation4 + $0x190] sm:$0xff] }
 0x698   : > { %6885 = vmatpush.bf16.msra.mxu0 %v10468_v21 }
 0x69c   : > { %6886 = vmatpush.bf16.msra.mxu0 %v10467_v55  ;;  %v11974_v55 = vld [vmem:[#allocation8 + $0x8] ss:$0 sm:$0xff] }
 0x69d   : > { %6380 = vmatmul.bf16.gmra.mxu1 %v9732_v39 }
 0x69f   : > { %6626 = vmatmul.bf16.gmra.mxu2 %v6550_v16 }
 0x6a0   : > { %6887 = vmatpush.bf16.msra.mxu0 %v10466_v53 }
 0x6a3   : > { %v5512_v25 = vpop.f32.mrf.mxu0 }
 0x6a5   : > { %6072 = vmatmul.bf16.gmra.mxu3 %v5996_v54 }
 0x6a9   : > { %v5678_v0 = vpop.f32.mrf.mxu1 }
 0x6ab   : > { %v11929_v4 = vpop.f32.mrf.mxu0 }
 0x6b1   : > { %v11931_v13 = vpop.f32.mrf.mxu1 }
 0x6b2   : > { %v5812_v27 = vpop.f32.mrf.mxu2 }
 0x6b4   : > { %v5517_v28 = vpop.f32.mrf.mxu0 }
 0x6b5   : > { %6785 = vmatmul.bf16.vlgmr.msrb.gmra.mxu3 %v6721_v11 }
 0x6b8   : > { %v5411_v10 = vpop.f32.mrf.mxu3 }
 0x6b9   : > { %v5513_v5 = vadd.f32 %v5512_v25, %v5411_v10 }
 0x6ba   : > { %v5683_v32 = vpop.f32.mrf.mxu1  ;;  %v11939_v11 = vpop.f32.mrf.mxu2 }
 0x6bb   : > { %v5698_v26 = vadd.f32 %v5678_v0, %v5513_v5  ;;  %v10463_v5 = vld [vmem:[#allocation4 + $0x188] sm:$0xff] }
 0x6bc   : > { %v11935_v42 = vpop.f32.mrf.mxu0 }
 0x6bd   : > { %v5832_v49 = vadd.f32 %v5812_v27, %v5698_v26 }
 0x6c0   : > { %v11933_v45 = vpop.f32.mrf.mxu3 }
 0x6c2   : > { %v11937_v40 = vpop.f32.mrf.mxu1  ;;  %v5817_v43 = vpop.f32.mrf.mxu2 }
 0x6c4   : > { %v5522_v60 = vpop.f32.mrf.mxu0 }
 0x6c5   : > { %6790 = vmatmul.bf16.gmra.mxu3 %v6722_v50 }
 0x6c8   : > { %v5416_v30 = vpop.f32.mrf.mxu3 }
 0x6c9   : > { %v5518_v51 = vadd.f32 %v5517_v28, %v5416_v30  ;;  %v10462_v30 = vld [vmem:[#allocation4 + $0x180] sm:$0xff] }
 0x6ca   : > { %v5688_v29 = vpop.f32.mrf.mxu1  ;;  %v11949_v9 = vpop.f32.mrf.mxu2 }
 0x6cb   : > { %v5700_v33 = vadd.f32 %v5683_v32, %v5518_v51 }
 0x6cc   : > { %v11943_v8 = vpop.f32.mrf.mxu0 }
 0x6cd   : > { %v5834_v1 = vadd.f32 %v5817_v43, %v5700_v33 }
 0x6d0   : > { %v11941_v3 = vpop.f32.mrf.mxu3 }
 0x6d2   : > { %v11945_v56 = vpop.f32.mrf.mxu1  ;;  %v5822_v52 = vpop.f32.mrf.mxu2 }
 0x6d4   : > { %v5527_v31 = vpop.f32.mrf.mxu0 }
 0x6d5   : > { %6795 = vmatmul.bf16.gmra.mxu3 %v6723_v48 }
 0x6d8   : > { %v5421_v47 = vpop.f32.mrf.mxu3 }
 0x6d9   : > { %v5523_v59 = vadd.f32 %v5522_v60, %v5421_v47  ;;  %v5515_v60 = vadd.f32 %v11929_v4, %v11933_v45  ;;  %v5520_v4 = vadd.f32 %v11935_v42, %v11941_v3 }
 0x6da   : > { %v5693_v57 = vpop.f32.mrf.mxu1  ;;  %v11953_v20 = vpop.f32.mrf.mxu2 }
 0x6db   : > { %v5702_v50 = vadd.f32 %v5688_v29, %v5523_v59  ;;  %v5699_v47 = vadd.f32 %v11931_v13, %v5515_v60  ;;  %v5701_v13 = vadd.f32 %v11937_v40, %v5520_v4 }
 0x6dc   : > { %v11955_v54 = vpop.f32.mrf.mxu0 }
 0x6dd   : > { %v5836_v41 = vadd.f32 %v5822_v52, %v5702_v50  ;;  %v5833_v50 = vadd.f32 %v11939_v11, %v5699_v47 }
 0x6e0   : > { %v11947_v34 = vpop.f32.mrf.mxu3 }
 0x6e2   : > { %v5827_v24 = vpop.f32.mrf.mxu2  ;;  %v11959_v10 = vpop.f32.mrf.mxu1 }
 0x6e4   : > { %v6232_v28 = vpop.f32.mrf.mxu0 }
 0x6e5   : > { %6800 = vmatmul.bf16.gmra.mxu3 %v6724_v14  ;;  %v10465_v14 = vld [vmem:[#allocation4 + $0x198] sm:$0xff] }
 0x6e6   : > { %6888 = vmatpush.bf16.msra.mxu0 %v10465_v14 }
 0x6e8   : > { %v5426_v35 = vpop.f32.mrf.mxu3 }
 0x6e9   : > { %v5528_v58 = vadd.f32 %v5527_v31, %v5426_v35 }
 0x6ea   : > { %6889 = vmatpush.bf16.msra.mxu0 %v10464_v18  ;;  %v11961_v26 = vpop.f32.mrf.mxu2  ;;  %v6366_v27 = vpop.f32.mrf.mxu1 }
 0x6eb   : > { %v5704_v48 = vadd.f32 %v5693_v57, %v5528_v58 }
 0x6ec   : > { %v6234_v29 = vpop.f32.mrf.mxu0 }
 0x6ed   : > { %v5838_v62 = vadd.f32 %v5827_v24, %v5704_v48 }
 0x6ee   : > { %6890 = vmatpush.bf16.msra.mxu0 %v10463_v5 }
 0x6f0   : > { %v11951_v37 = vpop.f32.mrf.mxu3 }
 0x6f2   : > { %v6612_v51 = vpop.f32.mrf.mxu2  ;;  %6891 = vmatpush.bf16.msra.mxu0 %v10462_v30  ;;  %v6368_v59 = vpop.f32.mrf.mxu1 }
 0x6f4   : > { %v6237_v58 = vpop.f32.mrf.mxu0 }
 0x6f8   : > { %v6058_v39 = vpop.f32.mrf.mxu3 }
 0x6f9   : > { %v6078_v23 = vadd.f32 %v6058_v39, %v5832_v49 }
 0x6fa   : > { %v6371_v63 = vpop.f32.mrf.mxu1 }
 0x6fb   : > { %v6252_v31 = vadd.f32 %v6232_v28, %v6078_v23 }
 0x6fc   : > { %v6239_v11 = vpop.f32.mrf.mxu0 }
 0x6fd   : > { %v6386_v48 = vadd.f32 %v6366_v27, %v6252_v31 }
 0x6ff   : > { %v6632_v45 = vadd.f32 %v6612_v51, %v6386_v48 }
 0x700   : > { %v6060_v46 = vpop.f32.mrf.mxu3 }
 0x701   : > { %v6079_v35 = vadd.f32 %v6060_v46, %v5833_v50  ;;  %v5835_v46 = vadd.f32 %v11949_v9, %v5701_v13  ;;  %v10564_v13 = vld [vmem:[#allocation6 + $0x6f8] sm:$0xff] }
 0x702   : > { %7233 = vmatpush.bf16.msrb.mxu2 %v10564_v13  ;;  %v10558_v13 = vld [vmem:[#allocation6 + $0x6c8] sm:$0xff] }
 0x703   : > { %v6253_v57 = vadd.f32 %v6234_v29, %v6079_v35 }
 0x704   : > { %v6242_v30 = vpop.f32.mrf.mxu0 }
 0x705   : > { %v6387_v21 = vadd.f32 %v6368_v59, %v6253_v57 }
 0x708   : > { %v6063_v16 = vpop.f32.mrf.mxu3 }
 0x709   : > { %v6080_v22 = vadd.f32 %v6063_v16, %v5834_v1  ;;  %v6614_v1 = vpop.f32.mrf.mxu2  ;;  %v6373_v16 = vpop.f32.mrf.mxu1 }
 0x70a   : > { %v6633_v24 = vadd.f32 %v6614_v1, %v6387_v21 }
 0x70b   : > { %v6254_v14 = vadd.f32 %v6237_v58, %v6080_v22 }
 0x70c   : > { %v6244_v58 = vpop.f32.mrf.mxu0 }
 0x70d   : > { %v6388_v27 = vadd.f32 %v6371_v63, %v6254_v14 }
 0x710   : > { %v6065_v38 = vpop.f32.mrf.mxu3 }
 0x711   : > { %v6081_v18 = vadd.f32 %v6065_v38, %v5835_v46  ;;  %v6376_v29 = vpop.f32.mrf.mxu1 }
 0x713   : > { %v6255_v40 = vadd.f32 %v6239_v11, %v6081_v18 }
 0x715   : > { %v6389_v60 = vadd.f32 %v6373_v16, %v6255_v40  ;;  %v10570_v16 = vld [vmem:[#allocation6 + $0x728] sm:$0xff] }
 0x718   : > { %v6068_v25 = vpop.f32.mrf.mxu3 }
 0x719   : > { %v11957_v0 = vadd.f32 %v6068_v25, %v5836_v41  ;;  %v6617_v41 = vpop.f32.mrf.mxu2 }
 0x71a   : > { %v6634_v9 = vadd.f32 %v6617_v41, %v6388_v27  ;;  %v5530_v41 = vadd.f32 %v11955_v54, %v11951_v37 }
 0x71b   : > { %v6256_v57 = vadd.f32 %v6242_v30, %v11957_v0  ;;  %v10571_v0 = vld [vmem:[#allocation6 + $0x730] sm:$0xff] }
 0x71c   : > { %v5705_v46 = vadd.f32 %v11959_v10, %v5530_v41  ;;  %v10569_v10 = vld [vmem:[#allocation6 + $0x720] sm:$0xff]  ;;  %v10617_v41 = vld [vmem:[#allocation6 + $0x870] sm:$0xff] }
 0x71e   : > { %v5839_v54 = vadd.f32 %v11961_v26, %v5705_v46  ;;  %v6913_v46 = vunpack.c.l.bf16 %v11662_v61  ;;  %v6914_v61 = vunpack.c.l.bf16 %v11664_v2 }
 0x720   : > { %v6070_v32 = vpop.f32.mrf.mxu3 }
 0x721   : > { %v6619_v5 = vpop.f32.mrf.mxu2 }
 0x722   : > { %v6635_v47 = vadd.f32 %v6619_v5, %v6389_v60 }
 0x728   : > { %v6073_v33 = vpop.f32.mrf.mxu3 }
 0x729   : > { %v11965_v49 = vadd.f32 %v6073_v33, %v5838_v62  ;;  %v5525_v33 = vadd.f32 %v11943_v8, %v11947_v34  ;;  %v6622_v59 = vpop.f32.mrf.mxu2 }
 0x72b   : > { %v5703_v22 = vadd.f32 %v11945_v56, %v5525_v33  ;;  %v6390_v56 = vadd.f32 %v6376_v29, %v6256_v57  ;;  %v10580_v57 = vld [vmem:[#allocation6 + $0x778] sm:$0xff] }
 0x72c   : > { %7376 = vmatpush.bf16.msra.mxu3 %v10580_v57 }
 0x72d   : > { %v5837_v1 = vadd.f32 %v11953_v20, %v5703_v22  ;;  %v10572_v20 = vld [vmem:[#allocation6 + $0x738] sm:$0xff]  ;;  %v6636_v11 = vadd.f32 %v6622_v59, %v6390_v56  ;;  %v10567_v56 = vld [vmem:[#allocation6 + $0x710] sm:$0xff] }
 0x72e   : > { %7143 = vmatpush.bf16.msrb.mxu1 %v10572_v20  ;;  %v10576_v20 = vld [vmem:[#allocation6 + $0x758] sm:$0xff] }
 0x72f   : > { %v6083_v48 = vadd.f32 %v6070_v32, %v5837_v1  ;;  %v10563_v32 = vld [vmem:[#allocation6 + $0x6f0] sm:$0xff] }
 0x730   : > { %v11968_v43 = vpop.f32.mrf.mxu3  ;;  %7234 = vmatpush.bf16.msrb.mxu2 %v10563_v32 }
 0x731   : > { %v6257_v4 = vadd.f32 %v6244_v58, %v6083_v48  ;;  %v10562_v48 = vld [vmem:[#allocation6 + $0x6e8] sm:$0xff] }
 0x732   : > { %7144 = vmatpush.bf16.msrb.mxu1 %v10571_v0  ;;  %v11996_v0 = vld [vmem:[#allocation8 + $0x9] ss:$0 sm:$0xff] }
 0x734   : > { %7235 = vmatpush.bf16.msrb.mxu2 %v10562_v48 }
 0x736   : > { %7145 = vmatpush.bf16.msrb.mxu1 %v10570_v16  ;;  %v10574_v16 = vld [vmem:[#allocation6 + $0x748] sm:$0xff] }
 0x738   : > { %v6786_v52 = vpop.f32.mrf.mxu3 }
 0x739   : > { %v6806_v39 = vadd.f32 %v6786_v52, %v6632_v45  ;;  %v6378_v52 = vpop.f32.mrf.mxu1 }
 0x73a   : > { %7146 = vmatpush.bf16.msrb.mxu1 %v10569_v10  ;;  %v10613_v10 = vld [vmem:[#allocation6 + $0x850] sm:$0xff] }
 0x73b   : > { %v6815_v53 = vadd.f32 %v11974_v55, %v6806_v39  ;;  %v6624_v39 = vpop.f32.mrf.mxu2 }
 0x73d   : > { %v6823_v3 = vmax.f32 %v6815_v53, 0.0 }
 0x740   : > { %v6788_v23 = vpop.f32.mrf.mxu3 }
 0x741   : > { %v6807_v62 = vadd.f32 %v6788_v23, %v6633_v24  ;;  %v6391_v24 = vadd.f32 %v6378_v52, %v6257_v4  ;;  %v6247_v23 = vpop.f32.mrf.mxu0  ;;  %v6381_v14 = vpop.f32.mrf.mxu1  ;;  %v10578_v52 = vld [vmem:[#allocation6 + $0x768] sm:$0xff]  ;;  %v10618_v4 = vld [vmem:[#allocation6 + $0x878] sm:$0xff] }
 0x742   : > { %7966 = vmatpush.bf16.msrb.mxu0 %v10618_v4 }
 0x743   : > { %v6816_v42 = vadd.f32 %v11974_v55, %v6807_v62  ;;  %v6637_v62 = vadd.f32 %v6624_v39, %v6391_v24  ;;  %v6627_v40 = vpop.f32.mrf.mxu2  ;;  %v10616_v39 = vld [vmem:[#allocation6 + $0x868] sm:$0xff]  ;;  %v10575_v24 = vld [vmem:[#allocation6 + $0x750] sm:$0xff] }
 0x745   : > { %v6824_v25 = vmax.f32 %v6816_v42, 0.0 }
 0x746   : > { %7967 = vmatpush.bf16.msrb.mxu0 %v10617_v41  ;;  %v6916_v41 = vunpack.c.l.bf16 %v11674_v44 }
 0x747   : > { %v6831_v28 = vpack.c.bf16 %v6824_v25, %v6823_v3  ;;  %v6258_v3 = vadd.f32 %v6247_v23, %v11965_v49  ;;  %v6085_v25 = vadd.f32 %v11968_v43, %v5839_v54  ;;  %v10614_v54 = vld [vmem:[#allocation6 + $0x858] sm:$0xff] }
 0x748   : > { %v6791_v51 = vpop.f32.mrf.mxu3 }
 0x749   : > { %6892 = vmatmul.bf16.vlgmr.msra.gmra.mxu0 %v6831_v28  ;;  %v6808_v38 = vadd.f32 %v6791_v51, %v6634_v9  ;;  %v6249_v30 = vpop.f32.mrf.mxu0  ;;  %v6392_v33 = vadd.f32 %v6381_v14, %v6258_v3  ;;  %v6383_v60 = vpop.f32.mrf.mxu1  ;;  %v10565_v14 = vld [vmem:[#allocation6 + $0x700] sm:$0xff] }
 0x74a   : > { %v6259_v51 = vadd.f32 %v6249_v30, %v6085_v25  ;;  %7968 = vmatpush.bf16.msrb.mxu0 %v10616_v39  ;;  %v10598_v39 = vld [vmem:[#allocation6 + $0x7f0] sm:$0xff] }
 0x74b   : > { %v6817_v31 = vadd.f32 %v11974_v55, %v6808_v38  ;;  %v6638_v29 = vadd.f32 %v6627_v40, %v6392_v33  ;;  %v6629_v38 = vpop.f32.mrf.mxu2  ;;  %v10591_v40 = vld [vmem:[#allocation6 + $0x7b8] sm:$0xff] }
 0x74c   : > { %v6393_v22 = vadd.f32 %v6383_v60, %v6259_v51 }
 0x74d   : > { %v6825_v34 = vmax.f32 %v6817_v31, 0.0 }
 0x74e   : > { %v6639_v43 = vadd.f32 %v6629_v38, %v6393_v22  ;;  %v6915_v22 = vunpack.c.l.bf16 %v11672_v36  ;;  %v10611_v38 = vld [vmem:[#allocation6 + $0x840] sm:$0xff] }
 0x750   : > { %v6793_v50 = vpop.f32.mrf.mxu3 }
 0x751   : > { %v6809_v35 = vadd.f32 %v6793_v50, %v6635_v47 }
 0x753   : > { %v6818_v8 = vadd.f32 %v11974_v55, %v6809_v35 }
 0x755   : > { %v6826_v63 = vmax.f32 %v6818_v8, 0.0  ;;  %v10568_v8 = vld [vmem:[#allocation6 + $0x718] sm:$0xff] }
 0x756   : > { %7147 = vmatpush.bf16.msrb.mxu1 %v10568_v8 }
 0x757   : > { %v6832_v45 = vpack.c.bf16 %v6826_v63, %v6825_v34  ;;  %v10579_v34 = vld [vmem:[#allocation6 + $0x770] sm:$0xff]  ;;  %v10561_v63 = vld [vmem:[#allocation6 + $0x6e0] sm:$0xff] }
 0x758   : > { %v6796_v21 = vpop.f32.mrf.mxu3  ;;  %7377 = vmatpush.bf16.msra.mxu3 %v10579_v34  ;;  %7236 = vmatpush.bf16.msrb.mxu2 %v10561_v63 }
 0x759   : > { %6897 = vmatmul.bf16.gmra.mxu0 %v6832_v45  ;;  %v6810_v53 = vadd.f32 %v6796_v21, %v6636_v11  ;;  %v10560_v45 = vld [vmem:[#allocation6 + $0x6d8] sm:$0xff]  ;;  %v10559_v21 = vld [vmem:[#allocation6 + $0x6d0] sm:$0xff]  ;;  %v10566_v11 = vld [vmem:[#allocation6 + $0x708] sm:$0xff] }
 0x75a   : > { %7148 = vmatpush.bf16.msrb.mxu1 %v10567_v56 }
 0x75b   : > { %v6819_v18 = vadd.f32 %v11974_v55, %v6810_v53  ;;  %v10557_v53 = vld [vmem:[#allocation6 + $0x6c0] sm:$0xff] }
 0x75c   : > { %7378 = vmatpush.bf16.msra.mxu3 %v10578_v52  ;;  %7237 = vmatpush.bf16.msrb.mxu2 %v10560_v45 }
 0x75d   : > { %v6827_v28 = vmax.f32 %v6819_v18, 0.0  ;;  %v10573_v18 = vld [vmem:[#allocation6 + $0x740] sm:$0xff] }
 0x75e   : > { %7149 = vmatpush.bf16.msrb.mxu1 %v10566_v11  ;;  %v10607_v11 = vld [vmem:[#allocation6 + $0x838] sm:$0xff] }
 0x760   : > { %v6798_v37 = vpop.f32.mrf.mxu3  ;;  %7238 = vmatpush.bf16.msrb.mxu2 %v10559_v21 }
 0x761   : > { %v6811_v42 = vadd.f32 %v6798_v37, %v6637_v62  ;;  %v10615_v62 = vld [vmem:[#allocation6 + $0x860] sm:$0xff] }
 0x762   : > { %7969 = vmatpush.bf16.msrb.mxu0 %v10615_v62  ;;  %7150 = vmatpush.bf16.msrb.mxu1 %v10565_v14 }
 0x763   : > { %v6820_v5 = vadd.f32 %v11974_v55, %v6811_v42 }
 0x764   : > { %7239 = vmatpush.bf16.msrb.mxu2 %v10558_v13 }
 0x765   : > { %v6828_v27 = vmax.f32 %v6820_v5, 0.0 }
 0x766   : > { %7970 = vmatpush.bf16.msrb.mxu0 %v10614_v54  ;;  %7495 = vmatpush.bf16.msra.mxu1 %v10591_v40 }
 0x767   : > { %v6833_v9 = vpack.c.bf16 %v6828_v27, %v6827_v28  ;;  %v10612_v27 = vld [vmem:[#allocation6 + $0x848] sm:$0xff] }
 0x768   : > { %v6801_v26 = vpop.f32.mrf.mxu3  ;;  %7240 = vmatpush.bf16.msrb.mxu2 %v10557_v53 }
 0x769   : > { %6902 = vmatmul.bf16.gmra.mxu0 %v6833_v9  ;;  %v6812_v49 = vadd.f32 %v6801_v26, %v6638_v29  ;;  %v6976_v9 = vld [vmem:[#allocation3 + $0x4] sm:$0x1] }
 0x76a   : > { %7971 = vmatpush.bf16.msrb.mxu0 %v10613_v10  ;;  %v6992_v63 = vshll.u32 %v6976_v9, 16 }
 0x76b   : > { %v6821_v59 = vadd.f32 %v11974_v55, %v6812_v49 }
 0x76c   : > { %v6994_v14 = vrot.slane %v6992_v63, 5  ;;  %v10604_v63 = vld [vmem:[#allocation6 + $0x820] sm:$0xff] }
 0x76d   : > { %v6829_v31 = vmax.f32 %v6821_v59, 0.0 }
 0x76e   : > { %7972 = vmatpush.bf16.msrb.mxu0 %v10612_v27 }
 0x770   : > { %v6803_v47 = vpop.f32.mrf.mxu3 }
 0x771   : > { %v6813_v50 = vadd.f32 %v6803_v47, %v6639_v43  ;;  %v10590_v43 = vld [vmem:[#allocation6 + $0x7b0] sm:$0xff]  ;;  %v10599_v47 = vld [vmem:[#allocation6 + $0x7f8] sm:$0xff] }
 0x772   : > { %7973 = vmatpush.bf16.msrb.mxu0 %v10611_v38  ;;  %7496 = vmatpush.bf16.msra.mxu1 %v10590_v43  ;;  %v10605_v38 = vld [vmem:[#allocation6 + $0x828] sm:$0xff] }
 0x773   : > { %v6822_v1 = vadd.f32 %v11974_v55, %v6813_v50  ;;  %v10577_v55 = vld [vmem:[#allocation6 + $0x760] sm:$0xff]  ;;  %v6977_v50 = vld [vmem:[#allocation3 + $0xc] sm:$0x1]  ;;  %7698 = vmatpush.bf16.msra.mxu2 %v10599_v47 }
 0x774   : > { %7379 = vmatpush.bf16.msra.mxu3 %v10577_v55  ;;  %v7281_v34 = vrot.slane %v6977_v50, 5 }
 0x775   : > { %v6830_v35 = vmax.f32 %v6822_v1, 0.0 }
 0x777   : > { %v6834_v58 = vpack.c.bf16 %v6830_v35, %v6829_v31  ;;  %v7277_v31 = vrot.slane %v6976_v9, 5  ;;  %7699 = vmatpush.bf16.msra.mxu2 %v10598_v39 }
 0x778   : > { %7380 = vmatpush.bf16.msra.mxu3 %v10576_v20 }
 0x779   : > { %6907 = vmatmul.bf16.gmra.mxu0 %v6834_v58 }
 0x77c   : > { %7381 = vmatpush.bf16.msra.mxu3 %v10575_v24  ;;  %v10589_v24 = vld [vmem:[#allocation6 + $0x7a8] sm:$0xff] }
 0x77d   : > { %7497 = vmatpush.bf16.msra.mxu1 %v10589_v24 }
 0x780   : > { %7382 = vmatpush.bf16.msra.mxu3 %v10574_v16 }
 0x784   : > { %7383 = vmatpush.bf16.msra.mxu3 %v10573_v18 }
 0x788   : > { %7847 = vmatpush.bf16.msrb.mxu3 %v10607_v11 }
 0x7c6   : > { %v6893_v32 = vpop.f32.mrf.mxu0 }
 0x7c7   : > { %v6894_v23 = vadd.f32 %v11996_v0, %v6893_v32 }
 0x7c9   : > { %v6921_v37 = vadd.f32 %v6913_v46, %v6894_v23  ;;  %v7006_v46 = vshll.u32 %v6977_v50, 16  ;;  %v12016_v50 = vld [vmem:[#allocation3 + $0x14] sm:$0x1] }
 0x7cb   : > { %v6929_v42 = vmax.f32 %v6921_v37, 0.0  ;;  %v10606_v37 = vld [vmem:[#allocation6 + $0x830] sm:$0xff] }
 0x7cc   : > { %7848 = vmatpush.bf16.msrb.mxu3 %v10606_v37  ;;  %v10603_v37 = vld [vmem:[#allocation6 + $0x818] sm:$0xff] }
 0x7cd   : > { %v6937_v3 = vpack.c.bf16 %v6929_v42, %v6929_v42 }
 0x7ce   : > { %v6895_v25 = vpop.f32.mrf.mxu0 }
 0x7cf   : > { %6945 = vst [vmem:[#allocation3] sm:$0xf] %v6937_v3  ;;  %v6896_v5 = vadd.f32 %v11996_v0, %v6895_v25  ;;  %v10597_v3 = vld [vmem:[#allocation6 + $0x7e8] sm:$0xff] }
 0x7d0   : > { %7700 = vmatpush.bf16.msra.mxu2 %v10597_v3  ;;  %7849 = vmatpush.bf16.msrb.mxu3 %v10605_v38 }
 0x7d1   : > { %v6922_v28 = vadd.f32 %v6914_v61, %v6896_v5 }
 0x7d3   : > { %v6930_v30 = vmax.f32 %v6922_v28, 0.0 }
 0x7d4   : > { %7850 = vmatpush.bf16.msrb.mxu3 %v10604_v63 }
 0x7d5   : > { %v6938_v51 = vpack.c.bf16 %v6930_v30, %v6930_v30  ;;  %v7008_v30 = vrot.slane %v7006_v46, 5 }
 0x7d6   : > { %v6898_v33 = vpop.f32.mrf.mxu0  ;;  %v7257_v26 = vld [vmem:[#allocation3] sm:$0xe] }
 0x7d7   : > { %v6953_v60 = vld [vmem:[#allocation3] sm:$0xf]  ;;  %6946 = vst [vmem:[#allocation3 + $0x8] sm:$0xf] %v6938_v51  ;;  %v6899_v29 = vadd.f32 %v11996_v0, %v6898_v33  ;;  %v9945_v1 = vrot.slane %v7257_v26, 9  ;;  %v6917_v33 = vunpack.c.l.bf16 %v11682_v6 }
 0x7d8   : > { %v6983_v49 = vshrl.u32 %v6953_v60, 16  ;;  %v6986_v2 = vshll.u32 %v6953_v60, 16  ;;  %v9903_v8 = vld [vmem:[#allocation3] sm:$0xf]  ;;  %7851 = vmatpush.bf16.msrb.mxu3 %v10603_v37 }
 0x7d9   : > { %v6923_v59 = vadd.f32 %v6915_v22, %v6899_v29  ;;  %v7278_v56 = vsel %vm11367_vm11, %v9945_v1, %v7277_v31  ;;  %v12018_v1 = vld [vmem:[#allocation3 + $0x1c] sm:$0x1]  ;;  %v12020_v31 = vld [vmem:[#allocation6 + $0x8f8] sm:$0xff] }
 0x7da   : > { %v6985_v35 = vrot.slane %v6983_v49, 4  ;;  %v6988_v58 = vrot.slane %v6986_v2, 5  ;;  %v7316_v16 = vunpack.c.l.b16 %v7278_v56  ;;  %v10588_v49 = vld [vmem:[#allocation6 + $0x7a0] sm:$0xff]  ;;  %8318 = vmatpush.bf16.msra.mxu0 %v12020_v31 }
 0x7db   : > { %v6931_v57 = vmax.f32 %v6923_v59, 0.0  ;;  %v10596_v2 = vld [vmem:[#allocation6 + $0x7e0] sm:$0xff]  ;;  %7498 = vmatpush.bf16.msra.mxu1 %v10588_v49 }
 0x7dc   : > { %v6989_v55 = vor.u32 %v6988_v58, %v6985_v35  ;;  %7701 = vmatpush.bf16.msra.mxu2 %v10596_v2  ;;  %v12039_v49 = vld [vmem:[#allocation6 + $0x8e0] sm:$0xff] }
 0x7dd   : > { %v6939_v48 = vpack.c.bf16 %v6931_v57, %v6931_v57  ;;  %v10595_v57 = vld [vmem:[#allocation6 + $0x7d8] sm:$0xff] }
 0x7de   : > { %v6900_v36 = vpop.f32.mrf.mxu0  ;;  %v10554_v52 = vld [vmem:[#allocation3 + $0x4] sm:$0xf0]  ;;  %v6990_v18 = vrot.slane %v6989_v55, 4  ;;  %v7289_v55 = vrot.slane %v12018_v1, 5 }
 0x7df   : > { %v7258_v4 = vld [vmem:[#allocation3 + $0x8] sm:$0xe]  ;;  %6947 = vst [vmem:[#allocation3 + $0x10] sm:$0xf] %v6939_v48  ;;  %v6901_v21 = vadd.f32 %v11996_v0, %v6900_v36  ;;  %v9904_v20 = vor.u32 %v10554_v52, %v9903_v8  ;;  %v7285_v52 = vrot.slane %v12016_v50, 5 }
 0x7e0   : > { %v6954_v45 = vld [vmem:[#allocation3 + $0x8] sm:$0xf]  ;;  %v9946_v13 = vrot.slane %v7258_v4, 9  ;;  %v6995_v28 = vsel %vm11126_vm8, %v6990_v18, %v6994_v14  ;;  %v12024_v4 = vld [vmem:[#allocation6 + $0x8f0] sm:$0xff]  ;;  %7702 = vmatpush.bf16.msra.mxu2 %v10595_v57  ;;  %v10584_v57 = vld [vmem:[#allocation6 + $0x780] sm:$0xff] }
 0x7e1   : > { %v6997_v32 = vshrl.u32 %v6954_v45, 16  ;;  %v7000_v23 = vshll.u32 %v6954_v45, 16  ;;  %v6924_v53 = vadd.f32 %v6916_v41, %v6901_v21  ;;  %7241 = vmatmul.bf16.vlgmr.msrb.gmra.mxu2 %v9904_v20  ;;  %v7083_v47 = vunpack.c.l.b16 %v6995_v28  ;;  %v10587_v48 = vld [vmem:[#allocation6 + $0x798] sm:$0xff]  ;;  %v10594_v21 = vld [vmem:[#allocation6 + $0x7d0] sm:$0xff]  ;;  %8319 = vmatpush.bf16.msra.mxu0 %v12024_v4 }
 0x7e2   : > { %v7282_v62 = vsel %vm11367_vm11, %v9946_v13, %v7281_v34  ;;  %v10586_v41 = vld [vmem:[#allocation6 + $0x790] sm:$0xff]  ;;  %v6918_v13 = vunpack.c.l.bf16 %v11684_v7  ;;  %7499 = vmatpush.bf16.msra.mxu1 %v10587_v48  ;;  %v7020_v7 = vshll.u32 %v12016_v50, 16 }
 0x7e3   : > { %v7317_v54 = vunpack.c.l.b16 %v7282_v62  ;;  %v6999_v44 = vrot.slane %v6997_v32, 4  ;;  %v7002_v42 = vrot.slane %v7000_v23, 5  ;;  %v6932_v25 = vmax.f32 %v6924_v53, 0.0 }
 0x7e4   : > { %7703 = vmatpush.bf16.msra.mxu2 %v10594_v21  ;;  %v12052_v21 = vld [vmem:[#allocation6 + $0x8d8] sm:$0xff] }
 0x7e5   : > { %v7322_v5 = vpack.c.b16 %v7317_v54, %v7316_v16  ;;  %v7003_v61 = vor.u32 %v7002_v42, %v6999_v44  ;;  %v6940_v10 = vpack.c.bf16 %v6932_v25, %v6932_v25  ;;  %v12033_v44 = vld [vmem:[#allocation6 + $0x8e8] sm:$0xff] }
 0x7e6   : > { %v6903_v40 = vpop.f32.mrf.mxu0  ;;  %v7259_v9 = vld [vmem:[#allocation3 + $0x10] sm:$0xe]  ;;  %7500 = vmatpush.bf16.msra.mxu1 %v10586_v41  ;;  %8320 = vmatpush.bf16.msra.mxu0 %v12033_v44 }
 0x7e7   : > { %7384 = vmatmul.bf16.vlgmr.msra.gmra.mxu3 %v7322_v5  ;;  %v7004_v27 = vrot.slane %v7003_v61, 4  ;;  %6948 = vst [vmem:[#allocation3 + $0x18] sm:$0xf] %v6940_v10  ;;  %v6904_v51 = vadd.f32 %v11996_v0, %v6903_v40  ;;  %v6955_v26 = vld [vmem:[#allocation3 + $0x10] sm:$0xf]  ;;  %v9947_v6 = vrot.slane %v7259_v9, 9 }
 0x7e8   : > { %v7011_v29 = vshrl.u32 %v6955_v26, 16  ;;  %v7014_v22 = vshll.u32 %v6955_v26, 16  ;;  %v9907_v36 = vld [vmem:[#allocation3 + $0x10] sm:$0xf]  ;;  %v7034_v5 = vshll.u32 %v12018_v1, 16 }
 0x7e9   : > { %v7009_v60 = vsel %vm11126_vm8, %v7004_v27, %v7008_v30  ;;  %v6925_v43 = vadd.f32 %v6917_v33, %v6904_v51  ;;  %v10099_v45 = vld [vmem:[#allocation3 + $0x10] sm:$0xf]  ;;  %v7286_v32 = vsel %vm11367_vm11, %v9947_v6, %v7285_v52  ;;  %v10593_v27 = vld [vmem:[#allocation6 + $0x7c8] sm:$0xff]  ;;  %v10602_v30 = vld [vmem:[#allocation6 + $0x810] sm:$0xff] }
 0x7ea   : > { %v7084_v59 = vunpack.c.l.b16 %v7009_v60  ;;  %v7013_v35 = vrot.slane %v7011_v29, 4  ;;  %v7016_v58 = vrot.slane %v7014_v22, 5  ;;  %v7318_v25 = vunpack.c.l.b16 %v7286_v32  ;;  %v10585_v33 = vld [vmem:[#allocation6 + $0x788] sm:$0xff]  ;;  %v7525_v9 = vld [vmem:[#allocation3 + $0x8] sm:$0xf]  ;;  %7704 = vmatpush.bf16.msra.mxu2 %v10593_v27  ;;  %v10592_v1 = vld [vmem:[#allocation6 + $0x7c0] sm:$0xff]  ;;  %7852 = vmatpush.bf16.msrb.mxu3 %v10602_v30 }
 0x7eb   : > { %v6933_v8 = vmax.f32 %v6925_v43, 0.0  ;;  %v7527_v26 = vld [vmem:[#allocation3 + $0x10] sm:$0xf]  ;;  %v7022_v29 = vrot.slane %v7020_v7, 5  ;;  %v7036_v38 = vrot.slane %v7034_v5, 5  ;;  %v10601_v6 = vld [vmem:[#allocation6 + $0x808] sm:$0xff]  ;;  %7501 = vmatpush.bf16.msra.mxu1 %v10585_v33  ;;  %8321 = vmatpush.bf16.msra.mxu0 %v12039_v49 }
 0x7ec   : > { %v7089_v34 = vpack.c.b16 %v7084_v59, %v7083_v47  ;;  %v7017_v23 = vor.u32 %v7016_v58, %v7013_v35  ;;  %v12041_v43 = vld [vmem:[#allocation3 + $0x24] sm:$0x1]  ;;  %v7538_v35 = vshrl.u32 %v7525_v9, 16  ;;  %v7552_v58 = vshrl.u32 %v7527_v26, 16  ;;  %v12049_v52 = vld [vmem:[#allocation3 + $0x2c] sm:$0x1] }
 0x7ed   : > { %v6941_v56 = vpack.c.bf16 %v6933_v8, %v6933_v8  ;;  %v6919_v8 = vunpack.c.l.bf16 %v11692_v12  ;;  %v7541_v12 = vshll.u32 %v7525_v9, 16  ;;  %v7062_v37 = vshll.u32 %v12049_v52, 16 }
 0x7ee   : > { %7151 = vmatmul.bf16.vlgmr.msrb.gmra.mxu1 %v7089_v34  ;;  %v6905_v20 = vpop.f32.mrf.mxu0  ;;  %v10555_v39 = vld [vmem:[#allocation3 + $0x14] sm:$0xf0]  ;;  %v7018_v10 = vrot.slane %v7017_v23, 4  ;;  %7705 = vmatpush.bf16.msra.mxu2 %v10592_v1  ;;  %v7540_v7 = vrot.slane %v7538_v35, 4 }
 0x7ef   : > { %v10608_v11 = vld [vmem:[#allocation3 + $0x14] sm:$0xf0]  ;;  %6949 = vst [vmem:[#allocation3 + $0x20] sm:$0xf] %v6941_v56  ;;  %v6906_v46 = vadd.f32 %v11996_v0, %v6905_v20  ;;  %v9908_v53 = vor.u32 %v10555_v39, %v9907_v36  ;;  %7853 = vmatpush.bf16.msrb.mxu3 %v10601_v6  ;;  %7502 = vmatpush.bf16.msra.mxu1 %v10584_v57 }
 0x7f0   : > { %v7260_v24 = vld [vmem:[#allocation3 + $0x18] sm:$0xe]  ;;  %v10100_v62 = vor.u32 %v10608_v11, %v10099_v45  ;;  %v7023_v59 = vsel %vm11126_vm8, %v7018_v10, %v7022_v29  ;;  %v7293_v11 = vrot.slane %v12041_v43, 5  ;;  %8322 = vmatpush.bf16.msra.mxu0 %v12052_v21  ;;  %v10626_v10 = vld [vmem:[#allocation6 + $0x8b8] sm:$0xff] }
 0x7f1   : > { %v9948_v16 = vrot.slane %v7260_v24, 9  ;;  %v6956_v14 = vld [vmem:[#allocation3 + $0x18] sm:$0xf]  ;;  %v6926_v42 = vadd.f32 %v6918_v13, %v6906_v46  ;;  %7246 = vmatmul.bf16.gmra.mxu2 %v9908_v53  ;;  %v7085_v20 = vunpack.c.l.b16 %v7023_v59  ;;  %v7297_v53 = vrot.slane %v12049_v52, 5 }
 0x7f2   : > { %v7025_v54 = vshrl.u32 %v6956_v14, 16  ;;  %v7028_v18 = vshll.u32 %v6956_v14, 16  ;;  %7974 = vmatmul.bf16.vlgmr.msrb.gmra.mxu0 %v10100_v62  ;;  %v7048_v62 = vshll.u32 %v12041_v43, 16  ;;  %v10600_v14 = vld [vmem:[#allocation6 + $0x800] sm:$0xff]  ;;  %10643 = vmatpush.bf16.msrb.mxu2 %v12020_v31  ;;  %v12068_v43 = vld [vmem:[#allocation3 + $0xc] sm:$0x1] }
 0x7f3   : > { %v7290_v3 = vsel %vm11367_vm11, %v9948_v16, %v7289_v55  ;;  %v6934_v51 = vmax.f32 %v6926_v42, 0.0  ;;  %v7555_v55 = vshll.u32 %v7527_v26, 16  ;;  %v12057_v16 = vld [vmem:[#allocation3 + $0x14] sm:$0x1]  ;;  %v12061_v42 = vld [vmem:[#allocation6 + $0x8d0] sm:$0xff]  ;;  %7854 = vmatpush.bf16.msrb.mxu3 %v10600_v14  ;;  %v12072_v59 = vld [vmem:[#allocation6 + $0x8c8] sm:$0xff]  ;;  %8169 = vmatpush.bf16.msrb.mxu1 %v10626_v10 }
 0x7f4   : > { %v7319_v61 = vunpack.c.l.b16 %v7290_v3  ;;  %v7027_v40 = vrot.slane %v7025_v54, 4  ;;  %v7030_v28 = vrot.slane %v7028_v18, 5  ;;  %v7554_v54 = vrot.slane %v7552_v58, 4  ;;  %8323 = vmatpush.bf16.msra.mxu0 %v12061_v42  ;;  %v7728_v14 = vld [vmem:[#allocation3 + $0x8] sm:$0xe] }
 0x7f5   : > { %v6942_v2 = vpack.c.bf16 %v6934_v51, %v6934_v51  ;;  %v7557_v18 = vrot.slane %v7555_v55, 5  ;;  %v7050_v52 = vrot.slane %v7048_v62, 5  ;;  %v12079_v55 = vld [vmem:[#allocation6 + $0x8c0] sm:$0xff] }
 0x7f6   : > { %v7323_v60 = vpack.c.b16 %v7319_v61, %v7318_v25  ;;  %v7031_v22 = vor.u32 %v7030_v28, %v7027_v40  ;;  %v6908_v47 = vpop.f32.mrf.mxu0  ;;  %v7261_v34 = vld [vmem:[#allocation3 + $0x20] sm:$0xe]  ;;  %v7543_v61 = vrot.slane %v7541_v12, 5  ;;  %v6920_v28 = vunpack.c.l.bf16 %v11694_v15  ;;  %10644 = vmatpush.bf16.msrb.mxu2 %v12024_v4 }
 0x7f7   : > { %6950 = vst [vmem:[#allocation3 + $0x28] sm:$0xf] %v6942_v2  ;;  %v6909_v48 = vadd.f32 %v11996_v0, %v6908_v47  ;;  %v6957_v63 = vld [vmem:[#allocation3 + $0x20] sm:$0xf]  ;;  %v9949_v39 = vrot.slane %v7261_v34, 9  ;;  %v7558_v15 = vor.u32 %v7557_v18, %v7554_v54  ;;  %v7561_v47 = vshll.u32 %v12057_v16, 16 }
 0x7f8   : > { %7389 = vmatmul.bf16.gmra.mxu3 %v7323_v60  ;;  %v7032_v50 = vrot.slane %v7031_v22, 4  ;;  %v7039_v56 = vshrl.u32 %v6957_v63, 16  ;;  %v7042_v45 = vshll.u32 %v6957_v63, 16  ;;  %v9911_v25 = vld [vmem:[#allocation3 + $0x20] sm:$0xf]  ;;  %v7544_v6 = vor.u32 %v7543_v61, %v7540_v7  ;;  %8324 = vmatpush.bf16.msra.mxu0 %v12072_v59 }
 0x7f9   : > { %v6927_v41 = vadd.f32 %v6919_v8, %v6909_v48  ;;  %v10103_v5 = vld [vmem:[#allocation3 + $0x20] sm:$0xf]  ;;  %v7294_v33 = vsel %vm11367_vm11, %v9949_v39, %v7293_v11  ;;  %v7547_v63 = vshll.u32 %v12068_v43, 16  ;;  %v7563_v11 = vrot.slane %v7561_v47, 5  ;;  %v12099_v47 = vld [vmem:[#allocation3 + $0x1c] sm:$0x1] }
 0x7fa   : > { %v7037_v36 = vsel %vm11126_vm8, %v7032_v50, %v7036_v38  ;;  %v7041_v24 = vrot.slane %v7039_v56, 4  ;;  %v7044_v32 = vrot.slane %v7042_v45, 5  ;;  %v7320_v1 = vunpack.c.l.b16 %v7294_v33  ;;  %v10625_v8 = vld [vmem:[#allocation6 + $0x8b0] sm:$0xff]  ;;  %10645 = vmatpush.bf16.msrb.mxu2 %v12033_v44 }
 0x7fb   : > { %v7086_v13 = vunpack.c.l.b16 %v7037_v36  ;;  %v6935_v23 = vmax.f32 %v6927_v41, 0.0  ;;  %v7559_v45 = vrot.slane %v7558_v15, 4  ;;  %8170 = vmatpush.bf16.msrb.mxu1 %v10625_v8  ;;  %v7545_v39 = vrot.slane %v7544_v6, 4 }
 0x7fc   : > { %v7045_v9 = vor.u32 %v7044_v32, %v7041_v24  ;;  %v7729_v24 = vld [vmem:[#allocation3 + $0x10] sm:$0xe]  ;;  %v10624_v32 = vld [vmem:[#allocation6 + $0x8a8] sm:$0xff]  ;;  %8325 = vmatpush.bf16.msra.mxu0 %v12079_v55  ;;  %v7748_v33 = vrot.slane %v12068_v43, 5 }
 0x7fd   : > { %v7090_v46 = vpack.c.b16 %v7086_v13, %v7085_v20  ;;  %v6943_v3 = vpack.c.bf16 %v6935_v23, %v6935_v23  ;;  %v7064_v20 = vrot.slane %v7062_v37, 5  ;;  %v7531_v13 = vld [vmem:[#allocation3 + $0x20] sm:$0xf]  ;;  %v7549_v23 = vrot.slane %v7547_v63, 5 }
 0x7fe   : > { %v6910_v40 = vpop.f32.mrf.mxu0  ;;  %v10556_v27 = vld [vmem:[#allocation3 + $0x24] sm:$0xf0]  ;;  %v7046_v58 = vrot.slane %v7045_v9, 4  ;;  %v7564_v62 = vsel %vm11126_vm8, %v7559_v45, %v7563_v11  ;;  %v7580_v37 = vshrl.u32 %v7531_v13, 16  ;;  %v7583_v7 = vshll.u32 %v7531_v13, 16  ;;  %10646 = vmatpush.bf16.msrb.mxu2 %v12039_v49  ;;  %v10621_v13 = vld [vmem:[#allocation6 + $0x890] sm:$0xff] }
 0x7ff   : > { %7156 = vmatmul.bf16.gmra.mxu1 %v7090_v46  ;;  %v10609_v30 = vld [vmem:[#allocation3 + $0x24] sm:$0xf0]  ;;  %6951 = vst [vmem:[#allocation3 + $0x30] sm:$0xf] %v6943_v3  ;;  %v6911_v26 = vadd.f32 %v11996_v0, %v6910_v40  ;;  %v9912_v31 = vor.u32 %v10556_v27, %v9911_v25  ;;  %v7529_v46 = vld [vmem:[#allocation3 + $0x18] sm:$0xf]  ;;  %v7550_v44 = vsel %vm11126_vm8, %v7545_v39, %v7549_v23  ;;  %v7639_v10 = vunpack.c.l.b16 %v7564_v62 }
 0x800   : > { %v7262_v51 = vld [vmem:[#allocation3 + $0x28] sm:$0xe]  ;;  %v10104_v60 = vor.u32 %v10609_v30, %v10103_v5  ;;  %v7051_v12 = vsel %vm11126_vm8, %v7046_v58, %v7050_v52  ;;  %8171 = vmatpush.bf16.msrb.mxu1 %v10624_v32  ;;  %v10060_v3 = vrot.slane %v7729_v24, 9  ;;  %v7566_v25 = vshrl.u32 %v7529_v46, 16  ;;  %v12101_v58 = vld [vmem:[#allocation3 + $0x1c] sm:$0x1] }
 0x801   : > { %v9950_v29 = vrot.slane %v7262_v51, 9  ;;  %v6958_v22 = vld [vmem:[#allocation3 + $0x28] sm:$0xf]  ;;  %v6928_v50 = vadd.f32 %v6920_v28, %v6911_v26  ;;  %7251 = vmatmul.bf16.gmra.mxu2 %v9912_v31  ;;  %v7087_v54 = vunpack.c.l.b16 %v7051_v12  ;;  %v7569_v5 = vshll.u32 %v7529_v46, 16  ;;  %v10623_v26 = vld [vmem:[#allocation6 + $0x8a0] sm:$0xff] }
 0x802   : > { %v7053_v2 = vshrl.u32 %v6958_v22, 16  ;;  %v7056_v38 = vshll.u32 %v6958_v22, 16  ;;  %7979 = vmatmul.bf16.gmra.mxu0 %v10104_v60  ;;  %v10059_v40 = vrot.slane %v7728_v14, 9  ;;  %v7752_v28 = vrot.slane %v12057_v16, 5  ;;  %10647 = vmatpush.bf16.msrb.mxu2 %v12052_v21  ;;  %v10581_v39 = vld [vmem:[#allocation3 + $0xc] sm:$0xf0] }
 0x803   : > { %v7298_v0 = vsel %vm11367_vm11, %v9950_v29, %v7297_v53  ;;  %v6936_v34 = vmax.f32 %v6928_v50, 0.0  ;;  %v7582_v27 = vrot.slane %v7580_v37, 4  ;;  %v7585_v30 = vrot.slane %v7583_v7, 5  ;;  %v8200_v50 = vld [vmem:[#allocation3 + $0x18] sm:$0xe] }
 0x804   : > { %v7321_v35 = vunpack.c.l.b16 %v7298_v0  ;;  %v7055_v57 = vrot.slane %v7053_v2, 4  ;;  %v7058_v48 = vrot.slane %v7056_v38, 5  ;;  %v7638_v51 = vunpack.c.l.b16 %v7550_v44  ;;  %v7532_v38 = vld [vmem:[#allocation3 + $0x24] sm:$0x1]  ;;  %8172 = vmatpush.bf16.msrb.mxu1 %v10623_v26  ;;  %v10622_v0 = vld [vmem:[#allocation6 + $0x898] sm:$0xff] }
 0x805   : > { %v6944_v41 = vpack.c.bf16 %v6936_v34, %v6936_v34  ;;  %v7753_v9 = vsel %vm11367_vm11, %v10060_v3, %v7752_v28  ;;  %v7568_v29 = vrot.slane %v7566_v25, 4  ;;  %v7571_v22 = vrot.slane %v7569_v5, 5  ;;  %v12105_v34 = vld [vmem:[#allocation3 + $0x14] sm:$0x1]  ;;  %v7730_v32 = vld [vmem:[#allocation3 + $0x18] sm:$0xe] }
 0x806   : > { %v7324_v36 = vpack.c.b16 %v7321_v35, %v7320_v1  ;;  %v7059_v56 = vor.u32 %v7058_v48, %v7055_v57  ;;  %v10107_v31 = vld [vmem:[#allocation3 + $0x30] sm:$0xf]  ;;  %v7644_v49 = vpack.c.b16 %v7639_v10, %v7638_v51  ;;  %v7749_v16 = vsel %vm11367_vm11, %v10059_v40, %v7748_v33  ;;  %10648 = vmatpush.bf16.msrb.mxu2 %v12061_v42  ;;  %v9985_v14 = vld [vmem:[#allocation3 + $0x8] sm:$0xf] }
 0x807   : > { %6952 = vst [vmem:[#allocation3 + $0x38] sm:$0xf] %v6944_v41  ;;  %v7788_v15 = vunpack.c.l.b16 %v7753_v9  ;;  %v7586_v43 = vor.u32 %v7585_v30, %v7582_v27  ;;  %v7787_v1 = vunpack.c.l.b16 %v7749_v16  ;;  %v7572_v6 = vor.u32 %v7571_v22, %v7568_v29  ;;  %v8199_v57 = vld [vmem:[#allocation3 + $0x10] sm:$0xe]  ;;  %v10620_v30 = vld [vmem:[#allocation6 + $0x888] sm:$0xff] }
 0x808   : > { %7394 = vmatmul.bf16.gmra.mxu3 %v7324_v36  ;;  %v7060_v4 = vrot.slane %v7059_v56, 4  ;;  %v7589_v35 = vshll.u32 %v7532_v38, 16  ;;  %v7575_v21 = vshll.u32 %v12099_v47, 16  ;;  %8173 = vmatpush.bf16.msrb.mxu1 %v10622_v0  ;;  %v10174_v63 = vrot.slane %v8200_v50, 9  ;;  %v7535_v52 = vld [vmem:[#allocation3 + $0x30] sm:$0xf] }
 0x809   : > { %v7793_v48 = vpack.c.b16 %v7788_v15, %v7787_v1  ;;  %v7587_v8 = vrot.slane %v7586_v43, 4  ;;  %v8223_v36 = vrot.slane %v12101_v58, 5  ;;  %v7573_v56 = vrot.slane %v7572_v6, 4  ;;  %v7534_v22 = vld [vmem:[#allocation3 + $0x2c] sm:$0x1] }
 0x80a   : > { %v7065_v53 = vsel %vm11126_vm8, %v7060_v4, %v7064_v20  ;;  %v7591_v45 = vrot.slane %v7589_v35, 5  ;;  %v10173_v41 = vrot.slane %v8199_v57, 9  ;;  %v7731_v20 = vld [vmem:[#allocation3 + $0x20] sm:$0xe]  ;;  %10649 = vmatpush.bf16.msrb.mxu2 %v12072_v59  ;;  %v7577_v42 = vrot.slane %v7575_v21, 5 }
 0x80b   : > { %v7088_v18 = vunpack.c.l.b16 %v7065_v53  ;;  %v8219_v12 = vrot.slane %v12105_v34, 5  ;;  %v7533_v4 = vld [vmem:[#allocation3 + $0x28] sm:$0xf]  ;;  %v8224_v24 = vsel %vm11367_vm11, %v10174_v63, %v8223_v36  ;;  %v7608_v23 = vshrl.u32 %v7535_v52, 16  ;;  %v7733_v1 = vld [vmem:[#allocation3 + $0x30] sm:$0xe] }
 0x80c   : > { %v7592_v11 = vsel %vm11126_vm8, %v7587_v8, %v7591_v45  ;;  %v7611_v46 = vshll.u32 %v7535_v52, 16  ;;  %8174 = vmatpush.bf16.msrb.mxu1 %v10621_v13  ;;  %v10062_v53 = vrot.slane %v7731_v20, 9  ;;  %v7760_v62 = vrot.slane %v7532_v38, 5  ;;  %v10582_v6 = vld [vmem:[#allocation3 + $0x1c] sm:$0xf0] }
 0x80d   : > { %v7091_v61 = vpack.c.b16 %v7088_v18, %v7087_v54  ;;  %v7578_v59 = vsel %vm11126_vm8, %v7573_v56, %v7577_v42  ;;  %v8220_v37 = vsel %vm11367_vm11, %v10173_v41, %v8219_v12  ;;  %v7594_v7 = vshrl.u32 %v7533_v4, 16  ;;  %v7732_v57 = vld [vmem:[#allocation3 + $0x28] sm:$0xe]  ;;  %v9989_v8 = vld [vmem:[#allocation3 + $0x18] sm:$0xf] }
 0x80e   : > { %v10610_v60 = vld [vmem:[#allocation3 + $0x34] sm:$0xf0]  ;;  %v7597_v54 = vshll.u32 %v7533_v4, 16  ;;  %10650 = vmatpush.bf16.msrb.mxu2 %v12079_v55  ;;  %v9986_v18 = vor.u32 %v10581_v39, %v9985_v14  ;;  %v7641_v3 = vunpack.c.l.b16 %v7592_v11  ;;  %v8259_v44 = vunpack.c.l.b16 %v8224_v24  ;;  %v8202_v39 = vld [vmem:[#allocation3 + $0x28] sm:$0xe] }
 0x80f   : > { %7161 = vmatmul.bf16.gmra.mxu1 %v7091_v61  ;;  %v10108_v2 = vor.u32 %v10610_v60, %v10107_v31  ;;  %v10061_v25 = vrot.slane %v7730_v32, 9  ;;  %v7610_v5 = vrot.slane %v7608_v23, 4  ;;  %v7613_v61 = vrot.slane %v7611_v46, 5  ;;  %v7536_v31 = vld [vmem:[#allocation3 + $0x34] sm:$0x1] }
 0x810   : > { %v7640_v10 = vunpack.c.l.b16 %v7578_v59  ;;  %v8258_v40 = vunpack.c.l.b16 %v8220_v37  ;;  %v7756_v28 = vrot.slane %v12099_v47, 5  ;;  %v7761_v27 = vsel %vm11367_vm11, %v10062_v53, %v7760_v62  ;;  %8175 = vmatpush.bf16.msrb.mxu1 %v10620_v30  ;;  %v7998_v11 = vld [vmem:[#allocation3 + $0x18] sm:$0xf]  ;;  %v12132_v32 = vld [vmem:[#allocation3 + $0x2c] sm:$0x1] }
 0x811   : > { %7706 = vmatmul.bf16.vlgmr.msra.gmra.mxu2 %v7644_v49  ;;  %v7596_v51 = vrot.slane %v7594_v7, 4  ;;  %v7599_v33 = vrot.slane %v7597_v54, 5  ;;  %v7790_v60 = vunpack.c.l.b16 %v7761_v27  ;;  %v7614_v29 = vor.u32 %v7613_v61, %v7610_v5  ;;  %v10619_v49 = vld [vmem:[#allocation6 + $0x880] sm:$0xff]  ;;  %v8201_v23 = vld [vmem:[#allocation3 + $0x20] sm:$0xe] }
 0x812   : > { %7984 = vmatmul.bf16.gmra.mxu0 %v10108_v2  ;;  %v7645_v9 = vpack.c.b16 %v7641_v3, %v7640_v10  ;;  %v8264_v26 = vpack.c.b16 %v8259_v44, %v8258_v40  ;;  %v7757_v55 = vsel %vm11367_vm11, %v10061_v25, %v7756_v28  ;;  %v7617_v38 = vshll.u32 %v7536_v31, 16  ;;  %v7996_v46 = vld [vmem:[#allocation3 + $0x10] sm:$0xf]  ;;  %v12134_v37 = vld [vmem:[#allocation3 + $0x24] sm:$0x1] }
 0x813   : > { %v7789_v2 = vunpack.c.l.b16 %v7757_v55  ;;  %v7600_v16 = vor.u32 %v7599_v33, %v7596_v51  ;;  %v7603_v47 = vshll.u32 %v7534_v22, 16  ;;  %v7615_v43 = vrot.slane %v7614_v29, 4  ;;  %v10583_v44 = vld [vmem:[#allocation3 + $0x2c] sm:$0xf0]  ;;  %v9993_v40 = vld [vmem:[#allocation3 + $0x28] sm:$0xf] }
 0x814   : > { %8176 = vmatpush.bf16.msrb.mxu1 %v10619_v49  ;;  %v7619_v0 = vrot.slane %v7617_v38, 5  ;;  %v9990_v36 = vor.u32 %v10582_v6, %v9989_v8  ;;  %v10063_v56 = vrot.slane %v7732_v57, 9  ;;  %v7768_v45 = vrot.slane %v7536_v31, 5  ;;  %v8204_v49 = vld [vmem:[#allocation3 + $0x38] sm:$0xe] }
 0x815   : > { %v7794_v15 = vpack.c.b16 %v7790_v60, %v7789_v2  ;;  %v7601_v50 = vrot.slane %v7600_v16, 4  ;;  %v7605_v35 = vrot.slane %v7603_v47, 5  ;;  %v7764_v20 = vrot.slane %v7534_v22, 5  ;;  %v8002_v2 = vld [vmem:[#allocation3 + $0x28] sm:$0xf] }
 0x816   : > { %v7620_v21 = vsel %vm11126_vm8, %v7615_v43, %v7619_v0  ;;  %v10176_v62 = vrot.slane %v8202_v39, 9  ;;  %v8023_v14 = vshrl.u32 %v7998_v11, 16  ;;  %v8026_v59 = vshll.u32 %v7998_v11, 16  ;;  %v8203_v43 = vld [vmem:[#allocation3 + $0x30] sm:$0xe] }
 0x817   : > { %v7606_v63 = vsel %vm11126_vm8, %v7601_v50, %v7605_v35  ;;  %v7643_v52 = vunpack.c.l.b16 %v7620_v21  ;;  %v7765_v12 = vsel %vm11367_vm11, %v10063_v56, %v7764_v20  ;;  %v10175_v7 = vrot.slane %v8201_v23, 9  ;;  %v8000_v50 = vld [vmem:[#allocation3 + $0x20] sm:$0xf]  ;;  %v8004_v19 = vld [vmem:[#allocation3 + $0x30] sm:$0xf] }
 0x818   : > { %7855 = vmatmul.bf16.vlgmr.msrb.gmra.mxu3 %v7793_v48  ;;  %v10064_v48 = vrot.slane %v7733_v1, 9  ;;  %v7642_v41 = vunpack.c.l.b16 %v7606_v63  ;;  %v7791_v24 = vunpack.c.l.b16 %v7765_v12  ;;  %v8231_v54 = vrot.slane %v12132_v32, 5 }
 0x819   : > { %v8012_v3 = vshll.u32 %v7996_v46, 16  ;;  %v8227_v25 = vrot.slane %v12134_v37, 5  ;;  %v8025_v61 = vrot.slane %v8023_v14, 4  ;;  %v8028_v10 = vrot.slane %v8026_v59, 5  ;;  %v8006_v14 = vld [vmem:[#allocation3 + $0x38] sm:$0xf] }
 0x81a   : > { %v7769_v13 = vsel %vm11367_vm11, %v10064_v48, %v7768_v45  ;;  %v7646_v42 = vpack.c.b16 %v7643_v52, %v7642_v41  ;;  %v8232_v5 = vsel %vm11367_vm11, %v10176_v62, %v8231_v54  ;;  %v9994_v51 = vor.u32 %v10583_v44, %v9993_v40 }
 0x81b   : > { %v7792_v4 = vunpack.c.l.b16 %v7769_v13  ;;  %v8228_v28 = vsel %vm11367_vm11, %v10175_v7, %v8227_v25  ;;  %v8014_v30 = vrot.slane %v8012_v3, 5  ;;  %v8261_v33 = vunpack.c.l.b16 %v8232_v5 }
 0x81c   : > { %v8032_v31 = vshll.u32 %v12101_v58, 16  ;;  %v8018_v29 = vshll.u32 %v12105_v34, 16  ;;  %v10178_v1 = vrot.slane %v8204_v49, 9  ;;  %v8051_v6 = vshrl.u32 %v8002_v2, 16  ;;  %v8005_v58 = vld [vmem:[#allocation3 + $0x34] sm:$0x1] }
 0x81d   : > { %v7795_v53 = vpack.c.b16 %v7792_v4, %v7791_v24  ;;  %v8054_v35 = vshll.u32 %v8002_v2, 16  ;;  %v10177_v57 = vrot.slane %v8203_v43, 9  ;;  %v8037_v48 = vshrl.u32 %v8000_v50, 16 }
 0x81e   : > { %v8034_v38 = vrot.slane %v8032_v31, 5  ;;  %v8020_v47 = vrot.slane %v8018_v29, 5  ;;  %v8040_v8 = vshll.u32 %v8000_v50, 16  ;;  %v8053_v56 = vrot.slane %v8051_v6, 4 }
 0x81f   : > { %7503 = vmatmul.bf16.vlgmr.msra.gmra.mxu1 %v9986_v18  ;;  %v8009_v18 = vshrl.u32 %v7996_v46, 16  ;;  %v8056_v45 = vrot.slane %v8054_v35, 5  ;;  %v8039_v13 = vrot.slane %v8037_v48, 4  ;;  %v8060_v23 = vshll.u32 %v12132_v32, 16 }
 0x820   : > { %v8079_v3 = vshrl.u32 %v8006_v14, 16  ;;  %v8082_v44 = vshll.u32 %v8006_v14, 16  ;;  %v8065_v5 = vshrl.u32 %v8004_v19, 16  ;;  %v8068_v32 = vshll.u32 %v8004_v19, 16 }
 0x821   : > { %7711 = vmatmul.bf16.gmra.mxu2 %v7645_v9  ;;  %v8011_v27 = vrot.slane %v8009_v18, 4  ;;  %v8029_v9 = vor.u32 %v8028_v10, %v8025_v61  ;;  %v8057_v39 = vor.u32 %v8056_v45, %v8053_v56  ;;  %v8062_v7 = vrot.slane %v8060_v23, 5 }
 0x822   : > { %8326 = vmatmul.bf16.vlgmr.msra.gmra.mxu0 %v8264_v26  ;;  %v8260_v26 = vunpack.c.l.b16 %v8228_v28  ;;  %v8081_v10 = vrot.slane %v8079_v3, 4  ;;  %v8067_v28 = vrot.slane %v8065_v5, 4 }
 0x823   : > { %v8015_v55 = vor.u32 %v8014_v30, %v8011_v27  ;;  %v8030_v22 = vrot.slane %v8029_v9, 4  ;;  %v8058_v62 = vrot.slane %v8057_v39, 4  ;;  %v8070_v27 = vrot.slane %v8068_v32, 5 }
 0x824   : > { %v8265_v60 = vpack.c.b16 %v8261_v33, %v8260_v26  ;;  %v8074_v26 = vshll.u32 %v8005_v58, 16 }
 0x825   : > { %v8016_v16 = vrot.slane %v8015_v55, 4  ;;  %v8035_v0 = vsel %vm11126_vm8, %v8030_v22, %v8034_v38  ;;  %v8063_v18 = vsel %vm11126_vm8, %v8058_v62, %v8062_v7  ;;  %v8071_v33 = vor.u32 %v8070_v27, %v8067_v28 }
 0x826   : > { %v8110_v63 = vunpack.c.l.b16 %v8035_v0  ;;  %v8112_v61 = vunpack.c.l.b16 %v8063_v18  ;;  %v8076_v22 = vrot.slane %v8074_v26, 5 }
 0x827   : > { %v8021_v34 = vsel %vm11126_vm8, %v8016_v16, %v8020_v47  ;;  %v8072_v31 = vrot.slane %v8071_v33, 4 }
 0x828   : > { %7860 = vmatmul.bf16.gmra.mxu3 %v7794_v15  ;;  %v8007_v15 = vld [vmem:[#allocation3 + $0x3c] sm:$0x1]  ;;  %v8109_v41 = vunpack.c.l.b16 %v8021_v34 }
 0x829   : > { %v8239_v21 = vrot.slane %v8007_v15, 5  ;;  %v8088_v9 = vshll.u32 %v8007_v15, 16  ;;  %v8077_v2 = vsel %vm11126_vm8, %v8072_v31, %v8076_v22 }
 0x82a   : > { %v8115_v12 = vpack.c.b16 %v8110_v63, %v8109_v41  ;;  %v8113_v38 = vunpack.c.l.b16 %v8077_v2 }
 0x82b   : > { %v8240_v52 = vsel %vm11367_vm11, %v10178_v1, %v8239_v21 }
 0x82c   : > { %v8263_v4 = vunpack.c.l.b16 %v8240_v52 }
 0x82f   : > { %7508 = vmatmul.bf16.gmra.mxu1 %v9990_v36  ;;  %v8235_v36 = vrot.slane %v8005_v58, 5 }
 0x831   : > { %7716 = vmatmul.bf16.gmra.mxu2 %v7646_v42  ;;  %v8236_v20 = vsel %vm11367_vm11, %v10177_v57, %v8235_v36  ;;  %v8042_v42 = vrot.slane %v8040_v8, 5 }
 0x832   : > { %v8262_v11 = vunpack.c.l.b16 %v8236_v20 }
 0x833   : > { %v8043_v24 = vor.u32 %v8042_v42, %v8039_v13 }
 0x834   : > { %v8266_v46 = vpack.c.b16 %v8263_v4, %v8262_v11 }
 0x835   : > { %v8044_v59 = vrot.slane %v8043_v24, 4 }
 0x838   : > { %7865 = vmatmul.bf16.gmra.mxu3 %v7795_v53  ;;  %v8046_v53 = vshll.u32 %v12134_v37, 16  ;;  %v8084_v37 = vrot.slane %v8082_v44, 5 }
 0x83a   : > { %v8048_v54 = vrot.slane %v8046_v53, 5 }
 0x83c   : > { %v8049_v25 = vsel %vm11126_vm8, %v8044_v59, %v8048_v54 }
 0x83d   : > { %v8111_v40 = vunpack.c.l.b16 %v8049_v25 }
 0x83f   : > { %7513 = vmatmul.bf16.gmra.mxu1 %v9994_v51  ;;  %v8116_v30 = vpack.c.b16 %v8112_v61, %v8111_v40  ;;  %v8085_v51 = vor.u32 %v8084_v37, %v8081_v10 }
 0x841   : > { %8331 = vmatmul.bf16.vlgmr.msrb.gmra.mxu2 %v8265_v60  ;;  %v8086_v55 = vrot.slane %v8085_v51, 4  ;;  %v8090_v60 = vrot.slane %v8088_v9, 5 }
 0x843   : > { %v8091_v49 = vsel %vm11126_vm8, %v8086_v55, %v8090_v60 }
 0x844   : > { %v8114_v16 = vunpack.c.l.b16 %v8091_v49 }
 0x846   : > { %v8117_v0 = vpack.c.b16 %v8114_v16, %v8113_v38 }
 0x84f   : > { %8177 = vmatmul.bf16.vlgmr.msrb.gmra.mxu1 %v8115_v12 }
 0x851   : > { %8336 = vmatmul.bf16.gmra.mxu2 %v8266_v46 }
 0x85f   : > { %8182 = vmatmul.bf16.gmra.mxu1 %v8116_v30 }
 0x864   : > { %v7242_v29 = vpop.f32.mrf.mxu2 }
 0x86a   : > { %v7385_v43 = vpop.f32.mrf.mxu3 }
 0x86b   : > { %v7152_v47 = vpop.f32.mrf.mxu1 }
 0x86c   : > { %v7243_v50 = vadd.f32 %v7242_v29, %v7152_v47  ;;  %v7244_v1 = vpop.f32.mrf.mxu2 }
 0x86e   : > { %v7400_v15 = vadd.f32 %v7385_v43, %v7243_v50 }
 0x86f   : > { %8187 = vmatmul.bf16.gmra.mxu1 %v8117_v0  ;;  %v7975_v45 = vpop.f32.mrf.mxu0 }
 0x872   : > { %v7387_v58 = vpop.f32.mrf.mxu3 }
 0x873   : > { %v7154_v6 = vpop.f32.mrf.mxu1 }
 0x874   : > { %v7245_v35 = vadd.f32 %v7244_v1, %v7154_v6  ;;  %v7247_v21 = vpop.f32.mrf.mxu2 }
 0x876   : > { %v7401_v34 = vadd.f32 %v7387_v58, %v7245_v35 }
 0x877   : > { %v7977_v12 = vpop.f32.mrf.mxu0 }
 0x87b   : > { %v7390_v20 = vpop.f32.mrf.mxu3 }
 0x87c   : > { %v7157_v57 = vpop.f32.mrf.mxu1  ;;  %v7249_v8 = vpop.f32.mrf.mxu2 }
 0x87d   : > { %v7248_v48 = vadd.f32 %v7247_v21, %v7157_v57 }
 0x87f   : > { %v7980_v23 = vpop.f32.mrf.mxu0  ;;  %v7402_v33 = vadd.f32 %v7390_v20, %v7248_v48 }
 0x883   : > { %v7392_v24 = vpop.f32.mrf.mxu3 }
 0x884   : > { %v7159_v63 = vpop.f32.mrf.mxu1  ;;  %v7252_v36 = vpop.f32.mrf.mxu2 }
 0x885   : > { %v7250_v17 = vadd.f32 %v7249_v8, %v7159_v63 }
 0x887   : > { %v7982_v7 = vpop.f32.mrf.mxu0  ;;  %v7403_v16 = vadd.f32 %v7392_v24, %v7250_v17 }
 0x88b   : > { %v7395_v14 = vpop.f32.mrf.mxu3 }
 0x88c   : > { %v7162_v52 = vpop.f32.mrf.mxu1  ;;  %v7254_v41 = vpop.f32.mrf.mxu2 }
 0x88d   : > { %v7253_v56 = vadd.f32 %v7252_v36, %v7162_v52 }
 0x88f   : > { %v7985_v3 = vpop.f32.mrf.mxu0  ;;  %v7404_v8 = vadd.f32 %v7395_v14, %v7253_v56 }
 0x893   : > { %v7397_v54 = vpop.f32.mrf.mxu3 }
 0x894   : > { %v7164_v13 = vpop.f32.mrf.mxu1  ;;  %v7707_v4 = vpop.f32.mrf.mxu2 }
 0x895   : > { %v12162_v42 = vadd.f32 %v7254_v41, %v7164_v13 }
 0x897   : > { %v12164_v32 = vpop.f32.mrf.mxu0 }
 0x89b   : > { %v7856_v25 = vpop.f32.mrf.mxu3 }
 0x89c   : > { %v7504_v39 = vpop.f32.mrf.mxu1  ;;  %v7709_v62 = vpop.f32.mrf.mxu2 }
 0x89d   : > { %v7519_v11 = vadd.f32 %v7504_v39, %v7400_v15 }
 0x89f   : > { %v7722_v40 = vadd.f32 %v7707_v4, %v7519_v11  ;;  %v8327_v30 = vpop.f32.mrf.mxu0  ;;  %v7405_v11 = vadd.f32 %v7397_v54, %v12162_v42 }
 0x8a1   : > { %v7871_v28 = vadd.f32 %v7856_v25, %v7722_v40 }
 0x8a3   : > { %v7858_v37 = vpop.f32.mrf.mxu3  ;;  %v7990_v31 = vadd.f32 %v7975_v45, %v7871_v28 }
 0x8a4   : > { %v7506_v46 = vpop.f32.mrf.mxu1  ;;  %v7712_v19 = vpop.f32.mrf.mxu2 }
 0x8a5   : > { %v7520_v53 = vadd.f32 %v7506_v46, %v7401_v34 }
 0x8a7   : > { %v7723_v27 = vadd.f32 %v7709_v62, %v7520_v53  ;;  %v8329_v43 = vpop.f32.mrf.mxu0 }
 0x8a9   : > { %v7872_v26 = vadd.f32 %v7858_v37, %v7723_v27 }
 0x8ab   : > { %v7861_v60 = vpop.f32.mrf.mxu3  ;;  %v7991_v49 = vadd.f32 %v7977_v12, %v7872_v26 }
 0x8ac   : > { %v7509_v59 = vpop.f32.mrf.mxu1  ;;  %v7714_v44 = vpop.f32.mrf.mxu2 }
 0x8ad   : > { %v7521_v55 = vadd.f32 %v7509_v59, %v7402_v33 }
 0x8af   : > { %v7724_v22 = vadd.f32 %v7712_v19, %v7521_v55 }
 0x8b1   : > { %v7873_v50 = vadd.f32 %v7861_v60, %v7724_v22 }
 0x8b3   : > { %v7863_v58 = vpop.f32.mrf.mxu3  ;;  %v7992_v57 = vadd.f32 %v7980_v23, %v7873_v50 }
 0x8b4   : > { %v7511_v18 = vpop.f32.mrf.mxu1  ;;  %v7717_v61 = vpop.f32.mrf.mxu2 }
 0x8b5   : > { %v7522_v0 = vadd.f32 %v7511_v18, %v7403_v16 }
 0x8b7   : > { %v7725_v34 = vadd.f32 %v7714_v44, %v7522_v0 }
 0x8b9   : > { %v7874_v17 = vadd.f32 %v7863_v58, %v7725_v34 }
 0x8bb   : > { %v7993_v12 = vadd.f32 %v7982_v7, %v7874_v17  ;;  %v7866_v4 = vpop.f32.mrf.mxu3 }
 0x8bc   : > { %v7514_v5 = vpop.f32.mrf.mxu1  ;;  %v7719_v9 = vpop.f32.mrf.mxu2 }
 0x8bd   : > { %v7523_v36 = vadd.f32 %v7514_v5, %v7404_v8 }
 0x8bf   : > { %v7726_v13 = vadd.f32 %v7717_v61, %v7523_v36 }
 0x8c1   : > { %v7875_v46 = vadd.f32 %v7866_v4, %v7726_v13 }
 0x8c3   : > { %v7994_v59 = vadd.f32 %v7985_v3, %v7875_v46  ;;  %v7868_v25 = vpop.f32.mrf.mxu3 }
 0x8c4   : > { %v7516_v10 = vpop.f32.mrf.mxu1  ;;  %v8332_v15 = vpop.f32.mrf.mxu2 }
 0x8c5   : > { %v7524_v53 = vadd.f32 %v7516_v10, %v7405_v11 }
 0x8c7   : > { %v7727_v14 = vadd.f32 %v7719_v9, %v7524_v53 }
 0x8c9   : > { %v7876_v5 = vadd.f32 %v7868_v25, %v7727_v14 }
 0x8cb   : > { %v7995_v42 = vadd.f32 %v12164_v32, %v7876_v5 }
 0x8cc   : > { %v8178_v51 = vpop.f32.mrf.mxu1  ;;  %v8334_v41 = vpop.f32.mrf.mxu2 }
 0x8cd   : > { %v8193_v29 = vadd.f32 %v8178_v51, %v7990_v31  ;;  %v8367_v31 = vld [vmem:[#allocation8 + $0xa] sm:$0x1] }
 0x8cf   : > { %v8342_v38 = vadd.f32 %v8327_v30, %v8193_v29 }
 0x8d1   : > { %v8349_v6 = vsel %vm8348_vm12, %v8342_v38, 0.0 }
 0x8d4   : > { %v8180_v2 = vpop.f32.mrf.mxu1  ;;  %v8337_v19 = vpop.f32.mrf.mxu2 }
 0x8d5   : > { %v8194_v47 = vadd.f32 %v8180_v2, %v7991_v49 }
 0x8d7   : > { %v8343_v1 = vadd.f32 %v8329_v43, %v8194_v47 }
 0x8d9   : > { %v8350_v35 = vsel %vm8348_vm12, %v8343_v1, 0.0 }
 0x8da   : > { %v8351_v21 = vadd.f32 %v8350_v35, %v8349_v6 }
 0x8dc   : > { %v8183_v48 = vpop.f32.mrf.mxu1  ;;  %v8339_v40 = vpop.f32.mrf.mxu2 }
 0x8dd   : > { %v8195_v63 = vadd.f32 %v8183_v48, %v7992_v57 }
 0x8df   : > { %v8344_v52 = vadd.f32 %v8332_v15, %v8195_v63 }
 0x8e1   : > { %v8352_v45 = vsel %vm8348_vm12, %v8344_v52, 0.0 }
 0x8e2   : > { %v8353_v20 = vadd.f32 %v8352_v45, %v8351_v21 }
 0x8e4   : > { %v8185_v39 = vpop.f32.mrf.mxu1 }
 0x8e5   : > { %v8196_v24 = vadd.f32 %v8185_v39, %v7993_v12 }
 0x8e7   : > { %v8345_v23 = vadd.f32 %v8334_v41, %v8196_v24 }
 0x8e9   : > { %v8354_v56 = vsel %vm8348_vm12, %v8345_v23, 0.0 }
 0x8ea   : > { %v8355_v62 = vadd.f32 %v8354_v56, %v8353_v20 }
 0x8ec   : > { %v8188_v18 = vpop.f32.mrf.mxu1 }
 0x8ed   : > { %v8197_v44 = vadd.f32 %v8188_v18, %v7994_v59 }
 0x8ef   : > { %v8346_v61 = vadd.f32 %v8337_v19, %v8197_v44 }
 0x8f1   : > { %v8356_v7 = vsel %vm8348_vm12, %v8346_v61, 0.0 }
 0x8f2   : > { %v8357_v37 = vadd.f32 %v8356_v7, %v8355_v62 }
 0x8f4   : > { %v8190_v54 = vpop.f32.mrf.mxu1 }
 0x8f5   : > { %v8198_v10 = vadd.f32 %v8190_v54, %v7995_v42 }
 0x8f7   : > { %v8347_v28 = vadd.f32 %v8339_v40, %v8198_v10 }
 0x8f9   : > { %v8358_v27 = vsel %vm8348_vm12, %v8347_v28, 0.0 }
 0x8fa   : > { %v8359_v30 = vadd.f32 %v8358_v27, %v8357_v37 }
 0x8fc   : > { %v8360_v3 = vrot.slane %v8359_v30, 4 }
 0x8fe   : > { %v8361_v51 = vadd.f32 %v8360_v3, %v8359_v30 }
 0x900   : > { %v8362_v33 = vrot.slane %v8361_v51, 2 }
 0x902   : > { %v8363_v9 = vadd.f32 %v8362_v33, %v8361_v51 }
 0x904   : > { %v8364_v26 = vrot.slane %v8363_v9, 1 }
 0x906   : > { %v8365_v55 = vadd.f32 %v8364_v26, %v8363_v9 }
 0x908   : > { %v8366_v60 = vmul.f32 0.027777778, %v8365_v55 }
 0x90a   : > { %v8368_v32 = vadd.f32 %v8367_v31, %v8366_v60 }
 0x90c   : > { %8369 = vst [vmem:[%s243_s20] sm:$0x1] %v8368_v32 }
 0x90d PF: > { %s16_s15 = sadd.s32 1, %s10811_s15  }
 0x90e   : > { %p13_p7 = scmp.ge.s32.totalorder %s16_s15, 4  }
 0x910   :  { %15 = sbr.rel (!%p13_p7) target bundleno = 2 (0x2), region = 127 }
 0x915   :  { %8387 = vsyncpa [#allocation5], 1 }
 0x916   :  { %8389 = vsyncpa [#allocation5 + $0x1], 1 }
 0x917   :  { %8390 = vsyncpa [#allocation7], 1 }

</bundles_post_ra>
